<compile_context>
chip_gen: v6e
topology: v6e:2x2x1
jax: 0.10.0
libtpu: 0.0.40
codegen_flags: <defaults>
</compile_context>

<pallas_src>
import math

import jax
import jax.numpy as jnp
from jax.experimental import pallas as pl
from jax.experimental.pallas import tpu as pltpu


def _to_lane_slab(a):
    """(R, S, C) -> (R, S*C): concatenate the S column slices along the lane dim.

    Equivalent to a reshape, but written as a lane-dim concatenate so it lowers
    through plain Mosaic slice/concat ops while producing a lane-dense slab for
    the store (avoids sub-128-lane masked vector stores).
    """
    _, s, _ = a.shape
    return jnp.concatenate([a[:, i, :] for i in range(s)], axis=-1)


def _fused_encoder_kernel(x_ref, w1_ref, b1_ref, w2_ref, b2_ref,
                          out_ref, pool_ref, xpad_ref, hpad_ref):
    """Fused conv3x3+ReLU -> conv3x3+ReLU -> 2x2 max-pool for one batch element.

    x_ref:    (1, H, W, Cin)           input tile (NHWC, compute dtype)
    w1_ref:   (9*Cin, Cout)            conv1 weights, 3x3 taps folded into K
    b1_ref:   (1, Cout)                conv1 bias (f32)
    w2_ref:   (9*Cout, Cout)           conv2 weights
    b2_ref:   (1, Cout)                conv2 bias (f32)
    out_ref:  (1, H, W*Cout)           conv2+ReLU output, lane-dense slab
    pool_ref: (1, H//2, (W//2)*Cout)   2x2 max-pooled output, lane-dense slab
    xpad_ref: (H+2, W+2, Cin)  f32     VMEM scratch: zero-padded input
    hpad_ref: (H+2, W+2, Cout) f32     VMEM scratch: zero-padded intermediate
    """
    _, H, W, Cin = x_ref.shape
    Cout = w1_ref.shape[-1]
    mxu_dtype = w1_ref.dtype

    def conv3x3_relu(src_ref, w_ref, b_ref):
        xp = src_ref[...]                                   # (H+2, W+2, c), f32
        c = xp.shape[-1]
        # im2col with the 3x3 taps folded into the contraction dim: a single
        # (H*W, 9*c) x (9*c, Cout) MXU matmul instead of nine K=c matmuls.
        cols = [xp[ky:ky + H, kx:kx + W, :].reshape(H * W, c)
                for ky in range(3) for kx in range(3)]
        patch = jnp.concatenate(cols, axis=-1).astype(mxu_dtype)
        acc = jnp.dot(patch, w_ref[...], preferred_element_type=jnp.float32)
        return jnp.maximum(acc + b_ref[...], 0.0)           # (H*W, Cout), f32

    # conv1: zero-pad the input entirely in VMEM (no wrapper-side jnp.pad).
    xpad_ref[...] = jnp.zeros_like(xpad_ref)
    xpad_ref[1:H + 1, 1:W + 1, :] = x_ref[0].astype(xpad_ref.dtype)
    h = conv3x3_relu(xpad_ref, w1_ref, b1_ref)

    # conv2: zero-pad the VMEM-resident intermediate; it never touches HBM.
    hpad_ref[...] = jnp.zeros_like(hpad_ref)
    hpad_ref[1:H + 1, 1:W + 1, :] = h.reshape(H, W, Cout)
    y = conv3x3_relu(hpad_ref, w2_ref, b2_ref)              # (H*W, Cout), f32

    # Lane-dense store of the conv output (last dim W*Cout instead of Cout).
    y3 = y.reshape(H, W, Cout)
    out_ref[0] = _to_lane_slab(y3).astype(out_ref.dtype)

    # Fused 2x2 / stride-2 max pool straight from the in-VMEM conv2 result:
    # splits only leading/sublane dims, then elementwise max of static slices
    # (pure VPU work, hidden under the MXU/DMA slack).
    rh = y3.reshape(H // 2, 2, W, Cout)
    ph = jnp.maximum(rh[:, 0], rh[:, 1])                    # (H/2, W, Cout)
    rw = ph.reshape(H // 2, W // 2, 2, Cout)
    pw = jnp.maximum(rw[:, :, 0, :], rw[:, :, 1, :])        # (H/2, W/2, Cout)
    pool_ref[0] = _to_lane_slab(pw).astype(pool_ref.dtype)


def unet_encoder_block(x_nchw, params, *, compute_dtype=jnp.bfloat16):
    """Forward pass matching UNetEncoderBlock: returns (out, max_pool2d(out, 2)), NCHW."""
    w1, b1, w2, b2 = params                                 # w: (3, 3, Cin, Cout) HWIO
    N, Cin, H, W = x_nchw.shape
    Cout = w1.shape[-1]
    assert H % 2 == 0 and W % 2 == 0, "max_pool2d(2) needs even spatial dims"
    out_dtype = x_nchw.dtype

    # NCHW -> NHWC (channels on lanes) is interface glue for the PyTorch NCHW
    # contract; the whole block then runs in a single fused kernel. Inputs and
    # weights are cast once for the MXU (accumulation stays f32 in-kernel).
    x = jnp.transpose(x_nchw, (0, 2, 3, 1)).astype(compute_dtype)
    w1r = w1.reshape(9 * Cin, Cout).astype(compute_dtype)   # K order = (ky, kx, ci)
    w2r = w2.reshape(9 * Cout, Cout).astype(compute_dtype)
    b1r = b1.reshape(1, Cout).astype(jnp.float32)
    b2r = b2.reshape(1, Cout).astype(jnp.float32)

    out_slab, pool_slab = pl.pallas_call(
        _fused_encoder_kernel,
        out_shape=(
            jax.ShapeDtypeStruct((N, H, W * Cout), out_dtype),
            jax.ShapeDtypeStruct((N, H // 2, (W // 2) * Cout), out_dtype),
        ),
        grid=(N,),
        in_specs=[
            pl.BlockSpec((1, H, W, Cin), lambda n: (n, 0, 0, 0)),
            pl.BlockSpec((9 * Cin, Cout), lambda n: (0, 0)),
            pl.BlockSpec((1, Cout), lambda n: (0, 0)),
            pl.BlockSpec((9 * Cout, Cout), lambda n: (0, 0)),
            pl.BlockSpec((1, Cout), lambda n: (0, 0)),
        ],
        out_specs=(
            pl.BlockSpec((1, H, W * Cout), lambda n: (n, 0, 0)),
            pl.BlockSpec((1, H // 2, (W // 2) * Cout), lambda n: (n, 0, 0)),
        ),
        scratch_shapes=[
            pltpu.VMEM((H + 2, W + 2, Cin), jnp.float32),
            pltpu.VMEM((H + 2, W + 2, Cout), jnp.float32),
        ],
        compiler_params=pltpu.CompilerParams(
            dimension_semantics=("parallel",),
            vmem_limit_bytes=32 * 1024 * 1024,
        ),
    )(x, w1r, b1r, w2r, b2r)

    out = jnp.transpose(out_slab.reshape(N, H, W, Cout), (0, 3, 1, 2))
    pooled = jnp.transpose(pool_slab.reshape(N, H // 2, W // 2, Cout), (0, 3, 1, 2))
    return out, pooled


def init_params(key, in_channels, out_channels):
    """He-normal (kaiming_normal_, fan_in, gain=sqrt(2)) weights; zero bias."""
    k1, k2 = jax.random.split(key)
    std1 = math.sqrt(2.0 / (in_channels * 9))
    std2 = math.sqrt(2.0 / (out_channels * 9))
    w1 = std1 * jax.random.normal(k1, (3, 3, in_channels, out_channels), jnp.float32)
    w2 = std2 * jax.random.normal(k2, (3, 3, out_channels, out_channels), jnp.float32)
    b1 = jnp.zeros((out_channels,), jnp.float32)
    b2 = jnp.zeros((out_channels,), jnp.float32)
    return (w1, b1, w2, b2)


def _reference(x_nchw, params, compute_dtype):
    """Plain-JAX reference with the same dtype handling as the kernel path."""
    w1, b1, w2, b2 = params

    def conv_relu(x, w, b):
        y = jax.lax.conv_general_dilated(
            x.astype(compute_dtype), w.astype(compute_dtype),
            window_strides=(1, 1), padding="SAME",
            dimension_numbers=("NCHW", "HWIO", "NCHW"),
            preferred_element_type=jnp.float32)
        return jax.nn.relu(y + b.astype(jnp.float32)[None, :, None, None])

    out = conv_relu(conv_relu(x_nchw, w1, b1), w2, b2)
    pooled = jax.lax.reduce_window(out, -jnp.inf, jax.lax.max,
                                   (1, 1, 2, 2), (1, 1, 2, 2), "VALID")
    return out.astype(x_nchw.dtype), pooled.astype(x_nchw.dtype)


if __name__ == "__main__":
    key = jax.random.PRNGKey(0)
    kx, kp = jax.random.split(key)

    N, Cin, Cout, H, W = 2, 4, 8, 16, 16
    x = jax.random.normal(kx, (N, Cin, H, W), jnp.float32)
    params = init_params(kp, Cin, Cout)

    # 1) exact-semantics check: f32 compute path vs. the plain f32 reference.
    out_f32, pooled_f32 = unet_encoder_block(x, params, compute_dtype=jnp.float32)
    out_f32 = jax.block_until_ready(out_f32)
    pooled_f32 = jax.block_until_ready(pooled_f32)
    ref_out, ref_pooled = _reference(x, params, jnp.float32)
    assert out_f32.shape == (N, Cout, H, W)
    assert pooled_f32.shape == (N, Cout, H // 2, W // 2)
    assert jnp.allclose(out_f32, ref_out, atol=1e-3, rtol=1e-3)
    assert jnp.allclose(pooled_f32, ref_pooled, atol=1e-3, rtol=1e-3)

    # 2) fast path: bf16 MXU inputs with f32 accumulation, checked against a
    #    reference applying the same casts (differences = accumulation order only).
    out_bf, pooled_bf = unet_encoder_block(x, params, compute_dtype=jnp.bfloat16)
    out_bf = jax.block_until_ready(out_bf)
    pooled_bf = jax.block_until_ready(pooled_bf)
    ref_out_bf, ref_pooled_bf = _reference(x, params, jnp.bfloat16)
    assert out_bf.shape == (N, Cout, H, W)
    assert pooled_bf.shape == (N, Cout, H // 2, W // 2)
    assert jnp.allclose(out_bf, ref_out_bf, atol=1e-2, rtol=1e-2)
    assert jnp.allclose(pooled_bf, ref_pooled_bf, atol=1e-2, rtol=1e-2)

    print("KERNEL_OK")
</pallas_src>

<mosaic_0001>
module attributes {stable_mosaic.version = 11 : i64} {
  func.func @_fused_encoder_kernel(%arg0: i32, %arg1: memref<1x16x16x4xf32, #tpu.memory_space<vmem>>, %arg2: memref<36x8xf32, #tpu.memory_space<vmem>>, %arg3: memref<1x8xf32, #tpu.memory_space<vmem>>, %arg4: memref<72x8xf32, #tpu.memory_space<vmem>>, %arg5: memref<1x8xf32, #tpu.memory_space<vmem>>, %arg6: memref<1x16x128xf32, #tpu.memory_space<vmem>>, %arg7: memref<1x8x64xf32, #tpu.memory_space<vmem>>, %arg8: memref<18x18x4xf32, #tpu.memory_space<vmem>>, %arg9: memref<18x18x8xf32, #tpu.memory_space<vmem>>) attributes {dimension_semantics = [#tpu.dimension_semantics<parallel>], iteration_bounds = array<i64: 2>, scalar_prefetch = 0 : i64, scratch_operands = 2 : i64, tpu.core_type = #tpu.core_type<tc>, window_params = [{transform_indices = @transform_0, window_bounds = array<i64: 1, 16, 16, 4>}, {pipeline_mode = #tpu.pipeline_mode<synchronous>, transform_indices = @transform_1, window_bounds = array<i64: 36, 8>}, {pipeline_mode = #tpu.pipeline_mode<synchronous>, transform_indices = @transform_2, window_bounds = array<i64: 1, 8>}, {pipeline_mode = #tpu.pipeline_mode<synchronous>, transform_indices = @transform_3, window_bounds = array<i64: 72, 8>}, {pipeline_mode = #tpu.pipeline_mode<synchronous>, transform_indices = @transform_4, window_bounds = array<i64: 1, 8>}, {transform_indices = @transform_5, window_bounds = array<i64: 1, 16, 128>}, {transform_indices = @transform_6, window_bounds = array<i64: 1, 8, 64>}]} {
    %cst = arith.constant 0.000000e+00 : f32
    %0 = vector.broadcast %cst : f32 to vector<18x18x4xf32>
    %c0 = arith.constant 0 : index
    %c0_0 = arith.constant 0 : index
    %c0_1 = arith.constant 0 : index
    %1 = vector.load %arg8[%c0, %c0_0, %c0_1] : memref<18x18x4xf32, #tpu.memory_space<vmem>>, vector<18x18x4xf32>
    tpu.vector_store %arg8[%c0, %c0_0, %c0_1], %0 {strides = array<i32>} : memref<18x18x4xf32, #tpu.memory_space<vmem>>, vector<18x18x4xf32>,
    %c0_2 = arith.constant 0 : index
    %c0_3 = arith.constant 0 : index
    %c0_4 = arith.constant 0 : index
    %c0_5 = arith.constant 0 : index
    %2 = vector.load %arg1[%c0_2, %c0_3, %c0_4, %c0_5] : memref<1x16x16x4xf32, #tpu.memory_space<vmem>>, vector<1x16x16x4xf32>
    %3 = vector.shape_cast %2 : vector<1x16x16x4xf32> to vector<16x16x4xf32>
    %c1 = arith.constant 1 : index
    %c1_6 = arith.constant 1 : index
    %c0_7 = arith.constant 0 : index
    %4 = vector.load %arg8[%c1, %c1_6, %c0_7] : memref<18x18x4xf32, #tpu.memory_space<vmem>>, vector<16x16x4xf32>
    tpu.vector_store %arg8[%c1, %c1_6, %c0_7], %3 {strides = array<i32>} : memref<18x18x4xf32, #tpu.memory_space<vmem>>, vector<16x16x4xf32>,
    %c0_8 = arith.constant 0 : index
    %c0_9 = arith.constant 0 : index
    %c0_10 = arith.constant 0 : index
    %5 = vector.load %arg8[%c0_8, %c0_9, %c0_10] : memref<18x18x4xf32, #tpu.memory_space<vmem>>, vector<18x18x4xf32>
    %6 = vector.extract_strided_slice %5 {offsets = [0, 0, 0], sizes = [16, 16, 4], strides = [1, 1, 1]} : vector<18x18x4xf32> to vector<16x16x4xf32>
    %7 = vector.shape_cast %6 : vector<16x16x4xf32> to vector<256x4xf32>
    %8 = vector.extract_strided_slice %5 {offsets = [0, 1, 0], sizes = [16, 16, 4], strides = [1, 1, 1]} : vector<18x18x4xf32> to vector<16x16x4xf32>
    %9 = vector.shape_cast %8 : vector<16x16x4xf32> to vector<256x4xf32>
    %10 = vector.extract_strided_slice %5 {offsets = [0, 2, 0], sizes = [16, 16, 4], strides = [1, 1, 1]} : vector<18x18x4xf32> to vector<16x16x4xf32>
    %11 = vector.shape_cast %10 : vector<16x16x4xf32> to vector<256x4xf32>
    %12 = vector.extract_strided_slice %5 {offsets = [1, 0, 0], sizes = [16, 16, 4], strides = [1, 1, 1]} : vector<18x18x4xf32> to vector<16x16x4xf32>
    %13 = vector.shape_cast %12 : vector<16x16x4xf32> to vector<256x4xf32>
    %14 = vector.extract_strided_slice %5 {offsets = [1, 1, 0], sizes = [16, 16, 4], strides = [1, 1, 1]} : vector<18x18x4xf32> to vector<16x16x4xf32>
    %15 = vector.shape_cast %14 : vector<16x16x4xf32> to vector<256x4xf32>
    %16 = vector.extract_strided_slice %5 {offsets = [1, 2, 0], sizes = [16, 16, 4], strides = [1, 1, 1]} : vector<18x18x4xf32> to vector<16x16x4xf32>
    %17 = vector.shape_cast %16 : vector<16x16x4xf32> to vector<256x4xf32>
    %18 = vector.extract_strided_slice %5 {offsets = [2, 0, 0], sizes = [16, 16, 4], strides = [1, 1, 1]} : vector<18x18x4xf32> to vector<16x16x4xf32>
    %19 = vector.shape_cast %18 : vector<16x16x4xf32> to vector<256x4xf32>
    %20 = vector.extract_strided_slice %5 {offsets = [2, 1, 0], sizes = [16, 16, 4], strides = [1, 1, 1]} : vector<18x18x4xf32> to vector<16x16x4xf32>
    %21 = vector.shape_cast %20 : vector<16x16x4xf32> to vector<256x4xf32>
    %22 = vector.extract_strided_slice %5 {offsets = [2, 2, 0], sizes = [16, 16, 4], strides = [1, 1, 1]} : vector<18x18x4xf32> to vector<16x16x4xf32>
    %23 = vector.shape_cast %22 : vector<16x16x4xf32> to vector<256x4xf32>
    %24 = tpu.concatenate %7, %9, %11, %13, %15, %17, %19, %21, %23 in 1 : vector<256x4xf32>, vector<256x4xf32>, vector<256x4xf32>, vector<256x4xf32>, vector<256x4xf32>, vector<256x4xf32>, vector<256x4xf32>, vector<256x4xf32>, vector<256x4xf32> -> vector<256x36xf32>
    %c0_11 = arith.constant 0 : index
    %c0_12 = arith.constant 0 : index
    %25 = vector.load %arg2[%c0_11, %c0_12] : memref<36x8xf32, #tpu.memory_space<vmem>>, vector<36x8xf32>
    %cst_13 = arith.constant dense<0.000000e+00> : vector<256x8xf32>
    %26 = tpu.matmul %24, %25, %cst_13 {dimension_numbers = #tpu.dot_dimension_numbers<[1], [0], [0], [1], [0, 0, 1, 1], [], []>} : vector<256x36xf32>, vector<36x8xf32>, vector<256x8xf32> -> vector<256x8xf32>
    %c0_14 = arith.constant 0 : index
    %c0_15 = arith.constant 0 : index
    %27 = vector.load %arg3[%c0_14, %c0_15] : memref<1x8xf32, #tpu.memory_space<vmem>>, vector<1x8xf32>
    %28 = vector.broadcast %27 : vector<1x8xf32> to vector<256x8xf32>
    %29 = arith.addf %26, %28 : vector<256x8xf32>
    %cst_16 = arith.constant 0.000000e+00 : f32
    %30 = vector.broadcast %cst_16 : f32 to vector<256x8xf32>
    %31 = arith.maximumf %29, %30 : vector<256x8xf32>
    %cst_17 = arith.constant 0.000000e+00 : f32
    %32 = vector.broadcast %cst_17 : f32 to vector<18x18x8xf32>
    %c0_18 = arith.constant 0 : index
    %c0_19 = arith.constant 0 : index
    %c0_20 = arith.constant 0 : index
    %33 = vector.load %arg9[%c0_18, %c0_19, %c0_20] : memref<18x18x8xf32, #tpu.memory_space<vmem>>, vector<18x18x8xf32>
    tpu.vector_store %arg9[%c0_18, %c0_19, %c0_20], %32 {strides = array<i32>} : memref<18x18x8xf32, #tpu.memory_space<vmem>>, vector<18x18x8xf32>,
    %34 = vector.shape_cast %31 : vector<256x8xf32> to vector<16x16x8xf32>
    %c1_21 = arith.constant 1 : index
    %c1_22 = arith.constant 1 : index
    %c0_23 = arith.constant 0 : index
    %35 = vector.load %arg9[%c1_21, %c1_22, %c0_23] : memref<18x18x8xf32, #tpu.memory_space<vmem>>, vector<16x16x8xf32>
    tpu.vector_store %arg9[%c1_21, %c1_22, %c0_23], %34 {strides = array<i32>} : memref<18x18x8xf32, #tpu.memory_space<vmem>>, vector<16x16x8xf32>,
    %c0_24 = arith.constant 0 : index
    %c0_25 = arith.constant 0 : index
    %c0_26 = arith.constant 0 : index
    %36 = vector.load %arg9[%c0_24, %c0_25, %c0_26] : memref<18x18x8xf32, #tpu.memory_space<vmem>>, vector<18x18x8xf32>
    %37 = vector.extract_strided_slice %36 {offsets = [0, 0, 0], sizes = [16, 16, 8], strides = [1, 1, 1]} : vector<18x18x8xf32> to vector<16x16x8xf32>
    %38 = vector.shape_cast %37 : vector<16x16x8xf32> to vector<256x8xf32>
    %39 = vector.extract_strided_slice %36 {offsets = [0, 1, 0], sizes = [16, 16, 8], strides = [1, 1, 1]} : vector<18x18x8xf32> to vector<16x16x8xf32>
    %40 = vector.shape_cast %39 : vector<16x16x8xf32> to vector<256x8xf32>
    %41 = vector.extract_strided_slice %36 {offsets = [0, 2, 0], sizes = [16, 16, 8], strides = [1, 1, 1]} : vector<18x18x8xf32> to vector<16x16x8xf32>
    %42 = vector.shape_cast %41 : vector<16x16x8xf32> to vector<256x8xf32>
    %43 = vector.extract_strided_slice %36 {offsets = [1, 0, 0], sizes = [16, 16, 8], strides = [1, 1, 1]} : vector<18x18x8xf32> to vector<16x16x8xf32>
    %44 = vector.shape_cast %43 : vector<16x16x8xf32> to vector<256x8xf32>
    %45 = vector.extract_strided_slice %36 {offsets = [1, 1, 0], sizes = [16, 16, 8], strides = [1, 1, 1]} : vector<18x18x8xf32> to vector<16x16x8xf32>
    %46 = vector.shape_cast %45 : vector<16x16x8xf32> to vector<256x8xf32>
    %47 = vector.extract_strided_slice %36 {offsets = [1, 2, 0], sizes = [16, 16, 8], strides = [1, 1, 1]} : vector<18x18x8xf32> to vector<16x16x8xf32>
    %48 = vector.shape_cast %47 : vector<16x16x8xf32> to vector<256x8xf32>
    %49 = vector.extract_strided_slice %36 {offsets = [2, 0, 0], sizes = [16, 16, 8], strides = [1, 1, 1]} : vector<18x18x8xf32> to vector<16x16x8xf32>
    %50 = vector.shape_cast %49 : vector<16x16x8xf32> to vector<256x8xf32>
    %51 = vector.extract_strided_slice %36 {offsets = [2, 1, 0], sizes = [16, 16, 8], strides = [1, 1, 1]} : vector<18x18x8xf32> to vector<16x16x8xf32>
    %52 = vector.shape_cast %51 : vector<16x16x8xf32> to vector<256x8xf32>
    %53 = vector.extract_strided_slice %36 {offsets = [2, 2, 0], sizes = [16, 16, 8], strides = [1, 1, 1]} : vector<18x18x8xf32> to vector<16x16x8xf32>
    %54 = vector.shape_cast %53 : vector<16x16x8xf32> to vector<256x8xf32>
    %55 = tpu.concatenate %38, %40, %42, %44, %46, %48, %50, %52, %54 in 1 : vector<256x8xf32>, vector<256x8xf32>, vector<256x8xf32>, vector<256x8xf32>, vector<256x8xf32>, vector<256x8xf32>, vector<256x8xf32>, vector<256x8xf32>, vector<256x8xf32> -> vector<256x72xf32>
    %c0_27 = arith.constant 0 : index
    %c0_28 = arith.constant 0 : index
    %56 = vector.load %arg4[%c0_27, %c0_28] : memref<72x8xf32, #tpu.memory_space<vmem>>, vector<72x8xf32>
    %cst_29 = arith.constant dense<0.000000e+00> : vector<256x8xf32>
    %57 = tpu.matmul %55, %56, %cst_29 {dimension_numbers = #tpu.dot_dimension_numbers<[1], [0], [0], [1], [0, 0, 1, 1], [], []>} : vector<256x72xf32>, vector<72x8xf32>, vector<256x8xf32> -> vector<256x8xf32>
    %c0_30 = arith.constant 0 : index
    %c0_31 = arith.constant 0 : index
    %58 = vector.load %arg5[%c0_30, %c0_31] : memref<1x8xf32, #tpu.memory_space<vmem>>, vector<1x8xf32>
    %59 = vector.broadcast %58 : vector<1x8xf32> to vector<256x8xf32>
    %60 = arith.addf %57, %59 : vector<256x8xf32>
    %cst_32 = arith.constant 0.000000e+00 : f32
    %61 = vector.broadcast %cst_32 : f32 to vector<256x8xf32>
    %62 = arith.maximumf %60, %61 : vector<256x8xf32>
    %63 = vector.shape_cast %62 : vector<256x8xf32> to vector<16x16x8xf32>
    %64 = vector.extract_strided_slice %63 {offsets = [0, 0, 0], sizes = [16, 1, 8], strides = [1, 1, 1]} : vector<16x16x8xf32> to vector<16x1x8xf32>
    %65 = vector.shape_cast %64 : vector<16x1x8xf32> to vector<16x8xf32>
    %66 = vector.extract_strided_slice %63 {offsets = [0, 1, 0], sizes = [16, 1, 8], strides = [1, 1, 1]} : vector<16x16x8xf32> to vector<16x1x8xf32>
    %67 = vector.shape_cast %66 : vector<16x1x8xf32> to vector<16x8xf32>
    %68 = vector.extract_strided_slice %63 {offsets = [0, 2, 0], sizes = [16, 1, 8], strides = [1, 1, 1]} : vector<16x16x8xf32> to vector<16x1x8xf32>
    %69 = vector.shape_cast %68 : vector<16x1x8xf32> to vector<16x8xf32>
    %70 = vector.extract_strided_slice %63 {offsets = [0, 3, 0], sizes = [16, 1, 8], strides = [1, 1, 1]} : vector<16x16x8xf32> to vector<16x1x8xf32>
    %71 = vector.shape_cast %70 : vector<16x1x8xf32> to vector<16x8xf32>
    %72 = vector.extract_strided_slice %63 {offsets = [0, 4, 0], sizes = [16, 1, 8], strides = [1, 1, 1]} : vector<16x16x8xf32> to vector<16x1x8xf32>
    %73 = vector.shape_cast %72 : vector<16x1x8xf32> to vector<16x8xf32>
    %74 = vector.extract_strided_slice %63 {offsets = [0, 5, 0], sizes = [16, 1, 8], strides = [1, 1, 1]} : vector<16x16x8xf32> to vector<16x1x8xf32>
    %75 = vector.shape_cast %74 : vector<16x1x8xf32> to vector<16x8xf32>
    %76 = vector.extract_strided_slice %63 {offsets = [0, 6, 0], sizes = [16, 1, 8], strides = [1, 1, 1]} : vector<16x16x8xf32> to vector<16x1x8xf32>
    %77 = vector.shape_cast %76 : vector<16x1x8xf32> to vector<16x8xf32>
    %78 = vector.extract_strided_slice %63 {offsets = [0, 7, 0], sizes = [16, 1, 8], strides = [1, 1, 1]} : vector<16x16x8xf32> to vector<16x1x8xf32>
    %79 = vector.shape_cast %78 : vector<16x1x8xf32> to vector<16x8xf32>
    %80 = vector.extract_strided_slice %63 {offsets = [0, 8, 0], sizes = [16, 1, 8], strides = [1, 1, 1]} : vector<16x16x8xf32> to vector<16x1x8xf32>
    %81 = vector.shape_cast %80 : vector<16x1x8xf32> to vector<16x8xf32>
    %82 = vector.extract_strided_slice %63 {offsets = [0, 9, 0], sizes = [16, 1, 8], strides = [1, 1, 1]} : vector<16x16x8xf32> to vector<16x1x8xf32>
    %83 = vector.shape_cast %82 : vector<16x1x8xf32> to vector<16x8xf32>
    %84 = vector.extract_strided_slice %63 {offsets = [0, 10, 0], sizes = [16, 1, 8], strides = [1, 1, 1]} : vector<16x16x8xf32> to vector<16x1x8xf32>
    %85 = vector.shape_cast %84 : vector<16x1x8xf32> to vector<16x8xf32>
    %86 = vector.extract_strided_slice %63 {offsets = [0, 11, 0], sizes = [16, 1, 8], strides = [1, 1, 1]} : vector<16x16x8xf32> to vector<16x1x8xf32>
    %87 = vector.shape_cast %86 : vector<16x1x8xf32> to vector<16x8xf32>
    %88 = vector.extract_strided_slice %63 {offsets = [0, 12, 0], sizes = [16, 1, 8], strides = [1, 1, 1]} : vector<16x16x8xf32> to vector<16x1x8xf32>
    %89 = vector.shape_cast %88 : vector<16x1x8xf32> to vector<16x8xf32>
    %90 = vector.extract_strided_slice %63 {offsets = [0, 13, 0], sizes = [16, 1, 8], strides = [1, 1, 1]} : vector<16x16x8xf32> to vector<16x1x8xf32>
    %91 = vector.shape_cast %90 : vector<16x1x8xf32> to vector<16x8xf32>
    %92 = vector.extract_strided_slice %63 {offsets = [0, 14, 0], sizes = [16, 1, 8], strides = [1, 1, 1]} : vector<16x16x8xf32> to vector<16x1x8xf32>
    %93 = vector.shape_cast %92 : vector<16x1x8xf32> to vector<16x8xf32>
    %94 = vector.extract_strided_slice %63 {offsets = [0, 15, 0], sizes = [16, 1, 8], strides = [1, 1, 1]} : vector<16x16x8xf32> to vector<16x1x8xf32>
    %95 = vector.shape_cast %94 : vector<16x1x8xf32> to vector<16x8xf32>
    %96 = tpu.concatenate %65, %67, %69, %71, %73, %75, %77, %79, %81, %83, %85, %87, %89, %91, %93, %95 in 1 : vector<16x8xf32>, vector<16x8xf32>, vector<16x8xf32>, vector<16x8xf32>, vector<16x8xf32>, vector<16x8xf32>, vector<16x8xf32>, vector<16x8xf32>, vector<16x8xf32>, vector<16x8xf32>, vector<16x8xf32>, vector<16x8xf32>, vector<16x8xf32>, vector<16x8xf32>, vector<16x8xf32>, vector<16x8xf32> -> vector<16x128xf32>
    %c0_33 = arith.constant 0 : index
    %c0_34 = arith.constant 0 : index
    %c0_35 = arith.constant 0 : index
    %97 = vector.load %arg6[%c0_33, %c0_34, %c0_35] : memref<1x16x128xf32, #tpu.memory_space<vmem>>, vector<1x16x128xf32>
    %98 = vector.shape_cast %97 : vector<1x16x128xf32> to vector<16x128xf32>
    %99 = vector.shape_cast %96 : vector<16x128xf32> to vector<1x16x128xf32>
    tpu.vector_store %arg6[%c0_33, %c0_34, %c0_35], %99 {strides = array<i32>} : memref<1x16x128xf32, #tpu.memory_space<vmem>>, vector<1x16x128xf32>,
    %100 = vector.shape_cast %63 : vector<16x16x8xf32> to vector<8x2x16x8xf32>
    %101 = vector.extract_strided_slice %100 {offsets = [0, 0, 0, 0], sizes = [8, 1, 16, 8], strides = [1, 1, 1, 1]} : vector<8x2x16x8xf32> to vector<8x1x16x8xf32>
    %102 = vector.shape_cast %101 : vector<8x1x16x8xf32> to vector<8x16x8xf32>
    %103 = vector.extract_strided_slice %100 {offsets = [0, 1, 0, 0], sizes = [8, 1, 16, 8], strides = [1, 1, 1, 1]} : vector<8x2x16x8xf32> to vector<8x1x16x8xf32>
    %104 = vector.shape_cast %103 : vector<8x1x16x8xf32> to vector<8x16x8xf32>
    %105 = arith.maximumf %102, %104 : vector<8x16x8xf32>
    %106 = vector.shape_cast %105 : vector<8x16x8xf32> to vector<8x8x2x8xf32>
    %107 = vector.extract_strided_slice %106 {offsets = [0, 0, 0, 0], sizes = [8, 8, 1, 8], strides = [1, 1, 1, 1]} : vector<8x8x2x8xf32> to vector<8x8x1x8xf32>
    %108 = vector.shape_cast %107 : vector<8x8x1x8xf32> to vector<8x8x8xf32>
    %109 = vector.extract_strided_slice %106 {offsets = [0, 0, 1, 0], sizes = [8, 8, 1, 8], strides = [1, 1, 1, 1]} : vector<8x8x2x8xf32> to vector<8x8x1x8xf32>
    %110 = vector.shape_cast %109 : vector<8x8x1x8xf32> to vector<8x8x8xf32>
    %111 = arith.maximumf %108, %110 : vector<8x8x8xf32>
    %112 = vector.extract_strided_slice %111 {offsets = [0, 0, 0], sizes = [8, 1, 8], strides = [1, 1, 1]} : vector<8x8x8xf32> to vector<8x1x8xf32>
    %113 = vector.shape_cast %112 : vector<8x1x8xf32> to vector<8x8xf32>
    %114 = vector.extract_strided_slice %111 {offsets = [0, 1, 0], sizes = [8, 1, 8], strides = [1, 1, 1]} : vector<8x8x8xf32> to vector<8x1x8xf32>
    %115 = vector.shape_cast %114 : vector<8x1x8xf32> to vector<8x8xf32>
    %116 = vector.extract_strided_slice %111 {offsets = [0, 2, 0], sizes = [8, 1, 8], strides = [1, 1, 1]} : vector<8x8x8xf32> to vector<8x1x8xf32>
    %117 = vector.shape_cast %116 : vector<8x1x8xf32> to vector<8x8xf32>
    %118 = vector.extract_strided_slice %111 {offsets = [0, 3, 0], sizes = [8, 1, 8], strides = [1, 1, 1]} : vector<8x8x8xf32> to vector<8x1x8xf32>
    %119 = vector.shape_cast %118 : vector<8x1x8xf32> to vector<8x8xf32>
    %120 = vector.extract_strided_slice %111 {offsets = [0, 4, 0], sizes = [8, 1, 8], strides = [1, 1, 1]} : vector<8x8x8xf32> to vector<8x1x8xf32>
    %121 = vector.shape_cast %120 : vector<8x1x8xf32> to vector<8x8xf32>
    %122 = vector.extract_strided_slice %111 {offsets = [0, 5, 0], sizes = [8, 1, 8], strides = [1, 1, 1]} : vector<8x8x8xf32> to vector<8x1x8xf32>
    %123 = vector.shape_cast %122 : vector<8x1x8xf32> to vector<8x8xf32>
    %124 = vector.extract_strided_slice %111 {offsets = [0, 6, 0], sizes = [8, 1, 8], strides = [1, 1, 1]} : vector<8x8x8xf32> to vector<8x1x8xf32>
    %125 = vector.shape_cast %124 : vector<8x1x8xf32> to vector<8x8xf32>
    %126 = vector.extract_strided_slice %111 {offsets = [0, 7, 0], sizes = [8, 1, 8], strides = [1, 1, 1]} : vector<8x8x8xf32> to vector<8x1x8xf32>
    %127 = vector.shape_cast %126 : vector<8x1x8xf32> to vector<8x8xf32>
    %128 = tpu.concatenate %113, %115, %117, %119, %121, %123, %125, %127 in 1 : vector<8x8xf32>, vector<8x8xf32>, vector<8x8xf32>, vector<8x8xf32>, vector<8x8xf32>, vector<8x8xf32>, vector<8x8xf32>, vector<8x8xf32> -> vector<8x64xf32>
    %c0_36 = arith.constant 0 : index
    %c0_37 = arith.constant 0 : index
    %c0_38 = arith.constant 0 : index
    %129 = vector.load %arg7[%c0_36, %c0_37, %c0_38] : memref<1x8x64xf32, #tpu.memory_space<vmem>>, vector<1x8x64xf32>
    %130 = vector.shape_cast %129 : vector<1x8x64xf32> to vector<8x64xf32>
    %131 = vector.shape_cast %128 : vector<8x64xf32> to vector<1x8x64xf32>
    tpu.vector_store %arg7[%c0_36, %c0_37, %c0_38], %131 {strides = array<i32>} : memref<1x8x64xf32, #tpu.memory_space<vmem>>, vector<1x8x64xf32>,
    return
  }
  func.func @transform_0(%arg0: i32) -> (i32, i32, i32, i32) {
    %c0_i32 = arith.constant 0 : i32
    %c0_i32_0 = arith.constant 0 : i32
    %c0_i32_1 = arith.constant 0 : i32
    %c0_i32_2 = arith.constant 0 : i32
    return %arg0, %c0_i32, %c0_i32_0, %c0_i32_1 : i32, i32, i32, i32
  }
  func.func @transform_1(%arg0: i32) -> (i32, i32) {
    %c0_i32 = arith.constant 0 : i32
    %c0_i32_0 = arith.constant 0 : i32
    %c0_i32_1 = arith.constant 0 : i32
    return %c0_i32, %c0_i32_0 : i32, i32
  }
  func.func @transform_2(%arg0: i32) -> (i32, i32) {
    %c0_i32 = arith.constant 0 : i32
    %c0_i32_0 = arith.constant 0 : i32
    %c0_i32_1 = arith.constant 0 : i32
    return %c0_i32, %c0_i32_0 : i32, i32
  }
  func.func @transform_3(%arg0: i32) -> (i32, i32) {
    %c0_i32 = arith.constant 0 : i32
    %c0_i32_0 = arith.constant 0 : i32
    %c0_i32_1 = arith.constant 0 : i32
    return %c0_i32, %c0_i32_0 : i32, i32
  }
  func.func @transform_4(%arg0: i32) -> (i32, i32) {
    %c0_i32 = arith.constant 0 : i32
    %c0_i32_0 = arith.constant 0 : i32
    %c0_i32_1 = arith.constant 0 : i32
    return %c0_i32, %c0_i32_0 : i32, i32
  }
  func.func @transform_5(%arg0: i32) -> (i32, i32, i32) {
    %c0_i32 = arith.constant 0 : i32
    %c0_i32_0 = arith.constant 0 : i32
    %c0_i32_1 = arith.constant 0 : i32
    return %arg0, %c0_i32, %c0_i32_0 : i32, i32, i32
  }
  func.func @transform_6(%arg0: i32) -> (i32, i32, i32) {
    %c0_i32 = arith.constant 0 : i32
    %c0_i32_0 = arith.constant 0 : i32
    %c0_i32_1 = arith.constant 0 : i32
    return %arg0, %c0_i32, %c0_i32_0 : i32, i32, i32
  }
}

</mosaic_0001>

<bundles_post_ra>
// kernel: tpu_custom_call.1
= control target key start
LH: loop header
LB: loop body
LE: loop exit
PB: predicated region body
PF: predicated region fallthrough
CT: control target
= control target key end

     0   :  { %12 = vsyncpa [#allocation5], 0  ;;  %s11675_s0 = inlined_call_operand.vmem [shape: f32[2,16,16,4], index: 0, kind: input, shape index: {}]   ;;  %s11676_s1 = inlined_call_operand.vmem [shape: f32[36,8], index: 1, kind: input, shape index: {}]   ;;  %s11677_s2 = inlined_call_operand.vmem [shape: f32[1,8], index: 2, kind: input, shape index: {}]   ;;  %s11678_s3 = inlined_call_operand.vmem [shape: f32[72,8], index: 3, kind: input, shape index: {}]   ;;  %s11679_s4 = inlined_call_operand.vmem [shape: f32[1,8], index: 4, kind: input, shape index: {}]   ;;  %s11680_s5 = inlined_call_operand.hbm [shape: f32[2,16,128], index: 5, kind: output, shape index: {0}]   ;;  %s11681_s6 = inlined_call_operand.hbm [shape: f32[2,8,64], index: 6, kind: output, shape index: {1}]  }
   0x1   :  { %14 = vsyncpa [#allocation5 + $0x1], 0 }
   0x2   :  { %15 = vsyncpa [#allocation7], 0 }
   0x3   :  { %17 = vsyncpa [#allocation7 + $0x1], 0  ;;  %s6270_s21 = smov 0   ;;  %s6272_s22 = smov 0  }
   0x4   :  { %s6274_s23 = smov 0   ;;  %s6276_s24 = smov 0  }
   0x5 LB: > { %s6291_s25 = sadd.s32 4294967295, %s6209_s24   ;;  %s5620_s26 = sadd.s32 4294967294, %s6209_s24   ;;  %s6209_s24 = sphi %s6276_s24, %s12842_s24   ;;  %s6205_s23 = sphi %s6274_s23, %s12841_s23   ;;  %s6201_s22 = sphi %s6272_s22, %s12840_s22   ;;  %s6197_s21 = sphi %s6270_s21, %s12839_s21  }
   0x6   : > { %s6295_s27 = sadd.s32 1, %s6209_s24   ;;  %s140_s28 = sadd.s32 1, %s6205_s23 }
   0x7   : > { %s137_s29 = ssub.s32 %s6209_s24, %s6295_s27  ;;  %p150_p0 = scmp.ne.s32.totalorder %s6205_s23, %s6201_s22 }
   0x8   : > { %p138_p1 = scmp.eq.s32.totalorder %s137_s29, 0  ;;  %p151_p2 = scmp.eq.s32.totalorder %s6291_s25, 1 }
   0x9   : > { %p156_p3 = scmp.ne.s32.totalorder %s6201_s22, %s6197_s21  ;;  %p157_p4 = scmp.eq.s32.totalorder %s5620_s26, 1 }
   0xa   : > { %s6306_s30 = scalar_select %p138_p1, %s6205_s23, %s140_s28  }
   0xb   : > { %p6308_p5 = por %p151_p2, %p150_p0  ;;  %p6312_p6 = por %p157_p4, %p156_p3 }
   0xc   : > { %p5623_p7 = scmp.ge.s32.totalorder %s6209_s24, 1  ;;  %p221_p8 = scmp.lt.s32.totalorder %s6209_s24, 3 }
   0xe   : > { %p222_p9 = pnand %p5623_p7, %p221_p8 }
  0x10   : > { %225 = sbr.rel (%p222_p9) target bundleno = 1899 (0x76b), region = 40 }
  0x15   : > { %vm261_vm0 = vcmask 31744   ;;  %vm264_vm1 = vcmask 25600   ;;  %p256_p10 = scmp.lt.s32.totalorder %s6291_s25, 1  ;;  %v11682_v0 = vmov 0.0   ;;  %vm484_vm2 = vcmask 1046528   ;;  %s6212_s14 = smov 4  }
  0x16   : > { %262 = vst.msk [vmem:[#allocation2] sm:$0xff] %vm261_vm0, %v11682_v0  ;;  %263 = vst.msk [vmem:[#allocation2 + $0x8] sm:$0xff] %vm261_vm0, %v11682_v0  ;;  %vm1472_vm3 = vcmask 64512   ;;  %vm565_vm4 = vcmask 1045504   ;;  %s11920_s15 = smov 8   ;;  %s6214_s16 = smov 12  }
  0x17   : > { %266 = vst.msk [vmem:[#allocation2 + $0x18] sm:$0xff] %vm261_vm0, %v11682_v0  ;;  %267 = vst.msk [vmem:[#allocation2 + $0x20] sm:$0xff] %vm261_vm0, %v11682_v0  ;;  %s257_s9 = scalar_select %p256_p10, %s6291_s25, 1  ;;  %vm1812_vm5 = vcmask 1043456   ;;  %vm1505_vm6 = vcmask 97280   ;;  %vm1538_vm7 = vcmask 130048  }
  0x18   : > { %269 = vst.msk [vmem:[#allocation2 + $0x30] sm:$0xff] %vm261_vm0, %v11682_v0  ;;  %270 = vst.msk [vmem:[#allocation2 + $0x38] sm:$0xff] %vm261_vm0, %v11682_v0  ;;  %s6215_s17 = smov 16   ;;  %s6216_s18 = smov 20   ;;  %vm1571_vm8 = vcmask 162816   ;;  %vm1604_vm9 = vcmask 195584  }
  0x19   : > { %272 = vst.msk [vmem:[#allocation2 + $0x48] sm:$0xff] %vm261_vm0, %v11682_v0  ;;  %273 = vst.msk [vmem:[#allocation2 + $0x50] sm:$0xff] %vm261_vm0, %v11682_v0  ;;  %s5766_s10 = sshll.u32 %s257_s9, 8  ;;  %s6217_s19 = smov 24   ;;  %vm1637_vm10 = vcmask 228352   ;;  %vm1670_vm11 = vcmask 261120  }
  0x1a   : > { %275 = vst.msk [vmem:[#allocation2 + $0x60] sm:$0xff] %vm261_vm0, %v11682_v0  ;;  %276 = vst.msk [vmem:[#allocation2 + $0x68] sm:$0xff] %vm261_vm0, %v11682_v0  ;;  %s6433_s13 = scalar_lea.vmem %s11675_s0, %s5766_s10  ;;  %s6218_s20 = smov 28   ;;  %vm1715_vm12 = vcmask 293888   ;;  %vm2075_vm13 = vcmask 58368   ;;  %vm3345_vm14 = vcmask 326656  }
  0x1b   : > { %278 = vst.msk [vmem:[#allocation2 + $0x78] sm:$0xff] %vm261_vm0, %v11682_v0  ;;  %279 = vst.msk [vmem:[#allocation2 + $0x80] sm:$0xff] %vm261_vm0, %v11682_v0  ;;  %v317_v1 = vld [vmem:[%s6433_s13] sm:$0xff]  ;;  %v318_v2 = vld [vmem:[%s6433_s13 + $0x8] sm:$0xff]  ;;  %s6220_s26 = smov 40   ;;  %s6221_s11 = smov 48  }
  0x1c   : > { %281 = vst.msk [vmem:[#allocation2 + $0x90] sm:$0xff] %vm261_vm0, %v11682_v0  ;;  %282 = vst.msk [vmem:[#allocation2 + $0x98] sm:$0xff] %vm261_vm0, %v11682_v0  ;;  %v319_v3 = vld [vmem:[%s6433_s13 + $0x10] sm:$0xff]  ;;  %v320_v4 = vld [vmem:[%s6433_s13 + $0x18] sm:$0xff]  ;;  %s6223_s28 = smov 64   ;;  %vm3378_vm15 = vcmask 392192  }
  0x1d   : > { %284 = vst.msk [vmem:[#allocation2 + $0xa8] sm:$0xff] %vm261_vm0, %v11682_v0  ;;  %285 = vst.msk [vmem:[#allocation2 + $0xb0] sm:$0xff] %vm261_vm0, %v11682_v0  ;;  %v321_v5 = vld [vmem:[%s6433_s13 + $0x20] sm:$0xff]  ;;  %v322_v6 = vld [vmem:[%s6433_s13 + $0x28] sm:$0xff]  ;;  %s5763_s29 = sshll.u32 %s6291_s25, 7 }
  0x1e   : > { %287 = vst.msk [vmem:[#allocation2 + $0xc0] sm:$0xff] %vm261_vm0, %v11682_v0  ;;  %288 = vst.msk [vmem:[#allocation2 + $0xc8] sm:$0xff] %vm261_vm0, %v11682_v0  ;;  %v6444_v7 = vld [vmem:[#allocation2] sm:$0xff]  ;;  %v6446_v8 = vld [vmem:[#allocation2 + $0x8] sm:$0xff] }
  0x1f   : > { %290 = vst.msk [vmem:[#allocation2 + $0xd8] sm:$0xff] %vm261_vm0, %v11682_v0  ;;  %291 = vst.msk [vmem:[#allocation2 + $0xe0] sm:$0xff] %vm261_vm0, %v11682_v0  ;;  %v485_v10 = vrot.slane %v6444_v7, 1  ;;  %v486_v11 = vrot.slane %v6446_v8, 1  ;;  %v323_v13 = vld [vmem:[%s6433_s13 + $0x30] sm:$0xff]  ;;  %v324_v14 = vld [vmem:[%s6433_s13 + $0x38] sm:$0xff] }
  0x20   : > { %293 = vst.msk [vmem:[#allocation2 + $0xf0] sm:$0xff] %vm261_vm0, %v11682_v0  ;;  %294 = vst.msk [vmem:[#allocation2 + $0xf8] sm:$0xff] %vm261_vm0, %v11682_v0  ;;  %v325_v15 = vld [vmem:[%s6433_s13 + $0x40] sm:$0xff]  ;;  %v326_v16 = vld [vmem:[%s6433_s13 + $0x48] sm:$0xff] }
  0x21   : > { %296 = vst.msk [vmem:[#allocation2 + $0x108] sm:$0xff] %vm261_vm0, %v11682_v0  ;;  %297 = vst.msk [vmem:[#allocation2 + $0x110] sm:$0xff] %vm261_vm0, %v11682_v0  ;;  %v327_v17 = vld [vmem:[%s6433_s13 + $0x50] sm:$0xff]  ;;  %v328_v18 = vld [vmem:[%s6433_s13 + $0x58] sm:$0xff]  ;;  %v487_v19 = vsel %vm484_vm2, %v485_v10, %v486_v11 }
  0x22   : > { %299 = vst.msk [vmem:[#allocation2 + $0x120] sm:$0xff] %vm261_vm0, %v11682_v0  ;;  %300 = vst.msk [vmem:[#allocation2 + $0x128] sm:$0xff] %vm261_vm0, %v11682_v0  ;;  %v329_v20 = vld [vmem:[%s6433_s13 + $0x60] sm:$0xff]  ;;  %v330_v21 = vld [vmem:[%s6433_s13 + $0x68] sm:$0xff]  ;;  %672 = vrot.lane.b32.xlu0 %v487_v19, %s6212_s14 }
  0x23   : > { %302 = vst.msk [vmem:[#allocation2 + $0x138] sm:$0xff] %vm261_vm0, %v11682_v0  ;;  %303 = vst.msk [vmem:[#allocation2 + $0x140] sm:$0xff] %vm261_vm0, %v11682_v0  ;;  %v331_v22 = vld [vmem:[%s6433_s13 + $0x70] sm:$0xff]  ;;  %v332_v23 = vld [vmem:[%s6433_s13 + $0x78] sm:$0xff] }
  0x24   : > { %305 = vst.msk [vmem:[#allocation2 + $0x150] sm:$0xff] %vm261_vm0, %v11682_v0  ;;  %306 = vst.msk [vmem:[#allocation2 + $0x158] sm:$0xff] %vm261_vm0, %v11682_v0  ;;  %v333_v24 = vld [vmem:[%s6433_s13 + $0x80] sm:$0xff]  ;;  %v334_v25 = vld [vmem:[%s6433_s13 + $0x88] sm:$0xff] }
  0x25   : > { %308 = vst.msk [vmem:[#allocation2 + $0x168] sm:$0xff] %vm261_vm0, %v11682_v0  ;;  %309 = vst.msk [vmem:[#allocation2 + $0x170] sm:$0xff] %vm261_vm0, %v11682_v0  ;;  %v335_v27 = vld [vmem:[%s6433_s13 + $0x90] sm:$0xff]  ;;  %v336_v28 = vld [vmem:[%s6433_s13 + $0x98] sm:$0xff] }
  0x26   : > { %311 = vst.msk [vmem:[#allocation2 + $0x180] sm:$0xff] %vm261_vm0, %v11682_v0  ;;  %312 = vst.msk [vmem:[#allocation2 + $0x188] sm:$0xff] %vm261_vm0, %v11682_v0  ;;  %v337_v29 = vld [vmem:[%s6433_s13 + $0xa0] sm:$0xff]  ;;  %v338_v60 = vld [vmem:[%s6433_s13 + $0xa8] sm:$0xff] }
  0x27   : > { %314 = vst.msk [vmem:[#allocation2 + $0x198] sm:$0xff] %vm261_vm0, %v11682_v0  ;;  %315 = vst.msk [vmem:[#allocation2 + $0x1a0] sm:$0xff] %vm261_vm0, %v11682_v0 }
  0x28   : > { %265 = vst.msk [vmem:[#allocation2 + $0x10] sm:$0x3] %vm264_vm1, %v11682_v0  ;;  %268 = vst.msk [vmem:[#allocation2 + $0x28] sm:$0x3] %vm264_vm1, %v11682_v0 }
  0x29   : > { %271 = vst.msk [vmem:[#allocation2 + $0x40] sm:$0x3] %vm264_vm1, %v11682_v0  ;;  %274 = vst.msk [vmem:[#allocation2 + $0x58] sm:$0x3] %vm264_vm1, %v11682_v0 }
  0x2a   : > { %277 = vst.msk [vmem:[#allocation2 + $0x70] sm:$0x3] %vm264_vm1, %v11682_v0  ;;  %280 = vst.msk [vmem:[#allocation2 + $0x88] sm:$0x3] %vm264_vm1, %v11682_v0 }
  0x2b   : > { %283 = vst.msk [vmem:[#allocation2 + $0xa0] sm:$0x3] %vm264_vm1, %v11682_v0  ;;  %286 = vst.msk [vmem:[#allocation2 + $0xb8] sm:$0x3] %vm264_vm1, %v11682_v0 }
  0x2c   : > { %289 = vst.msk [vmem:[#allocation2 + $0xd0] sm:$0x3] %vm264_vm1, %v11682_v0  ;;  %292 = vst.msk [vmem:[#allocation2 + $0xe8] sm:$0x3] %vm264_vm1, %v11682_v0 }
  0x2d   : > { %295 = vst.msk [vmem:[#allocation2 + $0x100] sm:$0x3] %vm264_vm1, %v11682_v0  ;;  %298 = vst.msk [vmem:[#allocation2 + $0x118] sm:$0x3] %vm264_vm1, %v11682_v0 }
  0x2e   : > { %301 = vst.msk [vmem:[#allocation2 + $0x130] sm:$0x3] %vm264_vm1, %v11682_v0  ;;  %304 = vst.msk [vmem:[#allocation2 + $0x148] sm:$0x3] %vm264_vm1, %v11682_v0 }
  0x2f   : > { %307 = vst.msk [vmem:[#allocation2 + $0x160] sm:$0x3] %vm264_vm1, %v11682_v0  ;;  %310 = vst.msk [vmem:[#allocation2 + $0x178] sm:$0x3] %vm264_vm1, %v11682_v0  ;;  %v6448_v9 = vld [vmem:[#allocation2 + $0x10] sm:$0x3] }
  0x30   : > { %313 = vst.msk [vmem:[#allocation2 + $0x190] sm:$0x3] %vm264_vm1, %v11682_v0  ;;  %316 = vst.msk [vmem:[#allocation2 + $0x1a8] sm:$0x3] %vm264_vm1, %v11682_v0  ;;  %v488_v12 = vrot.slane %v6448_v9, 1  ;;  %vm3444_vm1 = vcmask 523264  }
  0x31   : > { %350 = vst.msk [vmem:[#allocation2 + $0x19] sm:$0xff] %vm261_vm0, %v317_v1  ;;  %351 = vst.msk [vmem:[#allocation2 + $0x21] sm:$0xff] %vm261_vm0, %v318_v2 }
  0x32   : > { %352 = vst.msk [vmem:[#allocation2 + $0x31] sm:$0xff] %vm261_vm0, %v319_v3  ;;  %353 = vst.msk [vmem:[#allocation2 + $0x39] sm:$0xff] %vm261_vm0, %v320_v4  ;;  %v489_v26 = vsel %vm484_vm2, %v486_v11, %v488_v12  ;;  %v339_v3 = vld [vmem:[%s6433_s13 + $0xb0] sm:$0xff]  ;;  %v340_v4 = vld [vmem:[%s6433_s13 + $0xb8] sm:$0xff] }
  0x33   : > { %354 = vst.msk [vmem:[#allocation2 + $0x49] sm:$0xff] %vm261_vm0, %v321_v5  ;;  %355 = vst.msk [vmem:[#allocation2 + $0x51] sm:$0xff] %vm261_vm0, %v322_v6  ;;  %674 = vrot.lane.b32.xlu0 %v489_v26, %s6212_s14  ;;  %v341_v5 = vld [vmem:[%s6433_s13 + $0xc0] sm:$0xff]  ;;  %v342_v11 = vld [vmem:[%s6433_s13 + $0xc8] sm:$0xff] }
  0x34   : > { %356 = vst.msk [vmem:[#allocation2 + $0x61] sm:$0xff] %vm261_vm0, %v323_v13  ;;  %357 = vst.msk [vmem:[#allocation2 + $0x69] sm:$0xff] %vm261_vm0, %v324_v14  ;;  %v343_v12 = vld [vmem:[%s6433_s13 + $0xd0] sm:$0xff]  ;;  %v344_v13 = vld [vmem:[%s6433_s13 + $0xd8] sm:$0xff] }
  0x35   : > { %358 = vst.msk [vmem:[#allocation2 + $0x79] sm:$0xff] %vm261_vm0, %v325_v15  ;;  %359 = vst.msk [vmem:[#allocation2 + $0x81] sm:$0xff] %vm261_vm0, %v326_v16  ;;  %v345_v15 = vld [vmem:[%s6433_s13 + $0xe0] sm:$0xff]  ;;  %v346_v16 = vld [vmem:[%s6433_s13 + $0xe8] sm:$0xff] }
  0x36   : > { %360 = vst.msk [vmem:[#allocation2 + $0x91] sm:$0xff] %vm261_vm0, %v327_v17  ;;  %361 = vst.msk [vmem:[#allocation2 + $0x99] sm:$0xff] %vm261_vm0, %v328_v18 }
  0x37   : > { %362 = vst.msk [vmem:[#allocation2 + $0xa9] sm:$0xff] %vm261_vm0, %v329_v20  ;;  %363 = vst.msk [vmem:[#allocation2 + $0xb1] sm:$0xff] %vm261_vm0, %v330_v21 }
  0x38   : > { %364 = vst.msk [vmem:[#allocation2 + $0xc1] sm:$0xff] %vm261_vm0, %v331_v22  ;;  %365 = vst.msk [vmem:[#allocation2 + $0xc9] sm:$0xff] %vm261_vm0, %v332_v23  ;;  %v6486_v30 = vld [vmem:[#allocation2 + $0x18] sm:$0xff]  ;;  %v6488_v31 = vld [vmem:[#allocation2 + $0x20] sm:$0xff] }
  0x39   : > { %366 = vst.msk [vmem:[#allocation2 + $0xd9] sm:$0xff] %vm261_vm0, %v333_v24  ;;  %367 = vst.msk [vmem:[#allocation2 + $0xe1] sm:$0xff] %vm261_vm0, %v334_v25  ;;  %v6490_v32 = vld [vmem:[#allocation2 + $0x30] sm:$0xff]  ;;  %v490_v33 = vrot.slane %v6486_v30, 1  ;;  %v491_v34 = vrot.slane %v6488_v31, 1  ;;  %v6497_v35 = vld [vmem:[#allocation2 + $0x38] sm:$0xff] }
  0x3a   : > { %368 = vst.msk [vmem:[#allocation2 + $0xf1] sm:$0xff] %vm261_vm0, %v335_v27  ;;  %369 = vst.msk [vmem:[#allocation2 + $0xf9] sm:$0xff] %vm261_vm0, %v336_v28  ;;  %v495_v36 = vrot.slane %v6490_v32, 1  ;;  %v6500_v37 = vld [vmem:[#allocation2 + $0x28] sm:$0x3]  ;;  %v496_v38 = vrot.slane %v6497_v35, 1 }
  0x3b   : > { %370 = vst.msk [vmem:[#allocation2 + $0x109] sm:$0xff] %vm261_vm0, %v337_v29  ;;  %v493_v39 = vrot.slane %v6500_v37, 1  ;;  %v6505_v40 = vld [vmem:[#allocation2 + $0x48] sm:$0xff]  ;;  %v6507_v41 = vld [vmem:[#allocation2 + $0x50] sm:$0xff]  ;;  %v6509_v42 = vld [vmem:[#allocation2 + $0x40] sm:$0x3]  ;;  %v6512_v43 = vsel %vm484_vm2, %v490_v33, %v491_v34 }
  0x3c   : > { %v500_v44 = vrot.slane %v6505_v40, 1  ;;  %v501_v45 = vrot.slane %v6507_v41, 1  ;;  %676 = vrot.lane.b32.xlu1 %v6512_v43, %s6212_s14  ;;  %v6519_v46 = vsel %vm484_vm2, %v495_v36, %v496_v38  ;;  %v6521_v47 = vld [vmem:[#allocation2 + $0x60] sm:$0xff]  ;;  %v6523_v48 = vld [vmem:[#allocation2 + $0x68] sm:$0xff]  ;;  %v498_v50 = vrot.slane %v6509_v42, 1  ;;  %v6540_v55 = vld [vmem:[#allocation2 + $0x78] sm:$0xff] }
  0x3d   : > { %v6526_v49 = vsel %vm484_vm2, %v491_v34, %v493_v39  ;;  %680 = vrot.lane.b32.xlu0 %v6519_v46, %s6212_s14  ;;  %v6531_v51 = vld [vmem:[#allocation2 + $0x58] sm:$0x3]  ;;  %v505_v53 = vrot.slane %v6521_v47, 1  ;;  %v506_v54 = vrot.slane %v6523_v48, 1  ;;  %v6542_v56 = vld [vmem:[#allocation2 + $0x80] sm:$0xff]  ;;  %v510_v62 = vrot.slane %v6540_v55, 1 }
  0x3e   : > { %v6534_v52 = vsel %vm484_vm2, %v500_v44, %v501_v45  ;;  %v6545_v57 = vsel %vm484_vm2, %v496_v38, %v498_v50  ;;  %v503_v58 = vrot.slane %v6531_v51, 1  ;;  %v6550_v59 = vld [vmem:[#allocation2 + $0x70] sm:$0x3]  ;;  %v511_v63 = vrot.slane %v6542_v56, 1  ;;  %v6560_v2 = vld [vmem:[#allocation2 + $0x98] sm:$0xff]  ;;  %371 = vst.msk [vmem:[#allocation2 + $0x111] sm:$0xff] %vm261_vm0, %v338_v60 }
  0x3f   : > { %11923 = vst [vmem:[#allocation10_spill] sm:$0xff] %v6545_v57  ;;  %v6554_v61 = vsel %vm484_vm2, %v505_v53, %v506_v54  ;;  %v6558_v1 = vld [vmem:[#allocation2 + $0x90] sm:$0xff]  ;;  %v508_v10 = vrot.slane %v6550_v59, 1  ;;  %372 = vst.msk [vmem:[#allocation2 + $0x121] sm:$0xff] %vm261_vm0, %v339_v3  ;;  %v6580_v14 = vld [vmem:[#allocation2 + $0x88] sm:$0x3] }
  0x40   : > { %678 = vrot.lane.b32.xlu1 %v6526_v49, %s6212_s14  ;;  %11924 = vst [vmem:[#allocation11_spill] sm:$0xff] %v6554_v61  ;;  %v6569_v6 = vsel %vm484_vm2, %v501_v45, %v503_v58  ;;  %373 = vst.msk [vmem:[#allocation2 + $0x129] sm:$0xff] %vm261_vm0, %v340_v4  ;;  %v6588_v17 = vsel %vm484_vm2, %v510_v62, %v511_v63  ;;  %v515_v18 = vrot.slane %v6558_v1, 1  ;;  %v516_v19 = vrot.slane %v6560_v2, 1  ;;  %v6596_v20 = vld [vmem:[#allocation2 + $0xa8] sm:$0xff]  ;;  %v6598_v21 = vld [vmem:[#allocation2 + $0xb0] sm:$0xff] }
  0x41   : > { %684 = vrot.lane.b32.xlu0 %v6534_v52, %s6212_s14  ;;  %11925 = vst [vmem:[#allocation12_spill] sm:$0xff] %v6569_v6  ;;  %374 = vst.msk [vmem:[#allocation2 + $0x139] sm:$0xff] %vm261_vm0, %v341_v5  ;;  %v6601_v22 = vsel %vm484_vm2, %v506_v54, %v508_v10  ;;  %v513_v23 = vrot.slane %v6580_v14, 1  ;;  %v6606_v24 = vld [vmem:[#allocation2 + $0xa0] sm:$0x3]  ;;  %v520_v26 = vrot.slane %v6596_v20, 1 }
  0x42   : > { %375 = vst.msk [vmem:[#allocation2 + $0x141] sm:$0xff] %vm261_vm0, %v342_v11  ;;  %376 = vst.msk [vmem:[#allocation2 + $0x151] sm:$0xff] %vm261_vm0, %v343_v12  ;;  %v6609_v25 = vsel %vm484_vm2, %v515_v18, %v516_v19  ;;  %v521_v27 = vrot.slane %v6598_v21, 1  ;;  %v6615_v28 = vld [vmem:[#allocation2 + $0xc0] sm:$0xff]  ;;  %v6617_v29 = vld [vmem:[#allocation2 + $0xc8] sm:$0xff]  ;;  %v518_v34 = vrot.slane %v6606_v24, 1 }
  0x43   : > { %377 = vst.msk [vmem:[#allocation2 + $0x159] sm:$0xff] %vm261_vm0, %v344_v13  ;;  %11926 = vst [vmem:[#allocation13_spill] sm:$0xff] %v6588_v17  ;;  %v6620_v33 = vsel %vm484_vm2, %v511_v63, %v513_v23  ;;  %v6625_v36 = vld [vmem:[#allocation2 + $0xb8] sm:$0x3]  ;;  %v525_v39 = vrot.slane %v6615_v28, 1  ;;  %v526_v44 = vrot.slane %v6617_v29, 1 }
  0x44   : > { %682 = vrot.lane.b32.xlu1 %v6545_v57, %s6212_s14  ;;  %378 = vst.msk [vmem:[#allocation2 + $0x169] sm:$0xff] %vm261_vm0, %v345_v15  ;;  %379 = vst.msk [vmem:[#allocation2 + $0x171] sm:$0xff] %vm261_vm0, %v346_v16  ;;  %v6628_v38 = vsel %vm484_vm2, %v520_v26, %v521_v27  ;;  %v6634_v45 = vld [vmem:[#allocation2 + $0xd8] sm:$0xff]  ;;  %v6636_v50 = vld [vmem:[#allocation2 + $0xe0] sm:$0xff]  ;;  %v6639_v53 = vsel %vm484_vm2, %v516_v19, %v518_v34  ;;  %v523_v54 = vrot.slane %v6625_v36, 1 }
  0x45   : > { %688 = vrot.lane.b32.xlu0 %v6554_v61, %s6212_s14  ;;  %11927 = vst [vmem:[#allocation14_spill] sm:$0xff] %v6601_v22  ;;  %11928 = vst [vmem:[#allocation15_spill] sm:$0xff] %v6609_v25  ;;  %v6644_v58 = vld [vmem:[#allocation2 + $0xd0] sm:$0x3]  ;;  %v6647_v60 = vsel %vm484_vm2, %v525_v39, %v526_v44  ;;  %v530_v62 = vrot.slane %v6634_v45, 1  ;;  %v531_v63 = vrot.slane %v6636_v50, 1 }
  0x46   : > { %11929 = vst [vmem:[#allocation16_spill] sm:$0xff] %v6620_v33  ;;  %11930 = vst [vmem:[#allocation17_spill] sm:$0xff] %v6628_v38  ;;  %v6653_v3 = vld [vmem:[#allocation2 + $0xf0] sm:$0xff]  ;;  %v6655_v4 = vld [vmem:[#allocation2 + $0xf8] sm:$0xff]  ;;  %v6658_v5 = vsel %vm484_vm2, %v521_v27, %v523_v54  ;;  %v528_v10 = vrot.slane %v6644_v58, 1  ;;  %v567_v61 = vrot.slane %v6446_v8, 2 }
  0x47   : > { %11931 = vst [vmem:[#allocation18_spill] sm:$0xff] %v6639_v53  ;;  %11932 = vst [vmem:[#allocation19_spill] sm:$0xff] %v6647_v60  ;;  %v6663_v11 = vld [vmem:[#allocation2 + $0xe8] sm:$0x3]  ;;  %v6666_v12 = vsel %vm484_vm2, %v530_v62, %v531_v63  ;;  %v535_v13 = vrot.slane %v6653_v3, 1  ;;  %v536_v15 = vrot.slane %v6655_v4, 1 }
  0x48   : > { %686 = vrot.lane.b32.xlu1 %v6569_v6, %s6212_s14  ;;  %11933 = vst [vmem:[#allocation20_spill] sm:$0xff] %v6658_v5  ;;  %11934 = vst [vmem:[#allocation21_spill] sm:$0xff] %v6666_v12  ;;  %v6672_v16 = vld [vmem:[#allocation2 + $0x108] sm:$0xff]  ;;  %v6674_v18 = vld [vmem:[#allocation2 + $0x110] sm:$0xff]  ;;  %v6677_v19 = vsel %vm484_vm2, %v526_v44, %v528_v10  ;;  %v533_v23 = vrot.slane %v6663_v11, 1  ;;  %v571_v8 = vrot.slane %v6486_v30, 2 }
  0x49   : > { %692 = vrot.lane.b32.xlu0 %v6588_v17, %s6212_s14  ;;  %11935 = vst [vmem:[#allocation22_spill] sm:$0xff] %v6677_v19  ;;  %v6682_v26 = vld [vmem:[#allocation2 + $0x100] sm:$0x3]  ;;  %v6685_v27 = vsel %vm484_vm2, %v535_v13, %v536_v15  ;;  %v540_v34 = vrot.slane %v6672_v16, 1  ;;  %v541_v39 = vrot.slane %v6674_v18, 1  ;;  %v6693_v44 = vld [vmem:[#allocation2 + $0x128] sm:$0xff] }
  0x4a   : > { %11936 = vst [vmem:[#allocation23_spill] sm:$0xff] %v6685_v27  ;;  %v6691_v54 = vld [vmem:[#allocation2 + $0x120] sm:$0xff]  ;;  %v6696_v62 = vsel %vm484_vm2, %v531_v63, %v533_v23  ;;  %v538_v10 = vrot.slane %v6682_v26, 1  ;;  %v6701_v13 = vld [vmem:[#allocation2 + $0x118] sm:$0x3] }
  0x4b   : > { %11937 = vst [vmem:[#allocation24_spill] sm:$0xff] %v6696_v62  ;;  %v6704_v0 = vsel %vm484_vm2, %v540_v34, %v541_v39  ;;  %v6712_v63 = vld [vmem:[#allocation2 + $0x140] sm:$0xff]  ;;  %v6720_v34 = vld [vmem:[#allocation2 + $0x130] sm:$0x3]  ;;  %v348_v57 = vld [vmem:[%s6433_s13 + $0xf8] sm:$0xff] }
  0x4c   : > { %690 = vrot.lane.b32.xlu1 %v6601_v22, %s6212_s14  ;;  %11938 = vst [vmem:[#allocation25_spill] sm:$0xff] %v6704_v0  ;;  %v6715_v23 = vsel %vm484_vm2, %v536_v15, %v538_v10  ;;  %v6731_v15 = vld [vmem:[#allocation2 + $0x158] sm:$0xff]  ;;  %v11943_v22 = vmov 0.0   ;;  %381 = vst.msk [vmem:[#allocation2 + $0x189] sm:$0xff] %vm261_vm0, %v348_v57 }
  0x4d   : > { %696 = vrot.lane.b32.xlu0 %v6609_v25, %s6212_s14  ;;  %11939 = vst [vmem:[#allocation26_spill] sm:$0xff] %v6715_v23  ;;  %2073 = vst.msk [vmem:[#allocation3] sm:$0xff] %vm1472_vm3, %v11943_v22  ;;  %v11945_v17 = vrot.slane %v6731_v15, 1 }
  0x4e   : > { %2074 = vst.msk [vmem:[#allocation3 + $0x8] sm:$0xff] %vm1472_vm3, %v11943_v22  ;;  %2077 = vst.msk [vmem:[#allocation3 + $0x18] sm:$0xff] %vm1472_vm3, %v11943_v22 }
  0x4f   : > { %2078 = vst.msk [vmem:[#allocation3 + $0x20] sm:$0xff] %vm1472_vm3, %v11943_v22  ;;  %2080 = vst.msk [vmem:[#allocation3 + $0x30] sm:$0xff] %vm1472_vm3, %v11943_v22 }
  0x50   : > { %694 = vrot.lane.b32.xlu1 %v6620_v33, %s6212_s14  ;;  %2081 = vst.msk [vmem:[#allocation3 + $0x38] sm:$0xff] %vm1472_vm3, %v11943_v22  ;;  %2083 = vst.msk [vmem:[#allocation3 + $0x48] sm:$0xff] %vm1472_vm3, %v11943_v22 }
  0x51   : > { %700 = vrot.lane.b32.xlu0 %v6628_v38, %s6212_s14  ;;  %v6729_v38 = vld [vmem:[#allocation2 + $0x150] sm:$0xff]  ;;  %2084 = vst.msk [vmem:[#allocation3 + $0x50] sm:$0xff] %vm1472_vm3, %v11943_v22  ;;  %2086 = vst.msk [vmem:[#allocation3 + $0x60] sm:$0xff] %vm1472_vm3, %v11943_v22 }
  0x52   : > { %v555_v25 = vrot.slane %v6729_v38, 1  ;;  %2087 = vst.msk [vmem:[#allocation3 + $0x68] sm:$0xff] %vm1472_vm3, %v11943_v22  ;;  %2089 = vst.msk [vmem:[#allocation3 + $0x78] sm:$0xff] %vm1472_vm3, %v11943_v22 }
  0x53   : > { %2090 = vst.msk [vmem:[#allocation3 + $0x80] sm:$0xff] %vm1472_vm3, %v11943_v22  ;;  %2092 = vst.msk [vmem:[#allocation3 + $0x90] sm:$0xff] %vm1472_vm3, %v11943_v22 }
  0x54   : > { %698 = vrot.lane.b32.xlu1 %v6639_v53, %s6212_s14  ;;  %2093 = vst.msk [vmem:[#allocation3 + $0x98] sm:$0xff] %vm1472_vm3, %v11943_v22  ;;  %2095 = vst.msk [vmem:[#allocation3 + $0xa8] sm:$0xff] %vm1472_vm3, %v11943_v22  ;;  %v6837_v6 = vsel %vm484_vm2, %v555_v25, %v11945_v17  ;;  %v566_v25 = vrot.slane %v6444_v7, 2 }
  0x55   : > { %704 = vrot.lane.b32.xlu0 %v6647_v60, %s6212_s14  ;;  %2096 = vst.msk [vmem:[#allocation3 + $0xb0] sm:$0xff] %vm1472_vm3, %v11943_v22  ;;  %2098 = vst.msk [vmem:[#allocation3 + $0xc0] sm:$0xff] %vm1472_vm3, %v11943_v22 }
  0x56   : > { %2099 = vst.msk [vmem:[#allocation3 + $0xc8] sm:$0xff] %vm1472_vm3, %v11943_v22  ;;  %2101 = vst.msk [vmem:[#allocation3 + $0xd8] sm:$0xff] %vm1472_vm3, %v11943_v22  ;;  %v568_v7 = vsel %vm565_vm4, %v566_v25, %v567_v61  ;;  %v576_v25 = vrot.slane %v6490_v32, 2 }
  0x57   : > { %2102 = vst.msk [vmem:[#allocation3 + $0xe0] sm:$0xff] %vm1472_vm3, %v11943_v22  ;;  %2104 = vst.msk [vmem:[#allocation3 + $0xf0] sm:$0xff] %vm1472_vm3, %v11943_v22 }
  0x58   : > { %702 = vrot.lane.b32.xlu1 %v6658_v5, %s6212_s14  ;;  %v6710_v5 = vld [vmem:[#allocation2 + $0x138] sm:$0xff]  ;;  %2105 = vst.msk [vmem:[#allocation3 + $0xf8] sm:$0xff] %vm1472_vm3, %v11943_v22  ;;  %2107 = vst.msk [vmem:[#allocation3 + $0x108] sm:$0xff] %vm1472_vm3, %v11943_v22 }
  0x59   : > { %708 = vrot.lane.b32.xlu0 %v6666_v12, %s6212_s14  ;;  %v545_v12 = vrot.slane %v6691_v54, 1  ;;  %v550_v53 = vrot.slane %v6710_v5, 1  ;;  %2108 = vst.msk [vmem:[#allocation3 + $0x110] sm:$0xff] %vm1472_vm3, %v11943_v22  ;;  %2110 = vst.msk [vmem:[#allocation3 + $0x120] sm:$0xff] %vm1472_vm3, %v11943_v22 }
  0x5a   : > { %2111 = vst.msk [vmem:[#allocation3 + $0x128] sm:$0xff] %vm1472_vm3, %v11943_v22  ;;  %2113 = vst.msk [vmem:[#allocation3 + $0x138] sm:$0xff] %vm1472_vm3, %v11943_v22 }
  0x5b   : > { %2114 = vst.msk [vmem:[#allocation3 + $0x140] sm:$0xff] %vm1472_vm3, %v11943_v22  ;;  %2116 = vst.msk [vmem:[#allocation3 + $0x150] sm:$0xff] %vm1472_vm3, %v11943_v22 }
  0x5c   : > { %706 = vrot.lane.b32.xlu1 %v6677_v19, %s6212_s14  ;;  %v546_v19 = vrot.slane %v6693_v44, 1  ;;  %2117 = vst.msk [vmem:[#allocation3 + $0x158] sm:$0xff] %vm1472_vm3, %v11943_v22  ;;  %2119 = vst.msk [vmem:[#allocation3 + $0x168] sm:$0xff] %vm1472_vm3, %v11943_v22 }
  0x5d   : > { %712 = vrot.lane.b32.xlu0 %v6685_v27, %s6212_s14  ;;  %v543_v27 = vrot.slane %v6701_v13, 1  ;;  %2120 = vst.msk [vmem:[#allocation3 + $0x170] sm:$0xff] %vm1472_vm3, %v11943_v22  ;;  %2122 = vst.msk [vmem:[#allocation3 + $0x180] sm:$0xff] %vm1472_vm3, %v11943_v22 }
  0x5e   : > { %v6723_v60 = vsel %vm484_vm2, %v545_v12, %v546_v19  ;;  %v6739_v12 = vld [vmem:[#allocation2 + $0x148] sm:$0x3]  ;;  %2123 = vst.msk [vmem:[#allocation3 + $0x188] sm:$0xff] %vm1472_vm3, %v11943_v22  ;;  %2125 = vst.msk [vmem:[#allocation3 + $0x198] sm:$0xff] %vm1472_vm3, %v11943_v22 }
  0x5f   : > { %11940 = vst [vmem:[#allocation27_spill] sm:$0xff] %v6723_v60  ;;  %v6734_v10 = vsel %vm484_vm2, %v541_v39, %v543_v27  ;;  %v6748_v27 = vld [vmem:[#allocation2 + $0x168] sm:$0xff]  ;;  %v6750_v39 = vld [vmem:[#allocation2 + $0x170] sm:$0xff]  ;;  %2126 = vst.msk [vmem:[#allocation3 + $0x1a0] sm:$0xff] %vm1472_vm3, %v11943_v22 }
  0x60   : > { %710 = vrot.lane.b32.xlu1 %v6696_v62, %s6212_s14  ;;  %v551_v62 = vrot.slane %v6712_v63, 1  ;;  %11941 = vst [vmem:[#allocation28_spill] sm:$0xff] %v6734_v10  ;;  %11946 = vst [vmem:[#allocation31_spill] sm:$0xff] %v6837_v6  ;;  %v560_v22 = vrot.slane %v6748_v27, 1 }
  0x61   : > { %716 = vrot.lane.b32.xlu0 %v6704_v0, %s6212_s14  ;;  %v548_v0 = vrot.slane %v6720_v34, 1 }
  0x62   : > { %v6742_v33 = vsel %vm484_vm2, %v550_v53, %v551_v62 }
  0x63   : > { %11942 = vst [vmem:[#allocation29_spill] sm:$0xff] %v6742_v33  ;;  %v6825_v53 = vsel %vm484_vm2, %v546_v19, %v548_v0  ;;  %v561_v0 = vrot.slane %v6750_v39, 1 }
  0x64   : > { %714 = vrot.lane.b32.xlu1 %v6715_v23, %s6212_s14  ;;  %11944 = vst [vmem:[#allocation30_spill] sm:$0xff] %v6825_v53  ;;  %v553_v23 = vrot.slane %v6739_v12, 1 }
  0x65   : > { %720 = vrot.lane.b32.xlu0 %v6723_v60, %s6212_s14  ;;  %v6831_v60 = vld [vmem:[#allocation2 + $0x160] sm:$0x3]  ;;  %v6852_v17 = vsel %vm484_vm2, %v560_v22, %v561_v0  ;;  %v572_v22 = vrot.slane %v6488_v31, 2 }
  0x66   : > { %v6844_v19 = vsel %vm484_vm2, %v551_v62, %v553_v23  ;;  %11948 = vst [vmem:[#allocation33_spill] sm:$0xff] %v6852_v17  ;;  %v11949_v62 = vrot.slane %v6731_v15, 1 }
  0x67   : > { %11947 = vst [vmem:[#allocation32_spill] sm:$0xff] %v6844_v19 }
  0x68   : > { %718 = vrot.lane.b32.xlu1 %v6734_v10, %s6212_s14  ;;  %v347_v10 = vld [vmem:[%s6433_s13 + $0xf0] sm:$0xff]  ;;  %s6225_s13 = smov 72  }
  0x69   : > { %724 = vrot.lane.b32.xlu0 %v6742_v33, %s6212_s14  ;;  %380 = vst.msk [vmem:[#allocation2 + $0x181] sm:$0xff] %vm261_vm0, %v347_v10  ;;  %v558_v33 = vrot.slane %v6831_v60, 1  ;;  %v6849_v10 = vld [vmem:[#allocation2 + $0x178] sm:$0x3] }
  0x6b   : > { %v6863_v23 = vsel %vm484_vm2, %v11949_v62, %v558_v33  ;;  %v569_v33 = vrot.slane %v6448_v9, 2  ;;  %v6879_v62 = vsel %vm565_vm4, %v571_v8, %v572_v22 }
  0x6c   : > { %722 = vrot.lane.b32.xlu1 %v6825_v53, %s6212_s14  ;;  %11950 = vst [vmem:[#allocation34_spill] sm:$0xff] %v6863_v23 }
  0x6d   : > { %728 = vrot.lane.b32.xlu0 %v6837_v6, %s6212_s14  ;;  %v563_v6 = vrot.slane %v6849_v10, 1 }
  0x6f   : > { %v6874_v57 = vsel %vm484_vm2, %v561_v0, %v563_v6  ;;  %v574_v6 = vrot.slane %v6500_v37, 2  ;;  %v581_v0 = vrot.slane %v6505_v40, 2 }
  0x70   : > { %726 = vrot.lane.b32.xlu1 %v6844_v19, %s6212_s14  ;;  %11951 = vst [vmem:[#allocation35_spill] sm:$0xff] %v6874_v57 }
  0x71   : > { %732 = vrot.lane.b32.xlu0 %v6852_v17, %s6212_s14  ;;  %v577_v17 = vrot.slane %v6497_v35, 2  ;;  %v6896_v8 = vsel %vm565_vm4, %v572_v22, %v574_v6  ;;  %v584_v22 = vrot.slane %v6531_v51, 2  ;;  %v592_v6 = vrot.slane %v6542_v56, 2 }
  0x73   : > { %v6890_v9 = vsel %vm565_vm4, %v576_v25, %v577_v17  ;;  %v591_v25 = vrot.slane %v6540_v55, 2 }
  0x74   : > { %730 = vrot.lane.b32.xlu1 %v6863_v23, %s6212_s14  ;;  %v570_v23 = vsel %vm565_vm4, %v567_v61, %v569_v33  ;;  %v586_v61 = vrot.slane %v6521_v47, 2  ;;  %v587_v33 = vrot.slane %v6523_v48, 2 }
  0x75   : > { %768 = vrot.lane.b32.xlu0 %v568_v7, %s11920_s15  ;;  %v582_v7 = vrot.slane %v6507_v41, 2  ;;  %v6928_v51 = vsel %vm565_vm4, %v591_v25, %v592_v6  ;;  %v602_v25 = vrot.slane %v6598_v21, 2 }
  0x77   : > { %v6902_v37 = vsel %vm565_vm4, %v581_v0, %v582_v7  ;;  %v6922_v0 = vsel %vm565_vm4, %v582_v7, %v584_v22  ;;  %v594_v7 = vrot.slane %v6580_v14, 2  ;;  %v601_v22 = vrot.slane %v6596_v20, 2 }
  0x78   : > { %734 = vrot.lane.b32.xlu1 %v6874_v57, %s6212_s14  ;;  %v579_v57 = vrot.slane %v6509_v42, 2  ;;  %v6915_v42 = vsel %vm565_vm4, %v586_v61, %v587_v33  ;;  %11953 = vst [vmem:[#allocation37_spill] sm:$0xff] %v6922_v0  ;;  %v597_v61 = vrot.slane %v6560_v2, 2  ;;  %s6222_s14 = smov 56  }
  0x79   : > { %772 = vrot.lane.b32.xlu0 %v6879_v62, %s11920_s15  ;;  %v6954_v14 = vsel %vm565_vm4, %v601_v22, %v602_v25  ;;  %v612_v22 = vrot.slane %v6636_v50, 2 }
  0x7a   : > { %11956 = vst [vmem:[#allocation40_spill] sm:$0xff] %v6954_v14 }
  0x7c   : > { %770 = vrot.lane.b32.xlu1 %v570_v23, %s11920_s15  ;;  %v6909_v23 = vsel %vm565_vm4, %v577_v17, %v579_v57  ;;  %v589_v17 = vrot.slane %v6550_v59, 2  ;;  %v596_v57 = vrot.slane %v6558_v1, 2 }
  0x7d   : > { %776 = vrot.lane.b32.xlu0 %v6890_v9, %s11920_s15  ;;  %11952 = vst [vmem:[#allocation36_spill] sm:$0xff] %v6909_v23 }
  0x7e   : > { %v6941_v59 = vsel %vm565_vm4, %v596_v57, %v597_v61  ;;  %v607_v57 = vrot.slane %v6617_v29, 2 }
  0x80   : > { %774 = vrot.lane.b32.xlu1 %v6896_v8, %s11920_s15 }
  0x81   : > { %780 = vrot.lane.b32.xlu0 %v6902_v37, %s11920_s15 }
  0x84   : > { %778 = vrot.lane.b32.xlu1 %v6909_v23, %s11920_s15  ;;  %v6935_v23 = vsel %vm565_vm4, %v587_v33, %v589_v17  ;;  %v599_v33 = vrot.slane %v6606_v24, 2  ;;  %v606_v17 = vrot.slane %v6615_v28, 2 }
  0x85   : > { %784 = vrot.lane.b32.xlu0 %v6915_v42, %s11920_s15  ;;  %11954 = vst [vmem:[#allocation38_spill] sm:$0xff] %v6935_v23 }
  0x86   : > { %v6967_v24 = vsel %vm565_vm4, %v606_v17, %v607_v57  ;;  %v617_v17 = vrot.slane %v6655_v4, 2 }
  0x87   : > { %11958 = vst [vmem:[#allocation42_spill] sm:$0xff] %v6967_v24 }
  0x88   : > { %782 = vrot.lane.b32.xlu1 %v6922_v0, %s11920_s15  ;;  %v6948_v0 = vsel %vm565_vm4, %v592_v6, %v594_v7  ;;  %v604_v6 = vrot.slane %v6625_v36, 2  ;;  %v611_v7 = vrot.slane %v6634_v45, 2 }
  0x89   : > { %788 = vrot.lane.b32.xlu0 %v6928_v51, %s11920_s15  ;;  %11955 = vst [vmem:[#allocation39_spill] sm:$0xff] %v6948_v0 }
  0x8a   : > { %v6980_v36 = vsel %vm565_vm4, %v611_v7, %v612_v22  ;;  %v622_v7 = vrot.slane %v6674_v18, 2 }
  0x8b   : > { %11960 = vst [vmem:[#allocation44_spill] sm:$0xff] %v6980_v36 }
  0x8c   : > { %786 = vrot.lane.b32.xlu1 %v6935_v23, %s11920_s15  ;;  %v6961_v23 = vsel %vm565_vm4, %v597_v61, %v599_v33  ;;  %v609_v61 = vrot.slane %v6644_v58, 2  ;;  %v616_v33 = vrot.slane %v6653_v3, 2 }
  0x8d   : > { %792 = vrot.lane.b32.xlu0 %v6941_v59, %s11920_s15  ;;  %11957 = vst [vmem:[#allocation41_spill] sm:$0xff] %v6961_v23 }
  0x8e   : > { %v6993_v58 = vsel %vm565_vm4, %v616_v33, %v617_v17  ;;  %v627_v33 = vrot.slane %v6693_v44, 2 }
  0x8f   : > { %11962 = vst [vmem:[#allocation46_spill] sm:$0xff] %v6993_v58 }
  0x90   : > { %790 = vrot.lane.b32.xlu1 %v6948_v0, %s11920_s15  ;;  %v6974_v0 = vsel %vm565_vm4, %v602_v25, %v604_v6  ;;  %v614_v25 = vrot.slane %v6663_v11, 2  ;;  %v621_v6 = vrot.slane %v6672_v16, 2 }
  0x91   : > { %796 = vrot.lane.b32.xlu0 %v6954_v14, %s11920_s15  ;;  %11959 = vst [vmem:[#allocation43_spill] sm:$0xff] %v6974_v0 }
  0x92   : > { %v7006_v11 = vsel %vm565_vm4, %v621_v6, %v622_v7  ;;  %v632_v6 = vrot.slane %v6712_v63, 2 }
  0x93   : > { %11964 = vst [vmem:[#allocation48_spill] sm:$0xff] %v7006_v11 }
  0x94   : > { %794 = vrot.lane.b32.xlu1 %v6961_v23, %s11920_s15  ;;  %v6987_v23 = vsel %vm565_vm4, %v607_v57, %v609_v61  ;;  %v619_v57 = vrot.slane %v6682_v26, 2  ;;  %v626_v61 = vrot.slane %v6691_v54, 2 }
  0x95   : > { %800 = vrot.lane.b32.xlu0 %v6967_v24, %s11920_s15  ;;  %11961 = vst [vmem:[#allocation45_spill] sm:$0xff] %v6987_v23 }
  0x96   : > { %v7019_v26 = vsel %vm565_vm4, %v626_v61, %v627_v33  ;;  %v637_v61 = vrot.slane %v6731_v15, 2 }
  0x97   : > { %11966 = vst [vmem:[#allocation50_spill] sm:$0xff] %v7019_v26 }
  0x98   : > { %798 = vrot.lane.b32.xlu1 %v6974_v0, %s11920_s15  ;;  %v7000_v0 = vsel %vm565_vm4, %v612_v22, %v614_v25  ;;  %v624_v22 = vrot.slane %v6701_v13, 2  ;;  %v631_v25 = vrot.slane %v6710_v5, 2 }
  0x99   : > { %804 = vrot.lane.b32.xlu0 %v6980_v36, %s11920_s15  ;;  %11963 = vst [vmem:[#allocation47_spill] sm:$0xff] %v7000_v0 }
  0x9a   : > { %v7032_v13 = vsel %vm565_vm4, %v631_v25, %v632_v6  ;;  %v641_v25 = vrot.slane %v6748_v27, 2 }
  0x9c   : > { %802 = vrot.lane.b32.xlu1 %v6987_v23, %s11920_s15  ;;  %v7013_v23 = vsel %vm565_vm4, %v617_v17, %v619_v57  ;;  %v629_v17 = vrot.slane %v6720_v34, 2  ;;  %v636_v57 = vrot.slane %v6729_v38, 2  ;;  %v634_v34 = vrot.slane %v6739_v12, 2 }
  0x9d   : > { %808 = vrot.lane.b32.xlu0 %v6993_v58, %s11920_s15  ;;  %11965 = vst [vmem:[#allocation49_spill] sm:$0xff] %v7013_v23  ;;  %v639_v12 = vrot.slane %v6831_v60, 2 }
  0xa0   : > { %806 = vrot.lane.b32.xlu1 %v7000_v0, %s11920_s15  ;;  %v7026_v0 = vsel %vm565_vm4, %v622_v7, %v624_v22  ;;  %v7041_v7 = vsel %vm565_vm4, %v627_v33, %v629_v17  ;;  %v7047_v22 = vsel %vm565_vm4, %v636_v57, %v637_v61  ;;  %v7056_v33 = vsel %vm565_vm4, %v632_v6, %v634_v34 }
  0xa1   : > { %812 = vrot.lane.b32.xlu0 %v7006_v11, %s11920_s15  ;;  %v7036_v11 = vpop.permute.xlu0 %672  ;;  %11968 = vst [vmem:[#allocation52_spill] sm:$0xff] %v7047_v22  ;;  %11970 = vst [vmem:[#allocation54_spill] sm:$0xff] %v7056_v33  ;;  %v644_v6 = vrot.slane %v6849_v10, 2 }
  0xa2   : > { %11967 = vst [vmem:[#allocation51_spill] sm:$0xff] %v7036_v11 }
  0xa4   : > { %810 = vrot.lane.b32.xlu1 %v7013_v23, %s11920_s15 }
  0xa5   : > { %816 = vrot.lane.b32.xlu0 %v7019_v26, %s11920_s15  ;;  %v642_v26 = vrot.slane %v6750_v39, 2  ;;  %v7051_v23 = vpop.permute.xlu0 %674 }
  0xa6   : > { %11969 = vst [vmem:[#allocation53_spill] sm:$0xff] %v7051_v23  ;;  %v7071_v23 = vsel %vm565_vm4, %v637_v61, %v639_v12 }
  0xa7   : > { %v7064_v57 = vsel %vm565_vm4, %v641_v25, %v642_v26  ;;  %v7083_v25 = vsel %vm565_vm4, %v642_v26, %v644_v6 }
  0xa8   : > { %814 = vrot.lane.b32.xlu1 %v7026_v0, %s11920_s15 }
  0xa9   : > { %820 = vrot.lane.b32.xlu0 %v7032_v13, %s11920_s15 }
  0xac   : > { %818 = vrot.lane.b32.xlu1 %v7041_v7, %s11920_s15 }
  0xad   : > { %824 = vrot.lane.b32.xlu0 %v7047_v22, %s11920_s15 }
  0xae   : > { %v7061_v17 = vpop.permute.xlu1 %676 }
  0xaf   : > { %11971 = vst [vmem:[#allocation55_spill] sm:$0xff] %v7061_v17  ;;  %v7066_v11 = vpop.permute.xlu0 %680 }
  0xb0   : > { %11972 = vst [vmem:[#allocation56_spill] sm:$0xff] %v7066_v11  ;;  %822 = vrot.lane.b32.xlu1 %v7056_v33, %s11920_s15 }
  0xb1   : > { %828 = vrot.lane.b32.xlu0 %v7064_v57, %s11920_s15 }
  0xb2   : > { %v7076_v60 = vpop.permute.xlu1 %678 }
  0xb3   : > { %11973 = vst [vmem:[#allocation57_spill] sm:$0xff] %v7076_v60  ;;  %v7078_v34 = vpop.permute.xlu0 %684 }
  0xb4   : > { %11974 = vst [vmem:[#allocation58_spill] sm:$0xff] %v7078_v34  ;;  %826 = vrot.lane.b32.xlu1 %v7071_v23, %s11920_s15 }
  0xb5   : > { %864 = vrot.lane.b32.xlu0 %v6486_v30, %s6214_s16 }
  0xb6   : > { %v7087_v61 = vpop.permute.xlu1 %682 }
  0xb7   : > { %11975 = vst [vmem:[#allocation59_spill] sm:$0xff] %v7087_v61  ;;  %v7089_v10 = vpop.permute.xlu0 %688  ;;  %v12030_v61 = vld [vmem:[#allocation19_spill] sm:$0xff] }
  0xb8   : > { %11976 = vst [vmem:[#allocation60_spill] sm:$0xff] %v7089_v10  ;;  %830 = vrot.lane.b32.xlu1 %v7083_v25, %s11920_s15 }
  0xb9   : > { %868 = vrot.lane.b32.xlu0 %v6490_v32, %s6214_s16 }
  0xba   : > { %v7095_v12 = vpop.permute.xlu1 %686 }
  0xbb   : > { %11977 = vst [vmem:[#allocation61_spill] sm:$0xff] %v7095_v12  ;;  %v7097_v34 = vpop.permute.xlu0 %692  ;;  %v12022_v12 = vld [vmem:[#allocation15_spill] sm:$0xff] }
  0xbc   : > { %11978 = vst [vmem:[#allocation62_spill] sm:$0xff] %v7097_v34  ;;  %866 = vrot.lane.b32.xlu1 %v6488_v31, %s6214_s16 }
  0xbd   : > { %872 = vrot.lane.b32.xlu0 %v6505_v40, %s6214_s16 }
  0xbe   : > { %v7103_v30 = vpop.permute.xlu1 %690 }
  0xbf   : > { %11979 = vst [vmem:[#allocation63_spill] sm:$0xff] %v7103_v30  ;;  %v7105_v26 = vpop.permute.xlu0 %696  ;;  %v12014_v30 = vld [vmem:[#allocation11_spill] sm:$0xff] }
  0xc0   : > { %11980 = vst [vmem:[#allocation64_spill] sm:$0xff] %v7105_v26  ;;  %870 = vrot.lane.b32.xlu1 %v6497_v35, %s6214_s16 }
  0xc1   : > { %876 = vrot.lane.b32.xlu0 %v6521_v47, %s6214_s16 }
  0xc2   : > { %v7111_v32 = vpop.permute.xlu1 %694 }
  0xc3   : > { %11981 = vst [vmem:[#allocation65_spill] sm:$0xff] %v7111_v32  ;;  %v7113_v6 = vpop.permute.xlu0 %700 }
  0xc4   : > { %11982 = vst [vmem:[#allocation66_spill] sm:$0xff] %v7113_v6  ;;  %874 = vrot.lane.b32.xlu1 %v6507_v41, %s6214_s16 }
  0xc5   : > { %880 = vrot.lane.b32.xlu0 %v6540_v55, %s6214_s16 }
  0xc6   : > { %v7119_v31 = vpop.permute.xlu1 %698 }
  0xc7   : > { %11983 = vst [vmem:[#allocation67_spill] sm:$0xff] %v7119_v31  ;;  %v7121_v40 = vpop.permute.xlu0 %704 }
  0xc8   : > { %11984 = vst [vmem:[#allocation68_spill] sm:$0xff] %v7121_v40  ;;  %878 = vrot.lane.b32.xlu1 %v6523_v48, %s6214_s16 }
  0xc9   : > { %884 = vrot.lane.b32.xlu0 %v6558_v1, %s6214_s16 }
  0xca   : > { %v7127_v35 = vpop.permute.xlu1 %702 }
  0xcb   : > { %11985 = vst [vmem:[#allocation69_spill] sm:$0xff] %v7127_v35  ;;  %v7129_v47 = vpop.permute.xlu0 %708  ;;  %v7215_v35 = vld [vmem:[#allocation2 + $0x188] sm:$0xff] }
  0xcc   : > { %11986 = vst [vmem:[#allocation70_spill] sm:$0xff] %v7129_v47  ;;  %882 = vrot.lane.b32.xlu1 %v6542_v56, %s6214_s16 }
  0xcd   : > { %888 = vrot.lane.b32.xlu0 %v6596_v20, %s6214_s16 }
  0xce   : > { %v7135_v41 = vpop.permute.xlu1 %706 }
  0xcf   : > { %11987 = vst [vmem:[#allocation71_spill] sm:$0xff] %v7135_v41  ;;  %v7137_v55 = vpop.permute.xlu0 %712 }
  0xd0   : > { %11988 = vst [vmem:[#allocation72_spill] sm:$0xff] %v7137_v55  ;;  %886 = vrot.lane.b32.xlu1 %v6560_v2, %s6214_s16 }
  0xd1   : > { %892 = vrot.lane.b32.xlu0 %v6615_v28, %s6214_s16 }
  0xd2   : > { %v7143_v48 = vpop.permute.xlu1 %710 }
  0xd3   : > { %11989 = vst [vmem:[#allocation73_spill] sm:$0xff] %v7143_v48  ;;  %v7145_v1 = vpop.permute.xlu0 %716 }
  0xd4   : > { %11990 = vst [vmem:[#allocation74_spill] sm:$0xff] %v7145_v1  ;;  %890 = vrot.lane.b32.xlu1 %v6598_v21, %s6214_s16 }
  0xd5   : > { %896 = vrot.lane.b32.xlu0 %v6634_v45, %s6214_s16 }
  0xd6   : > { %v7151_v56 = vpop.permute.xlu1 %714 }
  0xd7   : > { %11991 = vst [vmem:[#allocation75_spill] sm:$0xff] %v7151_v56  ;;  %v7153_v41 = vpop.permute.xlu0 %720 }
  0xd8   : > { %11992 = vst [vmem:[#allocation76_spill] sm:$0xff] %v7153_v41  ;;  %894 = vrot.lane.b32.xlu1 %v6617_v29, %s6214_s16 }
  0xd9   : > { %900 = vrot.lane.b32.xlu0 %v6653_v3, %s6214_s16 }
  0xda   : > { %v7159_v2 = vpop.permute.xlu1 %718 }
  0xdb   : > { %11993 = vst [vmem:[#allocation77_spill] sm:$0xff] %v7159_v2  ;;  %v7161_v48 = vpop.permute.xlu0 %724 }
  0xdc   : > { %11994 = vst [vmem:[#allocation78_spill] sm:$0xff] %v7161_v48  ;;  %898 = vrot.lane.b32.xlu1 %v6636_v50, %s6214_s16 }
  0xdd   : > { %904 = vrot.lane.b32.xlu0 %v6672_v16, %s6214_s16 }
  0xde   : > { %v7167_v1 = vpop.permute.xlu1 %722 }
  0xdf   : > { %11995 = vst [vmem:[#allocation79_spill] sm:$0xff] %v7167_v1  ;;  %v7169_v56 = vpop.permute.xlu0 %728 }
  0xe0   : > { %11996 = vst [vmem:[#allocation80_spill] sm:$0xff] %v7169_v56  ;;  %902 = vrot.lane.b32.xlu1 %v6655_v4, %s6214_s16 }
  0xe1   : > { %908 = vrot.lane.b32.xlu0 %v6691_v54, %s6214_s16 }
  0xe2   : > { %v7175_v41 = vpop.permute.xlu1 %726 }
  0xe3   : > { %11997 = vst [vmem:[#allocation81_spill] sm:$0xff] %v7175_v41  ;;  %v7177_v2 = vpop.permute.xlu0 %732 }
  0xe4   : > { %11998 = vst [vmem:[#allocation82_spill] sm:$0xff] %v7177_v2  ;;  %906 = vrot.lane.b32.xlu1 %v6674_v18, %s6214_s16 }
  0xe5   : > { %912 = vrot.lane.b32.xlu0 %v6710_v5, %s6214_s16 }
  0xe6   : > { %v7183_v48 = vpop.permute.xlu1 %730 }
  0xe7   : > { %11999 = vst [vmem:[#allocation83_spill] sm:$0xff] %v7183_v48  ;;  %v7185_v1 = vpop.permute.xlu0 %768  ;;  %v7201_v48 = vld [vmem:[#allocation2 + $0x180] sm:$0xff] }
  0xe8   : > { %12000 = vst [vmem:[#allocation84_spill] sm:$0xff] %v7185_v1  ;;  %910 = vrot.lane.b32.xlu1 %v6693_v44, %s6214_s16  ;;  %v12042_v1 = vld [vmem:[#allocation25_spill] sm:$0xff] }
  0xe9   : > { %916 = vrot.lane.b32.xlu0 %v6729_v38, %s6214_s16 }
  0xea   : > { %v7191_v56 = vpop.permute.xlu1 %734 }
  0xeb   : > { %12001 = vst [vmem:[#allocation85_spill] sm:$0xff] %v7191_v56  ;;  %v7193_v41 = vpop.permute.xlu0 %772 }
  0xec   : > { %12002 = vst [vmem:[#allocation86_spill] sm:$0xff] %v7193_v41  ;;  %914 = vrot.lane.b32.xlu1 %v6712_v63, %s6214_s16  ;;  %v12034_v41 = vld [vmem:[#allocation21_spill] sm:$0xff] }
  0xed   : > { %920 = vrot.lane.b32.xlu0 %v6748_v27, %s6214_s16 }
  0xee   : > { %v7199_v2 = vpop.permute.xlu1 %770 }
  0xef   : > { %12003 = vst [vmem:[#allocation87_spill] sm:$0xff] %v7199_v2  ;;  %v7203_v55 = vpop.permute.xlu0 %776  ;;  %v12038_v2 = vld [vmem:[#allocation23_spill] sm:$0xff] }
  0xf0   : > { %12004 = vst [vmem:[#allocation88_spill] sm:$0xff] %v7203_v55  ;;  %918 = vrot.lane.b32.xlu1 %v6731_v15, %s6214_s16  ;;  %v12026_v55 = vld [vmem:[#allocation17_spill] sm:$0xff] }
  0xf1   : > { %924 = vrot.lane.b32.xlu0 %v7201_v48, %s6214_s16 }
  0xf2   : > { %v7209_v56 = vpop.permute.xlu1 %774 }
  0xf3   : > { %12005 = vst [vmem:[#allocation89_spill] sm:$0xff] %v7209_v56  ;;  %v7211_v47 = vpop.permute.xlu0 %780 }
  0xf4   : > { %12006 = vst [vmem:[#allocation90_spill] sm:$0xff] %v7211_v47  ;;  %922 = vrot.lane.b32.xlu1 %v6750_v39, %s6214_s16 }
  0xf5   : > { %960 = vrot.lane.b32.xlu0 %v6512_v43, %s6215_s17 }
  0xf6   : > { %v7219_v40 = vpop.permute.xlu1 %778 }
  0xf7   : > { %12007 = vst [vmem:[#allocation91_spill] sm:$0xff] %v7219_v40  ;;  %v7221_v31 = vpop.permute.xlu0 %784 }
  0xf8   : > { %12008 = vst [vmem:[#allocation92_spill] sm:$0xff] %v7221_v31  ;;  %926 = vrot.lane.b32.xlu1 %v7215_v35, %s6214_s16  ;;  %v12013_v31 = vld [vmem:[#allocation10_spill] sm:$0xff]  ;;  %s6226_s16 = smov 80  }
  0xf9   : > { %964 = vrot.lane.b32.xlu0 %v6519_v46, %s6215_s17 }
  0xfa   : > { %v7227_v6 = vpop.permute.xlu1 %782 }
  0xfb   : > { %12009 = vst [vmem:[#allocation93_spill] sm:$0xff] %v7227_v6  ;;  %v7229_v32 = vpop.permute.xlu0 %788 }
  0xfc   : > { %12010 = vst [vmem:[#allocation94_spill] sm:$0xff] %v7229_v32  ;;  %962 = vrot.lane.b32.xlu1 %v6526_v49, %s6215_s17  ;;  %v12017_v32 = vld [vmem:[#allocation12_spill] sm:$0xff]  ;;  %v12018_v49 = vld [vmem:[#allocation13_spill] sm:$0xff] }
  0xfd   : > { %968 = vrot.lane.b32.xlu0 %v6534_v52, %s6215_s17 }
  0xfe   : > { %v7235_v43 = vpop.permute.xlu1 %786 }
  0xff   : > { %12011 = vst [vmem:[#allocation95_spill] sm:$0xff] %v7235_v43  ;;  %v7237_v26 = vpop.permute.xlu0 %792 }
 0x100   : > { %12012 = vst [vmem:[#allocation96_spill] sm:$0xff] %v7237_v26  ;;  %966 = vrot.lane.b32.xlu1 %v12013_v31, %s6215_s17  ;;  %v12021_v26 = vld [vmem:[#allocation14_spill] sm:$0xff] }
 0x101   : > { %972 = vrot.lane.b32.xlu0 %v12014_v30, %s6215_s17 }
 0x102   : > { %v7243_v47 = vpop.permute.xlu1 %790 }
 0x103   : > { %12015 = vst [vmem:[#allocation10_spill] sm:$0xff] %v7243_v47  ;;  %v7245_v6 = vpop.permute.xlu0 %796 }
 0x104   : > { %12016 = vst [vmem:[#allocation11_spill] sm:$0xff] %v7245_v6  ;;  %970 = vrot.lane.b32.xlu1 %v12017_v32, %s6215_s17  ;;  %v12025_v6 = vld [vmem:[#allocation16_spill] sm:$0xff] }
 0x105   : > { %976 = vrot.lane.b32.xlu0 %v12018_v49, %s6215_s17 }
 0x106   : > { %v7251_v34 = vpop.permute.xlu1 %794 }
 0x107   : > { %12019 = vst [vmem:[#allocation12_spill] sm:$0xff] %v7251_v34  ;;  %v7253_v43 = vpop.permute.xlu0 %800 }
 0x108   : > { %12020 = vst [vmem:[#allocation13_spill] sm:$0xff] %v7253_v43  ;;  %974 = vrot.lane.b32.xlu1 %v12021_v26, %s6215_s17  ;;  %v12029_v43 = vld [vmem:[#allocation18_spill] sm:$0xff] }
 0x109   : > { %980 = vrot.lane.b32.xlu0 %v12022_v12, %s6215_s17 }
 0x10a   : > { %v7259_v40 = vpop.permute.xlu1 %798 }
 0x10b   : > { %12023 = vst [vmem:[#allocation14_spill] sm:$0xff] %v7259_v40  ;;  %v7261_v47 = vpop.permute.xlu0 %804 }
 0x10c   : > { %12024 = vst [vmem:[#allocation15_spill] sm:$0xff] %v7261_v47  ;;  %978 = vrot.lane.b32.xlu1 %v12025_v6, %s6215_s17  ;;  %v12033_v47 = vld [vmem:[#allocation20_spill] sm:$0xff] }
 0x10d   : > { %984 = vrot.lane.b32.xlu0 %v12026_v55, %s6215_s17 }
 0x10e   : > { %v7267_v10 = vpop.permute.xlu1 %802 }
 0x10f   : > { %12027 = vst [vmem:[#allocation16_spill] sm:$0xff] %v7267_v10  ;;  %v7269_v34 = vpop.permute.xlu0 %808 }
 0x110   : > { %12028 = vst [vmem:[#allocation17_spill] sm:$0xff] %v7269_v34  ;;  %982 = vrot.lane.b32.xlu1 %v12029_v43, %s6215_s17  ;;  %v12037_v34 = vld [vmem:[#allocation22_spill] sm:$0xff] }
 0x111   : > { %988 = vrot.lane.b32.xlu0 %v12030_v61, %s6215_s17 }
 0x112   : > { %v7275_v56 = vpop.permute.xlu1 %806 }
 0x113   : > { %12031 = vst [vmem:[#allocation18_spill] sm:$0xff] %v7275_v56  ;;  %v7277_v40 = vpop.permute.xlu0 %812 }
 0x114   : > { %12032 = vst [vmem:[#allocation19_spill] sm:$0xff] %v7277_v40  ;;  %986 = vrot.lane.b32.xlu1 %v12033_v47, %s6215_s17  ;;  %v12041_v40 = vld [vmem:[#allocation24_spill] sm:$0xff] }
 0x115   : > { %992 = vrot.lane.b32.xlu0 %v12034_v41, %s6215_s17 }
 0x116   : > { %v7283_v60 = vpop.permute.xlu1 %810 }
 0x117   : > { %12035 = vst [vmem:[#allocation20_spill] sm:$0xff] %v7283_v60  ;;  %v7285_v10 = vpop.permute.xlu0 %816 }
 0x118   : > { %12036 = vst [vmem:[#allocation21_spill] sm:$0xff] %v7285_v10  ;;  %990 = vrot.lane.b32.xlu1 %v12037_v34, %s6215_s17  ;;  %v12045_v10 = vld [vmem:[#allocation26_spill] sm:$0xff]  ;;  %v12046_v34 = vld [vmem:[#allocation27_spill] sm:$0xff] }
 0x119   : > { %996 = vrot.lane.b32.xlu0 %v12038_v2, %s6215_s17 }
 0x11a   : > { %v7291_v11 = vpop.permute.xlu1 %814 }
 0x11b   : > { %12039 = vst [vmem:[#allocation97_spill] sm:$0xff] %v7291_v11  ;;  %v7293_v56 = vpop.permute.xlu0 %820 }
 0x11c   : > { %12040 = vst [vmem:[#allocation98_spill] sm:$0xff] %v7293_v56  ;;  %994 = vrot.lane.b32.xlu1 %v12041_v40, %s6215_s17  ;;  %v12049_v56 = vld [vmem:[#allocation28_spill] sm:$0xff]  ;;  %v12050_v40 = vld [vmem:[#allocation29_spill] sm:$0xff] }
 0x11d   : > { %1000 = vrot.lane.b32.xlu0 %v12042_v1, %s6215_s17 }
 0x11e   : > { %v7299_v17 = vpop.permute.xlu1 %818 }
 0x11f   : > { %12043 = vst [vmem:[#allocation99_spill] sm:$0xff] %v7299_v17  ;;  %v7301_v60 = vpop.permute.xlu0 %824 }
 0x120   : > { %12044 = vst [vmem:[#allocation100_spill] sm:$0xff] %v7301_v60  ;;  %998 = vrot.lane.b32.xlu1 %v12045_v10, %s6215_s17  ;;  %v12053_v60 = vld [vmem:[#allocation31_spill] sm:$0xff] }
 0x121   : > { %1004 = vrot.lane.b32.xlu0 %v12046_v34, %s6215_s17 }
 0x122   : > { %v7307_v2 = vpop.permute.xlu1 %822 }
 0x123   : > { %12047 = vst [vmem:[#allocation26_spill] sm:$0xff] %v7307_v2  ;;  %v7309_v11 = vpop.permute.xlu0 %828  ;;  %v650_v2 = vrot.slane %v7215_v35, 1 }
 0x124   : > { %12048 = vst [vmem:[#allocation101_spill] sm:$0xff] %v7309_v11  ;;  %1002 = vrot.lane.b32.xlu1 %v12049_v56, %s6215_s17  ;;  %v649_v11 = vrot.slane %v7201_v48, 1 }
 0x125   : > { %1008 = vrot.lane.b32.xlu0 %v12050_v40, %s6215_s17  ;;  %v7335_v40 = vld [vmem:[#allocation2 + $0x190] sm:$0x3] }
 0x126   : > { %v7315_v1 = vpop.permute.xlu1 %826 }
 0x127   : > { %12051 = vst [vmem:[#allocation102_spill] sm:$0xff] %v7315_v1  ;;  %v7317_v17 = vpop.permute.xlu0 %864  ;;  %v12056_v1 = vld [vmem:[#allocation33_spill] sm:$0xff] }
 0x128   : > { %12052 = vst [vmem:[#allocation103_spill] sm:$0xff] %v7317_v17  ;;  %1006 = vrot.lane.b32.xlu1 %v6825_v53, %s6215_s17  ;;  %v12060_v53 = vld [vmem:[#allocation34_spill] sm:$0xff] }
 0x129   : > { %1012 = vrot.lane.b32.xlu0 %v12053_v60, %s6215_s17  ;;  %v7338_v60 = vsel %vm484_vm2, %v649_v11, %v650_v2 }
 0x12a   : > { %v7323_v34 = vpop.permute.xlu1 %830  ;;  %12058 = vst [vmem:[#allocation107_spill] sm:$0xff] %v7338_v60 }
 0x12b   : > { %12054 = vst [vmem:[#allocation104_spill] sm:$0xff] %v7323_v34  ;;  %v7327_v56 = vpop.permute.xlu0 %868 }
 0x12c   : > { %12055 = vst [vmem:[#allocation105_spill] sm:$0xff] %v7327_v56  ;;  %1010 = vrot.lane.b32.xlu1 %v6844_v19, %s6215_s17  ;;  %v652_v56 = vrot.slane %v7335_v40, 1 }
 0x12d   : > { %1016 = vrot.lane.b32.xlu0 %v12056_v1, %s6215_s17 }
 0x12e   : > { %v7333_v17 = vpop.permute.xlu1 %866  ;;  %v7354_v11 = vsel %vm484_vm2, %v650_v2, %v652_v56  ;;  %v12071_v2 = vld [vmem:[#allocation36_spill] sm:$0xff] }
 0x12f   : > { %12057 = vst [vmem:[#allocation106_spill] sm:$0xff] %v7333_v17  ;;  %v7340_v34 = vpop.permute.xlu0 %872  ;;  %v12063_v17 = vld [vmem:[#allocation35_spill] sm:$0xff]  ;;  %12064 = vst [vmem:[#allocation111_spill] sm:$0xff] %v7354_v11 }
 0x130   : > { %12059 = vst [vmem:[#allocation108_spill] sm:$0xff] %v7340_v34  ;;  %1014 = vrot.lane.b32.xlu1 %v12060_v53, %s6215_s17 }
 0x131   : > { %1020 = vrot.lane.b32.xlu0 %v7338_v60, %s6215_s17 }
 0x132   : > { %v7347_v19 = vpop.permute.xlu1 %870 }
 0x133   : > { %12061 = vst [vmem:[#allocation109_spill] sm:$0xff] %v7347_v19  ;;  %v7349_v1 = vpop.permute.xlu0 %876 }
 0x134   : > { %12062 = vst [vmem:[#allocation110_spill] sm:$0xff] %v7349_v1  ;;  %1018 = vrot.lane.b32.xlu1 %v12063_v17, %s6215_s17 }
 0x135   : > { %1056 = vrot.lane.b32.xlu0 %v6879_v62, %s6216_s18 }
 0x136   : > { %v7358_v34 = vpop.permute.xlu1 %874 }
 0x137   : > { %12065 = vst [vmem:[#allocation112_spill] sm:$0xff] %v7358_v34  ;;  %v7360_v53 = vpop.permute.xlu0 %880 }
 0x138   : > { %12066 = vst [vmem:[#allocation113_spill] sm:$0xff] %v7360_v53  ;;  %1022 = vrot.lane.b32.xlu1 %v7354_v11, %s6215_s17 }
 0x139   : > { %1060 = vrot.lane.b32.xlu0 %v6890_v9, %s6216_s18 }
 0x13a   : > { %v7366_v1 = vpop.permute.xlu1 %878 }
 0x13b   : > { %12067 = vst [vmem:[#allocation114_spill] sm:$0xff] %v7366_v1  ;;  %v7368_v19 = vpop.permute.xlu0 %884 }
 0x13c   : > { %12068 = vst [vmem:[#allocation115_spill] sm:$0xff] %v7368_v19  ;;  %1058 = vrot.lane.b32.xlu1 %v6896_v8, %s6216_s18  ;;  %v12074_v19 = vld [vmem:[#allocation37_spill] sm:$0xff] }
 0x13d   : > { %1064 = vrot.lane.b32.xlu0 %v6902_v37, %s6216_s18 }
 0x13e   : > { %v7374_v62 = vpop.permute.xlu1 %882 }
 0x13f   : > { %12069 = vst [vmem:[#allocation116_spill] sm:$0xff] %v7374_v62  ;;  %v7376_v56 = vpop.permute.xlu0 %888 }
 0x140   : > { %12070 = vst [vmem:[#allocation117_spill] sm:$0xff] %v7376_v56  ;;  %1062 = vrot.lane.b32.xlu1 %v12071_v2, %s6216_s18  ;;  %v12077_v56 = vld [vmem:[#allocation38_spill] sm:$0xff] }
 0x141   : > { %1068 = vrot.lane.b32.xlu0 %v6915_v42, %s6216_s18 }
 0x142   : > { %v7382_v53 = vpop.permute.xlu1 %886 }
 0x143   : > { %12072 = vst [vmem:[#allocation36_spill] sm:$0xff] %v7382_v53  ;;  %v7384_v1 = vpop.permute.xlu0 %892 }
 0x144   : > { %12073 = vst [vmem:[#allocation118_spill] sm:$0xff] %v7384_v1  ;;  %1066 = vrot.lane.b32.xlu1 %v12074_v19, %s6216_s18  ;;  %v12080_v1 = vld [vmem:[#allocation39_spill] sm:$0xff] }
 0x145   : > { %1072 = vrot.lane.b32.xlu0 %v6928_v51, %s6216_s18 }
 0x146   : > { %v7390_v8 = vpop.permute.xlu1 %890 }
 0x147   : > { %12075 = vst [vmem:[#allocation37_spill] sm:$0xff] %v7390_v8  ;;  %v7392_v62 = vpop.permute.xlu0 %896 }
 0x148   : > { %12076 = vst [vmem:[#allocation119_spill] sm:$0xff] %v7392_v62  ;;  %1070 = vrot.lane.b32.xlu1 %v12077_v56, %s6216_s18  ;;  %v12083_v62 = vld [vmem:[#allocation41_spill] sm:$0xff] }
 0x149   : > { %1076 = vrot.lane.b32.xlu0 %v6941_v59, %s6216_s18 }
 0x14a   : > { %v7398_v34 = vpop.permute.xlu1 %894 }
 0x14b   : > { %12078 = vst [vmem:[#allocation38_spill] sm:$0xff] %v7398_v34  ;;  %v7400_v53 = vpop.permute.xlu0 %900 }
 0x14c   : > { %12079 = vst [vmem:[#allocation120_spill] sm:$0xff] %v7400_v53  ;;  %1074 = vrot.lane.b32.xlu1 %v12080_v1, %s6216_s18  ;;  %v12086_v53 = vld [vmem:[#allocation43_spill] sm:$0xff] }
 0x14d   : > { %1080 = vrot.lane.b32.xlu0 %v6954_v14, %s6216_s18  ;;  %v12093_v14 = vld [vmem:[#allocation48_spill] sm:$0xff] }
 0x14e   : > { %v7406_v11 = vpop.permute.xlu1 %898 }
 0x14f   : > { %12081 = vst [vmem:[#allocation39_spill] sm:$0xff] %v7406_v11  ;;  %v7408_v8 = vpop.permute.xlu0 %904 }
 0x150   : > { %12082 = vst [vmem:[#allocation121_spill] sm:$0xff] %v7408_v8  ;;  %1078 = vrot.lane.b32.xlu1 %v12083_v62, %s6216_s18  ;;  %v12089_v8 = vld [vmem:[#allocation45_spill] sm:$0xff] }
 0x151   : > { %1084 = vrot.lane.b32.xlu0 %v6967_v24, %s6216_s18 }
 0x152   : > { %v7414_v60 = vpop.permute.xlu1 %902 }
 0x153   : > { %12084 = vst [vmem:[#allocation41_spill] sm:$0xff] %v7414_v60  ;;  %v7416_v34 = vpop.permute.xlu0 %908 }
 0x154   : > { %12085 = vst [vmem:[#allocation122_spill] sm:$0xff] %v7416_v34  ;;  %1082 = vrot.lane.b32.xlu1 %v12086_v53, %s6216_s18  ;;  %v12092_v34 = vld [vmem:[#allocation47_spill] sm:$0xff] }
 0x155   : > { %1088 = vrot.lane.b32.xlu0 %v6980_v36, %s6216_s18 }
 0x156   : > { %v7422_v17 = vpop.permute.xlu1 %906 }
 0x157   : > { %12087 = vst [vmem:[#allocation43_spill] sm:$0xff] %v7422_v17  ;;  %v7424_v11 = vpop.permute.xlu0 %912 }
 0x158   : > { %12088 = vst [vmem:[#allocation123_spill] sm:$0xff] %v7424_v11  ;;  %1086 = vrot.lane.b32.xlu1 %v12089_v8, %s6216_s18  ;;  %v12096_v11 = vld [vmem:[#allocation49_spill] sm:$0xff]  ;;  %v12097_v8 = vld [vmem:[#allocation50_spill] sm:$0xff] }
 0x159   : > { %1092 = vrot.lane.b32.xlu0 %v6993_v58, %s6216_s18 }
 0x15a   : > { %v7430_v24 = vpop.permute.xlu1 %910 }
 0x15b   : > { %12090 = vst [vmem:[#allocation124_spill] sm:$0xff] %v7430_v24  ;;  %v7432_v60 = vpop.permute.xlu0 %916 }
 0x15c   : > { %12091 = vst [vmem:[#allocation125_spill] sm:$0xff] %v7432_v60  ;;  %1090 = vrot.lane.b32.xlu1 %v12092_v34, %s6216_s18 }
 0x15d   : > { %1096 = vrot.lane.b32.xlu0 %v12093_v14, %s6216_s18 }
 0x15e   : > { %v7438_v36 = vpop.permute.xlu1 %914 }
 0x15f   : > { %12094 = vst [vmem:[#allocation47_spill] sm:$0xff] %v7438_v36  ;;  %v7440_v17 = vpop.permute.xlu0 %920 }
 0x160   : > { %12095 = vst [vmem:[#allocation48_spill] sm:$0xff] %v7440_v17  ;;  %1094 = vrot.lane.b32.xlu1 %v12096_v11, %s6216_s18 }
 0x161   : > { %1100 = vrot.lane.b32.xlu0 %v12097_v8, %s6216_s18 }
 0x162   : > { %v7446_v58 = vpop.permute.xlu1 %918 }
 0x163   : > { %12098 = vst [vmem:[#allocation49_spill] sm:$0xff] %v7446_v58  ;;  %v7448_v24 = vpop.permute.xlu0 %924  ;;  %v655_v58 = vrot.slane %v7215_v35, 2 }
 0x164   : > { %12099 = vst [vmem:[#allocation126_spill] sm:$0xff] %v7448_v24  ;;  %1098 = vrot.lane.b32.xlu1 %v7026_v0, %s6216_s18  ;;  %v654_v24 = vrot.slane %v7201_v48, 2 }
 0x165   : > { %1104 = vrot.lane.b32.xlu0 %v7032_v13, %s6216_s18 }
 0x166   : > { %v7454_v60 = vpop.permute.xlu1 %922 }
 0x167   : > { %12100 = vst [vmem:[#allocation127_spill] sm:$0xff] %v7454_v60  ;;  %v7456_v36 = vpop.permute.xlu0 %960 }
 0x168   : > { %12101 = vst [vmem:[#allocation128_spill] sm:$0xff] %v7456_v36  ;;  %1102 = vrot.lane.b32.xlu1 %v7041_v7, %s6216_s18  ;;  %v7475_v36 = vsel %vm565_vm4, %v654_v24, %v655_v58 }
 0x169   : > { %1108 = vrot.lane.b32.xlu0 %v7047_v22, %s6216_s18 }
 0x16a   : > { %v7462_v17 = vpop.permute.xlu1 %926 }
 0x16b   : > { %12102 = vst [vmem:[#allocation129_spill] sm:$0xff] %v7462_v17  ;;  %v7466_v8 = vpop.permute.xlu0 %964  ;;  %v657_v17 = vrot.slane %v7335_v40, 2 }
 0x16c   : > { %12103 = vst [vmem:[#allocation130_spill] sm:$0xff] %v7466_v8  ;;  %1106 = vrot.lane.b32.xlu1 %v7056_v33, %s6216_s18 }
 0x16d   : > { %1112 = vrot.lane.b32.xlu0 %v7064_v57, %s6216_s18  ;;  %v7491_v24 = vsel %vm565_vm4, %v655_v58, %v657_v17 }
 0x16e   : > { %v7472_v60 = vpop.permute.xlu1 %962  ;;  %12108 = vst [vmem:[#allocation135_spill] sm:$0xff] %v7491_v24 }
 0x16f   : > { %12104 = vst [vmem:[#allocation131_spill] sm:$0xff] %v7472_v60  ;;  %v7477_v22 = vpop.permute.xlu0 %968  ;;  %v7493_v60 = vld [vmem:[#allocation2 + $0x30] sm:$0xff] }
 0x170   : > { %12105 = vst [vmem:[#allocation132_spill] sm:$0xff] %v7477_v22  ;;  %1110 = vrot.lane.b32.xlu1 %v7071_v23, %s6216_s18  ;;  %12109 = vst [vmem:[#allocation136_spill] sm:$0xff] %v7493_v60 }
 0x171   : > { %1116 = vrot.lane.b32.xlu0 %v7475_v36, %s6216_s18 }
 0x172   : > { %v7484_v8 = vpop.permute.xlu1 %966 }
 0x173   : > { %12106 = vst [vmem:[#allocation133_spill] sm:$0xff] %v7484_v8  ;;  %v7486_v33 = vpop.permute.xlu0 %972  ;;  %v7511_v8 = vld [vmem:[#allocation2 + $0x38] sm:$0xff] }
 0x174   : > { %12107 = vst [vmem:[#allocation134_spill] sm:$0xff] %v7486_v33  ;;  %1114 = vrot.lane.b32.xlu1 %v7083_v25, %s6216_s18  ;;  %v7503_v33 = vld [vmem:[#allocation2 + $0x48] sm:$0xff]  ;;  %12115 = vst [vmem:[#allocation142_spill] sm:$0xff] %v7511_v8 }
 0x175   : > { %1152 = vrot.lane.b32.xlu0 %v7493_v60, %s6217_s19  ;;  %12112 = vst [vmem:[#allocation139_spill] sm:$0xff] %v7503_v33 }
 0x176   : > { %v7497_v40 = vpop.permute.xlu1 %970 }
 0x177   : > { %12110 = vst [vmem:[#allocation137_spill] sm:$0xff] %v7497_v40  ;;  %v7499_v22 = vpop.permute.xlu0 %976  ;;  %v7515_v40 = vld [vmem:[#allocation2 + $0x60] sm:$0xff] }
 0x178   : > { %12111 = vst [vmem:[#allocation138_spill] sm:$0xff] %v7499_v22  ;;  %1118 = vrot.lane.b32.xlu1 %v7491_v24, %s6216_s18  ;;  %12116 = vst [vmem:[#allocation143_spill] sm:$0xff] %v7515_v40  ;;  %v7523_v24 = vld [vmem:[#allocation2 + $0x50] sm:$0xff]  ;;  %s6219_s18 = smov 32  }
 0x179   : > { %1156 = vrot.lane.b32.xlu0 %v7503_v33, %s6217_s19  ;;  %12119 = vst [vmem:[#allocation146_spill] sm:$0xff] %v7523_v24  ;;  %v7535_v33 = vld [vmem:[#allocation2 + $0x68] sm:$0xff] }
 0x17a   : > { %v7507_v58 = vpop.permute.xlu1 %974  ;;  %12122 = vst [vmem:[#allocation149_spill] sm:$0xff] %v7535_v33 }
 0x17b   : > { %12113 = vst [vmem:[#allocation140_spill] sm:$0xff] %v7507_v58  ;;  %v7509_v17 = vpop.permute.xlu0 %980 }
 0x17c   : > { %12114 = vst [vmem:[#allocation141_spill] sm:$0xff] %v7509_v17  ;;  %1154 = vrot.lane.b32.xlu1 %v7511_v8, %s6217_s19  ;;  %v7527_v17 = vld [vmem:[#allocation2 + $0x78] sm:$0xff] }
 0x17d   : > { %1160 = vrot.lane.b32.xlu0 %v7515_v40, %s6217_s19  ;;  %v7547_v40 = vld [vmem:[#allocation2 + $0x80] sm:$0xff] }
 0x17e   : > { %v7519_v22 = vpop.permute.xlu1 %978 }
 0x17f   : > { %12117 = vst [vmem:[#allocation144_spill] sm:$0xff] %v7519_v22  ;;  %v7521_v60 = vpop.permute.xlu0 %984 }
 0x180   : > { %12118 = vst [vmem:[#allocation145_spill] sm:$0xff] %v7521_v60  ;;  %1158 = vrot.lane.b32.xlu1 %v7523_v24, %s6217_s19  ;;  %v7539_v60 = vld [vmem:[#allocation2 + $0x90] sm:$0xff] }
 0x181   : > { %1164 = vrot.lane.b32.xlu0 %v7527_v17, %s6217_s19 }
 0x182   : > { %v7531_v58 = vpop.permute.xlu1 %982 }
 0x183   : > { %12120 = vst [vmem:[#allocation147_spill] sm:$0xff] %v7531_v58  ;;  %v7533_v8 = vpop.permute.xlu0 %988 }
 0x184   : > { %12121 = vst [vmem:[#allocation148_spill] sm:$0xff] %v7533_v8  ;;  %1162 = vrot.lane.b32.xlu1 %v7535_v33, %s6217_s19  ;;  %v7557_v33 = vld [vmem:[#allocation2 + $0x98] sm:$0xff] }
 0x185   : > { %1168 = vrot.lane.b32.xlu0 %v7539_v60, %s6217_s19 }
 0x186   : > { %v7543_v22 = vpop.permute.xlu1 %986 }
 0x187   : > { %12123 = vst [vmem:[#allocation150_spill] sm:$0xff] %v7543_v22  ;;  %v7545_v24 = vpop.permute.xlu0 %992 }
 0x188   : > { %12124 = vst [vmem:[#allocation151_spill] sm:$0xff] %v7545_v24  ;;  %1166 = vrot.lane.b32.xlu1 %v7547_v40, %s6217_s19 }
 0x189   : > { %1172 = vrot.lane.b32.xlu0 %v6596_v20, %s6217_s19 }
 0x18a   : > { %v7553_v8 = vpop.permute.xlu1 %990 }
 0x18b   : > { %12125 = vst [vmem:[#allocation152_spill] sm:$0xff] %v7553_v8  ;;  %v7555_v58 = vpop.permute.xlu0 %996 }
 0x18c   : > { %12126 = vst [vmem:[#allocation153_spill] sm:$0xff] %v7555_v58  ;;  %1170 = vrot.lane.b32.xlu1 %v7557_v33, %s6217_s19 }
 0x18d   : > { %1176 = vrot.lane.b32.xlu0 %v6615_v28, %s6217_s19 }
 0x18e   : > { %v7563_v24 = vpop.permute.xlu1 %994 }
 0x18f   : > { %12127 = vst [vmem:[#allocation154_spill] sm:$0xff] %v7563_v24  ;;  %v7565_v22 = vpop.permute.xlu0 %1000 }
 0x190   : > { %12128 = vst [vmem:[#allocation155_spill] sm:$0xff] %v7565_v22  ;;  %1174 = vrot.lane.b32.xlu1 %v6598_v21, %s6217_s19  ;;  %v12206_v22 = vld [vmem:[#allocation51_spill] sm:$0xff] }
 0x191   : > { %1180 = vrot.lane.b32.xlu0 %v6634_v45, %s6217_s19 }
 0x192   : > { %v7571_v20 = vpop.permute.xlu1 %998 }
 0x193   : > { %12129 = vst [vmem:[#allocation156_spill] sm:$0xff] %v7571_v20  ;;  %v7573_v58 = vpop.permute.xlu0 %1004 }
 0x194   : > { %12130 = vst [vmem:[#allocation157_spill] sm:$0xff] %v7573_v58  ;;  %1178 = vrot.lane.b32.xlu1 %v6617_v29, %s6217_s19 }
 0x195   : > { %1184 = vrot.lane.b32.xlu0 %v6653_v3, %s6217_s19 }
 0x196   : > { %v7579_v28 = vpop.permute.xlu1 %1002 }
 0x197   : > { %12131 = vst [vmem:[#allocation158_spill] sm:$0xff] %v7579_v28  ;;  %v7581_v24 = vpop.permute.xlu0 %1008 }
 0x198   : > { %12132 = vst [vmem:[#allocation159_spill] sm:$0xff] %v7581_v24  ;;  %1182 = vrot.lane.b32.xlu1 %v6636_v50, %s6217_s19 }
 0x199   : > { %1188 = vrot.lane.b32.xlu0 %v6672_v16, %s6217_s19 }
 0x19a   : > { %v7587_v21 = vpop.permute.xlu1 %1006 }
 0x19b   : > { %12133 = vst [vmem:[#allocation160_spill] sm:$0xff] %v7587_v21  ;;  %v7589_v45 = vpop.permute.xlu0 %1012 }
 0x19c   : > { %12134 = vst [vmem:[#allocation161_spill] sm:$0xff] %v7589_v45  ;;  %1186 = vrot.lane.b32.xlu1 %v6655_v4, %s6217_s19  ;;  %v1703_v45 = vld [vmem:[%s11676_s1] sm:$0xff] }
 0x19d   : > { %1192 = vrot.lane.b32.xlu0 %v6691_v54, %s6217_s19 }
 0x19e   : > { %v7595_v29 = vpop.permute.xlu1 %1010 }
 0x19f   : > { %12135 = vst [vmem:[#allocation162_spill] sm:$0xff] %v7595_v29  ;;  %v7597_v3 = vpop.permute.xlu0 %1016 }
 0x1a0   : > { %12136 = vst [vmem:[#allocation163_spill] sm:$0xff] %v7597_v3  ;;  %1190 = vrot.lane.b32.xlu1 %v6674_v18, %s6217_s19 }
 0x1a1   : > { %1196 = vrot.lane.b32.xlu0 %v6710_v5, %s6217_s19 }
 0x1a2   : > { %v7603_v50 = vpop.permute.xlu1 %1014 }
 0x1a3   : > { %12137 = vst [vmem:[#allocation164_spill] sm:$0xff] %v7603_v50  ;;  %v7605_v16 = vpop.permute.xlu0 %1020 }
 0x1a4   : > { %12138 = vst [vmem:[#allocation165_spill] sm:$0xff] %v7605_v16  ;;  %1194 = vrot.lane.b32.xlu1 %v6693_v44, %s6217_s19  ;;  %v7629_v44 = vld [vmem:[#allocation2 + $0x198] sm:$0xff] }
 0x1a5   : > { %1200 = vrot.lane.b32.xlu0 %v6729_v38, %s6217_s19 }
 0x1a6   : > { %v7611_v4 = vpop.permute.xlu1 %1018 }
 0x1a7   : > { %12139 = vst [vmem:[#allocation166_spill] sm:$0xff] %v7611_v4  ;;  %v7613_v54 = vpop.permute.xlu0 %1056 }
 0x1a8   : > { %1198 = vrot.lane.b32.xlu1 %v6712_v63, %s6217_s19 }
 0x1a9   : > { %1204 = vrot.lane.b32.xlu0 %v6748_v27, %s6217_s19 }
 0x1aa   : > { %v7619_v5 = vpop.permute.xlu1 %1022 }
 0x1ab   : > { %12140 = vst [vmem:[#allocation167_spill] sm:$0xff] %v7619_v5  ;;  %v7621_v18 = vpop.permute.xlu0 %1060 }
 0x1ac   : > { %1202 = vrot.lane.b32.xlu1 %v6731_v15, %s6217_s19  ;;  %v7643_v15 = vld [vmem:[#allocation2 + $0x1a0] sm:$0xff] }
 0x1ad   : > { %1208 = vrot.lane.b32.xlu0 %v7201_v48, %s6217_s19 }
 0x1ae   : > { %v7627_v38 = vpop.permute.xlu1 %1058 }
 0x1af   : > { %v7631_v16 = vpop.permute.xlu0 %1064 }
 0x1b0   : > { %1206 = vrot.lane.b32.xlu1 %v6750_v39, %s6217_s19 }
 0x1b1   : > { %1212 = vrot.lane.b32.xlu0 %v7629_v44, %s6217_s19 }
 0x1b2   : > { %v7637_v63 = vpop.permute.xlu1 %1062 }
 0x1b3   : > { %v7639_v27 = vpop.permute.xlu0 %1068 }
 0x1b4   : > { %1210 = vrot.lane.b32.xlu1 %v7215_v35, %s6217_s19 }
 0x1b5   : > { %1248 = vrot.lane.b32.xlu0 %v6519_v46, %s6218_s20 }
 0x1b6   : > { %v7647_v48 = vpop.permute.xlu1 %1066 }
 0x1b7   : > { %v7649_v5 = vpop.permute.xlu0 %1072 }
 0x1b8   : > { %1214 = vrot.lane.b32.xlu1 %v7643_v15, %s6217_s19 }
 0x1b9   : > { %1252 = vrot.lane.b32.xlu0 %v6534_v52, %s6218_s20 }
 0x1ba   : > { %v7655_v39 = vpop.permute.xlu1 %1070 }
 0x1bb   : > { %v7657_v4 = vpop.permute.xlu0 %1076 }
 0x1bc   : > { %1250 = vrot.lane.b32.xlu1 %v12013_v31, %s6218_s20 }
 0x1bd   : > { %1256 = vrot.lane.b32.xlu0 %v12014_v30, %s6218_s20 }
 0x1be   : > { %v7663_v46 = vpop.permute.xlu1 %1074 }
 0x1bf   : > { %v7665_v35 = vpop.permute.xlu0 %1080 }
 0x1c0   : > { %1254 = vrot.lane.b32.xlu1 %v12017_v32, %s6218_s20 }
 0x1c1   : > { %1260 = vrot.lane.b32.xlu0 %v12018_v49, %s6218_s20 }
 0x1c2   : > { %v7671_v52 = vpop.permute.xlu1 %1078 }
 0x1c3   : > { %v7673_v3 = vpop.permute.xlu0 %1084 }
 0x1c4   : > { %12141 = vst [vmem:[#allocation168_spill] sm:$0xff] %v7673_v3  ;;  %1258 = vrot.lane.b32.xlu1 %v12021_v26, %s6218_s20  ;;  %v1707_v26 = vld [vmem:[%s11676_s1 + $0x20] sm:$0xf]  ;;  %v12216_v3 = vld [vmem:[#allocation57_spill] sm:$0xff] }
 0x1c5   : > { %1264 = vrot.lane.b32.xlu0 %v12022_v12, %s6218_s20  ;;  %5846 = vmatprep.subr.msk.mxu0 %vm1812_vm5, %v1707_v26 }
 0x1c6   : > { %v7679_v30 = vpop.permute.xlu1 %1082  ;;  %5847 = vmatpush3.msk.msra.mxu0 %vm1812_vm5, %v1707_v26  ;;  %v1704_v26 = vld [vmem:[%s11676_s1 + $0x8] sm:$0xff]  ;;  %vm3493_vm5 = vcmask 588800  }
 0x1c7   : > { %v7681_v31 = vpop.permute.xlu0 %1088 }
 0x1c8   : > { %12142 = vst [vmem:[#allocation169_spill] sm:$0xff] %v7681_v31  ;;  %1262 = vrot.lane.b32.xlu1 %v12025_v6, %s6218_s20  ;;  %v6066_v31 = vld [vmem:[#allocation2 + $0x18] sm:$0xff] }
 0x1c9   : > { %1268 = vrot.lane.b32.xlu0 %v12026_v55, %s6218_s20  ;;  %v1706_v55 = vld [vmem:[%s11676_s1 + $0x18] sm:$0xff] }
 0x1ca   : > { %v7687_v32 = vpop.permute.xlu1 %1086  ;;  %5848 = vmatprep.subr.mxu0 %v1706_v55 }
 0x1cb   : > { %12143 = vst [vmem:[#allocation170_spill] sm:$0xff] %v7687_v32  ;;  %v7689_v49 = vpop.permute.xlu0 %1092  ;;  %5849 = vmatpush3.msra.mxu0 %v1706_v55 }
 0x1cc   : > { %12144 = vst [vmem:[#allocation171_spill] sm:$0xff] %v7689_v49  ;;  %1266 = vrot.lane.b32.xlu1 %v12029_v43, %s6218_s20  ;;  %v1705_v43 = vld [vmem:[%s11676_s1 + $0x10] sm:$0xff] }
 0x1cd   : > { %1272 = vrot.lane.b32.xlu0 %v12030_v61, %s6218_s20  ;;  %5850 = vmatprep.subr.mxu0 %v1705_v43 }
 0x1ce   : > { %v7695_v12 = vpop.permute.xlu1 %1090  ;;  %5851 = vmatpush3.msra.mxu0 %v1705_v43  ;;  %v12153_v43 = vld [vmem:[#allocation24_spill] sm:$0xff] }
 0x1cf   : > { %12145 = vst [vmem:[#allocation172_spill] sm:$0xff] %v7695_v12  ;;  %v7700_v6 = vpop.permute.xlu0 %1096  ;;  %5852 = vmatprep.subr.mxu0 %v1704_v26 }
 0x1d0   : > { %12146 = vst [vmem:[#allocation173_spill] sm:$0xff] %v7700_v6  ;;  %1270 = vrot.lane.b32.xlu1 %v12033_v47, %s6218_s20  ;;  %v12149_v47 = vld [vmem:[#allocation22_spill] sm:$0xff]  ;;  %5853 = vmatpush3.msra.mxu0 %v1704_v26  ;;  %v12157_v26 = vld [vmem:[#allocation27_spill] sm:$0xff] }
 0x1d1   : > { %1276 = vrot.lane.b32.xlu0 %v12034_v41, %s6218_s20  ;;  %v12150_v41 = vld [vmem:[#allocation23_spill] sm:$0xff]  ;;  %5854 = vmatprep.subr.mxu0 %v1703_v45 }
 0x1d2   : > { %v7709_v61 = vpop.permute.xlu1 %1094  ;;  %5855 = vmatpush3.msra.mxu0 %v1703_v45 }
 0x1d3   : > { %12147 = vst [vmem:[#allocation174_spill] sm:$0xff] %v7709_v61  ;;  %v7714_v50 = vpop.permute.xlu0 %1100  ;;  %v6064_v61 = vld [vmem:[#allocation2] sm:$0xff] }
 0x1d4   : > { %12148 = vst [vmem:[#allocation175_spill] sm:$0xff] %v7714_v50  ;;  %1274 = vrot.lane.b32.xlu1 %v12149_v47, %s6218_s20  ;;  %v12154_v47 = vld [vmem:[#allocation25_spill] sm:$0xff]  ;;  %v12181_v50 = vld [vmem:[#allocation32_spill] sm:$0xff]  ;;  %v1440_v49 = vsel %vm261_vm0, %v6064_v61, %v12206_v22  ;;  %v12213_v22 = vld [vmem:[#allocation87_spill] sm:$0xff] }
 0x1d5   : > { %1280 = vrot.lane.b32.xlu0 %v12150_v41, %s6218_s20 }
 0x1d6   : > { %v7723_v55 = vpop.permute.xlu1 %1098 }
 0x1d7   : > { %12151 = vst [vmem:[#allocation22_spill] sm:$0xff] %v7723_v55  ;;  %v7728_v29 = vpop.permute.xlu0 %1104  ;;  %v12185_v55 = vld [vmem:[#allocation54_spill] sm:$0xff] }
 0x1d8   : > { %12152 = vst [vmem:[#allocation23_spill] sm:$0xff] %v7728_v29  ;;  %1278 = vrot.lane.b32.xlu1 %v12153_v43, %s6218_s20  ;;  %v12160_v43 = vld [vmem:[#allocation28_spill] sm:$0xff] }
 0x1d9   : > { %1284 = vrot.lane.b32.xlu0 %v12154_v47, %s6218_s20 }
 0x1da   : > { %v7734_v24 = vpop.permute.xlu1 %1102 }
 0x1db   : > { %12155 = vst [vmem:[#allocation24_spill] sm:$0xff] %v7734_v24  ;;  %v7736_v41 = vpop.permute.xlu0 %1108 }
 0x1dc   : > { %12156 = vst [vmem:[#allocation25_spill] sm:$0xff] %v7736_v41  ;;  %1282 = vrot.lane.b32.xlu1 %v12045_v10, %s6218_s20 }
 0x1dd   : > { %1288 = vrot.lane.b32.xlu0 %v12157_v26, %s6218_s20 }
 0x1de   : > { %v7742_v21 = vpop.permute.xlu1 %1106 }
 0x1df   : > { %12158 = vst [vmem:[#allocation27_spill] sm:$0xff] %v7742_v21  ;;  %v7744_v29 = vpop.permute.xlu0 %1112  ;;  %v12175_v21 = vld [vmem:[#allocation30_spill] sm:$0xff] }
 0x1e0   : > { %12159 = vst [vmem:[#allocation176_spill] sm:$0xff] %v7744_v29  ;;  %1286 = vrot.lane.b32.xlu1 %v12160_v43, %s6218_s20  ;;  %v12168_v29 = vld [vmem:[#allocation44_spill] sm:$0xff] }
 0x1e1   : > { %1346 = vrot.lane.b32.xlu0 %v12071_v2, %s6219_s18 }
 0x1e2   : > { %v7750_v45 = vpop.permute.xlu1 %1110 }
 0x1e3   : > { %12161 = vst [vmem:[#allocation28_spill] sm:$0xff] %v7750_v45  ;;  %v7752_v47 = vpop.permute.xlu0 %1116  ;;  %v12170_v45 = vld [vmem:[#allocation46_spill] sm:$0xff] }
 0x1e4   : > { %12162 = vst [vmem:[#allocation177_spill] sm:$0xff] %v7752_v47  ;;  %1344 = vrot.lane.b32.xlu1 %v6890_v9, %s6219_s18 }
 0x1e5   : > { %1350 = vrot.lane.b32.xlu0 %v12074_v19, %s6219_s18 }
 0x1e6   : > { %v7758_v10 = vpop.permute.xlu1 %1114 }
 0x1e7   : > { %12163 = vst [vmem:[#allocation178_spill] sm:$0xff] %v7758_v10  ;;  %v7760_v26 = vpop.permute.xlu0 %1152  ;;  %v12167_v10 = vld [vmem:[#allocation42_spill] sm:$0xff] }
 0x1e8   : > { %1348 = vrot.lane.b32.xlu1 %v6902_v37, %s6219_s18 }
 0x1e9   : > { %1354 = vrot.lane.b32.xlu0 %v12077_v56, %s6219_s18 }
 0x1ea   : > { %v7766_v2 = vpop.permute.xlu1 %1118 }
 0x1eb   : > { %12164 = vst [vmem:[#allocation179_spill] sm:$0xff] %v7766_v2  ;;  %v7768_v43 = vpop.permute.xlu0 %1156  ;;  %v12165_v2 = vld [vmem:[#allocation40_spill] sm:$0xff] }
 0x1ec   : > { %1352 = vrot.lane.b32.xlu1 %v6915_v42, %s6219_s18 }
 0x1ed   : > { %1358 = vrot.lane.b32.xlu0 %v12080_v1, %s6219_s18 }
 0x1ee   : > { %v7774_v19 = vpop.permute.xlu1 %1154 }
 0x1ef   : > { %v7776_v9 = vpop.permute.xlu0 %1160 }
 0x1f0   : > { %1356 = vrot.lane.b32.xlu1 %v6928_v51, %s6219_s18  ;;  %v12166_v51 = vld [vmem:[#allocation45_spill] sm:$0xff] }
 0x1f1   : > { %1362 = vrot.lane.b32.xlu0 %v12083_v62, %s6219_s18 }
 0x1f2   : > { %v7782_v37 = vpop.permute.xlu1 %1158 }
 0x1f3   : > { %v7784_v56 = vpop.permute.xlu0 %1164 }
 0x1f4   : > { %1360 = vrot.lane.b32.xlu1 %v6941_v59, %s6219_s18 }
 0x1f5   : > { %1366 = vrot.lane.b32.xlu0 %v12086_v53, %s6219_s18 }
 0x1f6   : > { %v7790_v42 = vpop.permute.xlu1 %1162 }
 0x1f7   : > { %v7792_v1 = vpop.permute.xlu0 %1168 }
 0x1f8   : > { %1364 = vrot.lane.b32.xlu1 %v12165_v2, %s6219_s18 }
 0x1f9   : > { %1370 = vrot.lane.b32.xlu0 %v12166_v51, %s6219_s18 }
 0x1fa   : > { %v7798_v62 = vpop.permute.xlu1 %1166 }
 0x1fb   : > { %v7800_v47 = vpop.permute.xlu0 %1172 }
 0x1fc   : > { %1368 = vrot.lane.b32.xlu1 %v12167_v10, %s6219_s18 }
 0x1fd   : > { %1374 = vrot.lane.b32.xlu0 %v12092_v34, %s6219_s18 }
 0x1fe   : > { %v7806_v53 = vpop.permute.xlu1 %1170 }
 0x1ff   : > { %v7808_v59 = vpop.permute.xlu0 %1176 }
 0x200   : > { %1372 = vrot.lane.b32.xlu1 %v12168_v29, %s6219_s18  ;;  %v12172_v29 = vld [vmem:[#allocation50_spill] sm:$0xff] }
 0x201   : > { %1378 = vrot.lane.b32.xlu0 %v12096_v11, %s6219_s18 }
 0x202   : > { %v7814_v2 = vpop.permute.xlu1 %1174 }
 0x203   : > { %v7816_v51 = vpop.permute.xlu0 %1180 }
 0x204   : > { %12169 = vst [vmem:[#allocation40_spill] sm:$0xff] %v7816_v51  ;;  %1376 = vrot.lane.b32.xlu1 %v12170_v45, %s6219_s18  ;;  %v12176_v45 = vld [vmem:[#allocation29_spill] sm:$0xff] }
 0x205   : > { %1382 = vrot.lane.b32.xlu0 %v7026_v0, %s6219_s18 }
 0x206   : > { %v7822_v34 = vpop.permute.xlu1 %1178 }
 0x207   : > { %v7824_v10 = vpop.permute.xlu0 %1184 }
 0x208   : > { %12171 = vst [vmem:[#allocation45_spill] sm:$0xff] %v7824_v10  ;;  %1380 = vrot.lane.b32.xlu1 %v12093_v14, %s6219_s18  ;;  %v12208_v10 = vld [vmem:[#allocation53_spill] sm:$0xff] }
 0x209   : > { %1384 = vrot.lane.b32.xlu0 %v12172_v29, %s6219_s18 }
 0x20a   : > { %v7830_v11 = vpop.permute.xlu1 %1182 }
 0x20b   : > { %12173 = vst [vmem:[#allocation42_spill] sm:$0xff] %v7830_v11  ;;  %v7832_v41 = vpop.permute.xlu0 %1188  ;;  %v12212_v11 = vld [vmem:[#allocation136_spill] sm:$0xff] }
 0x20c   : > { %12174 = vst [vmem:[#allocation44_spill] sm:$0xff] %v7832_v41  ;;  %1290 = vrot.lane.b32.xlu1 %v12175_v21, %s6218_s20  ;;  %v12182_v21 = vld [vmem:[#allocation31_spill] sm:$0xff] }
 0x20d   : > { %1292 = vrot.lane.b32.xlu0 %v12176_v45, %s6218_s20 }
 0x20e   : > { %v7838_v0 = vpop.permute.xlu1 %1186 }
 0x20f   : > { %12177 = vst [vmem:[#allocation46_spill] sm:$0xff] %v7838_v0  ;;  %v7840_v24 = vpop.permute.xlu0 %1192  ;;  %v6065_v0 = vld [vmem:[#allocation2 + $0x8] sm:$0xff] }
 0x210   : > { %12178 = vst [vmem:[#allocation50_spill] sm:$0xff] %v7840_v24  ;;  %1386 = vrot.lane.b32.xlu1 %v7041_v7, %s6219_s18  ;;  %v12186_v7 = vld [vmem:[#allocation52_spill] sm:$0xff]  ;;  %v1441_v12 = vsel %vm261_vm0, %v6065_v0, %v12208_v10 }
 0x211   : > { %1388 = vrot.lane.b32.xlu0 %v7032_v13, %s6219_s18  ;;  %v1474_v61 = vsel %vm1472_vm3, %v1441_v12, %v12213_v22  ;;  %v6067_v0 = vld [vmem:[#allocation2 + $0x20] sm:$0xff]  ;;  %v12221_v22 = vld [vmem:[#allocation86_spill] sm:$0xff] }
 0x212   : > { %v7846_v14 = vpop.permute.xlu1 %1190 }
 0x213   : > { %12179 = vst [vmem:[#allocation30_spill] sm:$0xff] %v7846_v14  ;;  %v7848_v29 = vpop.permute.xlu0 %1196 }
 0x214   : > { %12180 = vst [vmem:[#allocation29_spill] sm:$0xff] %v7848_v29  ;;  %1294 = vrot.lane.b32.xlu1 %v12181_v50, %s6218_s20  ;;  %v12189_v29 = vld [vmem:[#allocation34_spill] sm:$0xff]  ;;  %v12190_v50 = vld [vmem:[#allocation33_spill] sm:$0xff] }
 0x215   : > { %1296 = vrot.lane.b32.xlu0 %v12182_v21, %s6218_s20 }
 0x216   : > { %v7854_v45 = vpop.permute.xlu1 %1194 }
 0x217   : > { %12183 = vst [vmem:[#allocation32_spill] sm:$0xff] %v7854_v45  ;;  %v7856_v58 = vpop.permute.xlu0 %1200 }
 0x218   : > { %12184 = vst [vmem:[#allocation31_spill] sm:$0xff] %v7856_v58  ;;  %1390 = vrot.lane.b32.xlu1 %v12185_v55, %s6219_s18  ;;  %v12199_v58 = vld [vmem:[#allocation111_spill] sm:$0xff] }
 0x219   : > { %1392 = vrot.lane.b32.xlu0 %v12186_v7, %s6219_s18 }
 0x21a   : > { %v7862_v13 = vpop.permute.xlu1 %1198 }
 0x21b   : > { %12187 = vst [vmem:[#allocation54_spill] sm:$0xff] %v7862_v13  ;;  %v7864_v28 = vpop.permute.xlu0 %1204 }
 0x21c   : > { %12188 = vst [vmem:[#allocation52_spill] sm:$0xff] %v7864_v28  ;;  %1298 = vrot.lane.b32.xlu1 %v12189_v29, %s6218_s20  ;;  %v12195_v28 = vld [vmem:[#allocation35_spill] sm:$0xff] }
 0x21d   : > { %1300 = vrot.lane.b32.xlu0 %v12190_v50, %s6218_s20  ;;  %v12196_v29 = vld [vmem:[#allocation107_spill] sm:$0xff] }
 0x21e   : > { %v7870_v21 = vpop.permute.xlu1 %1202 }
 0x21f   : > { %12191 = vst [vmem:[#allocation34_spill] sm:$0xff] %v7870_v21  ;;  %v7872_v45 = vpop.permute.xlu0 %1208  ;;  %v663_v21 = vrot.slane %v7643_v15, 1 }
 0x220   : > { %12192 = vst [vmem:[#allocation33_spill] sm:$0xff] %v7872_v45  ;;  %1394 = vrot.lane.b32.xlu1 %v7071_v23, %s6219_s18  ;;  %v662_v45 = vrot.slane %v7629_v44, 1 }
 0x221   : > { %1396 = vrot.lane.b32.xlu0 %v7064_v57, %s6219_s18 }
 0x222   : > { %v7878_v55 = vpop.permute.xlu1 %1206 }
 0x223   : > { %12193 = vst [vmem:[#allocation180_spill] sm:$0xff] %v7878_v55  ;;  %v7880_v7 = vpop.permute.xlu0 %1212 }
 0x224   : > { %12194 = vst [vmem:[#allocation181_spill] sm:$0xff] %v7880_v7  ;;  %1302 = vrot.lane.b32.xlu1 %v12195_v28, %s6218_s20  ;;  %v435_v28 = vld [vmem:[#allocation2 + $0x1a8] sm:$0x3]  ;;  %v667_v7 = vrot.slane %v7629_v44, 2  ;;  %v12200_v44 = vld [vmem:[#allocation135_spill] sm:$0xff] }
 0x225   : > { %1304 = vrot.lane.b32.xlu0 %v12196_v29, %s6218_s20  ;;  %v668_v29 = vrot.slane %v7643_v15, 2  ;;  %v665_v13 = vrot.slane %v435_v28, 1 }
 0x226   : > { %v7886_v50 = vpop.permute.xlu1 %1210 }
 0x227   : > { %12197 = vst [vmem:[#allocation35_spill] sm:$0xff] %v7886_v50  ;;  %v7890_v23 = vpop.permute.xlu0 %1248  ;;  %v664_v50 = vsel %vm484_vm2, %v662_v45, %v663_v21  ;;  %v666_v15 = vsel %vm484_vm2, %v663_v21, %v665_v13  ;;  %v670_v45 = vrot.slane %v435_v28, 2 }
 0x228   : > { %1398 = vrot.lane.b32.xlu1 %v7083_v25, %s6219_s18 }
 0x229   : > { %1400 = vrot.lane.b32.xlu0 %v7475_v36, %s6219_s18  ;;  %v669_v36 = vsel %vm565_vm4, %v667_v7, %v668_v29 }
 0x22a   : > { %v7896_v57 = vpop.permute.xlu1 %1214 }
 0x22b   : > { %12198 = vst [vmem:[#allocation107_spill] sm:$0xff] %v7896_v57  ;;  %v7901_v55 = vpop.permute.xlu0 %1252 }
 0x22c   : > { %1306 = vrot.lane.b32.xlu1 %v12199_v58, %s6218_s20 }
 0x22d   : > { %1308 = vrot.lane.b32.xlu0 %v664_v50, %s6218_s20  ;;  %v671_v50 = vsel %vm565_vm4, %v668_v29, %v670_v45 }
 0x22e   : > { %v7906_v25 = vpop.permute.xlu1 %1250 }
 0x22f   : > { %v7909_v57 = vpop.permute.xlu0 %1256 }
 0x230   : > { %1402 = vrot.lane.b32.xlu1 %v12200_v44, %s6219_s18 }
 0x231   : > { %1404 = vrot.lane.b32.xlu0 %v669_v36, %s6219_s18 }
 0x232   : > { %v7915_v24 = vpop.permute.xlu1 %1254 }
 0x233   : > { %v7917_v58 = vpop.permute.xlu0 %1260 }
 0x234   : > { %1310 = vrot.lane.b32.xlu1 %v666_v15, %s6218_s20  ;;  %s6227_s20 = smov 88  }
 0x236   : > { %v7921_v14 = vpop.permute.xlu1 %1258 }
 0x237   : > { %v7923_v7 = vpop.permute.xlu0 %1264 }
 0x238   : > { %1406 = vrot.lane.b32.xlu1 %v671_v50, %s6219_s18 }
 0x23a   : > { %v7926_v44 = vpop.permute.xlu1 %1262 }
 0x23b   : > { %v7928_v13 = vpop.permute.xlu0 %1268 }
 0x23e   : > { %v7930_v21 = vpop.permute.xlu1 %1266 }
 0x23f   : > { %v7932_v28 = vpop.permute.xlu0 %1272 }
 0x242   : > { %v7934_v36 = vpop.permute.xlu1 %1270 }
 0x243   : > { %v7936_v6 = vpop.permute.xlu0 %1276 }
 0x244   : > { %12201 = vst [vmem:[#allocation111_spill] sm:$0xff] %v7936_v6  ;;  %v12210_v6 = vld [vmem:[#allocation84_spill] sm:$0xff] }
 0x246   : > { %v7938_v15 = vpop.permute.xlu1 %1274 }
 0x247   : > { %v7940_v29 = vpop.permute.xlu0 %1280 }
 0x248   : > { %12202 = vst [vmem:[#allocation135_spill] sm:$0xff] %v7940_v29  ;;  %v12209_v29 = vld [vmem:[#allocation55_spill] sm:$0xff] }
 0x24a   : > { %v7942_v45 = vpop.permute.xlu1 %1278 }
 0x24b   : > { %12203 = vst [vmem:[#allocation182_spill] sm:$0xff] %v7942_v45  ;;  %v7944_v41 = vpop.permute.xlu0 %1284  ;;  %v1442_v45 = vsel %vm261_vm0, %v6066_v31, %v12209_v29  ;;  %v1443_v31 = vsel %vm261_vm0, %v6067_v0, %v12216_v3  ;;  %v12217_v29 = vld [vmem:[#allocation106_spill] sm:$0xff] }
 0x24c   : > { %12204 = vst [vmem:[#allocation183_spill] sm:$0xff] %v7944_v41  ;;  %v1473_v41 = vsel %vm1472_vm3, %v1440_v49, %v12210_v6  ;;  %v1507_v49 = vsel %vm1505_vm6, %v1474_v61, %v12217_v29  ;;  %v12218_v6 = vld [vmem:[#allocation128_spill] sm:$0xff]  ;;  %v12223_v29 = vld [vmem:[#allocation89_spill] sm:$0xff] }
 0x24e   : > { %v7946_v50 = vpop.permute.xlu1 %1282 }
 0x24f   : > { %12205 = vst [vmem:[#allocation184_spill] sm:$0xff] %v7946_v50  ;;  %v7950_v20 = vpop.permute.xlu0 %1288  ;;  %v12211_v50 = vld [vmem:[#allocation56_spill] sm:$0xff] }
 0x250   : > { %12207 = vst [vmem:[#allocation51_spill] sm:$0xff] %v7950_v20  ;;  %v1444_v51 = vsel %vm261_vm0, %v12212_v11, %v12211_v50  ;;  %v12214_v20 = vld [vmem:[#allocation103_spill] sm:$0xff]  ;;  %v12219_v11 = vld [vmem:[#allocation58_spill] sm:$0xff] }
 0x251   : > { %v1506_v32 = vsel %vm1505_vm6, %v1473_v41, %v12214_v20  ;;  %v12220_v50 = vld [vmem:[#allocation139_spill] sm:$0xff]  ;;  %v1475_v20 = vsel %vm1472_vm3, %v1442_v45, %v12221_v22 }
 0x252   : > { %v7965_v10 = vpop.permute.xlu1 %1286  ;;  %v1539_v8 = vsel %vm1538_vm7, %v1506_v32, %v12218_v6  ;;  %v1446_v12 = vsel %vm261_vm0, %v12220_v50, %v12219_v11  ;;  %v12222_v41 = vld [vmem:[#allocation131_spill] sm:$0xff]  ;;  %v1476_v6 = vsel %vm1472_vm3, %v1443_v31, %v12223_v29  ;;  %v12224_v11 = vld [vmem:[#allocation105_spill] sm:$0xff] }
 0x253   : > { %12215 = vst [vmem:[#allocation53_spill] sm:$0xff] %v7965_v10  ;;  %v1540_v10 = vsel %vm1538_vm7, %v1507_v49, %v12222_v41  ;;  %v1572_v3 = vsel %vm1571_vm8, %v1539_v8, %v7613_v54  ;;  %v1347_v0 = vpop.permute.xlu0 %1346  ;;  %v1508_v45 = vsel %vm1505_vm6, %v1475_v20, %v12224_v11  ;;  %v12225_v50 = vld [vmem:[#allocation109_spill] sm:$0xff]  ;;  %v12227_v41 = vld [vmem:[#allocation59_spill] sm:$0xff]  ;;  %v12228_v20 = vld [vmem:[#allocation142_spill] sm:$0xff] }
 0x254   : > { %v1573_v61 = vsel %vm1571_vm8, %v1540_v10, %v7627_v38  ;;  %v1605_v32 = vsel %vm1604_vm9, %v1572_v3, %v7760_v26  ;;  %v1509_v38 = vsel %vm1505_vm6, %v1476_v6, %v12225_v50  ;;  %v12226_v10 = vld [vmem:[#allocation130_spill] sm:$0xff]  ;;  %v1445_v3 = vsel %vm261_vm0, %v12228_v20, %v12227_v41  ;;  %v12230_v6 = vld [vmem:[#allocation60_spill] sm:$0xff]  ;;  %v12231_v11 = vld [vmem:[#allocation143_spill] sm:$0xff] }
 0x255   : > { %v1606_v49 = vsel %vm1604_vm9, %v1573_v61, %v7774_v19  ;;  %v1638_v8 = vsel %vm1637_vm10, %v1605_v32, %v7890_v23  ;;  %v1541_v26 = vsel %vm1538_vm7, %v1508_v45, %v12226_v10  ;;  %v12229_v19 = vld [vmem:[#allocation133_spill] sm:$0xff]  ;;  %v12232_v45 = vld [vmem:[#allocation88_spill] sm:$0xff] }
 0x256   : > { %v1345_v54 = vpop.permute.xlu1 %1344  ;;  %v1639_v22 = vsel %vm1637_vm10, %v1606_v49, %v7906_v25  ;;  %v1542_v61 = vsel %vm1538_vm7, %v1509_v38, %v12229_v19  ;;  %v1574_v23 = vsel %vm1571_vm8, %v1541_v26, %v7621_v18  ;;  %v1448_v25 = vsel %vm261_vm0, %v12231_v11, %v12230_v6  ;;  %v12233_v18 = vld [vmem:[#allocation91_spill] sm:$0xff]  ;;  %v12234_v50 = vld [vmem:[#allocation108_spill] sm:$0xff]  ;;  %v12238_v19 = vld [vmem:[#allocation146_spill] sm:$0xff] }
 0x257   : > { %v1671_v31 = vsel %vm1670_vm11, %v1638_v8, %v1345_v54  ;;  %v1672_v32 = vsel %vm1670_vm11, %v1639_v22, %v1347_v0  ;;  %v1351_v29 = vpop.permute.xlu0 %1350  ;;  %v1477_v49 = vsel %vm1472_vm3, %v1444_v51, %v12232_v45  ;;  %v1575_v8 = vsel %vm1571_vm8, %v1542_v61, %v7637_v63  ;;  %v12235_v22 = vld [vmem:[#allocation112_spill] sm:$0xff]  ;;  %v12240_v11 = vld [vmem:[#allocation62_spill] sm:$0xff] }
 0x258   : > { %5856 = vmatprep.mubr.msk.f32.mxu0 %vm1715_vm12, %v1671_v31  ;;  %v1607_v54 = vsel %vm1604_vm9, %v1574_v23, %v7768_v43  ;;  %v1478_v0 = vsel %vm1472_vm3, %v1445_v3, %v12233_v18  ;;  %v1510_v38 = vsel %vm1505_vm6, %v1477_v49, %v12234_v50  ;;  %v1608_v10 = vsel %vm1604_vm9, %v1575_v8, %v7782_v37  ;;  %v12236_v31 = vld [vmem:[#allocation132_spill] sm:$0xff]  ;;  %v12237_v3 = vld [vmem:[#allocation61_spill] sm:$0xff]  ;;  %v12241_v45 = vld [vmem:[#allocation90_spill] sm:$0xff] }
 0x259   : > { %5857 = vmatmul.mubr.msk.f32.vlgmr.msra.gmra.mxu0 %vm1715_vm12, %v1672_v32  ;;  %v1640_v51 = vsel %vm1637_vm10, %v1607_v54, %v7901_v55  ;;  %v1511_v63 = vsel %vm1505_vm6, %v1478_v0, %v12235_v22  ;;  %v1543_v43 = vsel %vm1538_vm7, %v1510_v38, %v12236_v31  ;;  %v1641_v41 = vsel %vm1637_vm10, %v1608_v10, %v7915_v24  ;;  %v12239_v37 = vld [vmem:[#allocation137_spill] sm:$0xff]  ;;  %v12243_v18 = vld [vmem:[#allocation110_spill] sm:$0xff]  ;;  %v12246_v22 = vld [vmem:[#allocation63_spill] sm:$0xff] }
 0x25a   : > { %v1349_v26 = vpop.permute.xlu1 %1348  ;;  %v1447_v61 = vsel %vm261_vm0, %v12238_v19, %v12237_v3  ;;  %v1544_v23 = vsel %vm1538_vm7, %v1511_v63, %v12239_v37  ;;  %v1576_v55 = vsel %vm1571_vm8, %v1543_v43, %v7631_v16  ;;  %v1674_v32 = vsel %vm1670_vm11, %v1641_v41, %v1351_v29  ;;  %v12242_v16 = vld [vmem:[#allocation93_spill] sm:$0xff]  ;;  %v12244_v38 = vld [vmem:[#allocation114_spill] sm:$0xff]  ;;  %v12249_v3 = vld [vmem:[#allocation64_spill] sm:$0xff] }
 0x25b   : > { %v1673_v20 = vsel %vm1670_vm11, %v1640_v51, %v1349_v26  ;;  %v1355_v6 = vpop.permute.xlu0 %1354  ;;  %v1450_v24 = vsel %vm261_vm0, %v7527_v17, %v12240_v11  ;;  %v1479_v49 = vsel %vm1472_vm3, %v1446_v12, %v12241_v45  ;;  %v1577_v8 = vsel %vm1571_vm8, %v1544_v23, %v7647_v48  ;;  %v12245_v10 = vld [vmem:[#allocation134_spill] sm:$0xff]  ;;  %v12247_v63 = vld [vmem:[#allocation149_spill] sm:$0xff]  ;;  %v12250_v19 = vld [vmem:[#allocation92_spill] sm:$0xff] }
 0x25c   : > { %5859 = vmatprep.mubr.msk.f32.mxu0 %vm1715_vm12, %v1673_v20  ;;  %v1609_v54 = vsel %vm1604_vm9, %v1576_v55, %v7776_v9  ;;  %v1480_v29 = vsel %vm1472_vm3, %v1447_v61, %v12242_v16  ;;  %v1512_v0 = vsel %vm1505_vm6, %v1479_v49, %v12243_v18  ;;  %v1610_v17 = vsel %vm1604_vm9, %v1577_v8, %v7790_v42  ;;  %v12248_v42 = vld [vmem:[#allocation140_spill] sm:$0xff]  ;;  %v12254_v49 = vld [vmem:[#allocation138_spill] sm:$0xff]  ;;  %v12255_v16 = vld [vmem:[#allocation65_spill] sm:$0xff] }
 0x25d   : > { %5860 = vmatmul.mubr.msk.f32.gmra.mxu0 %vm1715_vm12, %v1674_v32  ;;  %v1642_v12 = vsel %vm1637_vm10, %v1609_v54, %v7909_v57  ;;  %v1513_v48 = vsel %vm1505_vm6, %v1480_v29, %v12244_v38  ;;  %v1545_v9 = vsel %vm1538_vm7, %v1512_v0, %v12245_v10  ;;  %v1643_v51 = vsel %vm1637_vm10, %v1610_v17, %v7921_v14  ;;  %v12252_v32 = vld [vmem:[#allocation113_spill] sm:$0xff]  ;;  %v12253_v45 = vld [vmem:[#allocation116_spill] sm:$0xff]  ;;  %v12258_v38 = vld [vmem:[#allocation94_spill] sm:$0xff] }
 0x25e   : > { %v1353_v50 = vpop.permute.xlu1 %1352  ;;  %v1449_v31 = vsel %vm261_vm0, %v12247_v63, %v12246_v22  ;;  %v1546_v43 = vsel %vm1538_vm7, %v1513_v48, %v12248_v42  ;;  %v1578_v57 = vsel %vm1571_vm8, %v1545_v9, %v7639_v27  ;;  %v1676_v41 = vsel %vm1670_vm11, %v1643_v51, %v1355_v6  ;;  %v12251_v27 = vld [vmem:[#allocation95_spill] sm:$0xff]  ;;  %v12262_v42 = vld [vmem:[#allocation141_spill] sm:$0xff] }
 0x25f   : > { %v1675_v26 = vsel %vm1670_vm11, %v1642_v12, %v1353_v50  ;;  %v1359_v20 = vpop.permute.xlu0 %1358  ;;  %v1452_v14 = vsel %vm261_vm0, %v7539_v60, %v12249_v3  ;;  %v1481_v61 = vsel %vm1472_vm3, %v1448_v25, %v12250_v19  ;;  %v1579_v37 = vsel %vm1571_vm8, %v1546_v43, %v7655_v39  ;;  %v6068_v12 = vld [vmem:[#allocation2 + $0xa8] sm:$0xff]  ;;  %v12257_v50 = vld [vmem:[#allocation66_spill] sm:$0xff]  ;;  %v12260_v51 = vld [vmem:[#allocation115_spill] sm:$0xff] }
 0x260   : > { %5862 = vmatprep.mubr.msk.f32.mxu0 %vm1715_vm12, %v1675_v26  ;;  %v1611_v23 = vsel %vm1604_vm9, %v1578_v57, %v7784_v56  ;;  %v1482_v55 = vsel %vm1472_vm3, %v1449_v31, %v12251_v27  ;;  %v1514_v6 = vsel %vm1505_vm6, %v1481_v61, %v12252_v32  ;;  %v1612_v60 = vsel %vm1604_vm9, %v1579_v37, %v7798_v62  ;;  %v12256_v62 = vld [vmem:[#allocation144_spill] sm:$0xff] }
 0x261   : > { %5863 = vmatmul.mubr.msk.f32.gmra.mxu0 %vm1715_vm12, %v1676_v41  ;;  %v1644_v25 = vsel %vm1637_vm10, %v1611_v23, %v7917_v58  ;;  %v1515_v39 = vsel %vm1505_vm6, %v1482_v55, %v12253_v45  ;;  %v1547_v56 = vsel %vm1538_vm7, %v1514_v6, %v12254_v49  ;;  %v1645_v8 = vsel %vm1637_vm10, %v1612_v60, %v7926_v44  ;;  %v12261_v31 = vld [vmem:[#allocation36_spill] sm:$0xff]  ;;  %v12263_v41 = vld [vmem:[#allocation67_spill] sm:$0xff]  ;;  %v12268_v60 = vld [vmem:[#allocation117_spill] sm:$0xff] }
 0x262   : > { %v1357_v11 = vpop.permute.xlu1 %1356  ;;  %v1451_v29 = vsel %vm261_vm0, %v7547_v40, %v12255_v16  ;;  %v1548_v18 = vsel %vm1538_vm7, %v1515_v39, %v12256_v62  ;;  %v1580_v58 = vsel %vm1571_vm8, %v1547_v56, %v7649_v5  ;;  %v1678_v0 = vsel %vm1670_vm11, %v1645_v8, %v1359_v20  ;;  %v12259_v5 = vld [vmem:[#allocation10_spill] sm:$0xff]  ;;  %v6069_v37 = vld [vmem:[#allocation2 + $0xc0] sm:$0xff]  ;;  %v12269_v39 = vld [vmem:[#allocation37_spill] sm:$0xff] }
 0x263   : > { %v1677_v54 = vsel %vm1670_vm11, %v1644_v25, %v1357_v11  ;;  %v1363_v17 = vpop.permute.xlu0 %1362  ;;  %v1454_v44 = vsel %vm261_vm0, %v6068_v12, %v12257_v50  ;;  %v1483_v48 = vsel %vm1472_vm3, %v1450_v24, %v12258_v38  ;;  %v1581_v40 = vsel %vm1571_vm8, %v1548_v18, %v7663_v46  ;;  %v12265_v23 = vld [vmem:[#allocation68_spill] sm:$0xff]  ;;  %v12270_v49 = vld [vmem:[#allocation145_spill] sm:$0xff]  ;;  %v12274_v12 = vld [vmem:[#allocation11_spill] sm:$0xff] }
 0x264   : > { %5865 = vmatprep.mubr.msk.f32.mxu0 %vm1715_vm12, %v1677_v54  ;;  %v1613_v10 = vsel %vm1604_vm9, %v1580_v58, %v7792_v1  ;;  %v1484_v9 = vsel %vm1472_vm3, %v1451_v29, %v12259_v5  ;;  %v1516_v26 = vsel %vm1505_vm6, %v1483_v48, %v12260_v51  ;;  %v1614_v22 = vsel %vm1604_vm9, %v1581_v40, %v7806_v53  ;;  %v12264_v53 = vld [vmem:[#allocation147_spill] sm:$0xff]  ;;  %v12266_v27 = vld [vmem:[#allocation96_spill] sm:$0xff]  ;;  %v6070_v54 = vld [vmem:[#allocation2 + $0xb0] sm:$0xff] }
 0x265   : > { %5866 = vmatmul.mubr.msk.f32.gmra.mxu0 %vm1715_vm12, %v1678_v0  ;;  %v1646_v24 = vsel %vm1637_vm10, %v1613_v10, %v7923_v7  ;;  %v1517_v46 = vsel %vm1505_vm6, %v1484_v9, %v12261_v31  ;;  %v1549_v1 = vsel %vm1538_vm7, %v1516_v26, %v12262_v42  ;;  %v1647_v43 = vsel %vm1637_vm10, %v1614_v22, %v7930_v21  ;;  %v12271_v16 = vld [vmem:[#allocation69_spill] sm:$0xff]  ;;  %v6071_v0 = vld [vmem:[#allocation2 + $0xd8] sm:$0xff]  ;;  %v12276_v10 = vld [vmem:[#allocation118_spill] sm:$0xff] }
 0x266   : > { %v1361_v63 = vpop.permute.xlu1 %1360  ;;  %v1453_v20 = vsel %vm261_vm0, %v7557_v33, %v12263_v41  ;;  %v1550_v3 = vsel %vm1538_vm7, %v1517_v46, %v12264_v53  ;;  %v1582_v7 = vsel %vm1571_vm8, %v1549_v1, %v7657_v4  ;;  %v1680_v19 = vsel %vm1670_vm11, %v1647_v43, %v1363_v17  ;;  %v12267_v4 = vld [vmem:[#allocation12_spill] sm:$0xff]  ;;  %v12273_v17 = vld [vmem:[#allocation70_spill] sm:$0xff]  ;;  %v6072_v31 = vld [vmem:[#allocation2 + $0xc8] sm:$0xff] }
 0x267   : > { %v1679_v57 = vsel %vm1670_vm11, %v1646_v24, %v1361_v63  ;;  %v1367_v61 = vpop.permute.xlu0 %1366  ;;  %v1456_v21 = vsel %vm261_vm0, %v6069_v37, %v12265_v23  ;;  %v1485_v55 = vsel %vm1472_vm3, %v1452_v14, %v12266_v27  ;;  %v1583_v33 = vsel %vm1571_vm8, %v1550_v3, %v7671_v52  ;;  %v12277_v26 = vld [vmem:[#allocation38_spill] sm:$0xff]  ;;  %v12278_v22 = vld [vmem:[#allocation148_spill] sm:$0xff]  ;;  %v12279_v46 = vld [vmem:[#allocation71_spill] sm:$0xff] }
 0x268   : > { %5868 = vmatprep.mubr.msk.f32.mxu0 %vm1715_vm12, %v1679_v57  ;;  %v1615_v32 = vsel %vm1604_vm9, %v1582_v7, %v7800_v47  ;;  %v1486_v6 = vsel %vm1472_vm3, %v1453_v20, %v12267_v4  ;;  %v1518_v25 = vsel %vm1505_vm6, %v1485_v55, %v12268_v60  ;;  %v1616_v11 = vsel %vm1604_vm9, %v1583_v33, %v7814_v2  ;;  %v12272_v2 = vld [vmem:[#allocation150_spill] sm:$0xff]  ;;  %v12282_v53 = vld [vmem:[#allocation72_spill] sm:$0xff]  ;;  %v12283_v3 = vld [vmem:[#allocation13_spill] sm:$0xff] }
 0x269   : > { %5869 = vmatmul.mubr.msk.f32.gmra.mxu0 %vm1715_vm12, %v1680_v19  ;;  %v1648_v14 = vsel %vm1637_vm10, %v1615_v32, %v7928_v13  ;;  %v1519_v52 = vsel %vm1505_vm6, %v1486_v6, %v12269_v39  ;;  %v1551_v47 = vsel %vm1538_vm7, %v1518_v25, %v12270_v49  ;;  %v1649_v56 = vsel %vm1637_vm10, %v1616_v11, %v7934_v36  ;;  %v6073_v20 = vld [vmem:[#allocation2 + $0xf0] sm:$0xff]  ;;  %v12285_v37 = vld [vmem:[#allocation40_spill] sm:$0xff]  ;;  %v12287_v33 = vld [vmem:[#allocation119_spill] sm:$0xff] }
 0x26a   : > { %v1365_v45 = vpop.permute.xlu1 %1364  ;;  %v1455_v29 = vsel %vm261_vm0, %v6070_v54, %v12271_v16  ;;  %v1552_v62 = vsel %vm1538_vm7, %v1519_v52, %v12272_v2  ;;  %v1584_v13 = vsel %vm1571_vm8, %v1551_v47, %v7665_v35  ;;  %v1682_v18 = vsel %vm1670_vm11, %v1649_v56, %v1367_v61  ;;  %v12275_v35 = vld [vmem:[#allocation14_spill] sm:$0xff]  ;;  %v12286_v27 = vld [vmem:[#allocation16_spill] sm:$0xff]  ;;  %v12289_v60 = vld [vmem:[#allocation111_spill] sm:$0xff] }
 0x26b   : > { %v1681_v8 = vsel %vm1670_vm11, %v1648_v14, %v1365_v45  ;;  %v1371_v58 = vpop.permute.xlu0 %1370  ;;  %v1458_v36 = vsel %vm261_vm0, %v6071_v0, %v12273_v17  ;;  %v1487_v50 = vsel %vm1472_vm3, %v1454_v44, %v12274_v12  ;;  %v1585_v38 = vsel %vm1571_vm8, %v1552_v62, %v7679_v30  ;;  %v12284_v19 = vld [vmem:[#allocation170_spill] sm:$0xff]  ;;  %v12290_v11 = vld [vmem:[#allocation39_spill] sm:$0xff]  ;;  %v6074_v56 = vld [vmem:[#allocation2 + $0xe0] sm:$0xff] }
 0x26c   : > { %5871 = vmatprep.mubr.msk.f32.mxu0 %vm1715_vm12, %v1681_v8  ;;  %v1617_v48 = vsel %vm1604_vm9, %v1584_v13, %v7808_v59  ;;  %v1488_v40 = vsel %vm1472_vm3, %v1455_v29, %v12275_v35  ;;  %v1520_v5 = vsel %vm1505_vm6, %v1487_v50, %v12276_v10  ;;  %v1618_v9 = vsel %vm1604_vm9, %v1585_v38, %v7822_v34  ;;  %v12280_v34 = vld [vmem:[#allocation152_spill] sm:$0xff]  ;;  %v12288_v4 = vld [vmem:[#allocation42_spill] sm:$0xff]  ;;  %v12291_v45 = vld [vmem:[#allocation151_spill] sm:$0xff] }
 0x26d   : > { %5872 = vmatmul.mubr.msk.f32.gmra.mxu0 %vm1715_vm12, %v1682_v18  ;;  %v1650_v44 = vsel %vm1637_vm10, %v1617_v48, %v7932_v28  ;;  %v1521_v30 = vsel %vm1505_vm6, %v1488_v40, %v12277_v26  ;;  %v1553_v59 = vsel %vm1538_vm7, %v1520_v5, %v12278_v22  ;;  %v1651_v24 = vsel %vm1637_vm10, %v1618_v9, %v7938_v15  ;;  %v12281_v28 = vld [vmem:[#allocation168_spill] sm:$0xff]  ;;  %v12292_v52 = vld [vmem:[#allocation182_spill] sm:$0xff]  ;;  %v12293_v8 = vld [vmem:[#allocation73_spill] sm:$0xff] }
 0x26e   : > { %v1369_v51 = vpop.permute.xlu1 %1368  ;;  %v1457_v42 = vsel %vm261_vm0, %v6072_v31, %v12279_v46  ;;  %v1554_v1 = vsel %vm1538_vm7, %v1521_v30, %v12280_v34  ;;  %v1586_v43 = vsel %vm1571_vm8, %v1553_v59, %v12281_v28  ;;  %v1684_v57 = vsel %vm1670_vm11, %v1651_v24, %v1371_v58  ;;  %v12294_v16 = vld [vmem:[#allocation154_spill] sm:$0xff]  ;;  %v12295_v2 = vld [vmem:[#allocation169_spill] sm:$0xff]  ;;  %v12296_v58 = vld [vmem:[#allocation15_spill] sm:$0xff] }
 0x26f   : > { %v1683_v63 = vsel %vm1670_vm11, %v1650_v44, %v1369_v51  ;;  %v1375_v41 = vpop.permute.xlu0 %1374  ;;  %v1460_v15 = vsel %vm261_vm0, %v6073_v20, %v12282_v53  ;;  %v1489_v7 = vsel %vm1472_vm3, %v1456_v21, %v12283_v3  ;;  %v1587_v61 = vsel %vm1571_vm8, %v1554_v1, %v12284_v19  ;;  %v12297_v17 = vld [vmem:[#allocation17_spill] sm:$0xff]  ;;  %v12298_v50 = vld [vmem:[#allocation172_spill] sm:$0xff]  ;;  %v12300_v40 = vld [vmem:[#allocation18_spill] sm:$0xff] }
 0x270   : > { %5874 = vmatprep.mubr.msk.f32.mxu0 %vm1715_vm12, %v1683_v63  ;;  %v1619_v23 = vsel %vm1604_vm9, %v1586_v43, %v12285_v37  ;;  %v1490_v55 = vsel %vm1472_vm3, %v1457_v42, %v12286_v27  ;;  %v1522_v32 = vsel %vm1505_vm6, %v1489_v7, %v12287_v33  ;;  %v1620_v6 = vsel %vm1604_vm9, %v1587_v61, %v12288_v4  ;;  %v12299_v48 = vld [vmem:[#allocation45_spill] sm:$0xff]  ;;  %v12301_v5 = vld [vmem:[#allocation120_spill] sm:$0xff]  ;;  %v12302_v44 = vld [vmem:[#allocation46_spill] sm:$0xff] }
 0x271   : > { %5875 = vmatmul.mubr.msk.f32.gmra.mxu0 %vm1715_vm12, %v1684_v57  ;;  %v1652_v21 = vsel %vm1637_vm10, %v1619_v23, %v12289_v60  ;;  %v1523_v14 = vsel %vm1505_vm6, %v1490_v55, %v12290_v11  ;;  %v1555_v39 = vsel %vm1538_vm7, %v1522_v32, %v12291_v45  ;;  %v1653_v49 = vsel %vm1637_vm10, %v1620_v6, %v12292_v52  ;;  %v12303_v51 = vld [vmem:[#allocation135_spill] sm:$0xff]  ;;  %v12304_v22 = vld [vmem:[#allocation41_spill] sm:$0xff]  ;;  %v12306_v31 = vld [vmem:[#allocation184_spill] sm:$0xff] }
 0x272   : > { %v1373_v25 = vpop.permute.xlu1 %1372  ;;  %v1459_v54 = vsel %vm261_vm0, %v6074_v56, %v12293_v8  ;;  %v1556_v29 = vsel %vm1538_vm7, %v1523_v14, %v12294_v16  ;;  %v1588_v62 = vsel %vm1571_vm8, %v1555_v39, %v12295_v2  ;;  %v1686_v13 = vsel %vm1670_vm11, %v1653_v49, %v1375_v41  ;;  %v12305_v24 = vld [vmem:[#allocation153_spill] sm:$0xff]  ;;  %v12308_v28 = vld [vmem:[#allocation156_spill] sm:$0xff]  ;;  %v12309_v57 = vld [vmem:[#allocation171_spill] sm:$0xff] }
 0x273   : > { %v1685_v47 = vsel %vm1670_vm11, %v1652_v21, %v1373_v25  ;;  %v1379_v18 = vpop.permute.xlu0 %1378  ;;  %v1491_v0 = vsel %vm1472_vm3, %v1458_v36, %v12296_v58  ;;  %v1493_v12 = vsel %vm1472_vm3, %v1460_v15, %v12297_v17  ;;  %v1589_v38 = vsel %vm1571_vm8, %v1556_v29, %v12298_v50  ;;  %v12307_v34 = vld [vmem:[#allocation121_spill] sm:$0xff]  ;;  %v12310_v15 = vld [vmem:[#allocation155_spill] sm:$0xff]  ;;  %v12311_v7 = vld [vmem:[#allocation174_spill] sm:$0xff] }
 0x274   : > { %5877 = vmatprep.mubr.msk.f32.mxu0 %vm1715_vm12, %v1685_v47  ;;  %v1621_v35 = vsel %vm1604_vm9, %v1588_v62, %v12299_v48  ;;  %v1492_v10 = vsel %vm1472_vm3, %v1459_v54, %v12300_v40  ;;  %v1524_v9 = vsel %vm1505_vm6, %v1491_v0, %v12301_v5  ;;  %v1622_v36 = vsel %vm1604_vm9, %v1589_v38, %v12302_v44  ;;  %v12312_v61 = vld [vmem:[#allocation44_spill] sm:$0xff]  ;;  %v12313_v23 = vld [vmem:[#allocation173_spill] sm:$0xff]  ;;  %v12314_v55 = vld [vmem:[#allocation30_spill] sm:$0xff] }
 0x275   : > { %5878 = vmatmul.mubr.msk.f32.gmra.mxu0 %vm1715_vm12, %v1686_v13  ;;  %v1654_v26 = vsel %vm1637_vm10, %v1621_v35, %v12303_v51  ;;  %v1525_v59 = vsel %vm1505_vm6, %v1492_v10, %v12304_v22  ;;  %v1557_v63 = vsel %vm1538_vm7, %v1524_v9, %v12305_v24  ;;  %v1655_v46 = vsel %vm1637_vm10, %v1622_v36, %v12306_v31  ;;  %v12315_v32 = vld [vmem:[#allocation183_spill] sm:$0xff]  ;;  %v12316_v60 = vld [vmem:[#allocation50_spill] sm:$0xff]  ;;  %v12317_v25 = vld [vmem:[#allocation53_spill] sm:$0xff] }
 0x276   : > { %v1377_v30 = vpop.permute.xlu1 %1376  ;;  %v1526_v1 = vsel %vm1505_vm6, %v1493_v12, %v12307_v34  ;;  %v1558_v43 = vsel %vm1538_vm7, %v1525_v59, %v12308_v28  ;;  %v1590_v41 = vsel %vm1571_vm8, %v1557_v63, %v12309_v57  ;;  %v1688_v20 = vsel %vm1670_vm11, %v1655_v46, %v1379_v18  ;;  %v6075_v45 = vld [vmem:[#allocation2 + $0xf8] sm:$0xff]  ;;  %v12320_v54 = vld [vmem:[#allocation20_spill] sm:$0xff]  ;;  %v6076_v2 = vld [vmem:[#allocation2 + $0x108] sm:$0xff] }
 0x277   : > { %v1687_v42 = vsel %vm1670_vm11, %v1654_v26, %v1377_v30  ;;  %v1383_v53 = vpop.permute.xlu0 %1382  ;;  %v1559_v3 = vsel %vm1538_vm7, %v1526_v1, %v12310_v15  ;;  %v1591_v19 = vsel %vm1571_vm8, %v1558_v43, %v12311_v7  ;;  %v1623_v37 = vsel %vm1604_vm9, %v1590_v41, %v12312_v61  ;;  %v12318_v39 = vld [vmem:[#allocation75_spill] sm:$0xff]  ;;  %v12321_v62 = vld [vmem:[#allocation74_spill] sm:$0xff]  ;;  %v12327_v9 = vld [vmem:[#allocation157_spill] sm:$0xff] }
 0x278   : > { %5880 = vmatprep.mubr.msk.f32.mxu0 %vm1715_vm12, %v1687_v42  ;;  %v1592_v27 = vsel %vm1571_vm8, %v1559_v3, %v12313_v23  ;;  %v1624_v33 = vsel %vm1604_vm9, %v1591_v19, %v12314_v55  ;;  %v1656_v4 = vsel %vm1637_vm10, %v1623_v37, %v12315_v32  ;;  %v1461_v52 = vsel %vm261_vm0, %v6075_v45, %v12318_v39  ;;  %v12319_v49 = vld [vmem:[#allocation51_spill] sm:$0xff]  ;;  %v12324_v50 = vld [vmem:[#allocation158_spill] sm:$0xff]  ;;  %v12328_v36 = vld [vmem:[#allocation32_spill] sm:$0xff] }
 0x279   : > { %5881 = vmatmul.mubr.msk.f32.gmra.mxu0 %vm1715_vm12, %v1688_v20  ;;  %v1625_v21 = vsel %vm1604_vm9, %v1592_v27, %v12316_v60  ;;  %v1657_v11 = vsel %vm1637_vm10, %v1624_v33, %v12317_v25  ;;  %v1494_v16 = vsel %vm1472_vm3, %v1461_v52, %v12320_v54  ;;  %v1462_v13 = vsel %vm261_vm0, %v6076_v2, %v12321_v62  ;;  %v12322_v18 = vld [vmem:[#allocation43_spill] sm:$0xff]  ;;  %v12325_v48 = vld [vmem:[#allocation122_spill] sm:$0xff]  ;;  %v12330_v24 = vld [vmem:[#allocation29_spill] sm:$0xff] }
 0x27a   : > { %v1381_v6 = vpop.permute.xlu1 %1380  ;;  %v1658_v47 = vsel %vm1637_vm10, %v1625_v21, %v12319_v49  ;;  %v1690_v56 = vsel %vm1670_vm11, %v1657_v11, %v1383_v53  ;;  %v1527_v58 = vsel %vm1505_vm6, %v1494_v16, %v12322_v18  ;;  %v12323_v17 = vld [vmem:[#allocation19_spill] sm:$0xff]  ;;  %v12326_v40 = vld [vmem:[#allocation22_spill] sm:$0xff]  ;;  %v12331_v42 = vld [vmem:[#allocation77_spill] sm:$0xff] }
 0x27b   : > { %v1689_v14 = vsel %vm1670_vm11, %v1656_v4, %v1381_v6  ;;  %v1385_v8 = vpop.permute.xlu0 %1384  ;;  %v1495_v12 = vsel %vm1472_vm3, %v1462_v13, %v12323_v17  ;;  %v1560_v38 = vsel %vm1538_vm7, %v1527_v58, %v12324_v50  ;;  %v12329_v26 = vld [vmem:[#allocation175_spill] sm:$0xff]  ;;  %v6077_v46 = vld [vmem:[#allocation2 + $0x110] sm:$0xff]  ;;  %v12332_v43 = vld [vmem:[#allocation97_spill] sm:$0xff] }
 0x27c   : > { %5883 = vmatprep.mubr.msk.f32.mxu0 %vm1715_vm12, %v1689_v14  ;;  %v1691_v29 = vsel %vm1670_vm11, %v1658_v47, %v1385_v8  ;;  %v1528_v35 = vsel %vm1505_vm6, %v1495_v12, %v12325_v48  ;;  %v1593_v10 = vsel %vm1571_vm8, %v1560_v38, %v12326_v40  ;;  %v1463_v34 = vsel %vm261_vm0, %v6077_v46, %v12331_v42  ;;  %v6078_v20 = vld [vmem:[#allocation2 + $0x120] sm:$0xff]  ;;  %v12335_v61 = vld [vmem:[#allocation21_spill] sm:$0xff]  ;;  %v12337_v55 = vld [vmem:[#allocation123_spill] sm:$0xff] }
 0x27d   : > { %5884 = vmatmul.mubr.msk.f32.gmra.mxu0 %vm1715_vm12, %v1690_v56  ;;  %v1561_v44 = vsel %vm1538_vm7, %v1528_v35, %v12327_v9  ;;  %v1626_v51 = vsel %vm1604_vm9, %v1593_v10, %v12328_v36  ;;  %v1496_v57 = vsel %vm1472_vm3, %v1463_v34, %v12332_v43  ;;  %v12333_v53 = vld [vmem:[#allocation76_spill] sm:$0xff]  ;;  %v12339_v60 = vld [vmem:[#allocation159_spill] sm:$0xff]  ;;  %v12340_v25 = vld [vmem:[#allocation54_spill] sm:$0xff] }
 0x27e   : > { %5886 = vmatprep.mubr.msk.f32.mxu0 %vm1715_vm12, %v1691_v29  ;;  %v1291_v0 = vpop.permute.xlu1 %1290  ;;  %v1594_v30 = vsel %vm1571_vm8, %v1561_v44, %v12329_v26  ;;  %v1464_v15 = vsel %vm261_vm0, %v6078_v20, %v12333_v53  ;;  %v12334_v3 = vld [vmem:[#allocation124_spill] sm:$0xff]  ;;  %v12341_v14 = vld [vmem:[#allocation23_spill] sm:$0xff]  ;;  %v6079_v8 = vld [vmem:[#allocation2 + $0x128] sm:$0xff] }
 0x27f   : > { %v1293_v5 = vpop.permute.xlu0 %1292  ;;  %v1659_v22 = vsel %vm1637_vm10, %v1626_v51, %v1291_v0  ;;  %v1627_v63 = vsel %vm1604_vm9, %v1594_v30, %v12330_v24  ;;  %v1529_v7 = vsel %vm1505_vm6, %v1496_v57, %v12334_v3  ;;  %v1497_v37 = vsel %vm1472_vm3, %v1464_v15, %v12335_v61  ;;  %v12336_v23 = vld [vmem:[#allocation160_spill] sm:$0xff]  ;;  %v12342_v49 = vld [vmem:[#allocation31_spill] sm:$0xff]  ;;  %v12345_v0 = vld [vmem:[#allocation78_spill] sm:$0xff] }
 0x280   : > { %v1660_v1 = vsel %vm1637_vm10, %v1627_v63, %v1293_v5  ;;  %v1562_v27 = vsel %vm1538_vm7, %v1529_v7, %v12336_v23  ;;  %v1530_v33 = vsel %vm1505_vm6, %v1497_v37, %v12337_v55  ;;  %v12338_v32 = vld [vmem:[#allocation24_spill] sm:$0xff]  ;;  %v12343_v54 = vld [vmem:[#allocation79_spill] sm:$0xff]  ;;  %v12347_v48 = vld [vmem:[#allocation98_spill] sm:$0xff] }
 0x281   : > { %v1595_v4 = vsel %vm1571_vm8, %v1562_v27, %v12338_v32  ;;  %v1563_v21 = vsel %vm1538_vm7, %v1530_v33, %v12339_v60  ;;  %v1465_v16 = vsel %vm261_vm0, %v6079_v8, %v12343_v54  ;;  %v12344_v62 = vld [vmem:[#allocation99_spill] sm:$0xff]  ;;  %v12348_v40 = vld [vmem:[#allocation162_spill] sm:$0xff]  ;;  %v12349_v5 = vld [vmem:[#allocation125_spill] sm:$0xff] }
 0x282   : > { %v1387_v59 = vpop.permute.xlu1 %1386  ;;  %v1628_v11 = vsel %vm1604_vm9, %v1595_v4, %v12340_v25  ;;  %v1596_v45 = vsel %vm1571_vm8, %v1563_v21, %v12341_v14  ;;  %v1498_v13 = vsel %vm1472_vm3, %v1465_v16, %v12344_v62  ;;  %v6080_v58 = vld [vmem:[#allocation2 + $0x138] sm:$0xff]  ;;  %v12351_v26 = vld [vmem:[#allocation161_spill] sm:$0xff]  ;;  %v12354_v42 = vld [vmem:[#allocation52_spill] sm:$0xff] }
 0x283   : > { %v1692_v31 = vsel %vm1670_vm11, %v1659_v22, %v1387_v59  ;;  %v1389_v28 = vpop.permute.xlu0 %1388  ;;  %v1629_v47 = vsel %vm1604_vm9, %v1596_v45, %v12342_v49  ;;  %v1466_v17 = vsel %vm261_vm0, %v6080_v58, %v12345_v0  ;;  %v12346_v12 = vld [vmem:[#allocation47_spill] sm:$0xff]  ;;  %v12352_v22 = vld [vmem:[#allocation34_spill] sm:$0xff]  ;;  %v12353_v24 = vld [vmem:[#allocation25_spill] sm:$0xff]  ;;  %v12368_v0 = vmov 0.0  }
 0x284   : > { %5887 = vmatmul.mubr.msk.f32.gmra.mxu0 %vm1715_vm12, %v1692_v31  ;;  %v1693_v41 = vsel %vm1670_vm11, %v1660_v1, %v1389_v28  ;;  %v1531_v50 = vsel %vm1505_vm6, %v1498_v13, %v12346_v12  ;;  %v1499_v35 = vsel %vm1472_vm3, %v1466_v17, %v12347_v48  ;;  %v12350_v44 = vld [vmem:[#allocation27_spill] sm:$0xff]  ;;  %v6081_v28 = vld [vmem:[#allocation2 + $0x140] sm:$0xff]  ;;  %v12355_v43 = vld [vmem:[#allocation81_spill] sm:$0xff]  ;;  %2079 = vst.msk [vmem:[#allocation3 + $0x28] sm:$0x3] %vm2075_vm13, %v12368_v0 }
 0x285   : > { %5889 = vmatprep.mubr.msk.f32.mxu0 %vm1715_vm12, %v1693_v41  ;;  %v1564_v10 = vsel %vm1538_vm7, %v1531_v50, %v12348_v40  ;;  %v1532_v9 = vsel %vm1505_vm6, %v1499_v35, %v12349_v5  ;;  %v1467_v57 = vsel %vm261_vm0, %v6081_v28, %v12355_v43  ;;  %v12356_v53 = vld [vmem:[#allocation26_spill] sm:$0xff]  ;;  %v12358_v37 = vld [vmem:[#allocation49_spill] sm:$0xff]  ;;  %v12359_v55 = vld [vmem:[#allocation100_spill] sm:$0xff]  ;;  %2076 = vst.msk [vmem:[#allocation3 + $0x10] sm:$0x3] %vm2075_vm13, %v12368_v0 }
 0x286   : > { %v1295_v19 = vpop.permute.xlu1 %1294  ;;  %v1597_v36 = vsel %vm1571_vm8, %v1564_v10, %v12350_v44  ;;  %v1565_v30 = vsel %vm1538_vm7, %v1532_v9, %v12351_v26  ;;  %v1500_v15 = vsel %vm1472_vm3, %v1467_v57, %v12356_v53  ;;  %v6082_v7 = vld [vmem:[#allocation2 + $0x150] sm:$0xff]  ;;  %v12360_v32 = vld [vmem:[#allocation164_spill] sm:$0xff]  ;;  %v12363_v14 = vld [vmem:[#allocation163_spill] sm:$0xff]  ;;  %2082 = vst.msk [vmem:[#allocation3 + $0x40] sm:$0x3] %vm2075_vm13, %v12368_v0 }
 0x287   : > { %v1297_v6 = vpop.permute.xlu0 %1296  ;;  %v1661_v39 = vsel %vm1637_vm10, %v1628_v11, %v1295_v19  ;;  %v1630_v59 = vsel %vm1604_vm9, %v1597_v36, %v12352_v22  ;;  %v1598_v63 = vsel %vm1571_vm8, %v1565_v30, %v12353_v24  ;;  %v12357_v19 = vld [vmem:[#allocation80_spill] sm:$0xff]  ;;  %v1533_v23 = vsel %vm1505_vm6, %v1500_v15, %v12358_v37  ;;  %v12366_v54 = vld [vmem:[#allocation33_spill] sm:$0xff]  ;;  %v12367_v62 = vld [vmem:[#allocation83_spill] sm:$0xff]  ;;  %2085 = vst.msk [vmem:[#allocation3 + $0x58] sm:$0x3] %vm2075_vm13, %v12368_v0 }
 0x288   : > { %v1662_v29 = vsel %vm1637_vm10, %v1629_v47, %v1297_v6  ;;  %v1631_v34 = vsel %vm1604_vm9, %v1598_v63, %v12354_v42  ;;  %v1468_v61 = vsel %vm261_vm0, %v6082_v7, %v12357_v19  ;;  %v1566_v4 = vsel %vm1538_vm7, %v1533_v23, %v12360_v32  ;;  %v12361_v6 = vld [vmem:[#allocation48_spill] sm:$0xff]  ;;  %2088 = vst.msk [vmem:[#allocation3 + $0x70] sm:$0x3] %vm2075_vm13, %v12368_v0  ;;  %v12369_v17 = vld [vmem:[#allocation102_spill] sm:$0xff]  ;;  %v12371_v40 = vld [vmem:[#allocation127_spill] sm:$0xff] }
 0x289   : > { %v1501_v33 = vsel %vm1472_vm3, %v1468_v61, %v12359_v55  ;;  %v12362_v21 = vld [vmem:[#allocation28_spill] sm:$0xff]  ;;  %2091 = vst.msk [vmem:[#allocation3 + $0x88] sm:$0x3] %vm2075_vm13, %v12368_v0  ;;  %2094 = vst.msk [vmem:[#allocation3 + $0xa0] sm:$0x3] %vm2075_vm13, %v12368_v0  ;;  %v12370_v48 = vld [vmem:[#allocation82_spill] sm:$0xff] }
 0x28a   : > { %v1391_v52 = vpop.permute.xlu1 %1390  ;;  %v1534_v60 = vsel %vm1505_vm6, %v1501_v33, %v12361_v6  ;;  %v1599_v25 = vsel %vm1571_vm8, %v1566_v4, %v12362_v21  ;;  %v12365_v49 = vld [vmem:[#allocation176_spill] sm:$0xff]  ;;  %2097 = vst.msk [vmem:[#allocation3 + $0xb8] sm:$0x3] %vm2075_vm13, %v12368_v0  ;;  %2100 = vst.msk [vmem:[#allocation3 + $0xd0] sm:$0x3] %vm2075_vm13, %v12368_v0  ;;  %v12372_v9 = vld [vmem:[#allocation101_spill] sm:$0xff] }
 0x28b   : > { %v1694_v56 = vsel %vm1670_vm11, %v1661_v39, %v1391_v52  ;;  %v1393_v2 = vpop.permute.xlu0 %1392  ;;  %v1567_v45 = vsel %vm1538_vm7, %v1534_v60, %v12363_v14  ;;  %v12364_v39 = vld [vmem:[#allocation180_spill] sm:$0xff]  ;;  %2103 = vst.msk [vmem:[#allocation3 + $0xe8] sm:$0x3] %vm2075_vm13, %v12368_v0  ;;  %2106 = vst.msk [vmem:[#allocation3 + $0x100] sm:$0x3] %vm2075_vm13, %v12368_v0  ;;  %v12373_v36 = vld [vmem:[#allocation166_spill] sm:$0xff] }
 0x28c   : > { %5890 = vmatmul.mubr.msk.f32.gmra.mxu0 %vm1715_vm12, %v1694_v56  ;;  %v1695_v18 = vsel %vm1670_vm11, %v1662_v29, %v1393_v2  ;;  %v1632_v52 = vsel %vm1604_vm9, %v1599_v25, %v12364_v39  ;;  %v1600_v47 = vsel %vm1571_vm8, %v1567_v45, %v12365_v49  ;;  %v6083_v2 = vld [vmem:[#allocation2 + $0x158] sm:$0xff]  ;;  %2109 = vst.msk [vmem:[#allocation3 + $0x118] sm:$0x3] %vm2075_vm13, %v12368_v0  ;;  %2112 = vst.msk [vmem:[#allocation3 + $0x130] sm:$0x3] %vm2075_vm13, %v12368_v0  ;;  %v12374_v26 = vld [vmem:[#allocation126_spill] sm:$0xff] }
 0x28d   : > { %5892 = vmatprep.mubr.msk.f32.mxu0 %vm1715_vm12, %v1695_v18  ;;  %v1633_v16 = vsel %vm1604_vm9, %v1600_v47, %v12366_v54  ;;  %v1469_v13 = vsel %vm261_vm0, %v6083_v2, %v12367_v62  ;;  %2115 = vst.msk [vmem:[#allocation3 + $0x148] sm:$0x3] %vm2075_vm13, %v12368_v0  ;;  %2118 = vst.msk [vmem:[#allocation3 + $0x160] sm:$0x3] %vm2075_vm13, %v12368_v0  ;;  %v12375_v22 = vld [vmem:[#allocation178_spill] sm:$0xff]  ;;  %v12376_v63 = vld [vmem:[#allocation165_spill] sm:$0xff] }
 0x28e   : > { %v1299_v38 = vpop.permute.xlu1 %1298  ;;  %2121 = vst.msk [vmem:[#allocation3 + $0x178] sm:$0x3] %vm2075_vm13, %v12368_v0  ;;  %2124 = vst.msk [vmem:[#allocation3 + $0x190] sm:$0x3] %vm2075_vm13, %v12368_v0  ;;  %v1502_v12 = vsel %vm1472_vm3, %v1469_v13, %v12369_v17  ;;  %v6085_v57 = vld [vmem:[#allocation2 + $0x170] sm:$0xff]  ;;  %v12380_v53 = vld [vmem:[#allocation181_spill] sm:$0xff] }
 0x28f   : > { %v1301_v51 = vpop.permute.xlu0 %1300  ;;  %v1663_v31 = vsel %vm1637_vm10, %v1630_v59, %v1299_v38  ;;  %2127 = vst.msk [vmem:[#allocation3 + $0x1a8] sm:$0x3] %vm2075_vm13, %v12368_v0  ;;  %v6084_v38 = vld [vmem:[#allocation2 + $0x168] sm:$0xff]  ;;  %v1535_v10 = vsel %vm1505_vm6, %v1502_v12, %v12371_v40  ;;  %v8482_v7 = vld [vmem:[#allocation3] sm:$0xff]  ;;  %v8484_v19 = vld [vmem:[#allocation3 + $0x8] sm:$0xff]  ;;  %vm3882_vm13 = vcmask 1047559  }
 0x290   : > { %v1664_v41 = vsel %vm1637_vm10, %v1631_v34, %v1301_v51  ;;  %v1470_v35 = vsel %vm261_vm0, %v6084_v38, %v12370_v48  ;;  %v1568_v51 = vsel %vm1538_vm7, %v1535_v10, %v12373_v36  ;;  %v12378_v34 = vld [vmem:[#allocation177_spill] sm:$0xff]  ;;  %v8486_v61 = vld [vmem:[#allocation3 + $0x10] sm:$0x3]  ;;  %v2264_v55 = vrot.slane %v8484_v19, 1  ;;  %v12383_v45 = vld [vmem:[#allocation167_spill] sm:$0xff] }
 0x291   : > { %v1503_v44 = vsel %vm1472_vm3, %v1470_v35, %v12372_v9  ;;  %v1601_v59 = vsel %vm1571_vm8, %v1568_v51, %v12375_v22  ;;  %v2266_v33 = vrot.slane %v8486_v61, 1  ;;  %v12381_v32 = vld [vmem:[#allocation104_spill] sm:$0xff]  ;;  %v12382_v60 = vld [vmem:[#allocation129_spill] sm:$0xff]  ;;  %v12385_v47 = vld [vmem:[#allocation107_spill] sm:$0xff] }
 0x292   : > { %v1395_v46 = vpop.permute.xlu1 %1394  ;;  %v1536_v30 = vsel %vm1505_vm6, %v1503_v44, %v12374_v26 }
 0x293   : > { %v1696_v1 = vsel %vm1670_vm11, %v1663_v31, %v1395_v46  ;;  %v1397_v20 = vpop.permute.xlu0 %1396  ;;  %v1569_v31 = vsel %vm1538_vm7, %v1536_v30, %v12376_v63  ;;  %v12377_v46 = vld [vmem:[#allocation35_spill] sm:$0xff]  ;;  %v2267_v14 = vsel %vm484_vm2, %v2264_v55, %v2266_v33 }
 0x294   : > { %5893 = vmatmul.mubr.msk.f32.gmra.mxu0 %vm1715_vm12, %v1696_v1  ;;  %v1697_v3 = vsel %vm1670_vm11, %v1664_v41, %v1397_v20  ;;  %v1634_v42 = vsel %vm1604_vm9, %v1601_v59, %v12377_v46  ;;  %v1602_v1 = vsel %vm1571_vm8, %v1569_v31, %v12378_v34  ;;  %v12379_v41 = vld [vmem:[#allocation85_spill] sm:$0xff]  ;;  %2451 = vrot.lane.b32.xlu1 %v2267_v14, %s11920_s15 }
 0x295   : > { %5895 = vmatprep.mubr.msk.f32.mxu0 %vm1715_vm12, %v1697_v3  ;;  %v1471_v20 = vsel %vm261_vm0, %v6085_v57, %v12379_v41  ;;  %v1635_v15 = vsel %vm1604_vm9, %v1602_v1, %v12380_v53  ;;  %vm3411_vm0 = vcmask 457728  }
 0x296   : > { %v1303_v27 = vpop.permute.xlu1 %1302  ;;  %v1504_v4 = vsel %vm1472_vm3, %v1471_v20, %v12381_v32 }
 0x297   : > { %v1305_v11 = vpop.permute.xlu0 %1304  ;;  %v1665_v56 = vsel %vm1637_vm10, %v1632_v52, %v1303_v27  ;;  %v2263_v27 = vrot.slane %v8482_v7, 1  ;;  %v1537_v21 = vsel %vm1505_vm6, %v1504_v4, %v12382_v60  ;;  %v12384_v52 = vld [vmem:[#allocation179_spill] sm:$0xff]  ;;  %vm3870_vm6 = vcmask 1043459  }
 0x298   : > { %v1666_v18 = vsel %vm1637_vm10, %v1633_v16, %v1305_v11  ;;  %v1570_v39 = vsel %vm1538_vm7, %v1537_v21, %v12383_v45 }
 0x299   : > { %v2265_v11 = vsel %vm484_vm2, %v2263_v27, %v2264_v55  ;;  %v1603_v49 = vsel %vm1571_vm8, %v1570_v39, %v12384_v52  ;;  %vm3873_vm8 = vcmask 1044484  }
 0x29a   : > { %v1399_v8 = vpop.permute.xlu1 %1398  ;;  %2449 = vrot.lane.b32.xlu0 %v2265_v11, %s11920_s15 }
 0x29b   : > { %v1698_v29 = vsel %vm1670_vm11, %v1665_v56, %v1399_v8  ;;  %v1401_v58 = vpop.permute.xlu0 %1400  ;;  %v1636_v56 = vsel %vm1604_vm9, %v1603_v49, %v12385_v47 }
 0x29c   : > { %5896 = vmatmul.mubr.msk.f32.gmra.mxu0 %vm1715_vm12, %v1698_v29  ;;  %v1699_v50 = vsel %vm1670_vm11, %v1666_v18, %v1401_v58  ;;  %v8515_v29 = vld [vmem:[%s11677_s2] ss:$0 sm:$0xff] }
 0x29d   : > { %5898 = vmatprep.mubr.msk.f32.mxu0 %vm1715_vm12, %v1699_v50 }
 0x29e   : > { %v1307_v5 = vpop.permute.xlu1 %1306 }
 0x29f   : > { %v1309_v24 = vpop.permute.xlu0 %1308  ;;  %v1667_v28 = vsel %vm1637_vm10, %v1634_v42, %v1307_v5 }
 0x2a0   : > { %v1668_v37 = vsel %vm1637_vm10, %v1635_v15, %v1309_v24 }
 0x2a2   : > { %v1403_v43 = vpop.permute.xlu1 %1402 }
 0x2a3   : > { %v1700_v3 = vsel %vm1670_vm11, %v1667_v28, %v1403_v43  ;;  %v1405_v23 = vpop.permute.xlu0 %1404 }
 0x2a4   : > { %5899 = vmatmul.mubr.msk.f32.gmra.mxu0 %vm1715_vm12, %v1700_v3  ;;  %v1701_v6 = vsel %vm1670_vm11, %v1668_v37, %v1405_v23 }
 0x2a5   : > { %5901 = vmatprep.mubr.msk.f32.mxu0 %vm1715_vm12, %v1701_v6 }
 0x2a6   : > { %v1311_v25 = vpop.permute.xlu1 %1310 }
 0x2a7   : > { %v1669_v8 = vsel %vm1637_vm10, %v1636_v56, %v1311_v25  ;;  %vm3876_vm10 = vcmask 1045509  }
 0x2aa   : > { %v1407_v54 = vpop.permute.xlu1 %1406 }
 0x2ab   : > { %v1702_v16 = vsel %vm1670_vm11, %v1669_v8, %v1407_v54 }
 0x2ac   : > { %5902 = vmatmul.mubr.msk.f32.gmra.mxu0 %vm1715_vm12, %v1702_v16  ;;  %vm3879_vm12 = vcmask 1046534  }
 0x319   : > { %v5858_v2 = vpop.f32.mrf.mxu0 }
 0x31a   : > { %v1888_v62 = vadd.f32 %v5858_v2, %v8515_v29 }
 0x31b   : > { %v1882_v13 = vpop.f32.mrf.mxu0 }
 0x31c   : > { %v2042_v18 = vmax.f32 %v1888_v62, 0.0  ;;  %v1883_v58 = vadd.f32 %v8515_v29, %v1882_v13 }
 0x31d   : > { %v5861_v0 = vpop.f32.mrf.mxu0 }
 0x31e   : > { %2130 = vst.msk [vmem:[#allocation3 + $0x21] sm:$0xff] %vm1472_vm3, %v2042_v18  ;;  %v2041_v17 = vmax.f32 %v1883_v58, 0.0  ;;  %v1898_v12 = vadd.f32 %v5861_v0, %v8515_v29 }
 0x31f   : > { %v1892_v50 = vpop.f32.mrf.mxu0 }
 0x320   : > { %2129 = vst.msk [vmem:[#allocation3 + $0x19] sm:$0xff] %vm1472_vm3, %v2041_v17  ;;  %v2044_v38 = vmax.f32 %v1898_v12, 0.0  ;;  %v1893_v48 = vadd.f32 %v8515_v29, %v1892_v50 }
 0x321   : > { %v5864_v35 = vpop.f32.mrf.mxu0 }
 0x322   : > { %2132 = vst.msk [vmem:[#allocation3 + $0x39] sm:$0xff] %vm1472_vm3, %v2044_v38  ;;  %v2043_v40 = vmax.f32 %v1893_v48, 0.0  ;;  %v1908_v10 = vadd.f32 %v5864_v35, %v8515_v29 }
 0x323   : > { %v1902_v5 = vpop.f32.mrf.mxu0 }
 0x324   : > { %2131 = vst.msk [vmem:[#allocation3 + $0x31] sm:$0xff] %vm1472_vm3, %v2043_v40  ;;  %v2046_v9 = vmax.f32 %v1908_v10, 0.0  ;;  %v1903_v44 = vadd.f32 %v8515_v29, %v1902_v5 }
 0x325   : > { %v5867_v36 = vpop.f32.mrf.mxu0  ;;  %v8527_v51 = vld [vmem:[#allocation3 + $0x28] sm:$0x3] }
 0x326   : > { %2134 = vst.msk [vmem:[#allocation3 + $0x51] sm:$0xff] %vm1472_vm3, %v2046_v9  ;;  %v2045_v26 = vmax.f32 %v1903_v44, 0.0  ;;  %v1918_v30 = vadd.f32 %v5867_v36, %v8515_v29  ;;  %v2271_v24 = vrot.slane %v8527_v51, 1 }
 0x327   : > { %v1912_v22 = vpop.f32.mrf.mxu0  ;;  %v8531_v59 = vld [vmem:[#allocation3 + $0x20] sm:$0xff]  ;;  %v8534_v63 = vld [vmem:[#allocation3 + $0x18] sm:$0xff] }
 0x328   : > { %2133 = vst.msk [vmem:[#allocation3 + $0x49] sm:$0xff] %vm1472_vm3, %v2045_v26  ;;  %v2048_v31 = vmax.f32 %v1918_v30, 0.0  ;;  %v1913_v46 = vadd.f32 %v8515_v29, %v1912_v22  ;;  %v2269_v42 = vrot.slane %v8531_v59, 1  ;;  %v2268_v34 = vrot.slane %v8534_v63, 1 }
 0x329   : > { %v5870_v1 = vpop.f32.mrf.mxu0  ;;  %v8540_v28 = vld [vmem:[#allocation3 + $0x40] sm:$0x3] }
 0x32a   : > { %2136 = vst.msk [vmem:[#allocation3 + $0x69] sm:$0xff] %vm1472_vm3, %v2048_v31  ;;  %v2047_v43 = vmax.f32 %v1913_v46, 0.0  ;;  %v1928_v57 = vadd.f32 %v5870_v1, %v8515_v29  ;;  %v8545_v41 = vsel %vm484_vm2, %v2269_v42, %v2271_v24  ;;  %v8548_v20 = vsel %vm484_vm2, %v2268_v34, %v2269_v42 }
 0x32b   : > { %12386 = vst [vmem:[#allocation55_spill] sm:$0xff] %v8545_v41  ;;  %12387 = vst [vmem:[#allocation84_spill] sm:$0xff] %v8548_v20  ;;  %2455 = vrot.lane.b32.xlu1 %v8545_v41, %s11920_s15  ;;  %2453 = vrot.lane.b32.xlu0 %v8548_v20, %s11920_s15  ;;  %v1922_v53 = vpop.f32.mrf.mxu0  ;;  %v8554_v15 = vld [vmem:[#allocation3 + $0x38] sm:$0xff]  ;;  %v2276_v3 = vrot.slane %v8540_v28, 1  ;;  %v8557_v37 = vld [vmem:[#allocation3 + $0x30] sm:$0xff] }
 0x32c   : > { %2135 = vst.msk [vmem:[#allocation3 + $0x61] sm:$0xff] %vm1472_vm3, %v2047_v43  ;;  %v2050_v23 = vmax.f32 %v1928_v57, 0.0  ;;  %v1923_v27 = vadd.f32 %v8515_v29, %v1922_v53  ;;  %v2274_v55 = vrot.slane %v8554_v15, 1  ;;  %v2273_v33 = vrot.slane %v8557_v37, 1 }
 0x32d   : > { %v5873_v32 = vpop.f32.mrf.mxu0  ;;  %v8563_v4 = vld [vmem:[#allocation3 + $0x58] sm:$0x3] }
 0x32e   : > { %2138 = vst.msk [vmem:[#allocation3 + $0x81] sm:$0xff] %vm1472_vm3, %v2050_v23  ;;  %v2049_v6 = vmax.f32 %v1923_v27, 0.0  ;;  %v1938_v60 = vadd.f32 %v5873_v32, %v8515_v29  ;;  %v8568_v21 = vsel %vm484_vm2, %v2274_v55, %v2276_v3  ;;  %v8571_v25 = vsel %vm484_vm2, %v2273_v33, %v2274_v55 }
 0x32f   : > { %12388 = vst [vmem:[#allocation56_spill] sm:$0xff] %v8568_v21  ;;  %12389 = vst [vmem:[#allocation136_spill] sm:$0xff] %v8571_v25  ;;  %2459 = vrot.lane.b32.xlu1 %v8568_v21, %s11920_s15  ;;  %2457 = vrot.lane.b32.xlu0 %v8571_v25, %s11920_s15  ;;  %v1932_v11 = vpop.f32.mrf.mxu0  ;;  %v8577_v14 = vld [vmem:[#allocation3 + $0x50] sm:$0xff]  ;;  %v2281_v45 = vrot.slane %v8563_v4, 1  ;;  %v8580_v39 = vld [vmem:[#allocation3 + $0x48] sm:$0xff] }
 0x330   : > { %2137 = vst.msk [vmem:[#allocation3 + $0x79] sm:$0xff] %vm1472_vm3, %v2049_v6  ;;  %v2052_v52 = vmax.f32 %v1938_v60, 0.0  ;;  %v1933_v49 = vadd.f32 %v8515_v29, %v1932_v11  ;;  %v2279_v47 = vrot.slane %v8577_v14, 1  ;;  %v2278_v56 = vrot.slane %v8580_v39, 1 }
 0x331   : > { %v5876_v8 = vpop.f32.mrf.mxu0  ;;  %v8586_v54 = vld [vmem:[#allocation3 + $0x70] sm:$0x3] }
 0x332   : > { %2140 = vst.msk [vmem:[#allocation3 + $0x99] sm:$0xff] %vm1472_vm3, %v2052_v52  ;;  %v2051_v16 = vmax.f32 %v1933_v49, 0.0  ;;  %v1948_v2 = vadd.f32 %v5876_v8, %v8515_v29  ;;  %v8591_v62 = vsel %vm484_vm2, %v2279_v47, %v2281_v45  ;;  %v8594_v13 = vsel %vm484_vm2, %v2278_v56, %v2279_v47 }
 0x333   : > { %2463 = vrot.lane.b32.xlu1 %v8591_v62, %s11920_s15  ;;  %2461 = vrot.lane.b32.xlu0 %v8594_v13, %s11920_s15  ;;  %v1942_v18 = vpop.f32.mrf.mxu0  ;;  %v8600_v58 = vld [vmem:[#allocation3 + $0x68] sm:$0xff]  ;;  %v2286_v0 = vrot.slane %v8586_v54, 1  ;;  %v8603_v17 = vld [vmem:[#allocation3 + $0x60] sm:$0xff] }
 0x334   : > { %2139 = vst.msk [vmem:[#allocation3 + $0x91] sm:$0xff] %vm1472_vm3, %v2051_v16  ;;  %v2054_v12 = vmax.f32 %v1948_v2, 0.0  ;;  %v1943_v50 = vadd.f32 %v8515_v29, %v1942_v18  ;;  %v2284_v38 = vrot.slane %v8600_v58, 1  ;;  %v2283_v48 = vrot.slane %v8603_v17, 1 }
 0x335   : > { %v5879_v35 = vpop.f32.mrf.mxu0  ;;  %v8609_v40 = vld [vmem:[#allocation3 + $0x88] sm:$0x3] }
 0x336   : > { %2142 = vst.msk [vmem:[#allocation3 + $0xb1] sm:$0xff] %vm1472_vm3, %v2054_v12  ;;  %v2053_v10 = vmax.f32 %v1943_v50, 0.0  ;;  %v1958_v5 = vadd.f32 %v5879_v35, %v8515_v29  ;;  %v8614_v9 = vsel %vm484_vm2, %v2284_v38, %v2286_v0  ;;  %v8617_v44 = vsel %vm484_vm2, %v2283_v48, %v2284_v38 }
 0x337   : > { %2467 = vrot.lane.b32.xlu1 %v8614_v9, %s11920_s15  ;;  %2465 = vrot.lane.b32.xlu0 %v8617_v44, %s11920_s15  ;;  %v1952_v36 = vpop.f32.mrf.mxu0  ;;  %v8623_v26 = vld [vmem:[#allocation3 + $0x80] sm:$0xff]  ;;  %v2291_v30 = vrot.slane %v8609_v40, 1  ;;  %v8626_v22 = vld [vmem:[#allocation3 + $0x78] sm:$0xff] }
 0x338   : > { %2141 = vst.msk [vmem:[#allocation3 + $0xa9] sm:$0xff] %vm1472_vm3, %v2053_v10  ;;  %v2056_v24 = vmax.f32 %v1958_v5, 0.0  ;;  %v1953_v31 = vadd.f32 %v8515_v29, %v1952_v36  ;;  %v2289_v46 = vrot.slane %v8623_v26, 1  ;;  %v2288_v42 = vrot.slane %v8626_v22, 1 }
 0x339   : > { %v5882_v34 = vpop.f32.mrf.mxu0  ;;  %v8632_v1 = vld [vmem:[#allocation3 + $0xa0] sm:$0x3] }
 0x33a   : > { %2144 = vst.msk [vmem:[#allocation3 + $0xc9] sm:$0xff] %vm1472_vm3, %v2056_v24  ;;  %v2055_v43 = vmax.f32 %v1953_v31, 0.0  ;;  %v1968_v57 = vadd.f32 %v5882_v34, %v8515_v29  ;;  %v8637_v53 = vsel %vm484_vm2, %v2289_v46, %v2291_v30  ;;  %v8640_v3 = vsel %vm484_vm2, %v2288_v42, %v2289_v46 }
 0x33b   : > { %12390 = vst [vmem:[#allocation87_spill] sm:$0xff] %v8637_v53  ;;  %12391 = vst [vmem:[#allocation103_spill] sm:$0xff] %v8640_v3  ;;  %2471 = vrot.lane.b32.xlu1 %v8637_v53, %s11920_s15  ;;  %2469 = vrot.lane.b32.xlu0 %v8640_v3, %s11920_s15  ;;  %v1962_v23 = vpop.f32.mrf.mxu0  ;;  %v8646_v27 = vld [vmem:[#allocation3 + $0x98] sm:$0xff]  ;;  %v2296_v55 = vrot.slane %v8632_v1, 1  ;;  %v8649_v33 = vld [vmem:[#allocation3 + $0x90] sm:$0xff] }
 0x33c   : > { %2143 = vst.msk [vmem:[#allocation3 + $0xc1] sm:$0xff] %vm1472_vm3, %v2055_v43  ;;  %v2058_v32 = vmax.f32 %v1968_v57, 0.0  ;;  %v1963_v6 = vadd.f32 %v8515_v29, %v1962_v23  ;;  %v2294_v60 = vrot.slane %v8646_v27, 1  ;;  %v2293_v11 = vrot.slane %v8649_v33, 1 }
 0x33d   : > { %v5885_v45 = vpop.f32.mrf.mxu0  ;;  %v8655_v52 = vld [vmem:[#allocation3 + $0xb8] sm:$0x3] }
 0x33e   : > { %2146 = vst.msk [vmem:[#allocation3 + $0xe1] sm:$0xff] %vm1472_vm3, %v2058_v32  ;;  %v2057_v49 = vmax.f32 %v1963_v6, 0.0  ;;  %v1978_v47 = vadd.f32 %v5885_v45, %v8515_v29  ;;  %v8660_v56 = vsel %vm484_vm2, %v2294_v60, %v2296_v55  ;;  %v8663_v8 = vsel %vm484_vm2, %v2293_v11, %v2294_v60 }
 0x33f   : > { %12392 = vst [vmem:[#allocation57_spill] sm:$0xff] %v8660_v56  ;;  %12393 = vst [vmem:[#allocation106_spill] sm:$0xff] %v8663_v8  ;;  %2475 = vrot.lane.b32.xlu1 %v8660_v56, %s11920_s15  ;;  %2473 = vrot.lane.b32.xlu0 %v8663_v8, %s11920_s15  ;;  %v1972_v16 = vpop.f32.mrf.mxu0  ;;  %v8669_v2 = vld [vmem:[#allocation3 + $0xb0] sm:$0xff]  ;;  %v2301_v18 = vrot.slane %v8655_v52, 1  ;;  %v8672_v0 = vld [vmem:[#allocation3 + $0xa8] sm:$0xff] }
 0x340   : > { %2145 = vst.msk [vmem:[#allocation3 + $0xd9] sm:$0xff] %vm1472_vm3, %v2057_v49  ;;  %v2060_v12 = vmax.f32 %v1978_v47, 0.0  ;;  %v1973_v50 = vadd.f32 %v8515_v29, %v1972_v16  ;;  %v2299_v38 = vrot.slane %v8669_v2, 1  ;;  %v2298_v48 = vrot.slane %v8672_v0, 1 }
 0x341   : > { %v8678_v35 = vld [vmem:[#allocation3 + $0xd0] sm:$0x3] }
 0x342   : > { %2148 = vst.msk [vmem:[#allocation3 + $0xf9] sm:$0xff] %vm1472_vm3, %v2060_v12  ;;  %v2059_v10 = vmax.f32 %v1973_v50, 0.0  ;;  %v8682_v5 = vsel %vm484_vm2, %v2299_v38, %v2301_v18  ;;  %v8685_v36 = vsel %vm484_vm2, %v2298_v48, %v2299_v38  ;;  %v2306_v42 = vrot.slane %v8678_v35, 1 }
 0x343   : > { %12394 = vst [vmem:[#allocation128_spill] sm:$0xff] %v8682_v5  ;;  %12395 = vst [vmem:[#allocation58_spill] sm:$0xff] %v8685_v36  ;;  %2479 = vrot.lane.b32.xlu1 %v8682_v5, %s11920_s15  ;;  %2477 = vrot.lane.b32.xlu0 %v8685_v36, %s11920_s15  ;;  %v8691_v30 = vld [vmem:[#allocation3 + $0xc8] sm:$0xff]  ;;  %v8693_v24 = vld [vmem:[#allocation3 + $0xc0] sm:$0xff] }
 0x344   : > { %2147 = vst.msk [vmem:[#allocation3 + $0xf1] sm:$0xff] %vm1472_vm3, %v2059_v10  ;;  %v5888_v31 = vpop.f32.mrf.mxu0  ;;  %v2304_v46 = vrot.slane %v8691_v30, 1  ;;  %v2303_v34 = vrot.slane %v8693_v24, 1 }
 0x345   : > { %v1988_v43 = vadd.f32 %v5888_v31, %v8515_v29  ;;  %v8700_v57 = vld [vmem:[#allocation3 + $0xe8] sm:$0x3] }
 0x346   : > { %v1982_v23 = vpop.f32.mrf.mxu0  ;;  %v8703_v55 = vsel %vm484_vm2, %v2304_v46, %v2306_v42  ;;  %v8706_v32 = vsel %vm484_vm2, %v2303_v34, %v2304_v46  ;;  %v2311_v47 = vrot.slane %v8700_v57, 1 }
 0x347   : > { %12396 = vst [vmem:[#allocation139_spill] sm:$0xff] %v8703_v55  ;;  %12397 = vst [vmem:[#allocation86_spill] sm:$0xff] %v8706_v32  ;;  %v2062_v6 = vmax.f32 %v1988_v43, 0.0  ;;  %v1983_v60 = vadd.f32 %v8515_v29, %v1982_v23  ;;  %2483 = vrot.lane.b32.xlu1 %v8703_v55, %s11920_s15  ;;  %2481 = vrot.lane.b32.xlu0 %v8706_v32, %s11920_s15  ;;  %v8713_v11 = vld [vmem:[#allocation3 + $0xe0] sm:$0xff]  ;;  %v8715_v45 = vld [vmem:[#allocation3 + $0xd8] sm:$0xff] }
 0x348   : > { %v2309_v49 = vrot.slane %v8713_v11, 1  ;;  %v2308_v16 = vrot.slane %v8715_v45, 1 }
 0x349   : > { %2150 = vst.msk [vmem:[#allocation3 + $0x111] sm:$0xff] %vm1472_vm3, %v2062_v6  ;;  %v2061_v18 = vmax.f32 %v1983_v60, 0.0  ;;  %v8721_v12 = vld [vmem:[#allocation3 + $0x100] sm:$0x3] }
 0x34a   : > { %v8724_v50 = vsel %vm484_vm2, %v2309_v49, %v2311_v47  ;;  %v8727_v38 = vsel %vm484_vm2, %v2308_v16, %v2309_v49  ;;  %v2316_v42 = vrot.slane %v8721_v12, 1 }
 0x34b   : > { %12398 = vst [vmem:[#allocation131_spill] sm:$0xff] %v8724_v50  ;;  %12399 = vst [vmem:[#allocation89_spill] sm:$0xff] %v8727_v38  ;;  %2487 = vrot.lane.b32.xlu1 %v8724_v50, %s11920_s15  ;;  %2485 = vrot.lane.b32.xlu0 %v8727_v38, %s11920_s15  ;;  %v8734_v48 = vld [vmem:[#allocation3 + $0xf8] sm:$0xff]  ;;  %v8736_v10 = vld [vmem:[#allocation3 + $0xf0] sm:$0xff] }
 0x34c   : > { %2149 = vst.msk [vmem:[#allocation3 + $0x109] sm:$0xff] %vm1472_vm3, %v2061_v18  ;;  %v5891_v31 = vpop.f32.mrf.mxu0  ;;  %v2314_v46 = vrot.slane %v8734_v48, 1  ;;  %v2313_v34 = vrot.slane %v8736_v10, 1 }
 0x34d   : > { %v1998_v43 = vadd.f32 %v5891_v31, %v8515_v29 }
 0x34e   : > { %v1992_v23 = vpop.f32.mrf.mxu0  ;;  %v8743_v6 = vsel %vm484_vm2, %v2314_v46, %v2316_v42  ;;  %v8746_v60 = vsel %vm484_vm2, %v2313_v34, %v2314_v46 }
 0x34f   : > { %12400 = vst [vmem:[#allocation105_spill] sm:$0xff] %v8743_v6  ;;  %12401 = vst [vmem:[#allocation109_spill] sm:$0xff] %v8746_v60  ;;  %v2064_v49 = vmax.f32 %v1998_v43, 0.0  ;;  %v1993_v47 = vadd.f32 %v8515_v29, %v1992_v23  ;;  %2491 = vrot.lane.b32.xlu1 %v8743_v6, %s11920_s15  ;;  %2489 = vrot.lane.b32.xlu0 %v8746_v60, %s11920_s15 }
 0x350   : > { %v8753_v16 = vld [vmem:[#allocation3 + $0x118] sm:$0x3] }
 0x351   : > { %2152 = vst.msk [vmem:[#allocation3 + $0x129] sm:$0xff] %vm1472_vm3, %v2064_v49  ;;  %v2063_v18 = vmax.f32 %v1993_v47, 0.0  ;;  %v2321_v34 = vrot.slane %v8753_v16, 1 }
 0x353   : > { %v8756_v31 = vld [vmem:[#allocation3 + $0x110] sm:$0xff]  ;;  %v8758_v42 = vld [vmem:[#allocation3 + $0x108] sm:$0xff]  ;;  %2151 = vst.msk [vmem:[#allocation3 + $0x121] sm:$0xff] %vm1472_vm3, %v2063_v18 }
 0x354   : > { %v2319_v46 = vrot.slane %v8756_v31, 1  ;;  %v2318_v43 = vrot.slane %v8758_v42, 1  ;;  %v5894_v23 = vpop.f32.mrf.mxu0 }
 0x355   : > { %v2008_v41 = vadd.f32 %v5894_v23, %v8515_v29 }
 0x356   : > { %v8766_v20 = vsel %vm484_vm2, %v2319_v46, %v2321_v34  ;;  %v8769_v49 = vsel %vm484_vm2, %v2318_v43, %v2319_v46  ;;  %v2002_v47 = vpop.f32.mrf.mxu0 }
 0x357   : > { %12402 = vst [vmem:[#allocation130_spill] sm:$0xff] %v8766_v20  ;;  %12403 = vst [vmem:[#allocation59_spill] sm:$0xff] %v8769_v49  ;;  %2495 = vrot.lane.b32.xlu1 %v8766_v20, %s11920_s15  ;;  %2493 = vrot.lane.b32.xlu0 %v8769_v49, %s11920_s15  ;;  %v2066_v18 = vmax.f32 %v2008_v41, 0.0  ;;  %v2003_v6 = vadd.f32 %v8515_v29, %v2002_v47 }
 0x358   : > { %v8776_v60 = vld [vmem:[#allocation3 + $0x130] sm:$0x3] }
 0x359   : > { %2154 = vst.msk [vmem:[#allocation3 + $0x141] sm:$0xff] %vm1472_vm3, %v2066_v18  ;;  %v2065_v23 = vmax.f32 %v2003_v6, 0.0  ;;  %v2326_v43 = vrot.slane %v8776_v60, 1 }
 0x35a   : > { %v8779_v34 = vld [vmem:[#allocation3 + $0x128] sm:$0xff]  ;;  %v8781_v50 = vld [vmem:[#allocation3 + $0x120] sm:$0xff] }
 0x35b   : > { %2153 = vst.msk [vmem:[#allocation3 + $0x139] sm:$0xff] %vm1472_vm3, %v2065_v23  ;;  %v2324_v46 = vrot.slane %v8779_v34, 1  ;;  %v2323_v20 = vrot.slane %v8781_v50, 1 }
 0x35c   : > { %v5897_v41 = vpop.f32.mrf.mxu0 }
 0x35d   : > { %v2018_v47 = vadd.f32 %v5897_v41, %v8515_v29  ;;  %v8789_v49 = vsel %vm484_vm2, %v2324_v46, %v2326_v43  ;;  %v8792_v6 = vsel %vm484_vm2, %v2323_v20, %v2324_v46 }
 0x35e   : > { %12404 = vst [vmem:[#allocation142_spill] sm:$0xff] %v8789_v49  ;;  %12405 = vst [vmem:[#allocation133_spill] sm:$0xff] %v8792_v6  ;;  %2499 = vrot.lane.b32.xlu1 %v8789_v49, %s11920_s15  ;;  %2497 = vrot.lane.b32.xlu0 %v8792_v6, %s11920_s15  ;;  %v2012_v18 = vpop.f32.mrf.mxu0 }
 0x35f   : > { %v2068_v23 = vmax.f32 %v2018_v47, 0.0  ;;  %v2013_v38 = vadd.f32 %v8515_v29, %v2012_v18 }
 0x360   : > { %v8799_v55 = vld [vmem:[#allocation3 + $0x148] sm:$0x3] }
 0x361   : > { %2156 = vst.msk [vmem:[#allocation3 + $0x159] sm:$0xff] %vm1472_vm3, %v2068_v23  ;;  %v2067_v41 = vmax.f32 %v2013_v38, 0.0  ;;  %v2331_v46 = vrot.slane %v8799_v55, 1 }
 0x362   : > { %v8802_v43 = vld [vmem:[#allocation3 + $0x140] sm:$0xff]  ;;  %v8804_v32 = vld [vmem:[#allocation3 + $0x138] sm:$0xff] }
 0x363   : > { %2155 = vst.msk [vmem:[#allocation3 + $0x151] sm:$0xff] %vm1472_vm3, %v2067_v41  ;;  %v2329_v20 = vrot.slane %v8802_v43, 1  ;;  %v2328_v49 = vrot.slane %v8804_v32, 1 }
 0x364   : > { %v5900_v47 = vpop.f32.mrf.mxu0 }
 0x365   : > { %v2028_v18 = vadd.f32 %v5900_v47, %v8515_v29  ;;  %v8812_v6 = vsel %vm484_vm2, %v2329_v20, %v2331_v46  ;;  %v8815_v38 = vsel %vm484_vm2, %v2328_v49, %v2329_v20 }
 0x366   : > { %12406 = vst [vmem:[#allocation60_spill] sm:$0xff] %v8812_v6  ;;  %12407 = vst [vmem:[#allocation143_spill] sm:$0xff] %v8815_v38  ;;  %2503 = vrot.lane.b32.xlu1 %v8812_v6, %s11920_s15  ;;  %2501 = vrot.lane.b32.xlu0 %v8815_v38, %s11920_s15  ;;  %v2022_v23 = vpop.f32.mrf.mxu0 }
 0x367   : > { %v2070_v41 = vmax.f32 %v2028_v18, 0.0  ;;  %v2023_v5 = vadd.f32 %v8515_v29, %v2022_v23 }
 0x368   : > { %v8822_v36 = vld [vmem:[#allocation3 + $0x160] sm:$0x3] }
 0x369   : > { %2158 = vst.msk [vmem:[#allocation3 + $0x171] sm:$0xff] %vm1472_vm3, %v2070_v41  ;;  %v2069_v47 = vmax.f32 %v2023_v5, 0.0  ;;  %v2336_v20 = vrot.slane %v8822_v36, 1 }
 0x36a   : > { %v8825_v46 = vld [vmem:[#allocation3 + $0x158] sm:$0xff]  ;;  %v8827_v56 = vld [vmem:[#allocation3 + $0x150] sm:$0xff] }
 0x36b   : > { %2157 = vst.msk [vmem:[#allocation3 + $0x169] sm:$0xff] %vm1472_vm3, %v2069_v47  ;;  %v2334_v49 = vrot.slane %v8825_v46, 1  ;;  %v2333_v6 = vrot.slane %v8827_v56, 1 }
 0x36c   : > { %v5903_v18 = vpop.f32.mrf.mxu0 }
 0x36d   : > { %v2038_v23 = vadd.f32 %v5903_v18, %v8515_v29  ;;  %v8835_v38 = vsel %vm484_vm2, %v2334_v49, %v2336_v20  ;;  %v8838_v5 = vsel %vm484_vm2, %v2333_v6, %v2334_v49  ;;  %v2344_v6 = vrot.slane %v8484_v19, 2 }
 0x36e   : > { %12408 = vst [vmem:[#allocation88_spill] sm:$0xff] %v8835_v38  ;;  %12409 = vst [vmem:[#allocation91_spill] sm:$0xff] %v8838_v5  ;;  %2507 = vrot.lane.b32.xlu1 %v8835_v38, %s11920_s15  ;;  %2505 = vrot.lane.b32.xlu0 %v8838_v5, %s11920_s15  ;;  %v2032_v41 = vpop.f32.mrf.mxu0  ;;  %v2346_v49 = vrot.slane %v8486_v61, 2  ;;  %v8967_v5 = vpop.permute.xlu0 %2449 }
 0x36f   : > { %v2072_v47 = vmax.f32 %v2038_v23, 0.0  ;;  %v2033_v8 = vadd.f32 %v8515_v29, %v2032_v41  ;;  %v2343_v41 = vrot.slane %v8482_v7, 2  ;;  %v2348_v7 = vrot.slane %v8534_v63, 2  ;;  %12418 = vst [vmem:[#allocation93_spill] sm:$0xff] %v8967_v5 }
 0x370   : > { %v8845_v53 = vld [vmem:[#allocation3 + $0x178] sm:$0x3]  ;;  %v2347_v19 = vsel %vm565_vm4, %v2344_v6, %v2346_v49  ;;  %v2354_v49 = vrot.slane %v8554_v15, 2 }
 0x371   : > { %2160 = vst.msk [vmem:[#allocation3 + $0x189] sm:$0xff] %vm1472_vm3, %v2072_v47  ;;  %v2071_v18 = vmax.f32 %v2033_v8, 0.0  ;;  %v2341_v23 = vrot.slane %v8845_v53, 1  ;;  %v2345_v61 = vsel %vm565_vm4, %v2343_v41, %v2344_v6  ;;  %v2353_v6 = vrot.slane %v8557_v37, 2 }
 0x372   : > { %v8848_v20 = vld [vmem:[#allocation3 + $0x170] sm:$0xff]  ;;  %v8850_v3 = vld [vmem:[#allocation3 + $0x168] sm:$0xff]  ;;  %v2356_v41 = vrot.slane %v8540_v28, 2 }
 0x373   : > { %2159 = vst.msk [vmem:[#allocation3 + $0x181] sm:$0xff] %vm1472_vm3, %v2071_v18  ;;  %v2339_v38 = vrot.slane %v8848_v20, 1  ;;  %v2338_v29 = vrot.slane %v8850_v3, 1  ;;  %v2349_v18 = vrot.slane %v8531_v59, 2 }
 0x375   : > { %v8860_v8 = vsel %vm484_vm2, %v2339_v38, %v2341_v23  ;;  %v8863_v47 = vsel %vm484_vm2, %v2338_v29, %v2339_v38  ;;  %v2351_v38 = vrot.slane %v8527_v51, 2  ;;  %v8880_v29 = vsel %vm565_vm4, %v2348_v7, %v2349_v18 }
 0x376   : > { %12410 = vst [vmem:[#allocation108_spill] sm:$0xff] %v8860_v8  ;;  %12411 = vst [vmem:[#allocation112_spill] sm:$0xff] %v8863_v47  ;;  %2511 = vrot.lane.b32.xlu1 %v8860_v8, %s11920_s15  ;;  %2509 = vrot.lane.b32.xlu0 %v8863_v47, %s11920_s15  ;;  %v8890_v51 = vsel %vm565_vm4, %v2354_v49, %v2356_v41  ;;  %v2361_v7 = vrot.slane %v8563_v4, 2  ;;  %v2366_v41 = vrot.slane %v8586_v54, 2  ;;  %v2371_v8 = vrot.slane %v8609_v40, 2 }
 0x377   : > { %v8877_v23 = vsel %vm565_vm4, %v2349_v18, %v2351_v38  ;;  %12413 = vst [vmem:[#allocation61_spill] sm:$0xff] %v8880_v29  ;;  %12414 = vst [vmem:[#allocation146_spill] sm:$0xff] %v8890_v51  ;;  %v2358_v18 = vrot.slane %v8580_v39, 2  ;;  %v2381_v47 = vrot.slane %v8655_v52, 2  ;;  %v8969_v52 = vpop.permute.xlu1 %2451 }
 0x378   : > { %12412 = vst [vmem:[#allocation132_spill] sm:$0xff] %v8877_v23  ;;  %12419 = vst [vmem:[#allocation110_spill] sm:$0xff] %v8969_v52 }
 0x37a   : > { %2547 = vrot.lane.b32.xlu1 %v2347_v19, %s6215_s17  ;;  %2545 = vrot.lane.b32.xlu0 %v2345_v61, %s6215_s17  ;;  %v8893_v19 = vsel %vm565_vm4, %v2353_v6, %v2354_v49  ;;  %v2359_v61 = vrot.slane %v8577_v14, 2  ;;  %v2364_v49 = vrot.slane %v8600_v58, 2  ;;  %v2363_v6 = vrot.slane %v8603_v17, 2 }
 0x37b   : > { %12415 = vst [vmem:[#allocation137_spill] sm:$0xff] %v8893_v19 }
 0x37c   : > { %v8903_v28 = vsel %vm565_vm4, %v2359_v61, %v2361_v7  ;;  %v8906_v38 = vsel %vm565_vm4, %v2358_v18, %v2359_v61  ;;  %v8916_v4 = vsel %vm565_vm4, %v2364_v49, %v2366_v41  ;;  %v8919_v7 = vsel %vm565_vm4, %v2363_v6, %v2364_v49 }
 0x37d   : > { %v2369_v61 = vrot.slane %v8623_v26, 2  ;;  %v2368_v18 = vrot.slane %v8626_v22, 2  ;;  %v2374_v49 = vrot.slane %v8646_v27, 2  ;;  %v2373_v6 = vrot.slane %v8649_v33, 2 }
 0x37e   : > { %2551 = vrot.lane.b32.xlu1 %v8877_v23, %s6215_s17  ;;  %2549 = vrot.lane.b32.xlu0 %v8880_v29, %s6215_s17  ;;  %v2376_v23 = vrot.slane %v8632_v1, 2  ;;  %v2386_v29 = vrot.slane %v8678_v35, 2  ;;  %v2391_v35 = vrot.slane %v8700_v57, 2  ;;  %v2396_v57 = vrot.slane %v8721_v12, 2 }
 0x37f   : > { %v8929_v54 = vsel %vm565_vm4, %v2369_v61, %v2371_v8  ;;  %v8932_v41 = vsel %vm565_vm4, %v2368_v18, %v2369_v61  ;;  %v8945_v8 = vsel %vm565_vm4, %v2373_v6, %v2374_v49  ;;  %v2379_v61 = vrot.slane %v8669_v2, 2 }
 0x380   : > { %v8942_v40 = vsel %vm565_vm4, %v2374_v49, %v2376_v23  ;;  %v2378_v18 = vrot.slane %v8672_v0, 2  ;;  %v2384_v49 = vrot.slane %v8691_v30, 2  ;;  %v2383_v6 = vrot.slane %v8693_v24, 2 }
 0x381   : > { %12416 = vst [vmem:[#allocation62_spill] sm:$0xff] %v8942_v40  ;;  %v8955_v1 = vsel %vm565_vm4, %v2379_v61, %v2381_v47 }
 0x382   : > { %2555 = vrot.lane.b32.xlu1 %v8890_v51, %s6215_s17  ;;  %2553 = vrot.lane.b32.xlu0 %v8893_v19, %s6215_s17  ;;  %12417 = vst [vmem:[#allocation90_spill] sm:$0xff] %v8955_v1  ;;  %v8958_v23 = vsel %vm565_vm4, %v2378_v18, %v2379_v61  ;;  %v8972_v47 = vsel %vm565_vm4, %v2384_v49, %v2386_v29  ;;  %v2389_v18 = vrot.slane %v8713_v11, 2 }
 0x383   : > { %12420 = vst [vmem:[#allocation114_spill] sm:$0xff] %v8972_v47  ;;  %v8975_v61 = vsel %vm565_vm4, %v2383_v6, %v2384_v49  ;;  %v2394_v49 = vrot.slane %v8734_v48, 2  ;;  %v2393_v6 = vrot.slane %v8736_v10, 2 }
 0x384   : > { %v8985_v52 = vsel %vm565_vm4, %v2389_v18, %v2391_v35 }
 0x385   : > { %12421 = vst [vmem:[#allocation134_spill] sm:$0xff] %v8985_v52  ;;  %v9002_v35 = vsel %vm565_vm4, %v2394_v49, %v2396_v57 }
 0x386   : > { %2559 = vrot.lane.b32.xlu1 %v8903_v28, %s6215_s17  ;;  %2557 = vrot.lane.b32.xlu0 %v8906_v38, %s6215_s17  ;;  %12424 = vst [vmem:[#allocation140_spill] sm:$0xff] %v9002_v35 }
 0x38a   : > { %2563 = vrot.lane.b32.xlu1 %v8916_v4, %s6215_s17  ;;  %2561 = vrot.lane.b32.xlu0 %v8919_v7, %s6215_s17 }
 0x38e   : > { %2567 = vrot.lane.b32.xlu1 %v8929_v54, %s6215_s17  ;;  %2565 = vrot.lane.b32.xlu0 %v8932_v41, %s6215_s17 }
 0x392   : > { %2571 = vrot.lane.b32.xlu1 %v8942_v40, %s6215_s17  ;;  %2569 = vrot.lane.b32.xlu0 %v8945_v8, %s6215_s17  ;;  %v2388_v40 = vrot.slane %v8715_v45, 2 }
 0x394   : > { %v8988_v29 = vsel %vm565_vm4, %v2388_v40, %v2389_v18  ;;  %v9005_v40 = vsel %vm565_vm4, %v2393_v6, %v2394_v49  ;;  %v2399_v18 = vrot.slane %v8756_v31, 2  ;;  %v2404_v6 = vrot.slane %v8779_v34, 2 }
 0x395   : > { %12422 = vst [vmem:[#allocation63_spill] sm:$0xff] %v8988_v29  ;;  %12425 = vst [vmem:[#allocation64_spill] sm:$0xff] %v9005_v40 }
 0x396   : > { %2575 = vrot.lane.b32.xlu1 %v8955_v1, %s6215_s17  ;;  %2573 = vrot.lane.b32.xlu0 %v8958_v23, %s6215_s17 }
 0x39a   : > { %2579 = vrot.lane.b32.xlu1 %v8972_v47, %s6215_s17  ;;  %2577 = vrot.lane.b32.xlu0 %v8975_v61, %s6215_s17  ;;  %v2398_v47 = vrot.slane %v8758_v42, 2 }
 0x39c   : > { %v9022_v49 = vsel %vm565_vm4, %v2398_v47, %v2399_v18  ;;  %v2409_v47 = vrot.slane %v8802_v43, 2 }
 0x39d   : > { %v8992_v5 = vpop.permute.xlu0 %2453  ;;  %v8994_v1 = vpop.permute.xlu1 %2455  ;;  %12428 = vst [vmem:[#allocation113_spill] sm:$0xff] %v9022_v49 }
 0x39e   : > { %12423 = vst [vmem:[#allocation149_spill] sm:$0xff] %v8994_v1  ;;  %2583 = vrot.lane.b32.xlu1 %v8985_v52, %s6215_s17  ;;  %2581 = vrot.lane.b32.xlu0 %v8988_v29, %s6215_s17  ;;  %v2401_v52 = vrot.slane %v8753_v16, 2  ;;  %v2403_v1 = vrot.slane %v8781_v50, 2  ;;  %v2406_v16 = vrot.slane %v8776_v60, 2  ;;  %v2411_v60 = vrot.slane %v8799_v55, 2 }
 0x3a0   : > { %v9019_v57 = vsel %vm565_vm4, %v2399_v18, %v2401_v52  ;;  %v9035_v52 = vsel %vm565_vm4, %v2403_v1, %v2404_v6  ;;  %v2408_v18 = vrot.slane %v8804_v32, 2 }
 0x3a1   : > { %v9014_v29 = vpop.permute.xlu0 %2457  ;;  %v9016_v12 = vpop.permute.xlu1 %2459  ;;  %12427 = vst [vmem:[#allocation95_spill] sm:$0xff] %v9019_v57  ;;  %12430 = vst [vmem:[#allocation138_spill] sm:$0xff] %v9035_v52 }
 0x3a2   : > { %2587 = vrot.lane.b32.xlu1 %v9002_v35, %s6215_s17  ;;  %2585 = vrot.lane.b32.xlu0 %v9005_v40, %s6215_s17  ;;  %12426 = vst [vmem:[#allocation92_spill] sm:$0xff] %v9016_v12  ;;  %v9032_v35 = vsel %vm565_vm4, %v2404_v6, %v2406_v16  ;;  %v9049_v16 = vsel %vm565_vm4, %v2409_v47, %v2411_v60  ;;  %v2414_v6 = vrot.slane %v8825_v46, 2 }
 0x3a3   : > { %12429 = vst [vmem:[#allocation116_spill] sm:$0xff] %v9032_v35  ;;  %12431 = vst [vmem:[#allocation65_spill] sm:$0xff] %v9049_v16  ;;  %v9052_v1 = vsel %vm565_vm4, %v2408_v18, %v2409_v47  ;;  %v2419_v18 = vrot.slane %v8848_v20, 2 }
 0x3a5   : > { %v9039_v40 = vpop.permute.xlu0 %2461  ;;  %v9041_v12 = vpop.permute.xlu1 %2463 }
 0x3a6   : > { %2591 = vrot.lane.b32.xlu1 %v9019_v57, %s6215_s17  ;;  %2589 = vrot.lane.b32.xlu0 %v9022_v49, %s6215_s17  ;;  %v2413_v57 = vrot.slane %v8827_v56, 2  ;;  %v2418_v49 = vrot.slane %v8850_v3, 2 }
 0x3a8   : > { %v9069_v47 = vsel %vm565_vm4, %v2413_v57, %v2414_v6 }
 0x3a9   : > { %v9063_v55 = vpop.permute.xlu1 %2467 }
 0x3aa   : > { %2595 = vrot.lane.b32.xlu1 %v9032_v35, %s6215_s17  ;;  %2593 = vrot.lane.b32.xlu0 %v9035_v52, %s6215_s17  ;;  %v2416_v35 = vrot.slane %v8822_v36, 2  ;;  %v9061_v52 = vpop.permute.xlu0 %2465  ;;  %v2421_v36 = vrot.slane %v8845_v53, 2 }
 0x3ac   : > { %v9066_v60 = vsel %vm565_vm4, %v2414_v6, %v2416_v35  ;;  %v9082_v35 = vsel %vm565_vm4, %v2418_v49, %v2419_v18 }
 0x3ad   : > { %12433 = vst [vmem:[#allocation66_spill] sm:$0xff] %v9082_v35  ;;  %v9086_v6 = vpop.permute.xlu1 %2471 }
 0x3ae   : > { %2599 = vrot.lane.b32.xlu1 %v9049_v16, %s6215_s17  ;;  %2597 = vrot.lane.b32.xlu0 %v9052_v1, %s6215_s17  ;;  %v9079_v16 = vsel %vm565_vm4, %v2419_v18, %v2421_v36  ;;  %v9084_v57 = vpop.permute.xlu0 %2469 }
 0x3af   : > { %12432 = vst [vmem:[#allocation144_spill] sm:$0xff] %v9079_v16 }
 0x3b1   : > { %v9098_v49 = vpop.permute.xlu1 %2475 }
 0x3b2   : > { %2603 = vrot.lane.b32.xlu1 %v9066_v60, %s6215_s17  ;;  %2601 = vrot.lane.b32.xlu0 %v9069_v47, %s6215_s17  ;;  %v9096_v53 = vpop.permute.xlu0 %2473 }
 0x3b5   : > { %v9106_v36 = vpop.permute.xlu1 %2479 }
 0x3b6   : > { %2607 = vrot.lane.b32.xlu1 %v9079_v16, %s6215_s17  ;;  %2605 = vrot.lane.b32.xlu0 %v9082_v35, %s6215_s17  ;;  %v9104_v18 = vpop.permute.xlu0 %2477 }
 0x3ba   : > { %2643 = vrot.lane.b32.xlu1 %v8531_v59, %s6217_s19  ;;  %2641 = vrot.lane.b32.xlu0 %v8534_v63, %s6217_s19  ;;  %v9116_v59 = vpop.permute.xlu0 %2481  ;;  %v9118_v63 = vpop.permute.xlu1 %2483 }
 0x3bb   : > { %12434 = vst [vmem:[#allocation94_spill] sm:$0xff] %v9118_v63 }
 0x3be   : > { %2647 = vrot.lane.b32.xlu1 %v8554_v15, %s6217_s19  ;;  %2645 = vrot.lane.b32.xlu0 %v8557_v37, %s6217_s19  ;;  %v9124_v15 = vpop.permute.xlu0 %2485  ;;  %v9126_v37 = vpop.permute.xlu1 %2487 }
 0x3bf   : > { %12435 = vst [vmem:[#allocation10_spill] sm:$0xff] %v9124_v15  ;;  %12436 = vst [vmem:[#allocation115_spill] sm:$0xff] %v9126_v37 }
 0x3c2   : > { %2651 = vrot.lane.b32.xlu1 %v8577_v14, %s6217_s19  ;;  %2649 = vrot.lane.b32.xlu0 %v8580_v39, %s6217_s19  ;;  %v9136_v16 = vpop.permute.xlu0 %2489  ;;  %v9138_v63 = vpop.permute.xlu1 %2491 }
 0x3c3   : > { %12437 = vst [vmem:[#allocation36_spill] sm:$0xff] %v9136_v16  ;;  %12438 = vst [vmem:[#allocation141_spill] sm:$0xff] %v9138_v63 }
 0x3c6   : > { %2655 = vrot.lane.b32.xlu1 %v8600_v58, %s6217_s19  ;;  %2653 = vrot.lane.b32.xlu0 %v8603_v17, %s6217_s19 }
 0x3c9   : > { %v9144_v37 = vpop.permute.xlu0 %2493  ;;  %v9146_v15 = vpop.permute.xlu1 %2495 }
 0x3ca   : > { %2659 = vrot.lane.b32.xlu1 %v8623_v26, %s6217_s19  ;;  %2657 = vrot.lane.b32.xlu0 %v8626_v22, %s6217_s19  ;;  %12439 = vst [vmem:[#allocation67_spill] sm:$0xff] %v9144_v37  ;;  %12440 = vst [vmem:[#allocation147_spill] sm:$0xff] %v9146_v15 }
 0x3ce   : > { %2663 = vrot.lane.b32.xlu1 %v8646_v27, %s6217_s19  ;;  %2661 = vrot.lane.b32.xlu0 %v8649_v33, %s6217_s19 }
 0x3d0   : > { %v9152_v35 = vpop.permute.xlu0 %2497  ;;  %v9154_v16 = vpop.permute.xlu1 %2499 }
 0x3d1   : > { %12441 = vst [vmem:[#allocation68_spill] sm:$0xff] %v9152_v35  ;;  %12442 = vst [vmem:[#allocation96_spill] sm:$0xff] %v9154_v16 }
 0x3d2   : > { %2667 = vrot.lane.b32.xlu1 %v8669_v2, %s6217_s19  ;;  %2665 = vrot.lane.b32.xlu0 %v8672_v0, %s6217_s19 }
 0x3d6   : > { %2671 = vrot.lane.b32.xlu1 %v8691_v30, %s6217_s19  ;;  %2669 = vrot.lane.b32.xlu0 %v8693_v24, %s6217_s19 }
 0x3d8   : > { %v9160_v63 = vpop.permute.xlu0 %2501  ;;  %v9162_v37 = vpop.permute.xlu1 %2503 }
 0x3d9   : > { %12443 = vst [vmem:[#allocation12_spill] sm:$0xff] %v9160_v63  ;;  %12444 = vst [vmem:[#allocation117_spill] sm:$0xff] %v9162_v37 }
 0x3da   : > { %2675 = vrot.lane.b32.xlu1 %v8713_v11, %s6217_s19  ;;  %2673 = vrot.lane.b32.xlu0 %v8715_v45, %s6217_s19 }
 0x3de   : > { %2679 = vrot.lane.b32.xlu1 %v8734_v48, %s6217_s19  ;;  %2677 = vrot.lane.b32.xlu0 %v8736_v10, %s6217_s19 }
 0x3e0   : > { %v9168_v15 = vpop.permute.xlu0 %2505  ;;  %v9170_v35 = vpop.permute.xlu1 %2507 }
 0x3e1   : > { %12445 = vst [vmem:[#allocation37_spill] sm:$0xff] %v9168_v15  ;;  %12446 = vst [vmem:[#allocation145_spill] sm:$0xff] %v9170_v35 }
 0x3e2   : > { %2683 = vrot.lane.b32.xlu1 %v8756_v31, %s6217_s19  ;;  %2681 = vrot.lane.b32.xlu0 %v8758_v42, %s6217_s19 }
 0x3e6   : > { %2687 = vrot.lane.b32.xlu1 %v8779_v34, %s6217_s19  ;;  %2685 = vrot.lane.b32.xlu0 %v8781_v50, %s6217_s19  ;;  %v3485_v50 = vld [vmem:[%s11678_s3 + $0x40] sm:$0xff] }
 0x3e7   : > { %5970 = vmatprep.subr.mxu1 %v3485_v50  ;;  %5904 = vmatprep.subr.mxu0 %v3485_v50 }
 0x3e8   : > { %v9176_v16 = vpop.permute.xlu0 %2509  ;;  %v9178_v63 = vpop.permute.xlu1 %2511  ;;  %5979 = vmatpush3.msra.mxu1 %v3485_v50  ;;  %5905 = vmatpush3.msra.mxu0 %v3485_v50 }
 0x3e9   : > { %12447 = vst [vmem:[#allocation69_spill] sm:$0xff] %v9176_v16  ;;  %12448 = vst [vmem:[#allocation150_spill] sm:$0xff] %v9178_v63 }
 0x3ea   : > { %2691 = vrot.lane.b32.xlu1 %v8802_v43, %s6217_s19  ;;  %2689 = vrot.lane.b32.xlu0 %v8804_v32, %s6217_s19  ;;  %v3484_v32 = vld [vmem:[%s11678_s3 + $0x38] sm:$0xff] }
 0x3eb   : > { %5971 = vmatprep.subr.mxu1 %v3484_v32  ;;  %5906 = vmatprep.subr.mxu0 %v3484_v32 }
 0x3ec   : > { %v9184_v31 = vpop.permute.xlu0 %2545  ;;  %v9186_v42 = vpop.permute.xlu1 %2547  ;;  %5980 = vmatpush3.msra.mxu1 %v3484_v32  ;;  %5907 = vmatpush3.msra.mxu0 %v3484_v32  ;;  %v3481_v32 = vld [vmem:[%s11678_s3 + $0x20] sm:$0xff] }
 0x3ed   : > { %12449 = vst [vmem:[#allocation70_spill] sm:$0xff] %v9184_v31  ;;  %12450 = vst [vmem:[#allocation11_spill] sm:$0xff] %v9186_v42 }
 0x3ee   : > { %2695 = vrot.lane.b32.xlu1 %v8825_v46, %s6217_s19  ;;  %2693 = vrot.lane.b32.xlu0 %v8827_v56, %s6217_s19  ;;  %v3483_v56 = vld [vmem:[%s11678_s3 + $0x30] sm:$0xff] }
 0x3ef   : > { %5972 = vmatprep.subr.mxu1 %v3483_v56  ;;  %5908 = vmatprep.subr.mxu0 %v3483_v56 }
 0x3f0   : > { %v9195_v34 = vpop.permute.xlu0 %2549  ;;  %v9197_v43 = vpop.permute.xlu1 %2551  ;;  %5981 = vmatpush3.msra.mxu1 %v3483_v56  ;;  %5909 = vmatpush3.msra.mxu0 %v3483_v56  ;;  %v3480_v56 = vld [vmem:[%s11678_s3 + $0x18] sm:$0xff] }
 0x3f2   : > { %2699 = vrot.lane.b32.xlu1 %v8848_v20, %s6217_s19  ;;  %2697 = vrot.lane.b32.xlu0 %v8850_v3, %s6217_s19  ;;  %v3482_v20 = vld [vmem:[%s11678_s3 + $0x28] sm:$0xff] }
 0x3f3   : > { %5973 = vmatprep.subr.mxu1 %v3482_v20  ;;  %5910 = vmatprep.subr.mxu0 %v3482_v20 }
 0x3f4   : > { %v9209_v46 = vpop.permute.xlu0 %2553  ;;  %v9211_v63 = vpop.permute.xlu1 %2555  ;;  %5982 = vmatpush3.msra.mxu1 %v3482_v20  ;;  %5911 = vmatpush3.msra.mxu0 %v3482_v20  ;;  %v3479_v20 = vld [vmem:[%s11678_s3 + $0x10] sm:$0xff] }
 0x3f5   : > { %5974 = vmatprep.subr.mxu1 %v3481_v32  ;;  %5912 = vmatprep.subr.mxu0 %v3481_v32 }
 0x3f6   : > { %2741 = vrot.lane.b32.xlu0 %v8571_v25, %s6219_s18  ;;  %2743 = vrot.lane.b32.xlu1 %v8568_v21, %s6219_s18  ;;  %v12479_v25 = vld [vmem:[#allocation128_spill] sm:$0xff] }
 0x3f7   : > { %5983 = vmatpush3.msra.mxu1 %v3481_v32  ;;  %5913 = vmatpush3.msra.mxu0 %v3481_v32  ;;  %v3478_v32 = vld [vmem:[%s11678_s3 + $0x8] sm:$0xff] }
 0x3f8   : > { %v9220_v3 = vpop.permute.xlu0 %2557  ;;  %v9222_v50 = vpop.permute.xlu1 %2559  ;;  %5975 = vmatprep.subr.mxu1 %v3480_v56  ;;  %5914 = vmatprep.subr.mxu0 %v3480_v56 }
 0x3f9   : > { %5984 = vmatpush3.msra.mxu1 %v3480_v56  ;;  %5915 = vmatpush3.msra.mxu0 %v3480_v56 }
 0x3fa   : > { %2837 = vrot.lane.b32.xlu0 %v8893_v19, %s6220_s26  ;;  %2839 = vrot.lane.b32.xlu1 %v8890_v51, %s6220_s26  ;;  %v12476_v19 = vld [vmem:[#allocation58_spill] sm:$0xff] }
 0x3fb   : > { %5976 = vmatprep.subr.mxu1 %v3479_v20  ;;  %5916 = vmatprep.subr.mxu0 %v3479_v20 }
 0x3fc   : > { %v9234_v16 = vpop.permute.xlu0 %2561  ;;  %v9236_v35 = vpop.permute.xlu1 %2563  ;;  %5985 = vmatpush3.msra.mxu1 %v3479_v20  ;;  %5917 = vmatpush3.msra.mxu0 %v3479_v20 }
 0x3fd   : > { %5977 = vmatprep.subr.mxu1 %v3478_v32  ;;  %5918 = vmatprep.subr.mxu0 %v3478_v32 }
 0x3fe   : > { %2933 = vrot.lane.b32.xlu0 %v8580_v39, %s6221_s11  ;;  %2935 = vrot.lane.b32.xlu1 %v8577_v14, %s6221_s11  ;;  %v3477_v14 = vld [vmem:[%s11678_s3] sm:$0xff] }
 0x3ff   : > { %5986 = vmatpush3.msra.mxu1 %v3478_v32  ;;  %5919 = vmatpush3.msra.mxu0 %v3478_v32 }
 0x400   : > { %v9245_v15 = vpop.permute.xlu0 %2565  ;;  %v9247_v42 = vpop.permute.xlu1 %2567  ;;  %5978 = vmatprep.subr.mxu1 %v3477_v14  ;;  %5920 = vmatprep.subr.mxu0 %v3477_v14 }
 0x401   : > { %5987 = vmatpush3.msra.mxu1 %v3477_v14  ;;  %5921 = vmatpush3.msra.mxu0 %v3477_v14 }
 0x402   : > { %3029 = vrot.lane.b32.xlu0 %v8594_v13, %s6222_s14  ;;  %2745 = vrot.lane.b32.xlu1 %v8594_v13, %s6219_s18 }
 0x404   : > { %v9259_v39 = vpop.permute.xlu0 %2569  ;;  %v9261_v56 = vpop.permute.xlu1 %2571 }
 0x406   : > { %3031 = vrot.lane.b32.xlu0 %v8591_v62, %s6222_s14  ;;  %3125 = vrot.lane.b32.xlu1 %v8906_v38, %s6223_s28 }
 0x408   : > { %v9267_v13 = vpop.permute.xlu0 %2573  ;;  %v9269_v20 = vpop.permute.xlu1 %2575 }
 0x40a   : > { %2747 = vrot.lane.b32.xlu0 %v8591_v62, %s6219_s18  ;;  %2841 = vrot.lane.b32.xlu1 %v8906_v38, %s6220_s26 }
 0x40c   : > { %v9275_v32 = vpop.permute.xlu0 %2577  ;;  %v9277_v31 = vpop.permute.xlu1 %2579 }
 0x40d   : > { %12451 = vst [vmem:[#allocation14_spill] sm:$0xff] %v9277_v31 }
 0x40e   : > { %3127 = vrot.lane.b32.xlu0 %v8903_v28, %s6223_s28  ;;  %2843 = vrot.lane.b32.xlu1 %v8903_v28, %s6220_s26 }
 0x410   : > { %v9283_v14 = vpop.permute.xlu0 %2581  ;;  %v9285_v37 = vpop.permute.xlu1 %2583 }
 0x411   : > { %12452 = vst [vmem:[#allocation118_spill] sm:$0xff] %v9283_v14  ;;  %12453 = vst [vmem:[#allocation38_spill] sm:$0xff] %v9285_v37 }
 0x412   : > { %2937 = vrot.lane.b32.xlu0 %v8603_v17, %s6221_s11  ;;  %2939 = vrot.lane.b32.xlu1 %v8600_v58, %s6221_s11 }
 0x414   : > { %v9291_v62 = vpop.permute.xlu0 %2585  ;;  %v9293_v38 = vpop.permute.xlu1 %2587 }
 0x415   : > { %12454 = vst [vmem:[#allocation148_spill] sm:$0xff] %v9291_v62  ;;  %12455 = vst [vmem:[#allocation71_spill] sm:$0xff] %v9293_v38  ;;  %v12472_v62 = vld [vmem:[#allocation62_spill] sm:$0xff] }
 0x416   : > { %3033 = vrot.lane.b32.xlu0 %v8617_v44, %s6222_s14  ;;  %2749 = vrot.lane.b32.xlu1 %v8617_v44, %s6219_s18 }
 0x418   : > { %v9299_v28 = vpop.permute.xlu0 %2589  ;;  %v9301_v51 = vpop.permute.xlu1 %2591 }
 0x419   : > { %12456 = vst [vmem:[#allocation152_spill] sm:$0xff] %v9299_v28  ;;  %12457 = vst [vmem:[#allocation168_spill] sm:$0xff] %v9301_v51 }
 0x41a   : > { %3035 = vrot.lane.b32.xlu0 %v8614_v9, %s6222_s14  ;;  %3129 = vrot.lane.b32.xlu1 %v8919_v7, %s6223_s28 }
 0x41c   : > { %v9307_v58 = vpop.permute.xlu0 %2593  ;;  %v9309_v17 = vpop.permute.xlu1 %2595 }
 0x41d   : > { %12458 = vst [vmem:[#allocation72_spill] sm:$0xff] %v9307_v58  ;;  %12459 = vst [vmem:[#allocation13_spill] sm:$0xff] %v9309_v17  ;;  %v12471_v17 = vld [vmem:[#allocation57_spill] sm:$0xff] }
 0x41e   : > { %2751 = vrot.lane.b32.xlu0 %v8614_v9, %s6219_s18  ;;  %2845 = vrot.lane.b32.xlu1 %v8919_v7, %s6220_s26 }
 0x420   : > { %v9315_v44 = vpop.permute.xlu0 %2597  ;;  %v9317_v28 = vpop.permute.xlu1 %2599 }
 0x421   : > { %12460 = vst [vmem:[#allocation170_spill] sm:$0xff] %v9315_v44  ;;  %12461 = vst [vmem:[#allocation40_spill] sm:$0xff] %v9317_v28  ;;  %v12466_v28 = vld [vmem:[#allocation103_spill] sm:$0xff] }
 0x422   : > { %3131 = vrot.lane.b32.xlu0 %v8916_v4, %s6223_s28  ;;  %2847 = vrot.lane.b32.xlu1 %v8916_v4, %s6220_s26 }
 0x424   : > { %v9323_v51 = vpop.permute.xlu0 %2601  ;;  %v9325_v58 = vpop.permute.xlu1 %2603 }
 0x425   : > { %12462 = vst [vmem:[#allocation16_spill] sm:$0xff] %v9323_v51  ;;  %12463 = vst [vmem:[#allocation119_spill] sm:$0xff] %v9325_v58  ;;  %v12469_v58 = vld [vmem:[#allocation87_spill] sm:$0xff] }
 0x426   : > { %2941 = vrot.lane.b32.xlu0 %v8626_v22, %s6221_s11  ;;  %2943 = vrot.lane.b32.xlu1 %v8623_v26, %s6221_s11 }
 0x428   : > { %v9331_v9 = vpop.permute.xlu0 %2605  ;;  %v9333_v7 = vpop.permute.xlu1 %2607 }
 0x429   : > { %12464 = vst [vmem:[#allocation42_spill] sm:$0xff] %v9331_v9  ;;  %12465 = vst [vmem:[#allocation111_spill] sm:$0xff] %v9333_v7 }
 0x42a   : > { %3037 = vrot.lane.b32.xlu0 %v12466_v28, %s6222_s14  ;;  %2753 = vrot.lane.b32.xlu1 %v12466_v28, %s6219_s18 }
 0x42c   : > { %v9339_v4 = vpop.permute.xlu0 %2641  ;;  %v9341_v51 = vpop.permute.xlu1 %2643 }
 0x42d   : > { %12467 = vst [vmem:[#allocation39_spill] sm:$0xff] %v9339_v4  ;;  %12468 = vst [vmem:[#allocation151_spill] sm:$0xff] %v9341_v51  ;;  %v12470_v4 = vld [vmem:[#allocation106_spill] sm:$0xff] }
 0x42e   : > { %3039 = vrot.lane.b32.xlu0 %v12469_v58, %s6222_s14  ;;  %3133 = vrot.lane.b32.xlu1 %v8932_v41, %s6223_s28 }
 0x430   : > { %v9347_v26 = vpop.permute.xlu0 %2645  ;;  %v9349_v22 = vpop.permute.xlu1 %2647 }
 0x432   : > { %2755 = vrot.lane.b32.xlu0 %v12469_v58, %s6219_s18  ;;  %2849 = vrot.lane.b32.xlu1 %v8932_v41, %s6220_s26 }
 0x434   : > { %v9355_v28 = vpop.permute.xlu0 %2649  ;;  %v9357_v7 = vpop.permute.xlu1 %2651 }
 0x436   : > { %3135 = vrot.lane.b32.xlu0 %v8929_v54, %s6223_s28  ;;  %2851 = vrot.lane.b32.xlu1 %v8929_v54, %s6220_s26 }
 0x438   : > { %v9363_v9 = vpop.permute.xlu0 %2653  ;;  %v9365_v51 = vpop.permute.xlu1 %2655 }
 0x43a   : > { %2945 = vrot.lane.b32.xlu0 %v8649_v33, %s6221_s11  ;;  %2947 = vrot.lane.b32.xlu1 %v8646_v27, %s6221_s11 }
 0x43c   : > { %v9371_v41 = vpop.permute.xlu0 %2657  ;;  %v9373_v58 = vpop.permute.xlu1 %2659 }
 0x43e   : > { %3041 = vrot.lane.b32.xlu0 %v12470_v4, %s6222_s14  ;;  %2757 = vrot.lane.b32.xlu1 %v12470_v4, %s6219_s18 }
 0x440   : > { %v9379_v54 = vpop.permute.xlu0 %2661  ;;  %v9381_v44 = vpop.permute.xlu1 %2663 }
 0x442   : > { %3043 = vrot.lane.b32.xlu0 %v12471_v17, %s6222_s14  ;;  %3137 = vrot.lane.b32.xlu1 %v8945_v8, %s6223_s28 }
 0x444   : > { %v9387_v27 = vpop.permute.xlu0 %2665  ;;  %v9389_v33 = vpop.permute.xlu1 %2667 }
 0x446   : > { %2759 = vrot.lane.b32.xlu0 %v12471_v17, %s6219_s18  ;;  %2853 = vrot.lane.b32.xlu1 %v8945_v8, %s6220_s26 }
 0x448   : > { %v9395_v4 = vpop.permute.xlu0 %2669  ;;  %v9397_v38 = vpop.permute.xlu1 %2671 }
 0x44a   : > { %3139 = vrot.lane.b32.xlu0 %v12472_v62, %s6223_s28  ;;  %2855 = vrot.lane.b32.xlu1 %v12472_v62, %s6220_s26 }
 0x44c   : > { %v9403_v37 = vpop.permute.xlu0 %2673  ;;  %v9405_v14 = vpop.permute.xlu1 %2675 }
 0x44d   : > { %12473 = vst [vmem:[#allocation182_spill] sm:$0xff] %v9405_v14 }
 0x44e   : > { %2949 = vrot.lane.b32.xlu0 %v8672_v0, %s6221_s11  ;;  %2951 = vrot.lane.b32.xlu1 %v8669_v2, %s6221_s11 }
 0x450   : > { %v9411_v8 = vpop.permute.xlu0 %2677  ;;  %v9413_v17 = vpop.permute.xlu1 %2679 }
 0x451   : > { %12474 = vst [vmem:[#allocation73_spill] sm:$0xff] %v9411_v8  ;;  %12475 = vst [vmem:[#allocation154_spill] sm:$0xff] %v9413_v17 }
 0x452   : > { %3045 = vrot.lane.b32.xlu0 %v12476_v19, %s6222_s14  ;;  %2761 = vrot.lane.b32.xlu1 %v12476_v19, %s6219_s18 }
 0x454   : > { %v9419_v62 = vpop.permute.xlu0 %2681  ;;  %v9421_v21 = vpop.permute.xlu1 %2683 }
 0x455   : > { %12477 = vst [vmem:[#allocation169_spill] sm:$0xff] %v9419_v62  ;;  %12478 = vst [vmem:[#allocation15_spill] sm:$0xff] %v9421_v21  ;;  %v12484_v21 = vld [vmem:[#allocation90_spill] sm:$0xff] }
 0x456   : > { %3047 = vrot.lane.b32.xlu0 %v12479_v25, %s6222_s14  ;;  %3141 = vrot.lane.b32.xlu1 %v8958_v23, %s6223_s28 }
 0x458   : > { %v9427_v2 = vpop.permute.xlu0 %2685  ;;  %v9429_v0 = vpop.permute.xlu1 %2687 }
 0x459   : > { %12480 = vst [vmem:[#allocation17_spill] sm:$0xff] %v9427_v2  ;;  %12481 = vst [vmem:[#allocation172_spill] sm:$0xff] %v9429_v0  ;;  %v12491_v0 = vld [vmem:[#allocation114_spill] sm:$0xff] }
 0x45a   : > { %2763 = vrot.lane.b32.xlu0 %v12479_v25, %s6219_s18  ;;  %2857 = vrot.lane.b32.xlu1 %v8958_v23, %s6220_s26 }
 0x45c   : > { %v9435_v19 = vpop.permute.xlu0 %2689  ;;  %v9437_v62 = vpop.permute.xlu1 %2691 }
 0x45d   : > { %12482 = vst [vmem:[#allocation45_spill] sm:$0xff] %v9435_v19  ;;  %12483 = vst [vmem:[#allocation18_spill] sm:$0xff] %v9437_v62  ;;  %v12489_v62 = vld [vmem:[#allocation86_spill] sm:$0xff]  ;;  %v6086_v19 = vld [vmem:[#allocation3 + $0x18] sm:$0xff] }
 0x45e   : > { %3143 = vrot.lane.b32.xlu0 %v12484_v21, %s6223_s28  ;;  %2859 = vrot.lane.b32.xlu1 %v12484_v21, %s6220_s26 }
 0x460   : > { %v9443_v17 = vpop.permute.xlu0 %2693  ;;  %v9445_v2 = vpop.permute.xlu1 %2695 }
 0x461   : > { %12485 = vst [vmem:[#allocation120_spill] sm:$0xff] %v9443_v17  ;;  %12486 = vst [vmem:[#allocation46_spill] sm:$0xff] %v9445_v2  ;;  %v12490_v2 = vld [vmem:[#allocation139_spill] sm:$0xff] }
 0x462   : > { %2953 = vrot.lane.b32.xlu0 %v8693_v24, %s6221_s11  ;;  %2955 = vrot.lane.b32.xlu1 %v8691_v30, %s6221_s11 }
 0x464   : > { %v9451_v25 = vpop.permute.xlu0 %2697  ;;  %v9453_v23 = vpop.permute.xlu1 %2699 }
 0x465   : > { %12487 = vst [vmem:[#allocation135_spill] sm:$0xff] %v9451_v25  ;;  %12488 = vst [vmem:[#allocation41_spill] sm:$0xff] %v9453_v23 }
 0x466   : > { %3049 = vrot.lane.b32.xlu0 %v12489_v62, %s6222_s14  ;;  %2765 = vrot.lane.b32.xlu1 %v12489_v62, %s6219_s18  ;;  %v3219_v62 = vsel %vm1472_vm3, %v6086_v19, %v8992_v5 }
 0x467   : > { %v3251_v8 = vsel %vm1538_vm7, %v3219_v62, %v9195_v34  ;;  %v12492_v62 = vld [vmem:[#allocation149_spill] sm:$0xff] }
 0x468   : > { %v2742_v21 = vpop.permute.xlu0 %2741  ;;  %v2744_v17 = vpop.permute.xlu1 %2743 }
 0x46a   : > { %3051 = vrot.lane.b32.xlu0 %v12490_v2, %s6222_s14  ;;  %3145 = vrot.lane.b32.xlu1 %v8975_v61, %s6223_s28 }
 0x46c   : > { %v2838_v24 = vpop.permute.xlu0 %2837  ;;  %v2840_v30 = vpop.permute.xlu1 %2839 }
 0x46e   : > { %2767 = vrot.lane.b32.xlu0 %v12490_v2, %s6219_s18  ;;  %2861 = vrot.lane.b32.xlu1 %v8975_v61, %s6220_s26  ;;  %v3283_v2 = vsel %vm1604_vm9, %v3251_v8, %v9347_v26 }
 0x46f   : > { %v3315_v31 = vsel %vm1670_vm11, %v3283_v2, %v2742_v21  ;;  %v6087_v21 = vld [vmem:[#allocation3 + $0x20] sm:$0xff] }
 0x470   : > { %v2934_v23 = vpop.permute.xlu0 %2933  ;;  %v2936_v25 = vpop.permute.xlu1 %2935  ;;  %v3348_v5 = vsel %vm3345_vm14, %v3315_v31, %v2838_v24  ;;  %v3220_v31 = vsel %vm1472_vm3, %v6087_v21, %v12492_v62  ;;  %v12493_v24 = vld [vmem:[#allocation89_spill] sm:$0xff]  ;;  %v9511_v62 = vld [vmem:[#allocation3 + $0x30] sm:$0xff] }
 0x471   : > { %v3381_v34 = vsel %vm3378_vm15, %v3348_v5, %v2934_v23 }
 0x472   : > { %3147 = vrot.lane.b32.xlu0 %v12491_v0, %s6223_s28  ;;  %2863 = vrot.lane.b32.xlu1 %v12491_v0, %s6220_s26 }
 0x474   : > { %v3030_v61 = vpop.permute.xlu0 %3029  ;;  %v2746_v14 = vpop.permute.xlu1 %2745 }
 0x475   : > { %v3414_v0 = vsel %vm3411_vm0, %v3381_v34, %v3030_v61  ;;  %v12494_v34 = vld [vmem:[#allocation131_spill] sm:$0xff] }
 0x476   : > { %2957 = vrot.lane.b32.xlu0 %v8715_v45, %s6221_s11  ;;  %2959 = vrot.lane.b32.xlu1 %v8713_v11, %s6221_s11  ;;  %v3252_v11 = vsel %vm1538_vm7, %v3220_v31, %v9197_v43 }
 0x477   : > { %v3284_v45 = vsel %vm1604_vm9, %v3252_v11, %v9349_v22 }
 0x478   : > { %v3032_v26 = vpop.permute.xlu0 %3031  ;;  %v3126_v8 = vpop.permute.xlu1 %3125  ;;  %v3316_v61 = vsel %vm1670_vm11, %v3284_v45, %v2744_v17 }
 0x479   : > { %v3447_v19 = vsel %vm3444_vm1, %v3414_v0, %v3126_v8  ;;  %v3349_v5 = vsel %vm3345_vm14, %v3316_v61, %v2840_v30  ;;  %v12495_v0 = vld [vmem:[#allocation63_spill] sm:$0xff] }
 0x47a   : > { %3053 = vrot.lane.b32.xlu0 %v12493_v24, %s6222_s14  ;;  %2769 = vrot.lane.b32.xlu1 %v12493_v24, %s6219_s18  ;;  %v3382_v8 = vsel %vm3378_vm15, %v3349_v5, %v2936_v25  ;;  %v3221_v25 = vsel %vm1472_vm3, %v9511_v62, %v9014_v29 }
 0x47b   : > { %5925 = vmatprep.mubr.msk.f32.mxu1 %vm3493_vm5, %v3447_v19  ;;  %v3415_v43 = vsel %vm3411_vm0, %v3382_v8, %v3032_v26  ;;  %v12496_v26 = vld [vmem:[#allocation134_spill] sm:$0xff]  ;;  %v3253_v31 = vsel %vm1538_vm7, %v3221_v25, %v9209_v46  ;;  %v9533_v8 = vld [vmem:[#allocation3 + $0x38] sm:$0xff] }
 0x47c   : > { %v2748_v23 = vpop.permute.xlu0 %2747  ;;  %v2842_v2 = vpop.permute.xlu1 %2841  ;;  %v3285_v24 = vsel %vm1604_vm9, %v3253_v31, %v9355_v28  ;;  %v12500_v31 = vld [vmem:[#allocation64_spill] sm:$0xff] }
 0x47d   : > { %v3317_v61 = vsel %vm1670_vm11, %v3285_v24, %v2746_v14 }
 0x47e   : > { %3055 = vrot.lane.b32.xlu0 %v12494_v34, %s6222_s14  ;;  %3149 = vrot.lane.b32.xlu1 %v12495_v0, %s6223_s28  ;;  %v3350_v5 = vsel %vm3345_vm14, %v3317_v61, %v2842_v2  ;;  %v12498_v2 = vld [vmem:[#allocation109_spill] sm:$0xff] }
 0x480   : > { %v3128_v19 = vpop.permute.xlu0 %3127  ;;  %v2844_v21 = vpop.permute.xlu1 %2843 }
 0x481   : > { %v3448_v22 = vsel %vm3444_vm1, %v3415_v43, %v3128_v19  ;;  %v12497_v43 = vld [vmem:[#allocation92_spill] sm:$0xff] }
 0x482   : > { %2771 = vrot.lane.b32.xlu0 %v12494_v34, %s6219_s18  ;;  %2865 = vrot.lane.b32.xlu1 %v12495_v0, %s6220_s26  ;;  %v3222_v14 = vsel %vm1472_vm3, %v9533_v8, %v12497_v43 }
 0x483   : > { %5926 = vmatmul.mubr.msk.f32.vlgmr.msra.gmra.mxu1 %vm3493_vm5, %v3448_v22 }
 0x484   : > { %v2938_v17 = vpop.permute.xlu0 %2937  ;;  %v2940_v30 = vpop.permute.xlu1 %2939 }
 0x485   : > { %v3383_v29 = vsel %vm3378_vm15, %v3350_v5, %v2938_v17  ;;  %v6090_v5 = vld [vmem:[#allocation3 + $0x48] sm:$0xff] }
 0x486   : > { %3151 = vrot.lane.b32.xlu0 %v12496_v26, %s6223_s28  ;;  %2867 = vrot.lane.b32.xlu1 %v12496_v26, %s6220_s26  ;;  %v12499_v26 = vld [vmem:[#allocation105_spill] sm:$0xff] }
 0x488   : > { %v3034_v11 = vpop.permute.xlu0 %3033  ;;  %v2750_v45 = vpop.permute.xlu1 %2749 }
 0x489   : > { %v3416_v34 = vsel %vm3411_vm0, %v3383_v29, %v3034_v11  ;;  %v12501_v29 = vld [vmem:[#allocation140_spill] sm:$0xff] }
 0x48a   : > { %2961 = vrot.lane.b32.xlu0 %v8736_v10, %s6221_s11  ;;  %2963 = vrot.lane.b32.xlu1 %v8734_v48, %s6221_s11  ;;  %v3254_v48 = vsel %vm1538_vm7, %v3222_v14, %v9211_v63 }
 0x48b   : > { %v3286_v10 = vsel %vm1604_vm9, %v3254_v48, %v9357_v7 }
 0x48c   : > { %v3036_v46 = vpop.permute.xlu0 %3035  ;;  %v3130_v0 = vpop.permute.xlu1 %3129  ;;  %v3318_v17 = vsel %vm1670_vm11, %v3286_v10, %v2748_v23 }
 0x48d   : > { %v3449_v28 = vsel %vm3444_vm1, %v3416_v34, %v3130_v0  ;;  %v3351_v25 = vsel %vm3345_vm14, %v3318_v17, %v2844_v21  ;;  %v6093_v17 = vld [vmem:[#allocation3 + $0x50] sm:$0xff] }
 0x48e   : > { %3057 = vrot.lane.b32.xlu0 %v12498_v2, %s6222_s14  ;;  %2773 = vrot.lane.b32.xlu1 %v12498_v2, %s6219_s18  ;;  %v3384_v24 = vsel %vm3378_vm15, %v3351_v25, %v2940_v30  ;;  %v3223_v30 = vsel %vm1472_vm3, %v6090_v5, %v9039_v40  ;;  %v9573_v2 = vld [vmem:[#allocation3 + $0x108] sm:$0xff]  ;;  %v9577_v40 = vld [vmem:[#allocation3 + $0x110] sm:$0xff] }
 0x48f   : > { %5928 = vmatprep.mubr.msk.f32.mxu1 %vm3493_vm5, %v3449_v28  ;;  %v3417_v63 = vsel %vm3411_vm0, %v3384_v24, %v3036_v46  ;;  %v3255_v34 = vsel %vm1538_vm7, %v3223_v30, %v9220_v3  ;;  %v12502_v25 = vld [vmem:[#allocation59_spill] sm:$0xff] }
 0x490   : > { %v2752_v19 = vpop.permute.xlu0 %2751  ;;  %v2846_v22 = vpop.permute.xlu1 %2845  ;;  %v3287_v46 = vsel %vm1604_vm9, %v3255_v34, %v9363_v9  ;;  %v6094_v34 = vld [vmem:[#allocation3 + $0x60] sm:$0xff] }
 0x491   : > { %v3319_v43 = vsel %vm1670_vm11, %v3287_v46, %v2750_v45  ;;  %v12505_v46 = vld [vmem:[#allocation95_spill] sm:$0xff] }
 0x492   : > { %3059 = vrot.lane.b32.xlu0 %v12499_v26, %s6222_s14  ;;  %3153 = vrot.lane.b32.xlu1 %v12500_v31, %s6223_s28  ;;  %v3352_v14 = vsel %vm3345_vm14, %v3319_v43, %v2846_v22  ;;  %v3224_v22 = vsel %vm1472_vm3, %v6093_v17, %v9041_v12 }
 0x494   : > { %v3132_v11 = vpop.permute.xlu0 %3131  ;;  %v2848_v61 = vpop.permute.xlu1 %2847 }
 0x495   : > { %v3450_v7 = vsel %vm3444_vm1, %v3417_v63, %v3132_v11 }
 0x496   : > { %2775 = vrot.lane.b32.xlu0 %v12499_v26, %s6219_s18  ;;  %2869 = vrot.lane.b32.xlu1 %v12500_v31, %s6220_s26  ;;  %v3256_v26 = vsel %vm1538_vm7, %v3224_v22, %v9222_v50  ;;  %v6097_v22 = vld [vmem:[#allocation3 + $0x68] sm:$0xff] }
 0x497   : > { %5929 = vmatmul.mubr.msk.f32.gmra.mxu1 %vm3493_vm5, %v3450_v7  ;;  %v3288_v31 = vsel %vm1604_vm9, %v3256_v26, %v9365_v51  ;;  %v12503_v7 = vld [vmem:[#allocation130_spill] sm:$0xff]  ;;  %v12506_v26 = vld [vmem:[#allocation133_spill] sm:$0xff] }
 0x498   : > { %v2942_v23 = vpop.permute.xlu0 %2941  ;;  %v2944_v21 = vpop.permute.xlu1 %2943  ;;  %v3320_v11 = vsel %vm1670_vm11, %v3288_v31, %v2752_v19 }
 0x499   : > { %v3385_v3 = vsel %vm3378_vm15, %v3352_v14, %v2942_v23  ;;  %v3353_v12 = vsel %vm3345_vm14, %v3320_v11, %v2848_v61  ;;  %v12504_v23 = vld [vmem:[#allocation113_spill] sm:$0xff] }
 0x49a   : > { %3155 = vrot.lane.b32.xlu0 %v12501_v29, %s6223_s28  ;;  %2871 = vrot.lane.b32.xlu1 %v12501_v29, %s6220_s26  ;;  %v3386_v5 = vsel %vm3378_vm15, %v3353_v12, %v2944_v21  ;;  %v3225_v21 = vsel %vm1472_vm3, %v6094_v34, %v9061_v52  ;;  %v9625_v52 = vld [vmem:[#allocation3 + $0x128] sm:$0xff]  ;;  %v12509_v34 = vld [vmem:[#allocation116_spill] sm:$0xff] }
 0x49c   : > { %v3038_v0 = vpop.permute.xlu0 %3037  ;;  %v2754_v28 = vpop.permute.xlu1 %2753 }
 0x49d   : > { %v3418_v9 = vsel %vm3411_vm0, %v3385_v3, %v3038_v0  ;;  %v3257_v0 = vsel %vm1538_vm7, %v3225_v21, %v9234_v16 }
 0x49e   : > { %2965 = vrot.lane.b32.xlu0 %v9573_v2, %s6221_s11  ;;  %2967 = vrot.lane.b32.xlu1 %v9577_v40, %s6221_s11  ;;  %v3289_v43 = vsel %vm1604_vm9, %v3257_v0, %v9371_v41 }
 0x4a0   : > { %v3040_v48 = vpop.permute.xlu0 %3039  ;;  %v3134_v10 = vpop.permute.xlu1 %3133 }
 0x4a1   : > { %v3451_v45 = vsel %vm3444_vm1, %v3418_v9, %v3134_v10  ;;  %v3419_v50 = vsel %vm3411_vm0, %v3386_v5, %v3040_v48  ;;  %v3321_v9 = vsel %vm1670_vm11, %v3289_v43, %v2754_v28  ;;  %v9621_v10 = vld [vmem:[#allocation3 + $0x120] sm:$0xff] }
 0x4a2   : > { %3061 = vrot.lane.b32.xlu0 %v12502_v25, %s6222_s14  ;;  %2777 = vrot.lane.b32.xlu1 %v12502_v25, %s6219_s18  ;;  %v3226_v25 = vsel %vm1472_vm3, %v6097_v22, %v9063_v55  ;;  %v12508_v5 = vld [vmem:[#allocation138_spill] sm:$0xff] }
 0x4a3   : > { %5931 = vmatprep.mubr.msk.f32.mxu1 %vm3493_vm5, %v3451_v45  ;;  %v3258_v31 = vsel %vm1538_vm7, %v3226_v25, %v9236_v35 }
 0x4a4   : > { %v2756_v24 = vpop.permute.xlu0 %2755  ;;  %v2850_v63 = vpop.permute.xlu1 %2849 }
 0x4a5   : > { %v3354_v48 = vsel %vm3345_vm14, %v3321_v9, %v2850_v63  ;;  %v3290_v63 = vsel %vm1604_vm9, %v3258_v31, %v9373_v58 }
 0x4a6   : > { %3063 = vrot.lane.b32.xlu0 %v12503_v7, %s6222_s14  ;;  %3157 = vrot.lane.b32.xlu1 %v12504_v23, %s6223_s28 }
 0x4a8   : > { %v3136_v30 = vpop.permute.xlu0 %3135  ;;  %v2852_v29 = vpop.permute.xlu1 %2851 }
 0x4a9   : > { %v3452_v51 = vsel %vm3444_vm1, %v3419_v50, %v3136_v30 }
 0x4aa   : > { %2779 = vrot.lane.b32.xlu0 %v12503_v7, %s6219_s18  ;;  %2873 = vrot.lane.b32.xlu1 %v12504_v23, %s6220_s26  ;;  %v3322_v7 = vsel %vm1670_vm11, %v3290_v63, %v2756_v24  ;;  %v12507_v23 = vld [vmem:[#allocation142_spill] sm:$0xff] }
 0x4ab   : > { %5932 = vmatmul.mubr.msk.f32.gmra.mxu1 %vm3493_vm5, %v3452_v51  ;;  %v3355_v55 = vsel %vm3345_vm14, %v3322_v7, %v2852_v29 }
 0x4ac   : > { %v2946_v19 = vpop.permute.xlu0 %2945  ;;  %v2948_v61 = vpop.permute.xlu1 %2947 }
 0x4ad   : > { %v3387_v16 = vsel %vm3378_vm15, %v3354_v48, %v2946_v19  ;;  %v3388_v50 = vsel %vm3378_vm15, %v3355_v55, %v2948_v61  ;;  %v6098_v19 = vld [vmem:[#allocation3 + $0x78] sm:$0xff] }
 0x4ae   : > { %3159 = vrot.lane.b32.xlu0 %v12505_v46, %s6223_s28  ;;  %2875 = vrot.lane.b32.xlu1 %v12505_v46, %s6220_s26  ;;  %v3227_v61 = vsel %vm1472_vm3, %v6098_v19, %v9084_v57  ;;  %v9669_v48 = vld [vmem:[#allocation3 + $0x138] sm:$0xff]  ;;  %v9673_v57 = vld [vmem:[#allocation3 + $0x140] sm:$0xff] }
 0x4af   : > { %v3259_v21 = vsel %vm1538_vm7, %v3227_v61, %v9245_v15  ;;  %v9717_v61 = vld [vmem:[#allocation3 + $0x150] sm:$0xff] }
 0x4b0   : > { %v3042_v14 = vpop.permute.xlu0 %3041  ;;  %v2758_v3 = vpop.permute.xlu1 %2757  ;;  %v3291_v46 = vsel %vm1604_vm9, %v3259_v21, %v9379_v54 }
 0x4b1   : > { %v3420_v41 = vsel %vm3411_vm0, %v3387_v16, %v3042_v14  ;;  %v3323_v14 = vsel %vm1670_vm11, %v3291_v46, %v2758_v3 }
 0x4b2   : > { %2969 = vrot.lane.b32.xlu0 %v9621_v10, %s6221_s11  ;;  %2971 = vrot.lane.b32.xlu1 %v9625_v52, %s6221_s11 }
 0x4b4   : > { %v3044_v45 = vpop.permute.xlu0 %3043  ;;  %v3138_v17 = vpop.permute.xlu1 %3137 }
 0x4b5   : > { %v3453_v28 = vsel %vm3444_vm1, %v3420_v41, %v3138_v17  ;;  %v3421_v35 = vsel %vm3411_vm0, %v3388_v50, %v3044_v45  ;;  %v6101_v45 = vld [vmem:[#allocation3 + $0x80] sm:$0xff]  ;;  %v6102_v50 = vld [vmem:[#allocation3 + $0x90] sm:$0xff] }
 0x4b6   : > { %3065 = vrot.lane.b32.xlu0 %v12506_v26, %s6222_s14  ;;  %2781 = vrot.lane.b32.xlu1 %v12506_v26, %s6219_s18  ;;  %v3228_v17 = vsel %vm1472_vm3, %v6101_v45, %v9086_v6 }
 0x4b7   : > { %5934 = vmatprep.mubr.msk.f32.mxu1 %vm3493_vm5, %v3453_v28  ;;  %v12510_v28 = vld [vmem:[#allocation143_spill] sm:$0xff]  ;;  %v3260_v22 = vsel %vm1538_vm7, %v3228_v17, %v9247_v42 }
 0x4b8   : > { %v2760_v11 = vpop.permute.xlu0 %2759  ;;  %v2854_v12 = vpop.permute.xlu1 %2853  ;;  %v3292_v25 = vsel %vm1604_vm9, %v3260_v22, %v9381_v44 }
 0x4b9   : > { %v3356_v9 = vsel %vm3345_vm14, %v3323_v14, %v2854_v12  ;;  %v3324_v63 = vsel %vm1670_vm11, %v3292_v25, %v2760_v11  ;;  %v12511_v12 = vld [vmem:[#allocation60_spill] sm:$0xff]  ;;  %v12513_v14 = vld [vmem:[#allocation91_spill] sm:$0xff] }
 0x4ba   : > { %3067 = vrot.lane.b32.xlu0 %v12507_v23, %s6222_s14  ;;  %3161 = vrot.lane.b32.xlu1 %v12508_v5, %s6223_s28 }
 0x4bc   : > { %v3140_v30 = vpop.permute.xlu0 %3139  ;;  %v2856_v51 = vpop.permute.xlu1 %2855 }
 0x4bd   : > { %v3454_v58 = vsel %vm3444_vm1, %v3421_v35, %v3140_v30  ;;  %v3357_v6 = vsel %vm3345_vm14, %v3324_v63, %v2856_v51  ;;  %v3229_v35 = vsel %vm1472_vm3, %v6102_v50, %v9096_v53  ;;  %v12512_v30 = vld [vmem:[#allocation65_spill] sm:$0xff]  ;;  %v12515_v63 = vld [vmem:[#allocation84_spill] sm:$0xff] }
 0x4be   : > { %2783 = vrot.lane.b32.xlu0 %v12507_v23, %s6219_s18  ;;  %2877 = vrot.lane.b32.xlu1 %v12508_v5, %s6220_s26  ;;  %v3261_v51 = vsel %vm1538_vm7, %v3229_v35, %v9259_v39  ;;  %v9721_v53 = vld [vmem:[#allocation3 + $0x158] sm:$0xff]  ;;  %v12516_v35 = vld [vmem:[#allocation55_spill] sm:$0xff] }
 0x4bf   : > { %5935 = vmatmul.mubr.msk.f32.gmra.mxu1 %vm3493_vm5, %v3454_v58 }
 0x4c0   : > { %v2950_v24 = vpop.permute.xlu0 %2949  ;;  %v2952_v29 = vpop.permute.xlu1 %2951 }
 0x4c1   : > { %v3389_v15 = vsel %vm3378_vm15, %v3356_v9, %v2950_v24  ;;  %v3390_v7 = vsel %vm3378_vm15, %v3357_v6, %v2952_v29 }
 0x4c2   : > { %3163 = vrot.lane.b32.xlu0 %v12509_v34, %s6223_s28  ;;  %2879 = vrot.lane.b32.xlu1 %v12509_v34, %s6220_s26 }
 0x4c4   : > { %v3046_v0 = vpop.permute.xlu0 %3045  ;;  %v2762_v43 = vpop.permute.xlu1 %2761 }
 0x4c5   : > { %v3422_v54 = vsel %vm3411_vm0, %v3389_v15, %v3046_v0  ;;  %v6105_v0 = vld [vmem:[#allocation3 + $0x98] sm:$0xff] }
 0x4c6   : > { %2973 = vrot.lane.b32.xlu0 %v9669_v48, %s6221_s11  ;;  %2975 = vrot.lane.b32.xlu1 %v9673_v57, %s6221_s11 }
 0x4c8   : > { %v3048_v16 = vpop.permute.xlu0 %3047  ;;  %v3142_v41 = vpop.permute.xlu1 %3141 }
 0x4c9   : > { %v3455_v3 = vsel %vm3444_vm1, %v3422_v54, %v3142_v41  ;;  %v3423_v42 = vsel %vm3411_vm0, %v3390_v7, %v3048_v16 }
 0x4ca   : > { %3069 = vrot.lane.b32.xlu0 %v12510_v28, %s6222_s14  ;;  %2785 = vrot.lane.b32.xlu1 %v12510_v28, %s6219_s18 }
 0x4cb   : > { %5937 = vmatprep.mubr.msk.f32.mxu1 %vm3493_vm5, %v3455_v3  ;;  %v12514_v3 = vld [vmem:[#allocation88_spill] sm:$0xff] }
 0x4cc   : > { %v2764_v26 = vpop.permute.xlu0 %2763  ;;  %v2858_v31 = vpop.permute.xlu1 %2857 }
 0x4ce   : > { %3071 = vrot.lane.b32.xlu0 %v12511_v12, %s6222_s14  ;;  %3165 = vrot.lane.b32.xlu1 %v9052_v1, %s6223_s28 }
 0x4d0   : > { %v3144_v55 = vpop.permute.xlu0 %3143  ;;  %v2860_v23 = vpop.permute.xlu1 %2859 }
 0x4d1   : > { %v3456_v44 = vsel %vm3444_vm1, %v3423_v42, %v3144_v55 }
 0x4d2   : > { %2787 = vrot.lane.b32.xlu0 %v12511_v12, %s6219_s18  ;;  %2881 = vrot.lane.b32.xlu1 %v9052_v1, %s6220_s26  ;;  %v3293_v1 = vsel %vm1604_vm9, %v3261_v51, %v9387_v27 }
 0x4d3   : > { %5938 = vmatmul.mubr.msk.f32.gmra.mxu1 %vm3493_vm5, %v3456_v44  ;;  %v3325_v29 = vsel %vm1670_vm11, %v3293_v1, %v2762_v43  ;;  %v3230_v43 = vsel %vm1472_vm3, %v6105_v0, %v9098_v49 }
 0x4d4   : > { %v2954_v11 = vpop.permute.xlu0 %2953  ;;  %v2956_v5 = vpop.permute.xlu1 %2955  ;;  %v3358_v19 = vsel %vm3345_vm14, %v3325_v29, %v2858_v31  ;;  %v3262_v9 = vsel %vm1538_vm7, %v3230_v43, %v9261_v56  ;;  %v9787_v29 = vld [vmem:[#allocation3 + $0x170] sm:$0xff]  ;;  %v6110_v43 = vld [vmem:[#allocation3 + $0xc0] sm:$0xff] }
 0x4d5   : > { %v3391_v39 = vsel %vm3378_vm15, %v3358_v19, %v2954_v11  ;;  %v3294_v15 = vsel %vm1604_vm9, %v3262_v9, %v9389_v33  ;;  %v12518_v19 = vld [vmem:[#allocation112_spill] sm:$0xff] }
 0x4d6   : > { %3167 = vrot.lane.b32.xlu0 %v12512_v30, %s6223_s28  ;;  %2883 = vrot.lane.b32.xlu1 %v12512_v30, %s6220_s26  ;;  %v3326_v41 = vsel %vm1670_vm11, %v3294_v15, %v2764_v26  ;;  %v6106_v26 = vld [vmem:[#allocation3 + $0xa8] sm:$0xff]  ;;  %v12520_v9 = vld [vmem:[#allocation108_spill] sm:$0xff] }
 0x4d7   : > { %v3359_v49 = vsel %vm3345_vm14, %v3326_v41, %v2860_v23  ;;  %v3231_v31 = vsel %vm1472_vm3, %v6106_v26, %v9104_v18  ;;  %v9767_v18 = vld [vmem:[#allocation3 + $0x168] sm:$0xff]  ;;  %v12524_v26 = vld [vmem:[#allocation182_spill] sm:$0xff] }
 0x4d8   : > { %v3050_v58 = vpop.permute.xlu0 %3049  ;;  %v2766_v24 = vpop.permute.xlu1 %2765  ;;  %v3392_v45 = vsel %vm3378_vm15, %v3359_v49, %v2956_v5  ;;  %v3263_v6 = vsel %vm1538_vm7, %v3231_v31, %v9267_v13  ;;  %v6108_v5 = vld [vmem:[#allocation3 + $0xb0] sm:$0xff] }
 0x4d9   : > { %v3424_v27 = vsel %vm3411_vm0, %v3391_v39, %v3050_v58  ;;  %v3232_v50 = vsel %vm1472_vm3, %v6108_v5, %v9106_v36 }
 0x4da   : > { %2977 = vrot.lane.b32.xlu0 %v9717_v61, %s6221_s11  ;;  %2979 = vrot.lane.b32.xlu1 %v9721_v53, %s6221_s11  ;;  %v3264_v30 = vsel %vm1538_vm7, %v3232_v50, %v9269_v20  ;;  %v6112_v50 = vld [vmem:[#allocation3 + $0xd8] sm:$0xff] }
 0x4db   : > { %v3296_v51 = vsel %vm1604_vm9, %v3264_v30, %v9397_v38  ;;  %v12528_v30 = vld [vmem:[#allocation56_spill] sm:$0xff] }
 0x4dc   : > { %v3052_v34 = vpop.permute.xlu0 %3051  ;;  %v3146_v21 = vpop.permute.xlu1 %3145 }
 0x4dd   : > { %v3457_v46 = vsel %vm3444_vm1, %v3424_v27, %v3146_v21  ;;  %v3425_v56 = vsel %vm3411_vm0, %v3392_v45, %v3052_v34  ;;  %v12519_v21 = vld [vmem:[#allocation132_spill] sm:$0xff] }
 0x4de   : > { %3073 = vrot.lane.b32.xlu0 %v12513_v14, %s6222_s14  ;;  %2789 = vrot.lane.b32.xlu1 %v12513_v14, %s6219_s18  ;;  %v3233_v14 = vsel %vm1472_vm3, %v6110_v43, %v9116_v59  ;;  %v12521_v59 = vld [vmem:[#allocation66_spill] sm:$0xff] }
 0x4df   : > { %5940 = vmatprep.mubr.msk.f32.mxu1 %vm3493_vm5, %v3457_v46  ;;  %v3265_v15 = vsel %vm1538_vm7, %v3233_v14, %v9275_v32 }
 0x4e0   : > { %v2768_v54 = vpop.permute.xlu0 %2767  ;;  %v2862_v16 = vpop.permute.xlu1 %2861 }
 0x4e2   : > { %3075 = vrot.lane.b32.xlu0 %v12514_v3, %s6222_s14  ;;  %3169 = vrot.lane.b32.xlu1 %v9069_v47, %s6223_s28 }
 0x4e4   : > { %v3148_v17 = vpop.permute.xlu0 %3147  ;;  %v2864_v28 = vpop.permute.xlu1 %2863 }
 0x4e5   : > { %v3458_v33 = vsel %vm3444_vm1, %v3425_v56, %v3148_v17  ;;  %v6111_v17 = vld [vmem:[#allocation3 + $0xc8] sm:$0xff] }
 0x4e6   : > { %2791 = vrot.lane.b32.xlu0 %v12514_v3, %s6219_s18  ;;  %2885 = vrot.lane.b32.xlu1 %v9069_v47, %s6220_s26  ;;  %v3295_v47 = vsel %vm1604_vm9, %v3263_v6, %v9395_v4 }
 0x4e7   : > { %5941 = vmatmul.mubr.msk.f32.gmra.mxu1 %vm3493_vm5, %v3458_v33  ;;  %v3327_v42 = vsel %vm1670_vm11, %v3295_v47, %v2766_v24  ;;  %v3328_v24 = vsel %vm1670_vm11, %v3296_v51, %v2768_v54  ;;  %v3297_v54 = vsel %vm1604_vm9, %v3265_v15, %v9403_v37  ;;  %v12529_v51 = vld [vmem:[#allocation137_spill] sm:$0xff] }
 0x4e8   : > { %v2958_v22 = vpop.permute.xlu0 %2957  ;;  %v2960_v25 = vpop.permute.xlu1 %2959  ;;  %v3360_v55 = vsel %vm3345_vm14, %v3327_v42, %v2862_v16  ;;  %v3361_v36 = vsel %vm3345_vm14, %v3328_v24, %v2864_v28  ;;  %v12522_v28 = vld [vmem:[#allocation94_spill] sm:$0xff]  ;;  %v12526_v42 = vld [vmem:[#allocation144_spill] sm:$0xff] }
 0x4e9   : > { %v3393_v23 = vsel %vm3378_vm15, %v3360_v55, %v2958_v22  ;;  %v3394_v20 = vsel %vm3378_vm15, %v3361_v36, %v2960_v25  ;;  %v3234_v33 = vsel %vm1472_vm3, %v6111_v17, %v12522_v28  ;;  %v12523_v22 = vld [vmem:[#allocation14_spill] sm:$0xff]  ;;  %v12531_v36 = vld [vmem:[#allocation73_spill] sm:$0xff] }
 0x4ea   : > { %3171 = vrot.lane.b32.xlu0 %v9066_v60, %s6223_s28  ;;  %2737 = vrot.lane.b32.xlu1 %v12515_v63, %s6219_s18  ;;  %v3266_v25 = vsel %vm1538_vm7, %v3234_v33, %v12523_v22 }
 0x4eb   : > { %v3298_v31 = vsel %vm1604_vm9, %v3266_v25, %v12524_v26 }
 0x4ec   : > { %v3054_v12 = vpop.permute.xlu0 %3053  ;;  %v2770_v7 = vpop.permute.xlu1 %2769 }
 0x4ed   : > { %v3426_v13 = vsel %vm3411_vm0, %v3393_v23, %v3054_v12  ;;  %v3329_v49 = vsel %vm1670_vm11, %v3297_v54, %v2770_v7  ;;  %v12525_v7 = vld [vmem:[#allocation136_spill] sm:$0xff]  ;;  %v6113_v54 = vld [vmem:[#allocation3 + $0xe0] sm:$0xff] }
 0x4ee   : > { %2887 = vrot.lane.b32.xlu0 %v9066_v60, %s6220_s26  ;;  %2981 = vrot.lane.b32.xlu1 %v9767_v18, %s6221_s11  ;;  %v12517_v60 = vld [vmem:[#allocation61_spill] sm:$0xff] }
 0x4f0   : > { %v3056_v44 = vpop.permute.xlu0 %3055  ;;  %v3150_v4 = vpop.permute.xlu1 %3149 }
 0x4f1   : > { %v3459_v11 = vsel %vm3444_vm1, %v3426_v13, %v3150_v4  ;;  %v3427_v39 = vsel %vm3411_vm0, %v3394_v20, %v3056_v44  ;;  %v2209_v4 = vld [vmem:[#allocation3 + $0x180] sm:$0xff] }
 0x4f2   : > { %2739 = vrot.lane.b32.xlu0 %v12516_v35, %s6219_s18  ;;  %2833 = vrot.lane.b32.xlu1 %v12517_v60, %s6220_s26  ;;  %v12527_v35 = vld [vmem:[#allocation10_spill] sm:$0xff]  ;;  %v2431_v28 = vrot.slane %v2209_v4, 2 }
 0x4f3   : > { %5943 = vmatprep.mubr.msk.f32.mxu1 %vm3493_vm5, %v3459_v11  ;;  %v3235_v60 = vsel %vm1472_vm3, %v6112_v50, %v12527_v35 }
 0x4f4   : > { %v2772_v1 = vpop.permute.xlu0 %2771  ;;  %v2866_v58 = vpop.permute.xlu1 %2865 }
 0x4f5   : > { %v3362_v3 = vsel %vm3345_vm14, %v3329_v49, %v2866_v58  ;;  %v3330_v47 = vsel %vm1670_vm11, %v3298_v31, %v2772_v1  ;;  %v2210_v1 = vld [vmem:[#allocation3 + $0x188] sm:$0xff]  ;;  %v12530_v58 = vld [vmem:[#allocation118_spill] sm:$0xff] }
 0x4f6   : > { %2983 = vrot.lane.b32.xlu0 %v9787_v29, %s6221_s11  ;;  %3077 = vrot.lane.b32.xlu1 %v12518_v19, %s6222_s14  ;;  %v3267_v24 = vsel %vm1538_vm7, %v3235_v60, %v12530_v58  ;;  %v12533_v49 = vld [vmem:[#allocation146_spill] sm:$0xff]  ;;  %v2432_v33 = vrot.slane %v2210_v1, 2 }
 0x4f8   : > { %v3152_v27 = vpop.permute.xlu0 %3151  ;;  %v2868_v38 = vpop.permute.xlu1 %2867 }
 0x4f9   : > { %v3460_v34 = vsel %vm3444_vm1, %v3427_v39, %v3152_v27  ;;  %v3363_v12 = vsel %vm3345_vm14, %v3330_v47, %v2868_v38  ;;  %v2426_v38 = vrot.slane %v2209_v4, 1 }
 0x4fa   : > { %2793 = vrot.lane.b32.xlu0 %v12518_v19, %s6219_s18  ;;  %2835 = vrot.lane.b32.xlu1 %v12519_v21, %s6220_s26  ;;  %v3299_v19 = vsel %vm1604_vm9, %v3267_v24, %v12531_v36 }
 0x4fb   : > { %5944 = vmatmul.mubr.msk.f32.gmra.mxu1 %vm3493_vm5, %v3460_v34  ;;  %v2427_v34 = vrot.slane %v2210_v1, 1 }
 0x4fc   : > { %v2962_v46 = vpop.permute.xlu0 %2961  ;;  %v2964_v0 = vpop.permute.xlu1 %2963 }
 0x4fd   : > { %v2428_v15 = vsel %vm484_vm2, %v2426_v38, %v2427_v34 }
 0x4fe   : > { %2929 = vrot.lane.b32.xlu0 %v9511_v62, %s6221_s11  ;;  %3079 = vrot.lane.b32.xlu1 %v12520_v9, %s6222_s14  ;;  %v3395_v62 = vsel %vm3378_vm15, %v3362_v3, %v2962_v46  ;;  %v12534_v3 = vld [vmem:[#allocation38_spill] sm:$0xff] }
 0x500   : > { %v3058_v16 = vpop.permute.xlu0 %3057  ;;  %v2774_v41 = vpop.permute.xlu1 %2773 }
 0x501   : > { %v3428_v45 = vsel %vm3411_vm0, %v3395_v62, %v3058_v16  ;;  %v3331_v27 = vsel %vm1670_vm11, %v3299_v19, %v2774_v41  ;;  %v12532_v16 = vld [vmem:[#allocation115_spill] sm:$0xff]  ;;  %v12535_v62 = vld [vmem:[#allocation154_spill] sm:$0xff] }
 0x502   : > { %3173 = vrot.lane.b32.xlu0 %v12521_v59, %s6223_s28  ;;  %2795 = vrot.lane.b32.xlu1 %v12520_v9, %s6219_s18  ;;  %v3236_v41 = vsel %vm1472_vm3, %v6113_v54, %v12532_v16 }
 0x504   : > { %v3060_v32 = vpop.permute.xlu0 %3059  ;;  %v3154_v56 = vpop.permute.xlu1 %3153 }
 0x505   : > { %v3461_v37 = vsel %vm3444_vm1, %v3428_v45, %v3154_v56 }
 0x506   : > { %2889 = vrot.lane.b32.xlu0 %v12521_v59, %s6220_s26  ;;  %2931 = vrot.lane.b32.xlu1 %v9533_v8, %s6221_s11  ;;  %v3396_v8 = vsel %vm3378_vm15, %v3363_v12, %v2964_v0  ;;  %v3268_v59 = vsel %vm1538_vm7, %v3236_v41, %v12534_v3 }
 0x507   : > { %5946 = vmatprep.mubr.msk.f32.mxu1 %vm3493_vm5, %v3461_v37  ;;  %v3429_v55 = vsel %vm3411_vm0, %v3396_v8, %v3060_v32  ;;  %v3300_v45 = vsel %vm1604_vm9, %v3268_v59, %v12535_v62  ;;  %v2211_v37 = vld [vmem:[#allocation3 + $0x190] sm:$0x3]  ;;  %v12541_v59 = vld [vmem:[#allocation15_spill] sm:$0xff] }
 0x508   : > { %v2776_v63 = vpop.permute.xlu0 %2775  ;;  %v2870_v6 = vpop.permute.xlu1 %2869  ;;  %v2429_v26 = vrot.slane %v2211_v37, 1 }
 0x509   : > { %v3364_v21 = vsel %vm3345_vm14, %v3331_v27, %v2870_v6  ;;  %v3332_v17 = vsel %vm1670_vm11, %v3300_v45, %v2776_v63  ;;  %v2433_v63 = vsel %vm565_vm4, %v2431_v28, %v2432_v33 }
 0x50a   : > { %3025 = vrot.lane.b32.xlu0 %v12525_v7, %s6222_s14  ;;  %3175 = vrot.lane.b32.xlu1 %v12526_v42, %s6223_s28  ;;  %v2430_v7 = vsel %vm484_vm2, %v2427_v34, %v2429_v26 }
 0x50c   : > { %v3156_v23 = vpop.permute.xlu0 %3155  ;;  %v2872_v13 = vpop.permute.xlu1 %2871 }
 0x50d   : > { %v3462_v44 = vsel %vm3444_vm1, %v3429_v55, %v3156_v23  ;;  %v3365_v22 = vsel %vm3345_vm14, %v3332_v17, %v2872_v13  ;;  %v6114_v55 = vld [vmem:[#allocation3 + $0xf0] sm:$0xff] }
 0x50e   : > { %2891 = vrot.lane.b32.xlu0 %v12526_v42, %s6220_s26  ;;  %2985 = vrot.lane.b32.xlu1 %v2209_v4, %s6221_s11  ;;  %v12536_v23 = vld [vmem:[#allocation36_spill] sm:$0xff] }
 0x50f   : > { %5947 = vmatmul.mubr.msk.f32.gmra.mxu1 %vm3493_vm5, %v3462_v44  ;;  %v3237_v13 = vsel %vm1472_vm3, %v6114_v55, %v12536_v23  ;;  %v12537_v44 = vld [vmem:[#allocation148_spill] sm:$0xff] }
 0x510   : > { %v2966_v11 = vpop.permute.xlu0 %2965  ;;  %v2968_v5 = vpop.permute.xlu1 %2967 }
 0x511   : > { %v3397_v46 = vsel %vm3378_vm15, %v3364_v21, %v2966_v11  ;;  %v3398_v25 = vsel %vm3378_vm15, %v3365_v22, %v2968_v5  ;;  %v2434_v11 = vrot.slane %v2211_v37, 2  ;;  %v12538_v5 = vld [vmem:[#allocation169_spill] sm:$0xff] }
 0x512   : > { %3027 = vrot.lane.b32.xlu0 %v12528_v30, %s6222_s14  ;;  %3121 = vrot.lane.b32.xlu1 %v12529_v51, %s6223_s28  ;;  %v2212_v30 = vld [vmem:[#allocation3 + $0x198] sm:$0xff]  ;;  %v2213_v51 = vld [vmem:[#allocation3 + $0x1a0] sm:$0xff] }
 0x513   : > { %v2435_v24 = vsel %vm565_vm4, %v2432_v33, %v2434_v11  ;;  %v2440_v27 = vrot.slane %v2213_v51, 1  ;;  %v2444_v54 = vrot.slane %v2212_v30, 2  ;;  %v2445_v16 = vrot.slane %v2213_v51, 2 }
 0x514   : > { %v3062_v20 = vpop.permute.xlu0 %3061  ;;  %v2778_v39 = vpop.permute.xlu1 %2777 }
 0x515   : > { %v3430_v0 = vsel %vm3411_vm0, %v3397_v46, %v3062_v20  ;;  %v2439_v20 = vrot.slane %v2212_v30, 1  ;;  %v2446_v33 = vsel %vm565_vm4, %v2444_v54, %v2445_v16  ;;  %v12550_v54 = vld [vmem:[#allocation45_spill] sm:$0xff] }
 0x516   : > { %2701 = vrot.lane.b32.xlu0 %v2209_v4, %s6217_s19  ;;  %2987 = vrot.lane.b32.xlu1 %v2210_v1, %s6221_s11  ;;  %v3269_v4 = vsel %vm1538_vm7, %v3237_v13, %v12537_v44 }
 0x517   : > { %v3301_v50 = vsel %vm1604_vm9, %v3269_v4, %v12538_v5  ;;  %v2441_v41 = vsel %vm484_vm2, %v2439_v20, %v2440_v27 }
 0x518   : > { %v3064_v43 = vpop.permute.xlu0 %3063  ;;  %v3158_v14 = vpop.permute.xlu1 %3157  ;;  %v3333_v58 = vsel %vm1670_vm11, %v3301_v50, %v2778_v39 }
 0x519   : > { %v3463_v9 = vsel %vm3444_vm1, %v3430_v0, %v3158_v14  ;;  %v3431_v31 = vsel %vm3411_vm0, %v3398_v25, %v3064_v43  ;;  %v6115_v0 = vld [vmem:[#allocation3 + $0xf8] sm:$0xff] }
 0x51a   : > { %3081 = vrot.lane.b32.xlu0 %v2428_v15, %s6222_s14  ;;  %3123 = vrot.lane.b32.xlu1 %v12533_v49, %s6223_s28  ;;  %v12539_v43 = vld [vmem:[#allocation141_spill] sm:$0xff] }
 0x51b   : > { %5949 = vmatprep.mubr.msk.f32.mxu1 %vm3493_vm5, %v3463_v9  ;;  %v3238_v39 = vsel %vm1472_vm3, %v6115_v0, %v12539_v43  ;;  %v12540_v9 = vld [vmem:[#allocation71_spill] sm:$0xff] }
 0x51c   : > { %v2780_v32 = vpop.permute.xlu0 %2779  ;;  %v2874_v56 = vpop.permute.xlu1 %2873 }
 0x51d   : > { %v3366_v36 = vsel %vm3345_vm14, %v3333_v58, %v2874_v56 }
 0x51e   : > { %2703 = vrot.lane.b32.xlu0 %v2210_v1, %s6217_s19  ;;  %2797 = vrot.lane.b32.xlu1 %v2428_v15, %s6219_s18  ;;  %v2214_v1 = vld [vmem:[#allocation3 + $0x1a8] sm:$0x3]  ;;  %v3270_v15 = vsel %vm1538_vm7, %v3238_v39, %v12540_v9  ;;  %v12548_v39 = vld [vmem:[#allocation68_spill] sm:$0xff] }
 0x51f   : > { %v2442_v38 = vrot.slane %v2214_v1, 1  ;;  %v2447_v3 = vrot.slane %v2214_v1, 2  ;;  %v3302_v62 = vsel %vm1604_vm9, %v3270_v15, %v12541_v59  ;;  %v12546_v1 = vld [vmem:[#allocation168_spill] sm:$0xff] }
 0x520   : > { %v3160_v6 = vpop.permute.xlu0 %3159  ;;  %v2876_v47 = vpop.permute.xlu1 %2875  ;;  %v3334_v37 = vsel %vm1670_vm11, %v3302_v62, %v2780_v32  ;;  %v12549_v9 = vld [vmem:[#allocation72_spill] sm:$0xff] }
 0x521   : > { %v3464_v12 = vsel %vm3444_vm1, %v3431_v31, %v3160_v6  ;;  %v2443_v49 = vsel %vm484_vm2, %v2440_v27, %v2442_v38  ;;  %v3367_v17 = vsel %vm3345_vm14, %v3334_v37, %v2876_v47  ;;  %v2448_v22 = vsel %vm565_vm4, %v2445_v16, %v2447_v3 }
 0x522   : > { %3083 = vrot.lane.b32.xlu0 %v2430_v7, %s6222_s14  ;;  %3177 = vrot.lane.b32.xlu1 %v2433_v63, %s6223_s28  ;;  %vm3864_vm2 = vcmask 1041409   ;;  %vm3867_vm4 = vcmask 1042434  }
 0x523   : > { %5950 = vmatmul.mubr.msk.f32.gmra.mxu1 %vm3493_vm5, %v3464_v12  ;;  %v12542_v12 = vld [vmem:[#allocation67_spill] sm:$0xff] }
 0x524   : > { %v2970_v42 = vpop.permute.xlu0 %2969  ;;  %v2972_v8 = vpop.permute.xlu1 %2971 }
 0x525   : > { %v3399_v19 = vsel %vm3378_vm15, %v3366_v36, %v2970_v42  ;;  %v3400_v28 = vsel %vm3378_vm15, %v3367_v17, %v2972_v8  ;;  %v12544_v8 = vld [vmem:[#allocation17_spill] sm:$0xff]  ;;  %v12551_v17 = vld [vmem:[#allocation96_spill] sm:$0xff] }
 0x526   : > { %2799 = vrot.lane.b32.xlu0 %v2430_v7, %s6219_s18  ;;  %2893 = vrot.lane.b32.xlu1 %v2433_v63, %s6220_s26  ;;  %v3239_v7 = vsel %vm1472_vm3, %v9573_v2, %v12542_v12  ;;  %v12543_v63 = vld [vmem:[#allocation152_spill] sm:$0xff] }
 0x527   : > { %v3271_v42 = vsel %vm1538_vm7, %v3239_v7, %v12543_v63 }
 0x528   : > { %v3066_v35 = vpop.permute.xlu0 %3065  ;;  %v2782_v60 = vpop.permute.xlu1 %2781  ;;  %v3303_v55 = vsel %vm1604_vm9, %v3271_v42, %v12544_v8 }
 0x529   : > { %v3432_v34 = vsel %vm3411_vm0, %v3399_v19, %v3066_v35  ;;  %v3335_v44 = vsel %vm1670_vm11, %v3303_v55, %v2782_v60  ;;  %v12547_v60 = vld [vmem:[#allocation172_spill] sm:$0xff] }
 0x52a   : > { %3179 = vrot.lane.b32.xlu0 %v2435_v24, %s6223_s28  ;;  %2895 = vrot.lane.b32.xlu1 %v2435_v24, %s6220_s26 }
 0x52c   : > { %v3068_v21 = vpop.permute.xlu0 %3067  ;;  %v3162_v46 = vpop.permute.xlu1 %3161 }
 0x52d   : > { %v3465_v14 = vsel %vm3444_vm1, %v3432_v34, %v3162_v46  ;;  %v3433_v25 = vsel %vm3411_vm0, %v3400_v28, %v3068_v21  ;;  %v3242_v28 = vsel %vm1472_vm3, %v9625_v52, %v12551_v17 }
 0x52e   : > { %2989 = vrot.lane.b32.xlu0 %v2212_v30, %s6221_s11  ;;  %2991 = vrot.lane.b32.xlu1 %v2213_v51, %s6221_s11  ;;  %v12545_v30 = vld [vmem:[#allocation147_spill] sm:$0xff] }
 0x52f   : > { %5952 = vmatprep.mubr.msk.f32.mxu1 %vm3493_vm5, %v3465_v14  ;;  %v3240_v51 = vsel %vm1472_vm3, %v9577_v40, %v12545_v30  ;;  %v3241_v14 = vsel %vm1472_vm3, %v9621_v10, %v12548_v39 }
 0x530   : > { %v2784_v45 = vpop.permute.xlu0 %2783  ;;  %v2878_v56 = vpop.permute.xlu1 %2877  ;;  %v3272_v58 = vsel %vm1538_vm7, %v3240_v51, %v12546_v1  ;;  %v3273_v15 = vsel %vm1538_vm7, %v3241_v14, %v12549_v9  ;;  %v12556_v51 = vld [vmem:[#allocation120_spill] sm:$0xff] }
 0x531   : > { %v3368_v4 = vsel %vm3345_vm14, %v3335_v44, %v2878_v56  ;;  %v3304_v24 = vsel %vm1604_vm9, %v3272_v58, %v12547_v60  ;;  %v3305_v16 = vsel %vm1604_vm9, %v3273_v15, %v12550_v54 }
 0x532   : > { %3085 = vrot.lane.b32.xlu0 %v2441_v41, %s6222_s14  ;;  %3087 = vrot.lane.b32.xlu1 %v2443_v49, %s6222_s14  ;;  %v3336_v20 = vsel %vm1670_vm11, %v3304_v24, %v2784_v45 }
 0x534   : > { %v3164_v26 = vpop.permute.xlu0 %3163  ;;  %v2880_v31 = vpop.permute.xlu1 %2879 }
 0x535   : > { %v3466_v6 = vsel %vm3444_vm1, %v3433_v25, %v3164_v26  ;;  %v3369_v27 = vsel %vm3345_vm14, %v3336_v20, %v2880_v31  ;;  %v12553_v25 = vld [vmem:[#allocation18_spill] sm:$0xff] }
 0x536   : > { %3181 = vrot.lane.b32.xlu0 %v2446_v33, %s6223_s28  ;;  %3183 = vrot.lane.b32.xlu1 %v2448_v22, %s6223_s28  ;;  %v12552_v33 = vld [vmem:[#allocation13_spill] sm:$0xff] }
 0x537   : > { %5953 = vmatmul.mubr.msk.f32.gmra.mxu1 %vm3493_vm5, %v3466_v6  ;;  %v3274_v22 = vsel %vm1538_vm7, %v3242_v28, %v12552_v33 }
 0x538   : > { %v2974_v32 = vpop.permute.xlu0 %2973  ;;  %v2976_v47 = vpop.permute.xlu1 %2975  ;;  %v3306_v26 = vsel %vm1604_vm9, %v3274_v22, %v12553_v25 }
 0x539   : > { %v3401_v11 = vsel %vm3378_vm15, %v3368_v4, %v2974_v32  ;;  %v3402_v38 = vsel %vm3378_vm15, %v3369_v27, %v2976_v47 }
 0x53c   : > { %v3070_v23 = vpop.permute.xlu0 %3069  ;;  %v2786_v13 = vpop.permute.xlu1 %2785 }
 0x53d   : > { %v3434_v5 = vsel %vm3411_vm0, %v3401_v11, %v3070_v23  ;;  %v3337_v3 = vsel %vm1670_vm11, %v3305_v16, %v2786_v13 }
 0x540   : > { %v3072_v50 = vpop.permute.xlu0 %3071  ;;  %v3166_v35 = vpop.permute.xlu1 %3165 }
 0x541   : > { %v3467_v2 = vsel %vm3444_vm1, %v3434_v5, %v3166_v35  ;;  %v3435_v34 = vsel %vm3411_vm0, %v3402_v38, %v3072_v50  ;;  %v12554_v50 = vld [vmem:[#allocation12_spill] sm:$0xff] }
 0x542   : > { %5955 = vmatprep.mubr.msk.f32.mxu1 %vm3493_vm5, %v3467_v2  ;;  %v3243_v35 = vsel %vm1472_vm3, %v9669_v48, %v12554_v50  ;;  %v12555_v2 = vld [vmem:[#allocation170_spill] sm:$0xff] }
 0x543   : > { %v3275_v30 = vsel %vm1538_vm7, %v3243_v35, %v12555_v2 }
 0x544   : > { %v2788_v36 = vpop.permute.xlu0 %2787  ;;  %v2882_v19 = vpop.permute.xlu1 %2881  ;;  %v3307_v1 = vsel %vm1604_vm9, %v3275_v30, %v12556_v51 }
 0x545   : > { %v3370_v59 = vsel %vm3345_vm14, %v3337_v3, %v2882_v19  ;;  %v3338_v32 = vsel %vm1670_vm11, %v3306_v26, %v2788_v36  ;;  %v6116_v3 = vld [vmem:[#allocation3] sm:$0xff] }
 0x548   : > { %v3168_v21 = vpop.permute.xlu0 %3167  ;;  %v2884_v40 = vpop.permute.xlu1 %2883 }
 0x549   : > { %v3468_v46 = vsel %vm3444_vm1, %v3435_v34, %v3168_v21  ;;  %v3371_v47 = vsel %vm3345_vm14, %v3338_v32, %v2884_v40  ;;  %v12557_v34 = vld [vmem:[#allocation117_spill] sm:$0xff]  ;;  %v12558_v40 = vld [vmem:[#allocation40_spill] sm:$0xff] }
 0x54a   : > { %5956 = vmatmul.mubr.msk.f32.gmra.mxu1 %vm3493_vm5, %v3468_v46  ;;  %v3244_v21 = vsel %vm1472_vm3, %v9673_v57, %v12557_v34 }
 0x54b   : > { %v3276_v46 = vsel %vm1538_vm7, %v3244_v21, %v12558_v40 }
 0x54c   : > { %v2978_v0 = vpop.permute.xlu0 %2977  ;;  %v2980_v43 = vpop.permute.xlu1 %2979 }
 0x54d   : > { %v3403_v62 = vsel %vm3378_vm15, %v3370_v59, %v2978_v0  ;;  %v3404_v12 = vsel %vm3378_vm15, %v3371_v47, %v2980_v43  ;;  %v12559_v0 = vld [vmem:[#allocation46_spill] sm:$0xff]  ;;  %v12560_v59 = vld [vmem:[#allocation93_spill] sm:$0xff]  ;;  %v6117_v47 = vld [vmem:[#allocation3 + $0x8] sm:$0xff] }
 0x54e   : > { %v3308_v43 = vsel %vm1604_vm9, %v3276_v46, %v12559_v0  ;;  %v12569_v46 = vld [vmem:[#allocation145_spill] sm:$0xff] }
 0x54f   : > { %v3246_v0 = vsel %vm1472_vm3, %v9721_v53, %v12569_v46 }
 0x550   : > { %v3074_v41 = vpop.permute.xlu0 %3073  ;;  %v2790_v49 = vpop.permute.xlu1 %2789 }
 0x551   : > { %v3436_v45 = vsel %vm3411_vm0, %v3403_v62, %v3074_v41  ;;  %v3339_v24 = vsel %vm1670_vm11, %v3307_v1, %v2790_v49  ;;  %v3217_v62 = vsel %vm1472_vm3, %v6116_v3, %v12560_v59  ;;  %v12566_v1 = vld [vmem:[#allocation37_spill] sm:$0xff] }
 0x554   : > { %v3076_v56 = vpop.permute.xlu0 %3075  ;;  %v3170_v37 = vpop.permute.xlu1 %3169 }
 0x555   : > { %v3469_v10 = vsel %vm3444_vm1, %v3436_v45, %v3170_v37  ;;  %v3437_v7 = vsel %vm3411_vm0, %v3404_v12, %v3076_v56  ;;  %v12561_v45 = vld [vmem:[#allocation70_spill] sm:$0xff]  ;;  %v12562_v37 = vld [vmem:[#allocation39_spill] sm:$0xff] }
 0x556   : > { %5958 = vmatprep.mubr.msk.f32.mxu1 %vm3493_vm5, %v3469_v10  ;;  %v3249_v56 = vsel %vm1538_vm7, %v3217_v62, %v12561_v45  ;;  %v12563_v12 = vld [vmem:[#allocation110_spill] sm:$0xff]  ;;  %v12572_v45 = vld [vmem:[#allocation69_spill] sm:$0xff] }
 0x557   : > { %v3281_v10 = vsel %vm1604_vm9, %v3249_v56, %v12562_v37  ;;  %v3247_v56 = vsel %vm1472_vm3, %v9767_v18, %v12572_v45  ;;  %v12573_v37 = vld [vmem:[#allocation150_spill] sm:$0xff] }
 0x558   : > { %v2792_v31 = vpop.permute.xlu0 %2791  ;;  %v2886_v6 = vpop.permute.xlu1 %2885 }
 0x559   : > { %v3372_v36 = vsel %vm3345_vm14, %v3339_v24, %v2886_v6  ;;  %v3340_v9 = vsel %vm1670_vm11, %v3308_v43, %v2792_v31  ;;  %v12570_v43 = vld [vmem:[#allocation119_spill] sm:$0xff] }
 0x55c   : > { %v3172_v63 = vpop.permute.xlu0 %3171  ;;  %v2738_v52 = vpop.permute.xlu1 %2737 }
 0x55d   : > { %v3470_v42 = vsel %vm3444_vm1, %v3437_v7, %v3172_v63  ;;  %v3313_v33 = vsel %vm1670_vm11, %v3281_v10, %v2738_v52  ;;  %v3218_v7 = vsel %vm1472_vm3, %v6117_v47, %v12563_v12  ;;  %v12564_v63 = vld [vmem:[#allocation11_spill] sm:$0xff]  ;;  %v12574_v10 = vld [vmem:[#allocation42_spill] sm:$0xff] }
 0x55e   : > { %5959 = vmatmul.mubr.msk.f32.gmra.mxu1 %vm3493_vm5, %v3470_v42  ;;  %v3250_v42 = vsel %vm1538_vm7, %v3218_v7, %v12564_v63  ;;  %v12565_v52 = vld [vmem:[#allocation151_spill] sm:$0xff] }
 0x560   : > { %v2888_v8 = vpop.permute.xlu0 %2887  ;;  %v2982_v55 = vpop.permute.xlu1 %2981 }
 0x561   : > { %v3405_v19 = vsel %vm3378_vm15, %v3372_v36, %v2982_v55  ;;  %v3373_v15 = vsel %vm3345_vm14, %v3340_v9, %v2888_v8  ;;  %v3282_v8 = vsel %vm1604_vm9, %v3250_v42, %v12565_v52 }
 0x564   : > { %v2740_v23 = vpop.permute.xlu0 %2739  ;;  %v2834_v13 = vpop.permute.xlu1 %2833 }
 0x565   : > { %v3346_v22 = vsel %vm3345_vm14, %v3313_v33, %v2834_v13 }
 0x568   : > { %v2984_v44 = vpop.permute.xlu0 %2983  ;;  %v3078_v4 = vpop.permute.xlu1 %3077 }
 0x569   : > { %v3438_v20 = vsel %vm3411_vm0, %v3405_v19, %v3078_v4  ;;  %v3406_v54 = vsel %vm3378_vm15, %v3373_v15, %v2984_v44  ;;  %v3314_v44 = vsel %vm1670_vm11, %v3282_v8, %v2740_v23  ;;  %v12568_v23 = vld [vmem:[#allocation135_spill] sm:$0xff] }
 0x56c   : > { %v2794_v11 = vpop.permute.xlu0 %2793  ;;  %v2836_v5 = vpop.permute.xlu1 %2835 }
 0x56d   : > { %v3347_v4 = vsel %vm3345_vm14, %v3314_v44, %v2836_v5 }
 0x570   : > { %v2930_v58 = vpop.permute.xlu0 %2929  ;;  %v3080_v60 = vpop.permute.xlu1 %3079 }
 0x571   : > { %v3439_v16 = vsel %vm3411_vm0, %v3406_v54, %v3080_v60  ;;  %v3379_v25 = vsel %vm3378_vm15, %v3346_v22, %v2930_v58  ;;  %v3245_v58 = vsel %vm1472_vm3, %v9717_v61, %v12566_v1  ;;  %v12567_v60 = vld [vmem:[#allocation16_spill] sm:$0xff] }
 0x572   : > { %v3277_v24 = vsel %vm1538_vm7, %v3245_v58, %v12567_v60 }
 0x573   : > { %v3309_v5 = vsel %vm1604_vm9, %v3277_v24, %v12568_v23  ;;  %v10089_v24 = vld [vmem:[%s11679_s4] ss:$0 sm:$0xff] }
 0x574   : > { %v3174_v27 = vpop.permute.xlu0 %3173  ;;  %v9986_v38 = vpop.permute.xlu1 %2795 }
 0x575   : > { %v3471_v48 = vsel %vm3444_vm1, %v3438_v20, %v3174_v27  ;;  %v3341_v20 = vsel %vm1670_vm11, %v3309_v5, %v2794_v11  ;;  %v12571_v11 = vld [vmem:[#allocation41_spill] sm:$0xff] }
 0x576   : > { %5961 = vmatprep.mubr.msk.f32.mxu1 %vm3493_vm5, %v3471_v48 }
 0x578   : > { %v2890_v39 = vpop.permute.xlu0 %2889  ;;  %v2932_v14 = vpop.permute.xlu1 %2931 }
 0x579   : > { %v3380_v50 = vsel %vm3378_vm15, %v3347_v4, %v2932_v14  ;;  %v3374_v27 = vsel %vm3345_vm14, %v3341_v20, %v2890_v39  ;;  %v3278_v14 = vsel %vm1538_vm7, %v3246_v0, %v12570_v43 }
 0x57a   : > { %v3310_v39 = vsel %vm1604_vm9, %v3278_v14, %v12571_v11 }
 0x57b   : > { %v3342_v54 = vsel %vm1670_vm11, %v3310_v39, %v9986_v38  ;;  %v3248_v38 = vsel %vm1472_vm3, %v9787_v29, %v12573_v37 }
 0x57c   : > { %v3026_v41 = vpop.permute.xlu0 %3025  ;;  %v3176_v57 = vpop.permute.xlu1 %3175 }
 0x57d   : > { %v3472_v49 = vsel %vm3444_vm1, %v3439_v16, %v3176_v57  ;;  %v3412_v26 = vsel %vm3411_vm0, %v3379_v25, %v3026_v41 }
 0x57e   : > { %5962 = vmatmul.mubr.msk.f32.gmra.mxu1 %vm3493_vm5, %v3472_v49 }
 0x580   : > { %v2892_v17 = vpop.permute.xlu0 %2891  ;;  %v2986_v28 = vpop.permute.xlu1 %2985 }
 0x581   : > { %v3407_v48 = vsel %vm3378_vm15, %v3374_v27, %v2986_v28  ;;  %v3375_v16 = vsel %vm3345_vm14, %v3342_v54, %v2892_v17  ;;  %v3279_v17 = vsel %vm1538_vm7, %v3247_v56, %v12574_v10  ;;  %v12575_v28 = vld [vmem:[#allocation111_spill] sm:$0xff] }
 0x582   : > { %v3280_v33 = vsel %vm1538_vm7, %v3248_v38, %v12575_v28 }
 0x584   : > { %v3028_v31 = vpop.permute.xlu0 %3027  ;;  %v3122_v6 = vpop.permute.xlu1 %3121 }
 0x585   : > { %v3445_v32 = vsel %vm3444_vm1, %v3412_v26, %v3122_v6  ;;  %v3413_v35 = vsel %vm3411_vm0, %v3380_v50, %v3028_v31 }
 0x586   : > { %5922 = vmatprep.mubr.msk.f32.mxu0 %vm3493_vm5, %v3445_v32 }
 0x588   : > { %v2702_v55 = vpop.permute.xlu0 %2701  ;;  %v2988_v13 = vpop.permute.xlu1 %2987 }
 0x589   : > { %v3408_v41 = vsel %vm3378_vm15, %v3375_v16, %v2988_v13  ;;  %v3311_v22 = vsel %vm1604_vm9, %v3279_v17, %v2702_v55  ;;  %v5927_v13 = vpop.f32.mrf.mxu1 }
 0x58a   : > { %v3672_v27 = vadd.f32 %v5927_v13, %v10089_v24 }
 0x58b   : > { %v3666_v44 = vpop.f32.mrf.mxu1 }
 0x58c   : > { %v3082_v2 = vpop.permute.xlu0 %3081  ;;  %v3124_v30 = vpop.permute.xlu1 %3123  ;;  %v3667_v46 = vadd.f32 %v10089_v24, %v3666_v44  ;;  %v10109_v11 = vmax.f32 %v3672_v27, 0.0 }
 0x58d   : > { %v3446_v51 = vsel %vm3444_vm1, %v3413_v35, %v3124_v30  ;;  %v3440_v34 = vsel %vm3411_vm0, %v3407_v48, %v3082_v2  ;;  %v5930_v4 = vpop.f32.mrf.mxu1  ;;  %v6224_v48 = vmov 1983009808  }
 0x58e   : > { %5923 = vmatmul.mubr.msk.f32.vlgmr.msra.gmra.mxu0 %vm3493_vm5, %v3446_v51  ;;  %12579 = vst [vmem:[#allocation156_spill] sm:$0xff] %v10109_v11 }
 0x58f   : > { %v3676_v50 = vpop.f32.mrf.mxu1 }
 0x590   : > { %v2704_v36 = vpop.permute.xlu0 %2703  ;;  %v2798_v19 = vpop.permute.xlu1 %2797 }
 0x591   : > { %v3312_v25 = vsel %vm1604_vm9, %v3280_v33, %v2704_v36  ;;  %v3343_v6 = vsel %vm1670_vm11, %v3311_v22, %v2798_v19  ;;  %v5933_v35 = vpop.f32.mrf.mxu1  ;;  %v3682_v36 = vadd.f32 %v5930_v4, %v10089_v24 }
 0x592   : > { %v3692_v23 = vadd.f32 %v5933_v35, %v10089_v24 }
 0x593   : > { %v3686_v2 = vpop.f32.mrf.mxu1  ;;  %v10103_v0 = vmax.f32 %v3682_v36, 0.0 }
 0x594   : > { %v3084_v21 = vpop.permute.xlu0 %3083  ;;  %v3178_v61 = vpop.permute.xlu1 %3177  ;;  %v3687_v19 = vadd.f32 %v10089_v24, %v3686_v2 }
 0x595   : > { %v3473_v40 = vsel %vm3444_vm1, %v3440_v34, %v3178_v61  ;;  %v3441_v57 = vsel %vm3411_vm0, %v3408_v41, %v3084_v21  ;;  %v10078_v30 = vpop.f32.mrf.mxu1  ;;  %v4498_v34 = vunpack.c.l.s4 %v6224_v48  ;;  %v4500_v21 = vlaneseq  ;;  %12577 = vst [vmem:[#allocation184_spill] sm:$0xff] %v10103_v0 }
 0x596   : > { %5964 = vmatprep.mubr.msk.f32.mxu1 %vm3493_vm5, %v3473_v40  ;;  %v3677_v61 = vadd.f32 %v10089_v24, %v3676_v50  ;;  %v10100_v40 = vmax.f32 %v3692_v23, 0.0  ;;  %v10105_v43 = vmax.f32 %v3687_v19, 0.0  ;;  %v10117_v41 = vmax.f32 %v3667_v46, 0.0 }
 0x597   : > { %v10080_v51 = vpop.f32.mrf.mxu1  ;;  %v4499_v39 = vunpack.c.0.s8 %v4498_v34  ;;  %v3702_v46 = vadd.f32 %v10078_v30, %v10089_v24 }
 0x598   : > { %v2800_v9 = vpop.permute.xlu0 %2799  ;;  %v2894_v15 = vpop.permute.xlu1 %2893  ;;  %12576 = vst [vmem:[#allocation153_spill] sm:$0xff] %v10100_v40  ;;  %12578 = vst [vmem:[#allocation121_spill] sm:$0xff] %v10105_v43  ;;  %v4467_v16 = vmax.f32 %v10103_v0, %v10100_v40  ;;  %v3697_v27 = vadd.f32 %v10089_v24, %v10080_v51 }
 0x599   : > { %v3344_v18 = vsel %vm1670_vm11, %v3312_v25, %v2800_v9  ;;  %v3376_v32 = vsel %vm3345_vm14, %v3343_v6, %v2894_v15  ;;  %v5939_v1 = vpop.f32.mrf.mxu1  ;;  %v4501_v9 = vshrl.u32 %v4500_v21, 7  ;;  %v10111_v15 = vmax.f32 %v3677_v61, 0.0  ;;  %12581 = vst [vmem:[#allocation155_spill] sm:$0xff] %v10117_v41 }
 0x59a   : > { %v4547_v38 = vcombine.high %v4467_v16, %v4467_v16  ;;  %v3712_v23 = vadd.f32 %v5939_v1, %v10089_v24  ;;  %v10172_v37 = vmax.f32 %v3702_v46, 0.0 }
 0x59b   : > { %v10082_v58 = vpop.f32.mrf.mxu1  ;;  %12580 = vst [vmem:[#allocation171_spill] sm:$0xff] %v10111_v15 }
 0x59c   : > { %v3180_v53 = vpop.permute.xlu0 %3179  ;;  %v2896_v49 = vpop.permute.xlu1 %2895  ;;  %12583 = vst [vmem:[#allocation44_spill] sm:$0xff] %v10172_v37 }
 0x59d   : > { %v3474_v3 = vsel %vm3444_vm1, %v3441_v57, %v3180_v53  ;;  %v3377_v29 = vsel %vm3345_vm14, %v3344_v18, %v2896_v49  ;;  %v4466_v57 = vmax.f32 %v10111_v15, %v10105_v43  ;;  %v10122_v49 = vsub.s32 %v4499_v39, %v4501_v9 }
 0x59e   : > { %5965 = vmatmul.mubr.msk.f32.gmra.mxu1 %vm3493_vm5, %v3474_v3  ;;  %v10124_v3 = vsub.s32 0, %v4501_v9  ;;  %v3707_v39 = vadd.f32 %v10089_v24, %v10082_v58 }
 0x5a0   : > { %v2990_v59 = vpop.permute.xlu0 %2989  ;;  %v2992_v62 = vpop.permute.xlu1 %2991  ;;  %v10174_v1 = vmax.f32 %v3707_v39, 0.0 }
 0x5a1   : > { %v3409_v47 = vsel %vm3378_vm15, %v3376_v32, %v2990_v59  ;;  %v3410_v12 = vsel %vm3378_vm15, %v3377_v29, %v2992_v62  ;;  %v4554_v29 = vrot.slane %v4467_v16, %v10122_v49 }
 0x5a2   : > { %12584 = vst [vmem:[#allocation173_spill] sm:$0xff] %v10174_v1 }
 0x5a3   : > { %v4562_v36 = vcombine.high %v4554_v29, %v4554_v29 }
 0x5a4   : > { %v3086_v26 = vpop.permute.xlu0 %3085  ;;  %v3088_v31 = vpop.permute.xlu1 %3087 }
 0x5a5   : > { %v3442_v7 = vsel %vm3411_vm0, %v3409_v47, %v3086_v26  ;;  %v3443_v63 = vsel %vm3411_vm0, %v3410_v12, %v3088_v31  ;;  %v4530_v31 = vcombine.high %v4466_v57, %v4466_v57  ;;  %v4537_v12 = vrot.slane %v4466_v57, %v10122_v49 }
 0x5a6   : > { %v10170_v47 = vmax.f32 %v3712_v23, 0.0  ;;  %v5708_v30 = vrot.slane %v4562_v36, 9 }
 0x5a7   : > { %v10084_v60 = vpop.f32.mrf.mxu1  ;;  %v4544_v2 = vrot.slane %v4530_v31, %v10122_v49  ;;  %v4545_v21 = vcombine.high %v4537_v12, %v4537_v12  ;;  %v5707_v31 = vrot.slane %v4554_v29, 9  ;;  %v5703_v19 = vrot.slane %v4537_v12, 9 }
 0x5a8   : > { %v3182_v42 = vpop.permute.xlu0 %3181  ;;  %v3184_v52 = vpop.permute.xlu1 %3183  ;;  %12582 = vst [vmem:[#allocation174_spill] sm:$0xff] %v10170_v47  ;;  %v4469_v34 = vmax.f32 %v10172_v37, %v10170_v47  ;;  %v10186_v46 = vmax.f32 %v4562_v36, %v5708_v30 }
 0x5a9   : > { %v3475_v8 = vsel %vm3444_vm1, %v3442_v7, %v3182_v42  ;;  %v3476_v55 = vsel %vm3444_vm1, %v3443_v63, %v3184_v52  ;;  %v10092_v5 = vpop.f32.mrf.mxu1  ;;  %v4561_v42 = vrot.slane %v4547_v38, %v10122_v49  ;;  %v4546_v57 = vcombine.high %v4544_v2, %v4544_v2 }
 0x5aa   : > { %5967 = vmatprep.mubr.msk.f32.mxu1 %vm3493_vm5, %v3475_v8  ;;  %v5704_v6 = vrot.slane %v4545_v21, 9  ;;  %v5705_v58 = vrot.slane %v4544_v2, 9  ;;  %v10182_v7 = vmax.f32 %v3697_v27, 0.0  ;;  %12586 = vst [vmem:[#allocation183_spill] sm:$0xff] %v10186_v46  ;;  %v10188_v39 = vmax.f32 %v4554_v29, %v5707_v31 }
 0x5ab   : > { %5968 = vmatmul.mubr.msk.f32.gmra.mxu1 %vm3493_vm5, %v3476_v55  ;;  %v4563_v61 = vcombine.high %v4561_v42, %v4561_v42  ;;  %v5706_v45 = vrot.slane %v4546_v57, 9  ;;  %v10203_v35 = vmax.f32 %v4537_v12, %v5703_v19 }
 0x5ac   : > { %12585 = vst [vmem:[#allocation30_spill] sm:$0xff] %v10182_v7  ;;  %12587 = vst [vmem:[#allocation50_spill] sm:$0xff] %v10188_v39  ;;  %v10190_v59 = vmax.f32 %v4545_v21, %v5704_v6  ;;  %v4468_v27 = vmax.f32 %v10182_v7, %v10174_v1  ;;  %v3717_v21 = vadd.f32 %v10089_v24, %v10092_v5 }
 0x5ad   : > { %v5710_v13 = vrot.slane %v4563_v61, 9  ;;  %12592 = vst [vmem:[#allocation74_spill] sm:$0xff] %v10203_v35  ;;  %v10207_v36 = vmax.f32 %v4546_v57, %v5706_v45  ;;  %v4588_v57 = vrot.slane %v4469_v34, %v10122_v49 }
 0x5ae   : > { %12588 = vst [vmem:[#allocation53_spill] sm:$0xff] %v10190_v59  ;;  %v4564_v30 = vcombine.high %v4468_v27, %v4468_v27 }
 0x5af   : > { %12593 = vst [vmem:[#allocation43_spill] sm:$0xff] %v10207_v36  ;;  %v4596_v29 = vcombine.high %v4588_v57, %v4588_v57  ;;  %v5715_v4 = vrot.slane %v4588_v57, 9 }
 0x5b1   : > { %v5716_v5 = vrot.slane %v4596_v29, 9 }
 0x5b3   : > { %v10287_v38 = vmax.f32 %v4596_v29, %v5716_v5 }
 0x5b5   : > { %12600 = vst [vmem:[#allocation175_spill] sm:$0xff] %v10287_v38 }
 0x5bb   : > { %v10096_v20 = vpop.f32.mrf.mxu1 }
 0x5bd   : > { %v10107_v14 = vpop.f32.mrf.mxu1 }
 0x5cf   : > { %v10113_v54 = vpop.f32.mrf.mxu1 }
 0x5d0   : > { %v3742_v52 = vadd.f32 %v10113_v54, %v10089_v24 }
 0x5d1   : > { %v3736_v62 = vpop.f32.mrf.mxu1 }
 0x5d2   : > { %v3737_v63 = vadd.f32 %v10089_v24, %v3736_v62  ;;  %v10192_v62 = vmax.f32 %v4544_v2, %v5705_v58  ;;  %v4578_v58 = vrot.slane %v4564_v30, %v10122_v49 }
 0x5d4   : > { %12589 = vst [vmem:[#allocation75_spill] sm:$0xff] %v10192_v62  ;;  %v10198_v48 = vmax.f32 %v3737_v63, 0.0  ;;  %v4571_v63 = vrot.slane %v4468_v27, %v10122_v49  ;;  %v3722_v27 = vadd.f32 %v10084_v60, %v10089_v24  ;;  %v4580_v23 = vcombine.high %v4578_v58, %v4578_v58 }
 0x5d6   : > { %v4579_v6 = vcombine.high %v4571_v63, %v4571_v63  ;;  %v10266_v33 = vmax.f32 %v3722_v27, 0.0  ;;  %v5711_v51 = vrot.slane %v4571_v63, 9 }
 0x5d8   : > { %v5712_v25 = vrot.slane %v4579_v6, 9  ;;  %12596 = vst [vmem:[#allocation122_spill] sm:$0xff] %v10266_v33 }
 0x5e3   : > { %v10134_v22 = vpop.f32.mrf.mxu1 }
 0x5e5   : > { %v3746_v44 = vpop.f32.mrf.mxu1 }
 0x5e6   : > { %v3747_v9 = vadd.f32 %v10089_v24, %v3746_v44  ;;  %v5709_v44 = vrot.slane %v4561_v42, 9 }
 0x5e8   : > { %v10177_v56 = vmax.f32 %v3747_v9, 0.0  ;;  %v10194_v9 = vmax.f32 %v4563_v61, %v5710_v13  ;;  %v10196_v32 = vmax.f32 %v4561_v42, %v5709_v44  ;;  %v4581_v42 = vcombine.high %v4469_v34, %v4469_v34 }
 0x5e9   : > { %v3732_v34 = vadd.f32 %v10096_v20, %v10089_v24  ;;  %v5714_v13 = vrot.slane %v4580_v23, 9  ;;  %v10283_v44 = vmax.f32 %v4588_v57, %v5715_v4 }
 0x5ea   : > { %12590 = vst [vmem:[#allocation51_spill] sm:$0xff] %v10194_v9  ;;  %12591 = vst [vmem:[#allocation20_spill] sm:$0xff] %v10196_v32  ;;  %v3884_v18 = vrot.slane %v10177_v56, 7  ;;  %v4472_v54 = vmax.f32 %v10198_v48, %v10177_v56  ;;  %v4085_v46 = vrot.slane %v10177_v56, 5 }
 0x5eb   : > { %v10261_v45 = vmax.f32 %v3732_v34, 0.0  ;;  %12598 = vst [vmem:[#allocation157_spill] sm:$0xff] %v10283_v44  ;;  %v10285_v34 = vmax.f32 %v4579_v6, %v5712_v25  ;;  %v10300_v57 = vmax.f32 %v4580_v23, %v5714_v13 }
 0x5ec   : > { %v3885_v61 = vsel %vm3864_vm2, %v3884_v18, %v10198_v48  ;;  %v4595_v18 = vrot.slane %v4581_v42, %v10122_v49 }
 0x5ed   : > { %12594 = vst [vmem:[#allocation19_spill] sm:$0xff] %v10261_v45  ;;  %v4471_v55 = vmax.f32 %v10266_v33, %v10261_v45  ;;  %12599 = vst [vmem:[#allocation32_spill] sm:$0xff] %v10285_v34 }
 0x5ee   : > { %v4597_v53 = vcombine.high %v4595_v18, %v4595_v18  ;;  %12605 = vst [vmem:[#allocation124_spill] sm:$0xff] %v10300_v57  ;;  %v4119_v57 = vrot.slane %v10177_v56, 6 }
 0x5ef   : > { %v4615_v25 = vcombine.high %v4471_v55, %v4471_v55 }
 0x5f0   : > { %v5718_v26 = vrot.slane %v4597_v53, 9 }
 0x5f1   : > { %v4629_v13 = vrot.slane %v4615_v25, %v10122_v49 }
 0x5f2   : > { %v10291_v8 = vmax.f32 %v4597_v53, %v5718_v26 }
 0x5f3   : > { %v4631_v42 = vcombine.high %v4629_v13, %v4629_v13  ;;  %v5725_v28 = vrot.slane %v4629_v13, 9 }
 0x5f4   : > { %12602 = vst [vmem:[#allocation77_spill] sm:$0xff] %v10291_v8 }
 0x5f5   : > { %v5726_v10 = vrot.slane %v4631_v42, 9 }
 0x5f7   : > { %v10210_v2 = vpop.f32.mrf.mxu1 }
 0x5f9   : > { %v3756_v31 = vpop.f32.mrf.mxu1 }
 0x5fa   : > { %v3757_v19 = vadd.f32 %v10089_v24, %v3756_v31  ;;  %v3727_v31 = vadd.f32 %v10089_v24, %v10107_v14  ;;  %v10268_v14 = vmax.f32 %v3717_v21, 0.0  ;;  %v10297_v21 = vmax.f32 %v4571_v63, %v5711_v51 }
 0x5fc   : > { %v10255_v20 = vmax.f32 %v3757_v19, 0.0  ;;  %v10263_v50 = vmax.f32 %v3727_v31, 0.0  ;;  %v5713_v19 = vrot.slane %v4578_v58, 9  ;;  %12597 = vst [vmem:[#allocation22_spill] sm:$0xff] %v10268_v14  ;;  %v5717_v31 = vrot.slane %v4595_v18, 9  ;;  %12604 = vst [vmem:[#allocation76_spill] sm:$0xff] %v10297_v21 }
 0x5fe   : > { %12595 = vst [vmem:[#allocation158_spill] sm:$0xff] %v10263_v50  ;;  %v3886_v30 = vrot.slane %v10255_v20, 6  ;;  %v4470_v60 = vmax.f32 %v10268_v14, %v10263_v50  ;;  %v10289_v16 = vmax.f32 %v4578_v58, %v5713_v19  ;;  %v4622_v19 = vrot.slane %v4471_v55, %v10122_v49 }
 0x600   : > { %v10278_v27 = vsel %vm3867_vm4, %v3886_v30, %v3885_v61  ;;  %12601 = vst [vmem:[#allocation29_spill] sm:$0xff] %v10289_v16  ;;  %v10295_v30 = vmax.f32 %v4595_v18, %v5717_v31  ;;  %v4598_v4 = vcombine.high %v4470_v60, %v4470_v60  ;;  %v4605_v5 = vrot.slane %v4470_v60, %v10122_v49 }
 0x601   : > { %v4630_v23 = vcombine.high %v4622_v19, %v4622_v19  ;;  %v3752_v60 = vadd.f32 %v10134_v22, %v10089_v24  ;;  %v5723_v6 = vrot.slane %v4622_v19, 9 }
 0x602   : > { %12603 = vst [vmem:[#allocation97_spill] sm:$0xff] %v10295_v30  ;;  %v4612_v53 = vrot.slane %v4598_v4, %v10122_v49  ;;  %v4613_v26 = vcombine.high %v4605_v5, %v4605_v5  ;;  %v5719_v22 = vrot.slane %v4605_v5, 9  ;;  %v10356_v30 = vmax.f32 %v3742_v52, 0.0 }
 0x603   : > { %v5724_v55 = vrot.slane %v4630_v23, 9  ;;  %v10349_v17 = vmax.f32 %v3752_v60, 0.0  ;;  %v10358_v21 = vmax.f32 %v4622_v19, %v5723_v6  ;;  %v10369_v4 = vmax.f32 %v4629_v13, %v5725_v28 }
 0x604   : > { %v4614_v31 = vcombine.high %v4612_v53, %v4612_v53  ;;  %v5720_v58 = vrot.slane %v4613_v26, 9  ;;  %v5721_v12 = vrot.slane %v4612_v53, 9  ;;  %12607 = vst [vmem:[#allocation160_spill] sm:$0xff] %v10356_v30  ;;  %v10361_v60 = vmax.f32 %v4605_v5, %v5719_v22 }
 0x605   : > { %12606 = vst [vmem:[#allocation21_spill] sm:$0xff] %v10349_v17  ;;  %12608 = vst [vmem:[#allocation123_spill] sm:$0xff] %v10358_v21  ;;  %v4473_v52 = vmax.f32 %v10356_v30, %v10349_v17  ;;  %v10377_v6 = vmax.f32 %v4631_v42, %v5726_v10  ;;  %v4236_v10 = vrot.slane %v10356_v30, 2  ;;  %v4202_v61 = vrot.slane %v10356_v30, 1 }
 0x606   : > { %v5722_v51 = vrot.slane %v4614_v31, 9  ;;  %12609 = vst [vmem:[#allocation24_spill] sm:$0xff] %v10361_v60  ;;  %v10363_v32 = vmax.f32 %v4613_v26, %v5720_v58  ;;  %v10367_v44 = vmax.f32 %v4612_v53, %v5721_v12  ;;  %12613 = vst [vmem:[#allocation31_spill] sm:$0xff] %v10369_v4  ;;  %v3914_v19 = vrot.slane %v10198_v48, 1 }
 0x607   : > { %12615 = vst [vmem:[#allocation99_spill] sm:$0xff] %v10377_v6  ;;  %v3982_v12 = vrot.slane %v10198_v48, 3  ;;  %v4016_v58 = vrot.slane %v10198_v48, 4  ;;  %v4656_v26 = vrot.slane %v4473_v52, %v10122_v49  ;;  %v4050_v5 = vrot.slane %v10198_v48, 5 }
 0x608   : > { %12610 = vst [vmem:[#allocation159_spill] sm:$0xff] %v10363_v32  ;;  %12612 = vst [vmem:[#allocation23_spill] sm:$0xff] %v10367_v44  ;;  %v4084_v13 = vrot.slane %v10198_v48, 6  ;;  %v4237_v42 = vrot.slane %v10349_v17, 1  ;;  %v4118_v4 = vrot.slane %v10198_v48, 7  ;;  %v4168_v60 = vrot.slane %v10349_v17, 7 }
 0x609   : > { %v3949_v21 = vrot.slane %v10177_v56, 1  ;;  %v4305_v6 = vrot.slane %v10349_v17, 3  ;;  %v10430_v39 = vsel %vm3864_vm2, %v10349_v17, %v4202_v61  ;;  %v4373_v8 = vrot.slane %v10349_v17, 5 }
 0x60a   : > { %v10302_v29 = vpop.f32.mrf.mxu1  ;;  %v4271_v44 = vrot.slane %v10349_v17, 2  ;;  %v10441_v38 = vsel %vm3864_vm2, %v10177_v56, %v3914_v19  ;;  %v4238_v61 = vsel %vm3864_vm2, %v4237_v42, %v4236_v10  ;;  %v5731_v36 = vrot.slane %v4656_v26, 9 }
 0x60b   : > { %v3762_v10 = vadd.f32 %v10210_v2, %v10089_v24 }
 0x60c   : > { %v3766_v18 = vpop.f32.mrf.mxu1 }
 0x60d   : > { %v3767_v63 = vadd.f32 %v10089_v24, %v3766_v18  ;;  %v10365_v18 = vmax.f32 %v4630_v23, %v5724_v55  ;;  %v4639_v23 = vrot.slane %v4472_v54, %v10122_v49  ;;  %v3948_v55 = vrot.slane %v10198_v48, 2 }
 0x60e   : > { %v4051_v48 = vrot.slane %v10177_v56, 4 }
 0x60f   : > { %v10347_v25 = vmax.f32 %v3767_v63, 0.0  ;;  %12611 = vst [vmem:[#allocation54_spill] sm:$0xff] %v10365_v18  ;;  %v10373_v63 = vmax.f32 %v4614_v31, %v5722_v51  ;;  %v4632_v31 = vcombine.high %v4472_v54, %v4472_v54  ;;  %v3950_v62 = vsel %vm3864_vm2, %v3949_v21, %v3948_v55 }
 0x610   : > { %v4052_v33 = vsel %vm3864_vm2, %v4051_v48, %v4050_v5  ;;  %v5727_v47 = vrot.slane %v4639_v23, 9  ;;  %v3772_v21 = vadd.f32 %v10302_v29, %v10089_v24  ;;  %v10459_v55 = vmax.f32 %v4656_v26, %v5731_v36 }
 0x611   : > { %v3888_v35 = vrot.slane %v10347_v25, 5  ;;  %12614 = vst [vmem:[#allocation79_spill] sm:$0xff] %v10373_v63  ;;  %v4646_v53 = vrot.slane %v4632_v31, %v10122_v49  ;;  %v3983_v31 = vrot.slane %v10177_v56, 2  ;;  %v4339_v5 = vrot.slane %v10349_v17, 4 }
 0x612   : > { %12617 = vst [vmem:[#allocation47_spill] sm:$0xff] %v10459_v55  ;;  %v10476_v36 = vmax.f32 %v4639_v23, %v5727_v47 }
 0x613   : > { %v10388_v51 = vsel %vm3870_vm6, %v3888_v35, %v10278_v27  ;;  %v4649_v27 = vcombine.high %v4473_v52, %v4473_v52  ;;  %v4647_v52 = vcombine.high %v4639_v23, %v4639_v23  ;;  %v4648_v9 = vcombine.high %v4646_v53, %v4646_v53 }
 0x614   : > { %v3984_v45 = vsel %vm3864_vm2, %v3983_v31, %v3982_v12  ;;  %v5729_v34 = vrot.slane %v4646_v53, 9  ;;  %12622 = vst [vmem:[#allocation161_spill] sm:$0xff] %v10476_v36  ;;  %v12628_v23 = vrot.slane %v10356_v30, 5 }
 0x615   : > { %v4663_v54 = vrot.slane %v4649_v27, %v10122_v49  ;;  %v4664_v27 = vcombine.high %v4656_v26, %v4656_v26  ;;  %v5728_v63 = vrot.slane %v4647_v52, 9  ;;  %v5730_v19 = vrot.slane %v4648_v9, 9 }
 0x616   : > { %v12625_v26 = vrot.slane %v10356_v30, 4 }
 0x617   : > { %v4665_v18 = vcombine.high %v4663_v54, %v4663_v54  ;;  %v10456_v12 = vmax.f32 %v4647_v52, %v5728_v63  ;;  %v5733_v2 = vrot.slane %v4663_v54, 9  ;;  %v10472_v63 = vmax.f32 %v4648_v9, %v5730_v19 }
 0x618   : > { %v4340_v52 = vsel %vm3864_vm2, %v4339_v5, %v12628_v23  ;;  %v3916_v5 = vrot.slane %v10255_v20, 7  ;;  %v4087_v23 = vrot.slane %v10255_v20, 4 }
 0x619   : > { %v5734_v59 = vrot.slane %v4665_v18, 9  ;;  %12616 = vst [vmem:[#allocation78_spill] sm:$0xff] %v10456_v12  ;;  %12620 = vst [vmem:[#allocation125_spill] sm:$0xff] %v10472_v63 }
 0x61e   : > { %v10404_v22 = vpop.f32.mrf.mxu1 }
 0x620   : > { %v3776_v28 = vpop.f32.mrf.mxu1 }
 0x621   : > { %v3777_v35 = vadd.f32 %v10089_v24, %v3776_v28  ;;  %v4017_v28 = vrot.slane %v10177_v56, 3  ;;  %v4086_v56 = vsel %vm3864_vm2, %v4085_v46, %v4084_v13  ;;  %v4474_v46 = vmax.f32 %v10255_v20, %v10347_v25 }
 0x622   : > { %v10474_v13 = vmax.f32 %v4665_v18, %v5734_v59  ;;  %v12627_v59 = vrot.slane %v10356_v30, 3 }
 0x623   : > { %v10437_v16 = vmax.f32 %v3777_v35, 0.0  ;;  %v4018_v32 = vsel %vm3864_vm2, %v4017_v28, %v4016_v58  ;;  %v5732_v35 = vrot.slane %v4664_v27, 9  ;;  %v4120_v58 = vsel %vm3864_vm2, %v4119_v57, %v4118_v4 }
 0x624   : > { %v10464_v28 = vmax.f32 %v4646_v53, %v5729_v34  ;;  %12621 = vst [vmem:[#allocation27_spill] sm:$0xff] %v10474_v13  ;;  %v10478_v57 = vmax.f32 %v3762_v10, 0.0  ;;  %v10480_v4 = vmax.f32 %v3772_v21, 0.0  ;;  %v4169_v34 = vsel %vm3864_vm2, %v4168_v60, %v10356_v30 }
 0x625   : > { %v3890_v42 = vrot.slane %v10437_v16, 4  ;;  %v10462_v31 = vmax.f32 %v4664_v27, %v5732_v35  ;;  %v4306_v53 = vsel %vm3864_vm2, %v4305_v6, %v12625_v26  ;;  %v4272_v47 = vsel %vm3864_vm2, %v4271_v44, %v12627_v59 }
 0x626   : > { %12619 = vst [vmem:[#allocation162_spill] sm:$0xff] %v10464_v28  ;;  %12623 = vst [vmem:[#allocation34_spill] sm:$0xff] %v10478_v57  ;;  %v10504_v27 = vmax.f32 %v4663_v54, %v5733_v2  ;;  %v4666_v48 = vcombine.high %v4474_v46, %v4474_v46  ;;  %v4239_v10 = vsel %vm3867_vm4, %v10478_v57, %v4238_v61  ;;  %v4170_v21 = vrot.slane %v10478_v57, 6 }
 0x627   : > { %12618 = vst [vmem:[#allocation98_spill] sm:$0xff] %v10462_v31  ;;  %v10468_v29 = vsel %vm3873_vm8, %v3890_v42, %v10388_v51  ;;  %12624 = vst [vmem:[#allocation25_spill] sm:$0xff] %v10480_v4  ;;  %v12626_v51 = vrot.slane %v10356_v30, 6  ;;  %v4307_v42 = vrot.slane %v10478_v57, 2  ;;  %v4475_v54 = vmax.f32 %v10478_v57, %v10480_v4 }
 0x628   : > { %12629 = vst [vmem:[#allocation52_spill] sm:$0xff] %v10504_v27  ;;  %v3985_v2 = vrot.slane %v10255_v20, 1  ;;  %v4019_v26 = vrot.slane %v10255_v20, 2  ;;  %v4053_v59 = vrot.slane %v10255_v20, 3  ;;  %v4121_v61 = vrot.slane %v10255_v20, 5 }
 0x629   : > { %v4374_v9 = vsel %vm3864_vm2, %v4373_v8, %v12626_v51  ;;  %v4204_v51 = vrot.slane %v10478_v57, 7  ;;  %v4375_v19 = vrot.slane %v10478_v57, 4  ;;  %v10527_v18 = vrot.slane %v4474_v46, %v10122_v49 }
 0x62a   : > { %v4680_v35 = vrot.slane %v4666_v48, %v10122_v49  ;;  %v4273_v8 = vrot.slane %v10478_v57, 1  ;;  %v4341_v6 = vrot.slane %v10478_v57, 3  ;;  %v3951_v44 = vsel %vm3867_vm4, %v10255_v20, %v3950_v62 }
 0x62b   : > { %v4171_v60 = vsel %vm3867_vm4, %v4170_v21, %v4169_v34  ;;  %v4690_v30 = vrot.slane %v4475_v54, %v10122_v49  ;;  %v4683_v17 = vcombine.high %v4475_v54, %v4475_v54  ;;  %v3917_v27 = vsel %vm3867_vm4, %v3916_v5, %v10441_v38 }
 0x62c   : > { %v3986_v46 = vsel %vm3867_vm4, %v3985_v2, %v3984_v45  ;;  %v4020_v36 = vsel %vm3867_vm4, %v4019_v26, %v4018_v32  ;;  %v4308_v48 = vsel %vm3867_vm4, %v4307_v42, %v4306_v53  ;;  %v4054_v55 = vsel %vm3867_vm4, %v4053_v59, %v4052_v33 }
 0x62d   : > { %v4088_v57 = vsel %vm3867_vm4, %v4087_v23, %v4086_v56  ;;  %v4122_v62 = vsel %vm3867_vm4, %v4121_v61, %v4120_v58  ;;  %v4205_v20 = vsel %vm3867_vm4, %v4204_v51, %v10430_v39  ;;  %v4681_v34 = vcombine.high %v10527_v18, %v10527_v18 }
 0x62e   : > { %v4682_v21 = vcombine.high %v4680_v35, %v4680_v35  ;;  %v4376_v38 = vsel %vm3867_vm4, %v4375_v19, %v4374_v9  ;;  %v4274_v45 = vsel %vm3867_vm4, %v4273_v8, %v4272_v47  ;;  %v4240_v32 = vrot.slane %v10480_v4, 7 }
 0x62f   : > { %v4698_v53 = vcombine.high %v4690_v30, %v4690_v30  ;;  %v10552_v33 = vrot.slane %v4683_v17, %v10122_v49  ;;  %v4342_v56 = vsel %vm3867_vm4, %v4341_v6, %v4340_v52  ;;  %v3918_v58 = vrot.slane %v10347_v25, 6 }
 0x630   : > { %v4172_v39 = vrot.slane %v10480_v4, 5  ;;  %v4309_v42 = vrot.slane %v10480_v4, 1  ;;  %v4206_v54 = vrot.slane %v10480_v4, 6  ;;  %v3952_v9 = vrot.slane %v10347_v25, 7 }
 0x631   : > { %12630 = vst [vmem:[#allocation81_spill] sm:$0xff] %v10552_v33  ;;  %v4021_v47 = vrot.slane %v10347_v25, 1  ;;  %v4377_v8 = vrot.slane %v10480_v4, 3  ;;  %v10564_v17 = vsel %vm3870_vm6, %v10480_v4, %v4274_v45  ;;  %v5736_v19 = vrot.slane %v4681_v34, 9 }
 0x632   : > { %v4055_v52 = vrot.slane %v10347_v25, 2  ;;  %v5738_v6 = vrot.slane %v4682_v21, 9  ;;  %v5737_v5 = vrot.slane %v4680_v35, 9  ;;  %v4089_v2 = vrot.slane %v10347_v25, 3 }
 0x633   : > { %v4123_v26 = vrot.slane %v10347_v25, 4  ;;  %v5740_v51 = vrot.slane %v4698_v53, 9  ;;  %v4699_v59 = vcombine.high %v10552_v33, %v10552_v33  ;;  %v3782_v23 = vadd.f32 %v10404_v22, %v10089_v24 }
 0x634   : > { %v3919_v45 = vsel %vm3870_vm6, %v3918_v58, %v3917_v27  ;;  %v3987_v13 = vsel %vm3870_vm6, %v10347_v25, %v3986_v46  ;;  %v4241_v28 = vsel %vm3870_vm6, %v4240_v32, %v4239_v10  ;;  %v3953_v31 = vsel %vm3870_vm6, %v3952_v9, %v3951_v44 }
 0x635   : > { %v4022_v63 = vsel %vm3870_vm6, %v4021_v47, %v4020_v36  ;;  %v5739_v12 = vrot.slane %v4690_v30, 9  ;;  %v4343_v37 = vrot.slane %v10480_v4, 2  ;;  %v10580_v40 = vmax.f32 %v4681_v34, %v5736_v19 }
 0x636   : > { %v4056_v0 = vsel %vm3870_vm6, %v4055_v52, %v4054_v55  ;;  %v10583_v22 = vmax.f32 %v4682_v21, %v5738_v6  ;;  %v10585_v11 = vmax.f32 %v4680_v35, %v5737_v5  ;;  %v4090_v27 = vsel %vm3870_vm6, %v4089_v2, %v4088_v57 }
 0x637   : > { %v4124_v25 = vsel %vm3870_vm6, %v4123_v26, %v4122_v62  ;;  %v10589_v10 = vmax.f32 %v4698_v53, %v5740_v51  ;;  %v5742_v44 = vrot.slane %v4699_v59, 9  ;;  %v10591_v46 = vmax.f32 %v3782_v23, 0.0 }
 0x638   : > { %v4173_v32 = vsel %vm3870_vm6, %v4172_v39, %v4171_v60  ;;  %v4310_v34 = vsel %vm3870_vm6, %v4309_v42, %v4308_v48  ;;  %v5735_v55 = vrot.slane %v10527_v18, 9  ;;  %v4207_v21 = vsel %vm3870_vm6, %v4206_v54, %v4205_v20 }
 0x639   : > { %12631 = vst [vmem:[#allocation26_spill] sm:$0xff] %v10591_v46  ;;  %v4378_v35 = vsel %vm3870_vm6, %v4377_v8, %v4376_v38  ;;  %v10598_v58 = vmax.f32 %v4690_v30, %v5739_v12  ;;  %v10601_v57 = vsel %vm3870_vm6, %v4343_v37, %v4342_v56  ;;  %v10614_v37 = vmax.f32 %v4699_v59, %v5742_v44 }
 0x63a   : > { %12633 = vst [vmem:[#allocation49_spill] sm:$0xff] %v10601_v57  ;;  %v3920_v12 = vrot.slane %v10437_v16, 5  ;;  %v3954_v56 = vrot.slane %v10437_v16, 6  ;;  %v4242_v39 = vrot.slane %v10591_v46, 6  ;;  %v10620_v42 = vmax.f32 %v10527_v18, %v5735_v55 }
 0x63b   : > { %12632 = vst [vmem:[#allocation80_spill] sm:$0xff] %v10598_v58  ;;  %12634 = vst [vmem:[#allocation100_spill] sm:$0xff] %v10614_v37  ;;  %v3988_v54 = vrot.slane %v10437_v16, 7  ;;  %v4057_v9 = vrot.slane %v10437_v16, 1  ;;  %v4091_v47 = vrot.slane %v10437_v16, 2  ;;  %v4174_v8 = vrot.slane %v10591_v46, 4 }
 0x63c   : > { %12635 = vst [vmem:[#allocation164_spill] sm:$0xff] %v10620_v42  ;;  %v4125_v19 = vrot.slane %v10437_v16, 3  ;;  %v4208_v52 = vrot.slane %v10591_v46, 5  ;;  %v4379_v6 = vrot.slane %v10591_v46, 2  ;;  %v4276_v5 = vrot.slane %v10591_v46, 7  ;;  %v12708_v58 = vld [vmem:[#allocation159_spill] sm:$0xff] }
 0x63d   : > { %v4311_v26 = vsel %vm3873_vm8, %v10591_v46, %v4310_v34  ;;  %v3921_v59 = vsel %vm3873_vm8, %v3920_v12, %v3919_v45  ;;  %v3955_v23 = vsel %vm3873_vm8, %v3954_v56, %v3953_v31  ;;  %v4243_v44 = vsel %vm3873_vm8, %v4242_v39, %v4241_v28  ;;  %v12710_v37 = vld [vmem:[#allocation19_spill] sm:$0xff] }
 0x63e   : > { %v5963_v61 = vpop.f32.mrf.mxu1  ;;  %v4058_v55 = vsel %vm3873_vm8, %v4057_v9, %v4056_v0  ;;  %v4175_v34 = vsel %vm3873_vm8, %v4174_v8, %v4173_v32  ;;  %v4209_v48 = vsel %vm3873_vm8, %v4208_v52, %v4207_v21  ;;  %v10650_v45 = vsel %vm3873_vm8, %v4379_v6, %v4378_v35 }
 0x63f   : > { %v3792_v20 = vadd.f32 %v5963_v61, %v10089_v24  ;;  %v4023_v61 = vsel %vm3873_vm8, %v10437_v16, %v4022_v63  ;;  %v10654_v31 = vsel %vm3873_vm8, %v4276_v5, %v10564_v17  ;;  %v12659_v8 = vrot.slane %v10117_v41, 5 }
 0x640   : > { %v3786_v36 = vpop.f32.mrf.mxu1  ;;  %v12661_v4 = vrot.slane %v10263_v50, 3 }
 0x641   : > { %v3787_v38 = vadd.f32 %v10089_v24, %v3786_v36  ;;  %v10630_v2 = vmax.f32 %v3792_v20, 0.0  ;;  %v3989_v36 = vsel %vm3873_vm8, %v3988_v54, %v3987_v13  ;;  %v4092_v20 = vsel %vm3873_vm8, %v4091_v47, %v4090_v27 }
 0x643   : > { %12636 = vst [vmem:[#allocation48_spill] sm:$0xff] %v10630_v2  ;;  %v10632_v18 = vmax.f32 %v3787_v38, 0.0  ;;  %v4126_v38 = vsel %vm3873_vm8, %v4125_v19, %v4124_v25  ;;  %v4244_v13 = vrot.slane %v10630_v2, 5  ;;  %v4176_v35 = vrot.slane %v10630_v2, 3 }
 0x644   : > { %v4312_v56 = vrot.slane %v10630_v2, 7  ;;  %v4210_v39 = vrot.slane %v10630_v2, 4 }
 0x645   : > { %v3922_v63 = vrot.slane %v10632_v18, 4  ;;  %v4476_v0 = vmax.f32 %v10437_v16, %v10632_v18  ;;  %v3892_v27 = vrot.slane %v10632_v18, 3  ;;  %v3956_v25 = vrot.slane %v10632_v18, 5 }
 0x646   : > { %v3990_v32 = vrot.slane %v10632_v18, 6  ;;  %v4024_v21 = vrot.slane %v10632_v18, 7  ;;  %v4093_v12 = vrot.slane %v10632_v18, 1  ;;  %v10670_v16 = vmax.f32 %v10591_v46, %v10630_v2 }
 0x647   : > { %v10675_v9 = vsel %vm3876_vm10, %v10632_v18, %v4058_v55  ;;  %v10680_v19 = vsel %vm3876_vm10, %v3922_v63, %v3921_v59  ;;  %v10683_v52 = vrot.slane %v4476_v0, %v10122_v49  ;;  %v10686_v6 = vsel %vm3876_vm10, %v4244_v13, %v4243_v44 }
 0x648   : > { %v10695_v55 = vsel %vm3876_vm10, %v3956_v25, %v3955_v23  ;;  %v10701_v59 = vsel %vm3876_vm10, %v4024_v21, %v4023_v61  ;;  %v10704_v44 = vsel %vm3876_vm10, %v4093_v12, %v4092_v20  ;;  %v4127_v63 = vrot.slane %v10632_v18, 2 }
 0x649   : > { %12637 = vst [vmem:[#allocation28_spill] sm:$0xff] %v10683_v52  ;;  %v10708_v13 = vsel %vm3876_vm10, %v4176_v35, %v4175_v34  ;;  %v4715_v61 = vcombine.high %v10683_v52, %v10683_v52  ;;  %v10717_v20 = vsel %vm3876_vm10, %v4312_v56, %v4311_v26  ;;  %v10720_v18 = vsel %vm3876_vm10, %v4210_v39, %v4209_v48 }
 0x64a   : > { %v4724_v34 = vrot.slane %v10670_v16, %v10122_v49  ;;  %v12640_v35 = vrot.slane %v10117_v41, 2  ;;  %v12641_v26 = vrot.slane %v10117_v41, 3  ;;  %v12642_v48 = vrot.slane %v10111_v15, 7 }
 0x64b   : > { %v5744_v30 = vrot.slane %v4715_v61, 9  ;;  %v12711_v52 = vrot.slane %v12710_v37, 1 }
 0x64c   : > { %v4732_v60 = vcombine.high %v4724_v34, %v4724_v34  ;;  %v5747_v47 = vrot.slane %v4724_v34, 9 }
 0x64d   : > { %v10851_v57 = vmax.f32 %v4715_v61, %v5744_v30 }
 0x64e   : > { %v5924_v28 = vpop.f32.mrf.mxu0 }
 0x650   : > { %v3656_v17 = vpop.f32.mrf.mxu0 }
 0x651   : > { %v3657_v54 = vadd.f32 %v10089_v24, %v3656_v17  ;;  %v10690_v24 = vsel %vm3876_vm10, %v3892_v27, %v10468_v29  ;;  %v10698_v17 = vsel %vm3876_vm10, %v3990_v32, %v3989_v36  ;;  %v4700_v29 = vcombine.high %v4476_v0, %v4476_v0 }
 0x652   : > { %v12639_v32 = vrot.slane %v10117_v41, 1 }
 0x653   : > { %v10692_v5 = vmax.f32 %v3657_v54, 0.0 }
 0x655   : > { %12638 = vst [vmem:[#allocation163_spill] sm:$0xff] %v10692_v5  ;;  %v3900_v27 = vrot.slane %v10692_v5, 1  ;;  %v3934_v23 = vrot.slane %v10692_v5, 2  ;;  %v3968_v36 = vrot.slane %v10692_v5, 3  ;;  %v4002_v25 = vrot.slane %v10692_v5, 4 }
 0x657   : > { %v3901_v0 = vsel %vm3864_vm2, %v10117_v41, %v3900_v27  ;;  %v3936_v21 = vsel %vm3864_vm2, %v12639_v32, %v3934_v23  ;;  %v3970_v12 = vsel %vm3864_vm2, %v12640_v35, %v3968_v36  ;;  %v4004_v56 = vsel %vm3864_vm2, %v12641_v26, %v4002_v25 }
 0x658   : > { %v3903_v39 = vsel %vm3867_vm4, %v12642_v48, %v3901_v0  ;;  %v3937_v54 = vsel %vm3867_vm4, %v10111_v15, %v3936_v21  ;;  %v12643_v27 = vrot.slane %v10111_v15, 1  ;;  %v10744_v23 = vsel %vm3876_vm10, %v4127_v63, %v4126_v38 }
 0x659   : > { %v12644_v36 = vrot.slane %v10105_v43, 6  ;;  %v12645_v25 = vrot.slane %v10105_v43, 7  ;;  %v4714_v21 = vrot.slane %v4700_v29, %v10122_v49  ;;  %v12646_v26 = vrot.slane %v10182_v7, 5 }
 0x65a   : > { %v3972_v51 = vsel %vm3867_vm4, %v12643_v27, %v3970_v12  ;;  %v12647_v38 = vrot.slane %v10182_v7, 6  ;;  %v12648_v48 = vrot.slane %v10111_v15, 2  ;;  %v4036_v27 = vrot.slane %v10692_v5, 5 }
 0x65b   : > { %v3905_v32 = vsel %vm3870_vm6, %v12644_v36, %v3903_v39  ;;  %v3939_v35 = vsel %vm3870_vm6, %v12645_v25, %v3937_v54  ;;  %v3973_v0 = vsel %vm3870_vm6, %v10105_v43, %v3972_v51  ;;  %v10768_v51 = vld [vmem:[%s11679_s4] ss:$0 sm:$0xff]  ;;  %v12649_v54 = vrot.slane %v10174_v1, 4 }
 0x65c   : > { %v3907_v12 = vsel %vm3873_vm8, %v12646_v26, %v3905_v32  ;;  %v3941_v63 = vsel %vm3873_vm8, %v12647_v38, %v3939_v35  ;;  %v4006_v39 = vsel %vm3867_vm4, %v12648_v48, %v4004_v56  ;;  %v3662_v29 = vadd.f32 %v10768_v51, %v5924_v28 }
 0x65d   : > { %v3909_v36 = vsel %vm3876_vm10, %v12649_v54, %v3907_v12  ;;  %v12650_v32 = vrot.slane %v10174_v1, 5  ;;  %v4070_v35 = vrot.slane %v10692_v5, 6  ;;  %v12651_v56 = vrot.slane %v10268_v14, 3 }
 0x65e   : > { %v12652_v38 = vrot.slane %v10182_v7, 7  ;;  %v4717_v28 = vcombine.high %v10670_v16, %v10670_v16  ;;  %v12653_v12 = vrot.slane %v10263_v50, 2  ;;  %v4716_v53 = vcombine.high %v4714_v21, %v4714_v21 }
 0x65f   : > { %v3943_v25 = vsel %vm3876_vm10, %v12650_v32, %v3941_v63  ;;  %v3911_v26 = vsel %vm3879_vm12, %v12651_v56, %v3909_v36  ;;  %v12654_v63 = vrot.slane %v10105_v43, 1  ;;  %v12655_v36 = vrot.slane %v10268_v14, 4 }
 0x660   : > { %v3975_v48 = vsel %vm3873_vm8, %v12652_v38, %v3973_v0  ;;  %v3913_v54 = vsel %vm3882_vm13, %v12653_v12, %v3911_v26  ;;  %v12656_v56 = vrot.slane %v10117_v41, 4  ;;  %v4104_v38 = vrot.slane %v10692_v5, 7 }
 0x661   : > { %v4008_v32 = vsel %vm3870_vm6, %v12654_v63, %v4006_v39  ;;  %3928 = vrot.lane.b32.xlu0 %v3913_v54, %s11920_s15  ;;  %v3945_v0 = vsel %vm3879_vm12, %v12655_v36, %v3943_v25  ;;  %v5745_v62 = vrot.slane %v4714_v21, 9  ;;  %v10800_v26 = vmax.f32 %v3662_v29, 0.0  ;;  %v5966_v36 = vpop.f32.mrf.mxu1 }
 0x662   : > { %v4038_v16 = vsel %vm3864_vm2, %v12656_v56, %v4036_v27  ;;  %v12657_v12 = vrot.slane %v10174_v1, 6  ;;  %v12658_v63 = vrot.slane %v10111_v15, 3  ;;  %v4072_v25 = vsel %vm3864_vm2, %v12659_v8, %v4070_v35 }
 0x663   : > { %v4009_v27 = vsel %vm3873_vm8, %v10182_v7, %v4008_v32  ;;  %v5748_v56 = vrot.slane %v4732_v60, 9  ;;  %v10814_v29 = vrot.slane %v4717_v28, %v10122_v49  ;;  %v12663_v8 = vrot.slane %v10630_v2, 1 }
 0x664   : > { %v3977_v39 = vsel %vm3876_vm10, %v12657_v12, %v3975_v48  ;;  %v4040_v54 = vsel %vm3867_vm4, %v12658_v63, %v4038_v16  ;;  %v3947_v48 = vsel %vm3882_vm13, %v12661_v4, %v3945_v0  ;;  %v12662_v12 = vrot.slane %v10105_v43, 2 }
 0x665   : > { %12660 = vst [vmem:[#allocation180_spill] sm:$0xff] %v10814_v29  ;;  %v10826_v35 = vsel %vm3876_vm10, %v12663_v8, %v10650_v45  ;;  %v12664_v32 = vrot.slane %v10630_v2, 6  ;;  %3962 = vrot.lane.b32.xlu0 %v3947_v48, %s6215_s17  ;;  %v12665_v4 = vrot.slane %v10268_v14, 5  ;;  %v12666_v63 = vrot.slane %v10111_v15, 4 }
 0x666   : > { %v4042_v16 = vsel %vm3870_vm6, %v12662_v12, %v4040_v54  ;;  %v12667_v12 = vrot.slane %v10117_v41, 6  ;;  %v5746_v8 = vrot.slane %v4716_v53, 9  ;;  %v12668_v2 = vrot.slane %v10174_v1, 7 }
 0x667   : > { %v10832_v28 = vsel %vm3876_vm10, %v12664_v32, %v10654_v31  ;;  %v3979_v0 = vsel %vm3879_vm12, %v12665_v4, %v3977_v39  ;;  %v4074_v54 = vsel %vm3867_vm4, %v12666_v63, %v4072_v25  ;;  %v12669_v32 = vld [vmem:[#allocation156_spill] sm:$0xff]  ;;  %v10853_v39 = vmax.f32 %v4714_v21, %v5745_v62  ;;  %v3796_v4 = vpop.f32.mrf.mxu1 }
 0x668   : > { %v4106_v45 = vsel %vm3864_vm2, %v12667_v12, %v4104_v38  ;;  %v4011_v31 = vsel %vm3876_vm10, %v12668_v2, %v4009_v27  ;;  %v12670_v48 = vrot.slane %v12669_v32, 7  ;;  %v12671_v25 = vrot.slane %v10182_v7, 1 }
 0x669   : > { %v10858_v38 = vmax.f32 %v4732_v60, %v5748_v56  ;;  %v10862_v12 = vcombine.high %v10814_v29, %v10814_v29  ;;  %v10864_v2 = vmax.f32 %v4724_v34, %v5747_v47  ;;  %v12673_v27 = vrot.slane %v10263_v50, 4  ;;  %v12677_v34 = vld [vmem:[#allocation184_spill] sm:$0xff] }
 0x66a   : > { %v4155_v33 = vsel %vm3864_vm2, %v12670_v48, %v10800_v26  ;;  %v4044_v63 = vsel %vm3873_vm8, %v12671_v25, %v4042_v16  ;;  %v12674_v62 = vrot.slane %v10105_v43, 3  ;;  %v12675_v21 = vrot.slane %v10111_v15, 5 }
 0x66b   : > { %12672 = vst [vmem:[#allocation176_spill] sm:$0xff] %v10864_v2  ;;  %v3981_v30 = vsel %vm3882_vm13, %v12673_v27, %v3979_v0  ;;  %v4188_v60 = vrot.slane %v10800_v26, 1  ;;  %v12676_v56 = vrot.slane %v10268_v14, 6  ;;  %v12678_v48 = vrot.slane %v12677_v34, 6 }
 0x66c   : > { %v4076_v61 = vsel %vm3870_vm6, %v12674_v62, %v4074_v54  ;;  %v4108_v16 = vsel %vm3867_vm4, %v12675_v21, %v4106_v45  ;;  %3996 = vrot.lane.b32.xlu0 %v3981_v30, %s6217_s19  ;;  %v4464_v25 = vmax.f32 %v10692_v5, %v10117_v41  ;;  %v10885_v54 = vmax.f32 %v4716_v53, %v5746_v8 }
 0x66d   : > { %v4013_v47 = vsel %vm3879_vm12, %v12676_v56, %v4011_v31  ;;  %v4157_v0 = vsel %vm3867_vm4, %v12678_v48, %v4155_v33  ;;  %v3797_v27 = vadd.f32 %v10768_v51, %v3796_v4  ;;  %v4045_v45 = vsel %vm3876_vm10, %v10174_v1, %v4044_v63  ;;  %v12682_v48 = vld [vmem:[#allocation153_spill] sm:$0xff] }
 0x66e   : > { %v12679_v62 = vrot.slane %v10182_v7, 2  ;;  %v12680_v21 = vrot.slane %v10105_v43, 4  ;;  %v10901_v8 = vrot.slane %v4464_v25, %v10122_v49  ;;  %v12681_v63 = vrot.slane %v10263_v50, 5 }
 0x66f   : > { %v12683_v31 = vrot.slane %v12682_v48, 5  ;;  %v3802_v46 = vadd.f32 %v10768_v51, %v5966_v36  ;;  %v12692_v36 = vrot.slane %v10174_v1, 2 }
 0x670   : > { %v4078_v33 = vsel %vm3873_vm8, %v12679_v62, %v4076_v61  ;;  %v4110_v53 = vsel %vm3870_vm6, %v12680_v21, %v4108_v16  ;;  %v4015_v56 = vsel %vm3882_vm13, %v12681_v63, %v4013_v47  ;;  %v4189_v61 = vsel %vm3864_vm2, %v12669_v32, %v4188_v60 }
 0x671   : > { %v4159_v30 = vsel %vm3870_vm6, %v12683_v31, %v4157_v0  ;;  %v4256_v62 = vrot.slane %v10800_v26, 3  ;;  %4030 = vrot.lane.b32.xlu0 %v4015_v56, %s6219_s18  ;;  %v12684_v16 = vrot.slane %v10268_v14, 7  ;;  %v4511_v4 = vcombine.high %v10901_v8, %v10901_v8  ;;  %v5969_v31 = vpop.f32.mrf.mxu1 }
 0x672   : > { %v10923_v0 = vmax.f32 %v3797_v27, 0.0  ;;  %v12685_v60 = vrot.slane %v10174_v1, 1  ;;  %v12686_v56 = vrot.slane %v10182_v7, 3  ;;  %v12689_v47 = vrot.slane %v12677_v34, 7 }
 0x673   : > { %v4047_v21 = vsel %vm3879_vm12, %v12684_v16, %v4045_v45  ;;  %v4496_v45 = vcombine.high %v4464_v25, %v4464_v25  ;;  %v12687_v16 = vld [vmem:[#allocation44_spill] sm:$0xff]  ;;  %v5696_v27 = vrot.slane %v4511_v4, 9  ;;  %v3806_v2 = vpop.f32.mrf.mxu1  ;;  %v12691_v25 = vrot.slane %v12669_v32, 2 }
 0x674   : > { %v4080_v43 = vsel %vm3876_vm10, %v12685_v60, %v4078_v33  ;;  %v4112_v15 = vsel %vm3873_vm8, %v12686_v56, %v4110_v53  ;;  %v12688_v5 = vrot.slane %v12687_v16, 4  ;;  %v4191_v63 = vsel %vm3867_vm4, %v12689_v47, %v4189_v61 }
 0x675   : > { %v12690_v33 = vrot.slane %v10263_v50, 6  ;;  %v4258_v53 = vsel %vm3864_vm2, %v12691_v25, %v4256_v62  ;;  %v4081_v61 = vsel %vm3879_vm12, %v10268_v14, %v4080_v43  ;;  %v4114_v47 = vsel %vm3876_vm10, %v12692_v36, %v4112_v15 }
 0x676   : > { %v4161_v41 = vsel %vm3873_vm8, %v12688_v5, %v4159_v30  ;;  %v10946_v5 = vrot.slane %v4496_v45, %v10122_v49  ;;  %v3807_v30 = vadd.f32 %v10768_v51, %v3806_v2  ;;  %v5025_v56 = vmax.f32 %v4511_v4, %v5696_v27  ;;  %v12697_v2 = vld [vmem:[#allocation174_spill] sm:$0xff] }
 0x677   : > { %v4049_v60 = vsel %vm3882_vm13, %v12690_v33, %v4047_v21  ;;  %v3924_v21 = vrot.slane %v10923_v0, 3  ;;  %v12693_v33 = vrot.slane %v12682_v48, 6  ;;  %v12694_v25 = vrot.slane %v12677_v34, 1 }
 0x678   : > { %4064 = vrot.lane.b32.xlu0 %v4049_v60, %s6220_s26  ;;  %v4512_v45 = vcombine.high %v10946_v5, %v10946_v5  ;;  %v10962_v60 = vmax.f32 %v3807_v30, 0.0  ;;  %v5147_v43 = vrot.slane %v5025_v56, %v10124_v3  ;;  %v10970_v4 = vmax.f32 %v10800_v26, %v12669_v32 }
 0x679   : > { %v4193_v62 = vsel %vm3870_vm6, %v12693_v33, %v4191_v63  ;;  %v4260_v15 = vsel %vm3867_vm4, %v12694_v25, %v4258_v53  ;;  %v10972_v27 = vmax.f32 %v3802_v46, 0.0  ;;  %v12695_v63 = vrot.slane %v10263_v50, 7 }
 0x67a   : > { %v12696_v33 = vrot.slane %v10268_v14, 1  ;;  %v12698_v56 = vrot.slane %v12697_v2, 3  ;;  %v3926_v53 = vrot.slane %v10962_v60, 2  ;;  %v3958_v25 = vrot.slane %v10923_v0, 4  ;;  %v12702_v14 = vld [vmem:[#allocation122_spill] sm:$0xff] }
 0x67b   : > { %v4083_v36 = vsel %vm3882_vm13, %v12695_v63, %v4081_v61  ;;  %v12699_v46 = vrot.slane %v12687_v16, 5  ;;  %v5698_v7 = vrot.slane %v4512_v45, 9  ;;  %v3925_v61 = vsel %vm3879_vm12, %v3924_v21, %v10680_v19  ;;  %v12700_v63 = vld [vmem:[#allocation53_spill] sm:$0xff] }
 0x67c   : > { %v4116_v30 = vsel %vm3879_vm12, %v12696_v33, %v4114_v47  ;;  %v4163_v29 = vsel %vm3876_vm10, %v12698_v56, %v4161_v41  ;;  %4098 = vrot.lane.b32.xlu0 %v4083_v36, %s6221_s11  ;;  %v4478_v47 = vmax.f32 %v10923_v0, %v10962_v60  ;;  %v12701_v41 = vrot.slane %v12700_v63, %v10124_v3 }
 0x67d   : > { %v4195_v1 = vsel %vm3873_vm8, %v12699_v46, %v4193_v62  ;;  %v4261_v33 = vsel %vm3870_vm6, %v12682_v48, %v4260_v15  ;;  %v3927_v56 = vsel %vm3882_vm13, %v3926_v53, %v3925_v61  ;;  %v4117_v62 = vsel %vm3882_vm13, %v10263_v50, %v4116_v30  ;;  %v12705_v53 = vld [vmem:[#allocation32_spill] sm:$0xff] }
 0x67e   : > { %v5176_v36 = vsel %vm3864_vm2, %v12701_v41, %v5147_v43  ;;  %v3960_v46 = vrot.slane %v10962_v60, 3  ;;  %v12703_v19 = vrot.slane %v12702_v14, 2  ;;  %3930 = vrot.lane.b32.xlu1 %v3927_v56, %s11920_s15  ;;  %v3992_v63 = vrot.slane %v10923_v0, 5 }
 0x67f   : > { %v12704_v43 = vrot.slane %v12697_v2, 4  ;;  %v11012_v15 = vrot.slane %v4478_v47, %v10122_v49  ;;  %v12706_v30 = vrot.slane %v12705_v53, %v10124_v3  ;;  %v12707_v56 = vrot.slane %v12687_v16, 7 }
 0x680   : > { %v4165_v21 = vsel %vm3879_vm12, %v12703_v19, %v4163_v29  ;;  %4132 = vrot.lane.b32.xlu0 %v4117_v62, %s6222_s14  ;;  %v4026_v29 = vrot.slane %v10923_v0, 6  ;;  %v4734_v50 = vcombine.high %v4478_v47, %v4478_v47  ;;  %v5027_v42 = vmax.f32 %v4512_v45, %v5698_v7 }
 0x681   : > { %v4197_v41 = vsel %vm3876_vm10, %v12704_v43, %v4195_v1  ;;  %v5177_v61 = vsel %vm3867_vm4, %v12706_v30, %v5176_v36  ;;  %v4263_v19 = vsel %vm3873_vm8, %v12707_v56, %v4261_v33  ;;  %v3812_v1 = vadd.f32 %v10768_v51, %v5969_v31 }
 0x682   : > { %v3959_v43 = vsel %vm3879_vm12, %v3958_v25, %v10695_v55  ;;  %v4749_v53 = vcombine.high %v11012_v15, %v11012_v15  ;;  %v12709_v36 = vrot.slane %v12708_v58, %v10124_v3  ;;  %v4167_v47 = vsel %vm3882_vm13, %v12711_v52, %v4165_v21 }
 0x683   : > { %v3961_v30 = vsel %vm3882_vm13, %v3960_v46, %v3959_v43  ;;  %v3994_v7 = vrot.slane %v10962_v60, 4  ;;  %v12712_v51 = vrot.slane %v12702_v14, 3  ;;  %v12713_v45 = vrot.slane %v12697_v2, 6  ;;  %v12714_v46 = vld [vmem:[#allocation78_spill] sm:$0xff] }
 0x684   : > { %v5178_v62 = vsel %vm3870_vm6, %v12709_v36, %v5177_v61  ;;  %3964 = vrot.lane.b32.xlu1 %v3961_v30, %s6215_s17  ;;  %v5752_v31 = vrot.slane %v4749_v53, 9  ;;  %v11045_v25 = vrot.slane %v4734_v50, %v10122_v49  ;;  %v5247_v33 = vrot.slane %v5027_v42, %v10124_v3  ;;  %4182 = vrot.lane.b32.xlu0 %v4167_v47, %s6223_s28 }
 0x685   : > { %v4199_v55 = vsel %vm3879_vm12, %v12712_v51, %v4197_v41  ;;  %v4265_v58 = vsel %vm3876_vm10, %v12713_v45, %v4263_v19  ;;  %v3993_v52 = vsel %vm3879_vm12, %v3992_v63, %v10698_v17  ;;  %v12715_v21 = vrot.slane %v12714_v46, %v10124_v3 }
 0x686   : > { %v4060_v61 = vrot.slane %v10923_v0, 7  ;;  %v4246_v56 = vrot.slane %v10972_v27, 4  ;;  %v11057_v19 = vmax.f32 %v3812_v1, 0.0  ;;  %v4027_v50 = vsel %vm3879_vm12, %v4026_v29, %v10701_v59 }
 0x687   : > { %v5179_v41 = vsel %vm3873_vm8, %v12715_v21, %v5178_v62  ;;  %v5081_v42 = vmax.f32 %v4749_v53, %v5752_v31  ;;  %v4129_v43 = vrot.slane %v10923_v0, 1  ;;  %v3995_v36 = vsel %vm3882_vm13, %v3994_v7, %v3993_v52  ;;  %v12719_v7 = vld [vmem:[#allocation43_spill] sm:$0xff] }
 0x688   : > { %v12716_v17 = vrot.slane %v12710_v37, 2  ;;  %v4028_v62 = vrot.slane %v10962_v60, 5  ;;  %v12717_v30 = vrot.slane %v12702_v14, 5  ;;  %3998 = vrot.lane.b32.xlu1 %v3995_v36, %s6217_s19  ;;  %v12718_v59 = vrot.slane %v10580_v40, %v10124_v3 }
 0x689   : > { %v5175_v1 = vrot.slane %v5081_v42, %v10124_v3  ;;  %v4750_v53 = vcombine.high %v11045_v25, %v11045_v25  ;;  %v12720_v51 = vrot.slane %v12719_v7, %v10124_v3  ;;  %v4061_v31 = vsel %vm3879_vm12, %v4060_v61, %v10675_v9  ;;  %v12723_v61 = vld [vmem:[#allocation124_spill] sm:$0xff]  ;;  %v12729_v7 = vld [vmem:[#allocation79_spill] sm:$0xff] }
 0x68a   : > { %v4201_v63 = vsel %vm3882_vm13, %v12716_v17, %v4199_v55  ;;  %v4267_v47 = vsel %vm3879_vm12, %v12717_v30, %v4265_v58  ;;  %v5180_v29 = vsel %vm3876_vm10, %v12718_v59, %v5179_v41  ;;  %v4247_v45 = vsel %vm3879_vm12, %v4246_v56, %v10686_v6 }
 0x68b   : > { %v5276_v55 = vsel %vm3864_vm2, %v12720_v51, %v5247_v33  ;;  %4216 = vrot.lane.b32.xlu0 %v4201_v63, %s6225_s13  ;;  %v4095_v40 = vsel %vm3879_vm12, %v10923_v0, %v10704_v44  ;;  %v4178_v58 = vrot.slane %v10972_v27, 2  ;;  %v4062_v52 = vrot.slane %v10962_v60, 6 }
 0x68c   : > { %v4248_v46 = vrot.slane %v11057_v19, 3  ;;  %v12721_v33 = vrot.slane %v12710_v37, 4  ;;  %v4130_v9 = vsel %vm3879_vm12, %v4129_v43, %v10744_v23  ;;  %v4029_v41 = vsel %vm3882_vm13, %v4028_v62, %v4027_v50 }
 0x68d   : > { %v12722_v6 = vrot.slane %v10851_v57, %v10124_v3  ;;  %v12724_v56 = vrot.slane %v12723_v61, %v10124_v3  ;;  %v11109_v36 = vmax.f32 %v10972_v27, %v11057_v19  ;;  %4032 = vrot.lane.b32.xlu1 %v4029_v41, %s6219_s18  ;;  %v5754_v43 = vrot.slane %v4750_v53, 9 }
 0x68e   : > { %v4269_v21 = vsel %vm3882_vm13, %v12721_v33, %v4267_v47  ;;  %v11115_v50 = vrot.slane %v10970_v4, %v10122_v49  ;;  %v5697_v57 = vrot.slane %v10946_v5, 9  ;;  %v4179_v17 = vsel %vm3879_vm12, %v4178_v58, %v10708_v13 }
 0x68f   : > { %v5181_v44 = vsel %vm3879_vm12, %v12722_v6, %v5180_v29  ;;  %v5277_v42 = vsel %vm3867_vm4, %v12724_v56, %v5276_v55  ;;  %v4314_v63 = vrot.slane %v10972_v27, 6  ;;  %v12725_v62 = vrot.slane %v10800_v26, 5 }
 0x690   : > { %v5182_v23 = vsel %vm3882_vm13, %v5175_v1, %v5181_v44  ;;  %v12726_v30 = vrot.slane %v12669_v32, 4  ;;  %v12727_v1 = vrot.slane %v10800_v26, 2  ;;  %v12728_v59 = vrot.slane %v12669_v32, 1 }
 0x691   : > { %5183 = vrot.lane.b32.xlu0 %v5182_v23, %s11920_s15  ;;  %v12730_v51 = vrot.slane %v12729_v7, %v10124_v3  ;;  %v4180_v13 = vrot.slane %v11057_v19, 1  ;;  %v4528_v58 = vcombine.high %v11115_v50, %v11115_v50  ;;  %v5026_v33 = vmax.f32 %v10946_v5, %v5697_v57 }
 0x692   : > { %v4326_v47 = vsel %vm3864_vm2, %v12726_v30, %v12725_v62  ;;  %v4224_v29 = vsel %vm3864_vm2, %v12728_v59, %v12727_v1  ;;  %v4063_v41 = vsel %vm3882_vm13, %v4062_v52, %v4061_v31  ;;  %v4249_v6 = vsel %vm3882_vm13, %v4248_v46, %v4247_v45  ;;  %v12732_v31 = vld [vmem:[#allocation125_spill] sm:$0xff] }
 0x693   : > { %v5278_v55 = vsel %vm3870_vm6, %v12730_v51, %v5277_v42  ;;  %v4096_v44 = vrot.slane %v10962_v60, 7  ;;  %v11145_v61 = vrot.slane %v11109_v36, %v10122_v49  ;;  %4066 = vrot.lane.b32.xlu1 %v4063_v41, %s6220_s26  ;;  %v5083_v56 = vmax.f32 %v4750_v53, %v5754_v43 }
 0x694   : > { %v12731_v42 = vrot.slane %v12677_v34, 3  ;;  %v4225_v5 = vsel %vm3867_vm4, %v12677_v34, %v4224_v29  ;;  %v5700_v57 = vrot.slane %v4528_v58, 9  ;;  %v12733_v45 = vrot.slane %v12732_v31, %v10124_v3 }
 0x695   : > { %4252 = vrot.lane.b32.xlu0 %v4249_v6, %s6226_s16  ;;  %v4315_v46 = vsel %vm3879_vm12, %v4314_v63, %v10717_v20  ;;  %v5197_v53 = vrot.slane %v5026_v33, %v10124_v3  ;;  %v4392_v43 = vrot.slane %v10800_v26, 7  ;;  %v4131_v62 = vsel %vm3882_vm13, %v10962_v60, %v4130_v9  ;;  %v12737_v6 = vld [vmem:[#allocation75_spill] sm:$0xff] }
 0x696   : > { %v4328_v23 = vsel %vm3867_vm4, %v12731_v42, %v4326_v47  ;;  %v5279_v52 = vsel %vm3873_vm8, %v12733_v45, %v5278_v55  ;;  %v4316_v30 = vrot.slane %v11057_v19, 5  ;;  %v4212_v47 = vrot.slane %v10972_v27, 3 }
 0x697   : > { %v5029_v1 = vmax.f32 %v4528_v58, %v5700_v57  ;;  %v4097_v59 = vsel %vm3882_vm13, %v4096_v44, %v4095_v40  ;;  %v12734_v29 = vrot.slane %v12682_v48, 2  ;;  %v12735_v20 = vrot.slane %v12682_v48, 7 }
 0x698   : > { %v4766_v51 = vcombine.high %v11145_v61, %v11145_v61  ;;  %4100 = vrot.lane.b32.xlu1 %v4097_v59, %s6221_s11  ;;  %v5275_v9 = vrot.slane %v5083_v56, %v10124_v3  ;;  %v12736_v55 = vrot.slane %v10583_v22, %v10124_v3  ;;  %v4513_v33 = vcombine.high %v10970_v4, %v10970_v4 }
 0x699   : > { %v4330_v7 = vsel %vm3870_vm6, %v12734_v29, %v4328_v23  ;;  %v4227_v63 = vsel %vm3870_vm6, %v12735_v20, %v4225_v5  ;;  %v5347_v58 = vrot.slane %v5029_v1, %v10124_v3  ;;  %4284 = vrot.lane.b32.xlu0 %v4269_v21, %s6227_s20  ;;  %v4181_v41 = vsel %vm3882_vm13, %v4180_v13, %v4179_v17  ;;  %v12741_v17 = vld [vmem:[#allocation183_spill] sm:$0xff] }
 0x69a   : > { %v5280_v40 = vsel %vm3876_vm10, %v12736_v55, %v5279_v52  ;;  %v12738_v44 = vrot.slane %v12737_v6, %v10124_v3  ;;  %v12739_v42 = vrot.slane %v12669_v32, 6  ;;  %v4290_v23 = vrot.slane %v10800_v26, 4 }
 0x69b   : > { %v4317_v5 = vsel %vm3882_vm13, %v4316_v30, %v4315_v46  ;;  %v4214_v4 = vrot.slane %v11057_v19, 2  ;;  %v12740_v57 = vrot.slane %v12687_v16, 1  ;;  %v12742_v13 = vrot.slane %v12741_v17, %v10124_v3  ;;  %v12745_v30 = vld [vmem:[#allocation175_spill] sm:$0xff] }
 0x69c   : > { %v5226_v56 = vsel %vm3864_vm2, %v12738_v44, %v5197_v53  ;;  %v4394_v22 = vsel %vm3864_vm2, %v12739_v42, %v4392_v43  ;;  %v12743_v45 = vrot.slane %v10885_v54, %v10124_v3  ;;  %v12744_v53 = vrot.slane %v12687_v16, 6  ;;  %4134 = vrot.lane.b32.xlu1 %v4131_v62, %s6222_s14 }
 0x69d   : > { %v4332_v21 = vsel %vm3873_vm8, %v12740_v57, %v4330_v7  ;;  %v5376_v31 = vsel %vm3864_vm2, %v12742_v13, %v5347_v58  ;;  %v5756_v43 = vrot.slane %v4766_v51, 9  ;;  %v12746_v1 = vrot.slane %v12745_v30, %v10124_v3  ;;  %v12747_v7 = vld [vmem:[#allocation29_spill] sm:$0xff]  ;;  %v12750_v58 = vld [vmem:[#allocation54_spill] sm:$0xff] }
 0x69e   : > { %v5281_v52 = vsel %vm3879_vm12, %v12743_v45, %v5280_v40  ;;  %v4229_v46 = vsel %vm3873_vm8, %v12744_v53, %v4227_v63  ;;  %v12748_v20 = vrot.slane %v12747_v7, %v10124_v3  ;;  %v12749_v55 = vrot.slane %v12677_v34, 5  ;;  %v12754_v45 = vld [vmem:[#allocation23_spill] sm:$0xff] }
 0x69f   : > { %v5377_v59 = vsel %vm3867_vm4, %v12746_v1, %v5376_v31  ;;  %v5282_v29 = vsel %vm3882_vm13, %v5275_v9, %v5281_v52  ;;  %v11224_v63 = vrot.slane %v4513_v33, %v10122_v49  ;;  %v12751_v6 = vrot.slane %v12750_v58, %v10124_v3  ;;  %v12762_v58 = vld [vmem:[#allocation162_spill] sm:$0xff] }
 0x6a0   : > { %v5227_v54 = vsel %vm3867_vm4, %v12748_v20, %v5226_v56  ;;  %v4396_v40 = vsel %vm3867_vm4, %v12749_v55, %v4394_v22  ;;  %5283 = vrot.lane.b32.xlu0 %v5282_v29, %s6217_s19  ;;  %v5753_v9 = vrot.slane %v11045_v25, 9  ;;  %v12752_v44 = vrot.slane %v12669_v32, 3  ;;  %4184 = vrot.lane.b32.xlu1 %v4181_v41, %s6223_s28  ;;  %s6228_s19 = smov 96   ;;  %s6229_s28 = smov 104  }
 0x6a1   : > { %v5378_v62 = vsel %vm3870_vm6, %v12751_v6, %v5377_v59  ;;  %v4751_v42 = vcombine.high %v11109_v36, %v11109_v36  ;;  %v4333_v33 = vsel %vm3876_vm10, %v12697_v2, %v4332_v21  ;;  %v12753_v22 = vrot.slane %v12697_v2, 5 }
 0x6a2   : > { %v4292_v56 = vsel %vm3864_vm2, %v12752_v44, %v4290_v23  ;;  %v4529_v17 = vcombine.high %v11224_v63, %v11224_v63  ;;  %v5699_v13 = vrot.slane %v11115_v50, 9  ;;  %v5085_v31 = vmax.f32 %v4766_v51, %v5756_v43 }
 0x6a3   : > { %v4231_v57 = vsel %vm3876_vm10, %v12753_v22, %v4229_v46  ;;  %v12755_v52 = vrot.slane %v12754_v45, %v10124_v3  ;;  %v12756_v36 = vrot.slane %v12682_v48, 4  ;;  %v11253_v21 = vrot.slane %v4751_v42, %v10122_v49  ;;  %v12757_v46 = vld [vmem:[#allocation98_spill] sm:$0xff] }
 0x6a4   : > { %v12758_v30 = vrot.slane %v12757_v46, %v10124_v3  ;;  %v12759_v51 = vrot.slane %v12677_v34, 2  ;;  %v5702_v59 = vrot.slane %v4529_v17, 9  ;;  %v5028_v29 = vmax.f32 %v11115_v50, %v5699_v13  ;;  %4320 = vrot.lane.b32.xlu0 %v4317_v5, %s6228_s19 }
 0x6a5   : > { %v5228_v23 = vsel %vm3870_vm6, %v12755_v52, %v5227_v54  ;;  %v4398_v53 = vsel %vm3870_vm6, %v12756_v36, %v4396_v40  ;;  %v4213_v49 = vsel %vm3879_vm12, %v4212_v47, %v10720_v18  ;;  %v12760_v41 = vrot.slane %v12702_v14, 7 }
 0x6a6   : > { %v5379_v1 = vsel %vm3873_vm8, %v12758_v30, %v5378_v62  ;;  %v4294_v43 = vsel %vm3867_vm4, %v12759_v51, %v4292_v56  ;;  %v12761_v20 = vrot.slane %v12702_v14, 4  ;;  %v5082_v55 = vmax.f32 %v11045_v25, %v5753_v9 }
 0x6a7   : > { %v4335_v7 = vsel %vm3879_vm12, %v12760_v41, %v4333_v33  ;;  %v4215_v40 = vsel %vm3882_vm13, %v4214_v4, %v4213_v49  ;;  %v12763_v50 = vrot.slane %v12762_v58, %v10124_v3  ;;  %v12764_v6 = vrot.slane %v12687_v16, 3 }
 0x6a8   : > { %v4233_v54 = vsel %vm3879_vm12, %v12761_v20, %v4231_v57  ;;  %v5031_v47 = vmax.f32 %v4529_v17, %v5702_v59  ;;  %v12765_v62 = vrot.slane %v10589_v10, %v10124_v3  ;;  %v12766_v56 = vrot.slane %v12682_v48, 1  ;;  %4218 = vrot.lane.b32.xlu1 %v4215_v40, %s6225_s13 }
 0x6a9   : > { %v5229_v5 = vsel %vm3873_vm8, %v12763_v50, %v5228_v23  ;;  %v4400_v18 = vsel %vm3873_vm8, %v12764_v6, %v4398_v53  ;;  %v4767_v4 = vcombine.high %v11253_v21, %v11253_v21  ;;  %v5297_v9 = vrot.slane %v5028_v29, %v10124_v3  ;;  %v12774_v29 = vld [vmem:[#allocation77_spill] sm:$0xff] }
 0x6aa   : > { %v5380_v44 = vsel %vm3876_vm10, %v12765_v62, %v5379_v1  ;;  %v4296_v25 = vsel %vm3870_vm6, %v12766_v56, %v4294_v43  ;;  %v12767_v42 = vrot.slane %v12710_v37, 6  ;;  %v12768_v22 = vrot.slane %v12710_v37, 3  ;;  %v12772_v1 = vld [vmem:[#allocation51_spill] sm:$0xff] }
 0x6ab   : > { %v5375_v57 = vrot.slane %v5085_v31, %v10124_v3  ;;  %v5447_v17 = vrot.slane %v5031_v47, %v10124_v3  ;;  %v5225_v13 = vrot.slane %v5082_v55, %v10124_v3  ;;  %v12769_v45 = vrot.slane %v10585_v11, %v10124_v3  ;;  %v12781_v56 = vld [vmem:[#allocation99_spill] sm:$0xff] }
 0x6ac   : > { %v4337_v33 = vsel %vm3882_vm13, %v12767_v42, %v4335_v7  ;;  %v4235_v10 = vsel %vm3882_vm13, %v12768_v22, %v4233_v54  ;;  %v4280_v23 = vrot.slane %v10972_v27, 5  ;;  %v12770_v36 = vrot.slane %v12697_v2, 2  ;;  %v12776_v7 = vld [vmem:[#allocation50_spill] sm:$0xff]  ;;  %v12783_v42 = vld [vmem:[#allocation157_spill] sm:$0xff] }
 0x6ad   : > { %4352 = vrot.lane.b32.xlu0 %v4337_v33, %s6229_s28  ;;  %v5230_v52 = vsel %vm3876_vm10, %v12769_v45, %v5229_v5  ;;  %v12771_v31 = vrot.slane %v10858_v38, %v10124_v3  ;;  %v4297_v30 = vsel %vm3873_vm8, %v12687_v16, %v4296_v25  ;;  %v12773_v51 = vrot.slane %v12772_v1, %v10124_v3 }
 0x6ae   : > { %v4402_v53 = vsel %vm3876_vm10, %v12770_v36, %v4400_v18  ;;  %v4358_v43 = vrot.slane %v10800_v26, 6  ;;  %v5758_v59 = vrot.slane %v4767_v4, 9  ;;  %v12775_v49 = vrot.slane %v12774_v29, %v10124_v3  ;;  %4250 = vrot.lane.b32.xlu1 %v4235_v10, %s6226_s16  ;;  %s5767_s16 = sshll.u32 %s6291_s25, 8 }
 0x6af   : > { %v5381_v46 = vsel %vm3879_vm12, %v12771_v31, %v5380_v44  ;;  %v5476_v11 = vsel %vm3864_vm2, %v12773_v51, %v5447_v17  ;;  %v12777_v38 = vrot.slane %v12776_v7, %v10124_v3  ;;  %v5701_v54 = vrot.slane %v11224_v63, 9  ;;  %v12793_v7 = vld [vmem:[#allocation28_spill] sm:$0xff] }
 0x6b0   : > { %v5477_v41 = vsel %vm3867_vm4, %v12775_v49, %v5476_v11  ;;  %v5382_v55 = vsel %vm3882_vm13, %v5375_v57, %v5381_v46  ;;  %v4383_v26 = vsel %vm3879_vm12, %v10972_v27, %v10826_v35  ;;  %v4384_v40 = vrot.slane %v11057_v19, 7  ;;  %v12790_v46 = vld [vmem:[#allocation123_spill] sm:$0xff] }
 0x6b1   : > { %v5326_v20 = vsel %vm3864_vm2, %v12777_v38, %v5297_v9  ;;  %v4282_v58 = vrot.slane %v11057_v19, 4  ;;  %5383 = vrot.lane.b32.xlu0 %v5382_v55, %s6220_s26  ;;  %v12778_v50 = vrot.slane %v10853_v39, %v10124_v3  ;;  %v4281_v6 = vsel %vm3879_vm12, %v4280_v23, %v10832_v28  ;;  %s6230_s26 = smov 112  }
 0x6b2   : > { %v12779_v18 = vrot.slane %v12702_v14, 1  ;;  %v12780_v35 = vrot.slane %v12697_v2, 7  ;;  %v12782_v25 = vrot.slane %v12781_v56, %v10124_v3  ;;  %v5755_v9 = vrot.slane %v11145_v61, 9 }
 0x6b3   : > { %v5231_v5 = vsel %vm3879_vm12, %v12778_v50, %v5230_v52  ;;  %v12784_v28 = vrot.slane %v12783_v42, %v10124_v3  ;;  %v5087_v22 = vmax.f32 %v4767_v4, %v5758_v59  ;;  %v12785_v10 = vrot.slane %v12669_v32, 5  ;;  %v12802_v42 = vld [vmem:[#allocation20_spill] sm:$0xff] }
 0x6b4   : > { %v4404_v47 = vsel %vm3879_vm12, %v12779_v18, %v4402_v53  ;;  %v4299_v62 = vsel %vm3876_vm10, %v12780_v35, %v4297_v30  ;;  %v5232_v44 = vsel %vm3882_vm13, %v5225_v13, %v5231_v5  ;;  %v5478_v39 = vsel %vm3870_vm6, %v12782_v25, %v5477_v41 }
 0x6b5   : > { %v5327_v33 = vsel %vm3867_vm4, %v12784_v28, %v5326_v20  ;;  %v4360_v57 = vsel %vm3864_vm2, %v12785_v10, %v4358_v43  ;;  %v5030_v17 = vmax.f32 %v11224_v63, %v5701_v54  ;;  %v3894_v13 = vrot.slane %v10923_v0, 2  ;;  %5233 = vrot.lane.b32.xlu1 %v5232_v44, %s6215_s17  ;;  %v12788_v63 = vld [vmem:[#allocation27_spill] sm:$0xff]  ;;  %s6231_s17 = smov 120   ;;  %v12804_v10 = vld [vmem:[#allocation176_spill] sm:$0xff] }
 0x6b6   : > { %v4385_v45 = vsel %vm3882_vm13, %v4384_v40, %v4383_v26  ;;  %v4283_v52 = vsel %vm3882_vm13, %v4282_v58, %v4281_v6  ;;  %v4405_v23 = vsel %vm3882_vm13, %v12710_v37, %v4404_v47  ;;  %v12786_v36 = vrot.slane %v12702_v14, 6  ;;  %v12796_v54 = vld [vmem:[#allocation47_spill] sm:$0xff]  ;;  %v12799_v6 = vld [vmem:[#allocation80_spill] sm:$0xff] }
 0x6b7   : > { %4388 = vrot.lane.b32.xlu0 %v4385_v45, %s6230_s26  ;;  %v12787_v32 = vrot.slane %v10862_v12, 9  ;;  %v12789_v53 = vrot.slane %v12788_v63, %v10124_v3  ;;  %v12791_v30 = vrot.slane %v12790_v46, %v10124_v3  ;;  %v3895_v51 = vsel %vm3879_vm12, %v3894_v13, %v10690_v24  ;;  %v12794_v24 = vld [vmem:[#allocation100_spill] sm:$0xff]  ;;  %v12806_v13 = vld [vmem:[#allocation74_spill] sm:$0xff]  ;;  %v12811_v46 = vld [vmem:[#allocation97_spill] sm:$0xff] }
 0x6b8   : > { %v4301_v4 = vsel %vm3879_vm12, %v12786_v36, %v4299_v62  ;;  %v5084_v11 = vmax.f32 %v11145_v61, %v5755_v9  ;;  %v12792_v43 = vrot.slane %v12677_v34, 4  ;;  %v5695_v29 = vrot.slane %v10901_v8, 9  ;;  %v12800_v47 = vld [vmem:[#allocation164_spill] sm:$0xff] }
 0x6b9   : > { %v5079_v0 = vmax.f32 %v10862_v12, %v12787_v32  ;;  %v5479_v31 = vsel %vm3873_vm8, %v12789_v53, %v5478_v39  ;;  %v5328_v1 = vsel %vm3870_vm6, %v12791_v30, %v5327_v33  ;;  %v3896_v12 = vrot.slane %v10962_v60, 1  ;;  %4286 = vrot.lane.b32.xlu1 %v4283_v52, %s6227_s20 }
 0x6ba   : > { %v4362_v59 = vsel %vm3867_vm4, %v12792_v43, %v4360_v57  ;;  %v5475_v49 = vrot.slane %v5087_v22, %v10124_v3  ;;  %v5397_v41 = vrot.slane %v5030_v17, %v10124_v3  ;;  %v5743_v38 = vrot.slane %v12793_v7, 9  ;;  %v12805_v57 = vld [vmem:[#allocation26_spill] sm:$0xff] }
 0x6bb   : > { %v5751_v20 = vrot.slane %v11012_v15, 9  ;;  %v12795_v61 = vrot.slane %v12794_v24, %v10124_v3  ;;  %v12797_v60 = vrot.slane %v12796_v54, %v10124_v3  ;;  %v11408_v26 = vsel %vm3882_vm13, %v3896_v12, %v3895_v51  ;;  %4420 = vrot.lane.b32.xlu0 %v4405_v23, %s6231_s17  ;;  %v12818_v24 = vld [vmem:[#allocation180_spill] sm:$0xff] }
 0x6bc   : > { %v5024_v40 = vmax.f32 %v10901_v8, %v5695_v29  ;;  %v12798_v58 = vrot.slane %v12710_v37, 5  ;;  %v5471_v5 = vrot.slane %v5079_v0, %v10124_v3  ;;  %v5317_v18 = vrot.slane %v12799_v6, %v10124_v3  ;;  %v12809_v0 = vld [vmem:[#allocation76_spill] sm:$0xff]  ;;  %v12823_v6 = vld [vmem:[#allocation31_spill] sm:$0xff] }
 0x6bd   : > { %v5480_v34 = vsel %vm3876_vm10, %v12795_v61, %v5479_v31  ;;  %v5329_v55 = vsel %vm3873_vm8, %v12797_v60, %v5328_v1  ;;  %v5119_v35 = vrot.slane %v12800_v47, %v10124_v3  ;;  %v5325_v62 = vrot.slane %v5084_v11, %v10124_v3  ;;  %v12813_v11 = vld [vmem:[#allocation24_spill] sm:$0xff] }
 0x6be   : > { %v4303_v50 = vsel %vm3882_vm13, %v12798_v58, %v4301_v4  ;;  %v12801_v44 = vrot.slane %v12682_v48, 3  ;;  %v5080_v56 = vmax.f32 %v11012_v15, %v5751_v20  ;;  %v5099_v25 = vrot.slane %v5024_v40, %v10124_v3  ;;  %v12821_v40 = vld [vmem:[#allocation48_spill] sm:$0xff] }
 0x6bf   : > { %v5481_v39 = vsel %vm3879_vm12, %v5471_v5, %v5480_v34  ;;  %v5330_v9 = vsel %vm3876_vm10, %v5317_v18, %v5329_v55  ;;  %v12803_v28 = vrot.slane %v12802_v42, %v10124_v3  ;;  %v5072_v22 = vmax.f32 %v12793_v7, %v5743_v38  ;;  %4318 = vrot.lane.b32.xlu1 %v4303_v50, %s6228_s19  ;;  %v12817_v38 = vld [vmem:[#allocation49_spill] sm:$0xff] }
 0x6c0   : > { %v4364_v8 = vsel %vm3870_vm6, %v12801_v44, %v4362_v59  ;;  %v5482_v48 = vsel %vm3882_vm13, %v5475_v49, %v5481_v39  ;;  %v5321_v15 = vrot.slane %v12804_v10, %v10124_v3  ;;  %v4345_v17 = vrot.slane %v12805_v57, 1  ;;  %v12815_v49 = vld [vmem:[#allocation161_spill] sm:$0xff]  ;;  %v12827_v10 = vld [vmem:[#allocation160_spill] sm:$0xff] }
 0x6c1   : > { %v5426_v33 = vsel %vm3864_vm2, %v12803_v28, %v5397_v41  ;;  %v12807_v45 = vrot.slane %v12806_v13, %v10124_v3  ;;  %5483 = vrot.lane.b32.xlu0 %v5482_v48, %s6222_s14  ;;  %v4348_v23 = vrot.slane %v10972_v27, 7  ;;  %v4350_v36 = vrot.slane %v11057_v19, 6  ;;  %v12819_v34 = vld [vmem:[#allocation81_spill] sm:$0xff] }
 0x6c2   : > { %v12808_v4 = vrot.slane %v12687_v16, 2  ;;  %v12810_v63 = vrot.slane %v12809_v0, %v10124_v3  ;;  %v5331_v31 = vsel %vm3879_vm12, %v5321_v15, %v5330_v9  ;;  %v12812_v30 = vrot.slane %v12811_v46, %v10124_v3 }
 0x6c3   : > { %v5128_v52 = vsel %vm3864_vm2, %v12807_v45, %v5099_v25  ;;  %v5127_v51 = vrot.slane %v5080_v56, %v10124_v3  ;;  %v12814_v43 = vrot.slane %v12813_v11, %v10124_v3  ;;  %v5332_v59 = vsel %vm3882_vm13, %v5325_v62, %v5331_v31 }
 0x6c4   : > { %v4366_v32 = vsel %vm3873_vm8, %v12808_v4, %v4364_v8  ;;  %v5129_v53 = vsel %vm3867_vm4, %v12810_v63, %v5128_v52  ;;  %v5427_v1 = vsel %vm3867_vm4, %v12812_v30, %v5426_v33  ;;  %v5757_v12 = vrot.slane %v11253_v21, 9  ;;  %5333 = vrot.lane.b32.xlu1 %v5332_v59, %s6219_s18  ;;  %v12825_v8 = vld [vmem:[#allocation52_spill] sm:$0xff]  ;;  %v12829_v52 = vld [vmem:[#allocation25_spill] sm:$0xff]  ;;  %s11563_s18 = sand.u32 1, %s6201_s22  }
 0x6c5   : > { %v5130_v16 = vsel %vm3870_vm6, %v12814_v43, %v5129_v53  ;;  %v5123_v29 = vrot.slane %v5072_v22, %v10124_v3  ;;  %v12816_v41 = vrot.slane %v12815_v49, %v10124_v3  ;;  %v4346_v20 = vsel %vm3873_vm8, %v4345_v17, %v12817_v38  ;;  %v12826_v22 = vld [vmem:[#allocation21_spill] sm:$0xff]  ;;  %v12828_v17 = vld [vmem:[#allocation34_spill] sm:$0xff]  ;;  %s5625_s14 = sshll.u32 %s11563_s18, 3 }
 0x6c6   : > { %v5749_v61 = vrot.slane %v12818_v24, 9  ;;  %v12820_v54 = vrot.slane %v12819_v34, 9  ;;  %v4347_v58 = vsel %vm3876_vm10, %v12821_v40, %v4346_v20  ;;  %v12822_v50 = vrot.slane %v12697_v2, 1  ;;  %s255_s9 = scalar_lea.vmem [#allocation6], %s5625_s14 }
 0x6c7   : > { %v5131_v7 = vsel %vm3873_vm8, %v12816_v41, %v5130_v16  ;;  %v12824_v18 = vrot.slane %v12823_v6, %v10124_v3  ;;  %v4349_v44 = vsel %vm3879_vm12, %v4348_v23, %v4347_v58  ;;  %v5413_v56 = vrot.slane %v12825_v8, %v10124_v3  ;;  %v12831_v58 = vld [vmem:[#allocation163_spill] sm:$0xff]  ;;  %s5529_s10 = sshll.u32 %s255_s9, 4  ;;  %s11599_s10 = int_to_ptr.vmem [resolvable:$true] %s5529_s10 }
 0x6c8   : > { %v5070_v60 = vmax.f32 %v12819_v34, %v12820_v54  ;;  %v5132_v55 = vsel %vm3876_vm10, %v5119_v35, %v5131_v7  ;;  %v4368_v5 = vsel %vm3876_vm10, %v12822_v50, %v4366_v32  ;;  %v4351_v25 = vsel %vm3882_vm13, %v4350_v36, %v4349_v44  ;;  %v12830_v54 = vld [vmem:[#allocation155_spill] sm:$0xff]  ;;  %s6119_s14 = scalar_lea.vmem %s11599_s10, 128 }
 0x6c9   : > { %v5428_v47 = vsel %vm3870_vm6, %v12824_v18, %v5427_v1  ;;  %v5133_v62 = vsel %vm3879_vm12, %v5123_v29, %v5132_v55  ;;  %v5086_v2 = vmax.f32 %v11253_v21, %v5757_v12  ;;  %4354 = vrot.lane.b32.xlu1 %v4351_v25, %s6229_s28  ;;  %v4369_v39 = vsel %vm3879_vm12, %v12702_v14, %v4368_v5  ;;  %v12832_v5 = vld [vmem:[#allocation171_spill] sm:$0xff]  ;;  %v12834_v25 = vld [vmem:[#allocation30_spill] sm:$0xff]  ;;  %s11597_s28 = scalar_lea.hbm %s11681_s6, %s5763_s29  ;;  %p6120_p11 = scmp.ne.s32.totalorder %s11599_s10, %s6119_s14 }
 0x6ca   : > { %v11491_v35 = vsel %vm3882_vm13, %v5127_v51, %v5133_v62  ;;  %v5078_v9 = vmax.f32 %v12818_v24, %v5749_v61  ;;  %v5429_v42 = vsel %vm3873_vm8, %v5413_v56, %v5428_v47  ;;  %v4370_v28 = vrot.slane %v12710_v37, 7  ;;  %v12833_v62 = vld [vmem:[#allocation121_spill] sm:$0xff]  ;;  %s6232_s29 = smov [#allocation6]  }
 0x6cb   : > { %v5417_v33 = vrot.slane %v5070_v60, %v10124_v3  ;;  %v4407_v48 = vrot.slane %v12826_v22, 6  ;;  %v4406_v15 = vrot.slane %v12827_v10, 7  ;;  %v4409_v13 = vrot.slane %v12828_v17, 5  ;;  %v12836_v10 = vld [vmem:[#allocation22_spill] sm:$0xff]  ;;  %p6121_p12 = pnand %p6120_p11, %p6308_p5  ;;  %s6123_s20 = sshll.u32 %s6232_s29, 4  ;;  %s6124_s20 = int_to_ptr.vmem [resolvable:$false] %s6123_s20 }
 0x6cc   : > { %v4371_v21 = vsel %vm3882_vm13, %v4370_v28, %v4369_v39  ;;  %v5425_v45 = vrot.slane %v5086_v2, %v10124_v3  ;;  %v4411_v23 = vrot.slane %v12829_v52, 4  ;;  %v5421_v37 = vrot.slane %v5078_v9, %v10124_v3  ;;  %s6125_s19 = scalar_lea.vmem %s6124_s20, 256  ;;  %p6126_p0 = scmp.lt.s32.totalorder %s11599_s10, %s6124_s20 }
 0x6cd   : > { %v5430_v14 = vsel %vm3876_vm10, %v5417_v33, %v5429_v42  ;;  %4386 = vrot.lane.b32.xlu1 %v4371_v21, %s6230_s26  ;;  %v4413_v36 = vrot.slane %v12805_v57, 3  ;;  %v4408_v4 = vsel %vm3864_vm2, %v4407_v48, %v4406_v15  ;;  %v4415_v32 = vrot.slane %v12821_v40, 2  ;;  %v12835_v42 = vld [vmem:[#allocation173_spill] sm:$0xff]  ;;  %v12837_v21 = vld [vmem:[#allocation158_spill] sm:$0xff]  ;;  %p6122_p13 = pneg %p6121_p12  ;;  %p6127_p1 = scmp.lt.s32.totalorder %s6125_s19, %s6119_s14 }
 0x6ce   : > { %v5431_v0 = vsel %vm3879_vm12, %v5421_v37, %v5430_v14  ;;  %v4410_v63 = vsel %vm3867_vm4, %v4409_v13, %v4408_v4  ;;  %v4417_v53 = vrot.slane %v10972_v27, 1  ;;  %v3863_v60 = vrot.slane %v12830_v54, 7 }
 0x6cf   : > { %v5432_v31 = vsel %vm3882_vm13, %v5425_v45, %v5431_v0  ;;  %v4412_v46 = vsel %vm3870_vm6, %v4411_v23, %v4410_v63  ;;  %v3866_v6 = vrot.slane %v12832_v5, 6  ;;  %v3869_v44 = vrot.slane %v12833_v62, 5  ;;  %p6128_p2 = por %p6127_p1, %p6126_p0 }
 0x6d0   : > { %v4414_v3 = vsel %vm3873_vm8, %v4413_v36, %v4412_v46  ;;  %v3865_v50 = vsel %vm3864_vm2, %v3863_v60, %v12831_v58  ;;  %v3872_v2 = vrot.slane %v12834_v25, 4  ;;  %v3875_v28 = vrot.slane %v12835_v42, 3 }
 0x6d1   : > { %5433 = vrot.lane.b32.xlu1 %v5432_v31, %s6221_s11  ;;  %v4416_v57 = vsel %vm3876_vm10, %v4415_v32, %v4414_v3  ;;  %v3868_v18 = vsel %vm3867_vm4, %v3866_v6, %v3865_v50  ;;  %v3878_v15 = vrot.slane %v12836_v10, 2  ;;  %v3881_v45 = vrot.slane %v12837_v21, 1  ;;  %s5624_s11 = sshll.u32 %s11563_s18, 4  ;;  %p6129_p3 = pnand %p6128_p2, %p6122_p13 }
 0x6d2   : > { %v4418_v30 = vsel %vm3879_vm12, %v4417_v53, %v4416_v57  ;;  %v3871_v56 = vsel %vm3870_vm6, %v3869_v44, %v3868_v18  ;;  %vm4444_vm2 = vcmask 654336   ;;  %vm4447_vm4 = vcmask 719872   ;;  %s11584_s12 = scalar_lea.vmem [#allocation4], %s5624_s11  ;;  %s5500_s11 = scalar_lea.sflag [#allocation7], %s11563_s18 }
 0x6d3   : > { %v4419_v1 = vsel %vm3882_vm13, %v11057_v19, %v4418_v30  ;;  %v3929_v51 = vpop.permute.xlu0 %3928  ;;  %v3874_v9 = vsel %vm3873_vm8, %v3872_v2, %v3871_v56  ;;  %vm4450_vm6 = vcmask 785408   ;;  %vm4453_vm8 = vcmask 850944   ;;  %s5513_s13 = sshll.u32 %s11584_s12, 4  ;;  %s11601_s13 = int_to_ptr.vmem [resolvable:$true] %s5513_s13 }
 0x6d4   : > { %v3877_v48 = vsel %vm3876_vm10, %v3875_v28, %v3874_v9  ;;  %vm4459_vm10 = vcmask 982016  }
 0x6d5   : > { %4422 = vrot.lane.b32.xlu1 %v4419_v1, %s6231_s17  ;;  %v3880_v17 = vsel %vm3879_vm12, %v3878_v15, %v3877_v48  ;;  %s11607_s17 = scalar_lea.hbm %s11680_s5, %s5767_s16 }
 0x6d6   : > { %v3883_v52 = vsel %vm3882_vm13, %v3881_v45, %v3880_v17 }
 0x6d7   : > { %v3963_v11 = vpop.permute.xlu0 %3962  ;;  %v4426_v23 = vsel %vm1472_vm3, %v3883_v52, %v3929_v51 }
 0x6d8   : > { %v4428_v36 = vsel %vm1538_vm7, %v4426_v23, %v3963_v11 }
 0x6de   : > { %v3997_v27 = vpop.permute.xlu0 %3996 }
 0x6df   : > { %v4430_v4 = vsel %vm1604_vm9, %v4428_v36, %v3997_v27 }
 0x6e3   : > { %v4031_v43 = vpop.permute.xlu0 %4030 }
 0x6e4   : > { %v4432_v32 = vsel %vm1670_vm11, %v4430_v4, %v4031_v43 }
 0x6ea   : > { %v4065_v16 = vpop.permute.xlu0 %4064 }
 0x6eb   : > { %v4434_v63 = vsel %vm3345_vm14, %v4432_v32, %v4065_v16 }
 0x6ee   : > { %v4099_v59 = vpop.permute.xlu0 %4098 }
 0x6ef   : > { %v4436_v31 = vsel %vm3378_vm15, %v4434_v63, %v4099_v59 }
 0x6f0   : > { %v3931_v12 = vpop.permute.xlu1 %3930 }
 0x6f1   : > { %v4427_v46 = vsel %vm1472_vm3, %v11408_v26, %v3931_v12 }
 0x6f2   : > { %v4133_v29 = vpop.permute.xlu0 %4132 }
 0x6f3   : > { %v4438_v3 = vsel %vm3411_vm0, %v4436_v31, %v4133_v29 }
 0x6f6   : > { %v3965_v49 = vpop.permute.xlu1 %3964  ;;  %v4183_v41 = vpop.permute.xlu0 %4182 }
 0x6f7   : > { %v4429_v57 = vsel %vm1538_vm7, %v4427_v46, %v3965_v49  ;;  %v4440_v30 = vsel %vm3444_vm1, %v4438_v3, %v4183_v41 }
 0x6fa   : > { %v3999_v7 = vpop.permute.xlu1 %3998 }
 0x6fb   : > { %v4431_v1 = vsel %vm1604_vm9, %v4429_v57, %v3999_v7 }
 0x6fd   : > { %v4217_v38 = vpop.permute.xlu0 %4216 }
 0x6fe   : > { %v4442_v51 = vsel %vm3493_vm5, %v4440_v30, %v4217_v38 }
 0x6ff   : > { %v4033_v20 = vpop.permute.xlu1 %4032 }
 0x700   : > { %v4433_v11 = vsel %vm1670_vm11, %v4431_v1, %v4033_v20 }
 0x703   : > { %v5184_v24 = vpop.permute.xlu0 %5183 }
 0x704   : > { %v5486_v29 = vsel %vm1472_vm3, %v11491_v35, %v5184_v24  ;;  %vm4456_vm3 = vcmask 916480  }
 0x705   : > { %v4067_v61 = vpop.permute.xlu1 %4066 }
 0x706   : > { %v4435_v43 = vsel %vm3345_vm14, %v4433_v11, %v4067_v61 }
 0x707   : > { %v11526_v34 = vpop.permute.xlu0 %4252 }
 0x70a   : > { %v4101_v19 = vpop.permute.xlu1 %4100 }
 0x70b   : > { %v4285_v55 = vpop.permute.xlu0 %4284  ;;  %v4437_v26 = vsel %vm3378_vm15, %v4435_v43, %v4101_v19 }
 0x70e   : > { %v4135_v40 = vpop.permute.xlu1 %4134 }
 0x70f   : > { %v4439_v12 = vsel %vm3411_vm0, %v4437_v26, %v4135_v40 }
 0x712   : > { %v4185_v47 = vpop.permute.xlu1 %4184  ;;  %v5284_v8 = vpop.permute.xlu0 %5283 }
 0x713   : > { %v4441_v49 = vsel %vm3444_vm1, %v4439_v12, %v4185_v47 }
 0x716   : > { %v11538_v33 = vpop.permute.xlu0 %4320 }
 0x71a   : > { %v4219_v39 = vpop.permute.xlu1 %4218 }
 0x71b   : > { %v4443_v38 = vsel %vm3493_vm5, %v4441_v49, %v4219_v39 }
 0x71c   : > { %v4446_v35 = vsel %vm4444_vm2, %v4443_v38, %v11526_v34 }
 0x71f   : > { %v4353_v14 = vpop.permute.xlu0 %4352 }
 0x720   : > { %v4251_v22 = vpop.permute.xlu1 %4250 }
 0x721   : > { %v4445_v16 = vsel %vm4444_vm2, %v4442_v51, %v4251_v22 }
 0x722   : > { %v4448_v41 = vsel %vm4447_vm4, %v4445_v16, %v4285_v55 }
 0x723   : > { %v5384_v0 = vpop.permute.xlu0 %5383 }
 0x727   : > { %v5234_v13 = vpop.permute.xlu1 %5233 }
 0x728   : > { %v5487_v20 = vsel %vm1538_vm7, %v5486_v29, %v5234_v13 }
 0x729   : > { %v4389_v59 = vpop.permute.xlu0 %4388  ;;  %v5488_v24 = vsel %vm1604_vm9, %v5487_v20, %v5284_v8 }
 0x72b   : > { %v4287_v37 = vpop.permute.xlu1 %4286 }
 0x72c   : > { %v4449_v55 = vsel %vm4447_vm4, %v4446_v35, %v4287_v37 }
 0x72d   : > { %v4421_v19 = vpop.permute.xlu0 %4420  ;;  %v4452_v34 = vsel %vm4450_vm6, %v4449_v55, %v11538_v33 }
 0x731   : > { %v4319_v53 = vpop.permute.xlu1 %4318 }
 0x732   : > { %v4451_v61 = vsel %vm4450_vm6, %v4448_v41, %v4319_v53 }
 0x733   : > { %v4454_v54 = vsel %vm4453_vm8, %v4451_v61, %v4353_v14  ;;  %v5484_v18 = vpop.permute.xlu0 %5483 }
 0x736   : > { %v5334_v27 = vpop.permute.xlu1 %5333 }
 0x737   : > { %v5489_v40 = vsel %vm1670_vm11, %v5488_v24, %v5334_v27 }
 0x738   : > { %v5490_v5 = vsel %vm3345_vm14, %v5489_v40, %v5384_v0 }
 0x73b   : > { %v4355_v7 = vpop.permute.xlu1 %4354 }
 0x73c   : > { %v4455_v47 = vsel %vm4453_vm8, %v4452_v34, %v4355_v7 }
 0x73d   : > { %v4458_v56 = vsel %vm4456_vm3, %v4455_v47, %v4389_v59 }
 0x73f   : > { %v4387_v60 = vpop.permute.xlu1 %4386 }
 0x740   : > { %v4457_v58 = vsel %vm4456_vm3, %v4454_v54, %v4387_v60 }
 0x741   : > { %v4460_v50 = vsel %vm4459_vm10, %v4457_v58, %v4421_v19 }
 0x742   : > { %4462 = vst [vmem:[%s11584_s12] sm:$0xff] %v4460_v50 }
 0x743   : > { %v5434_v6 = vpop.permute.xlu1 %5433 }
 0x744   : > { %v5491_v62 = vsel %vm3378_vm15, %v5490_v5, %v5434_v6 }
 0x745   : > { %v5492_v44 = vsel %vm3411_vm0, %v5491_v62, %v5484_v18 }
 0x746   : > { %5493 = vst.msk [vmem:[%s255_s9] sm:$0xff] %vm3444_vm1, %v5492_v44 }
 0x747   : > { %v4423_v8 = vpop.permute.xlu1 %4422 }
 0x748   : > { %6132 = shalt.err (!%p6129_p3)
}
 0x749   : > { %s6133_s9 = scalar_lea.hbm %s11597_s28, 128  ;;  %s6137_s26 = scalar_lea.hbm %s11681_s6, 256 }
 0x74a   : > { %p6134_p4 = scmp.ne.s32.totalorder %s11597_s28, %s6133_s9  ;;  %p6138_p9 = scmp.lt.s32.totalorder %s11597_s28, %s11681_s6 }
 0x74b   : > { %p6139_p10 = scmp.lt.s32.totalorder %s6137_s26, %s6133_s9 }
 0x74c   : > { %p6135_p7 = pnand %p6134_p4, %p6308_p5 }
 0x74d   : > { %p6140_p11 = por %p6139_p10, %p6138_p9 }
 0x74e   : > { %p6136_p8 = pneg %p6135_p7 }
 0x750   : > { %p6141_p12 = pnand %p6140_p11, %p6136_p8 }
 0x752   : > { %6144 = shalt.err (!%p6141_p12)
}
 0x753   : > { %5989 = dma.vmem_to_hbm [thread:$0]  (%p6308_p5), %s11599_s10, 128, %s11597_s28, %s5500_s11   ;;  %v4461_v25 = vsel %vm4459_vm10, %v4458_v56, %v4423_v8 }
 0x754   : > { %4463 = vst [vmem:[%s11584_s12 + $0x8] sm:$0xff] %v4461_v25  ;;  %s5495_s15 = scalar_lea.sflag [#allocation5], %s11563_s18  ;;  %s6145_s14 = scalar_lea.vmem %s11601_s13, 256 }
 0x755   : > { %p6146_p13 = scmp.ne.s32.totalorder %s11601_s13, %s6145_s14  ;;  %s6233_s20 = smov [#allocation4]  }
 0x756   : > { %s6149_s19 = sshll.u32 %s6233_s20, 4  ;;  %s6150_s19 = int_to_ptr.vmem [resolvable:$false] %s6149_s19 }
 0x757   : > { %p6147_p0 = pnand %p6146_p13, %p6308_p5  ;;  %s6151_s9 = scalar_lea.vmem %s6150_s19, 512 }
 0x758   : > { %p6152_p2 = scmp.lt.s32.totalorder %s11601_s13, %s6150_s19  ;;  %p6153_p3 = scmp.lt.s32.totalorder %s6151_s9, %s6145_s14 }
 0x759   : > { %p6148_p1 = pneg %p6147_p0 }
 0x75a   : > { %p6154_p4 = por %p6153_p3, %p6152_p2 }
 0x75c   : > { %p6155_p7 = pnand %p6154_p4, %p6148_p1 }
 0x75e   : > { %6158 = shalt.err (!%p6155_p7)
}
 0x75f   : > { %s6159_s10 = scalar_lea.hbm %s11607_s17, 256  ;;  %s6163_s11 = scalar_lea.hbm %s11680_s5, 512 }
 0x760   : > { %p6160_p8 = scmp.ne.s32.totalorder %s11607_s17, %s6159_s10  ;;  %p6164_p11 = scmp.lt.s32.totalorder %s11607_s17, %s11680_s5 }
 0x761   : > { %p6165_p12 = scmp.lt.s32.totalorder %s6163_s11, %s6159_s10 }
 0x762   : > { %p6161_p9 = pnand %p6160_p8, %p6308_p5 }
 0x763   : > { %p6166_p13 = por %p6165_p12, %p6164_p11 }
 0x764   : > { %p6162_p10 = pneg %p6161_p9 }
 0x766   : > { %p6167_p0 = pnand %p6166_p13, %p6162_p10 }
 0x768   : > { %6170 = shalt.err (!%p6167_p0)
}
 0x769   : > { %s6234_s26 = smov 128   ;;  %s12838_s29 = smov 8  }
 0x76a   : > { %5988 = dma.vmem_to_hbm [thread:$0]  (%p6308_p5), %s11601_s13, 256, %s11607_s17, %s5495_s15, %s6234_s26, %s6234_s26, %s12838_s29  }
 0x76b PF: > { %p5999_p1 = scmp.ge.s32.totalorder %s6209_s24, 2  ;;  %s5541_s14 = sand.u32 1, %s6197_s21  }
 0x76c   : > { %s5542_s20 = scalar_lea.sflag [#allocation5], %s5541_s14 }
 0x76d   : > { %p5993_p2 = pnand %p5999_p1, %p6312_p6 }
 0x76f   : > { %p5994_p3 = pneg %p5993_p2 }
 0x771   : > { %6188 = dma.done.wait (%p5994_p3), %s5542_s20, 256  }
 0x772   : > { %6190 = vsyncadd (%p5994_p3), %s5542_s20, 4294967040  ;;  %s5551_s19 = scalar_lea.sflag [#allocation7], %s5541_s14 }
 0x773   : > { %6192 = dma.done.wait (%p5994_p3), %s5551_s19, 128  }
 0x774   : > { %6194 = vsyncadd (%p5994_p3), %s5551_s19, 4294967168  ;;  %p20_p5 = scmp.ge.s32.totalorder %s6295_s27, 4   ;;  %s12839_s21 = smov %s6201_s22 }
 0x775   : > { %s12840_s22 = smov %s6205_s23  ;;  %s12841_s23 = smov %s6306_s30 }
 0x776   : > { %s12842_s24 = smov %s6295_s27  ;;  %22 = sbr.rel (!%p20_p5) target bundleno = 5 (0x5), region = 94 }
 0x77b   :  { %5556 = vsyncpa [#allocation5], 1 }
 0x77c   :  { %5558 = vsyncpa [#allocation5 + $0x1], 1 }
 0x77d   :  { %5559 = vsyncpa [#allocation7], 1 }
 0x77e   :  { %5561 = vsyncpa [#allocation7 + $0x1], 1 }

</bundles_post_ra>
